<compile_context>
chip_gen: v5e
topology: v5e:2x2
jax: 0.10.0
libtpu: 0.0.40
codegen_flags: <defaults>
</compile_context>

<pallas_src>
import functools

import jax
import jax.numpy as jnp
from jax.experimental import pallas as pl
from jax.experimental.pallas import tpu as pltpu


def _lstm_fused_kernel(x_ref, wih_ref, whh_ref, b_ref, out_ref, gx_a, gx_b):
    """Fused multi-layer LSTM forward. Everything resident in VMEM, no grid.

    x_ref:   (T*Bp, Hp)      padded time-major input, rows [t*Bp:(t+1)*Bp] = step t
    wih_ref: (L, Hp, 4*Hp)   W_ih^T per layer, gate k in lane block [k*Hp,(k+1)*Hp)
    whh_ref: (L, Hp, 4*Hp)   W_hh^T per layer, same gate layout
    b_ref:   (L, 1, 4*Hp)    b_ih + b_hh per layer, same gate layout
    out_ref: (Bp, Hp)        h_T of the last layer (lane-dense, written once)
    gx_a/gx_b: (T*Bp, 4*Hp) f32  ping-pong input-projection gate buffers
    """
    L, Hp, _ = wih_ref.shape
    Bp = out_ref.shape[0]
    T = x_ref.shape[0] // Bp

    # Layer-0 input projection hoisted: one big MXU matmul, bias folded in.
    gx_a[...] = (
        jnp.dot(x_ref[...], wih_ref[0], preferred_element_type=jnp.float32)
        + b_ref[0]
    )

    bufs = (gx_a, gx_b)
    h_last = None
    for layer in range(L):  # L is static & small: unrolled at trace time
        cur = bufs[layer % 2]
        nxt = bufs[(layer + 1) % 2]
        has_next = layer + 1 < L

        h = jnp.zeros((Bp, Hp), jnp.float32)
        c = jnp.zeros((Bp, Hp), jnp.float32)

        # Recurrence: T is small & static, fully unrolled; all slices are
        # (8-sublane, 128-lane) tile aligned (no relayouts, no masked stores).
        for t in range(T):
            gates = cur[pl.ds(t * Bp, Bp), :] + jnp.dot(
                h, whh_ref[layer], preferred_element_type=jnp.float32
            )  # (Bp, 4*Hp), PyTorch gate order [i, f, g, o]
            i_g = jax.nn.sigmoid(gates[:, 0 * Hp:1 * Hp])
            f_g = jax.nn.sigmoid(gates[:, 1 * Hp:2 * Hp])
            g_g = jnp.tanh(gates[:, 2 * Hp:3 * Hp])
            o_g = jax.nn.sigmoid(gates[:, 3 * Hp:4 * Hp])
            c = f_g * c + i_g * g_g
            h = o_g * jnp.tanh(c)
            if has_next:
                # Next layer's input projection computed on the spot: off the
                # serial critical path (MXU filler), and the inter-layer hidden
                # sequence never needs its own VMEM buffer or a separate matmul.
                nxt[pl.ds(t * Bp, Bp), :] = (
                    jnp.dot(h, wih_ref[layer + 1],
                            preferred_element_type=jnp.float32)
                    + b_ref[layer + 1]
                )
        h_last = h

    out_ref[...] = h_last.astype(out_ref.dtype)  # single lane-dense store


def _round_up(n, m):
    return ((n + m - 1) // m) * m


def _pack_gate_matrix(w, hp_in, hp_out):
    """w: (4*H_out, H_in) PyTorch layout -> (hp_in, 4*hp_out) padded transpose,
    gate k occupying lane block [k*hp_out, (k+1)*hp_out)."""
    four_h, h_in = w.shape
    h_out = four_h // 4
    wt = jnp.transpose(w).reshape(h_in, 4, h_out)
    wt = jnp.pad(wt, ((0, hp_in - h_in), (0, 0), (0, hp_out - h_out)))
    return wt.reshape(hp_in, 4 * hp_out)


def _pack_gate_bias(b, hp_out):
    """b: (4*H_out,) -> (1, 4*hp_out) with the same per-gate lane-block layout."""
    h_out = b.shape[0] // 4
    bb = b.reshape(4, h_out)
    bb = jnp.pad(bb, ((0, 0), (0, hp_out - h_out)))
    return bb.reshape(1, 4 * hp_out)


@functools.partial(jax.jit, static_argnums=(2,))
def lstm_model_forward(x, flat_params, num_layers):
    """x: (B, T, H) batch_first. Returns hidden_state[-1].unsqueeze(1): (B, 1, H)."""
    assert len(flat_params) == num_layers
    B, T, H = x.shape
    Hp = max(128, _round_up(H, 128))   # lane-aligned hidden width
    Bp = max(8, _round_up(B, 8))       # sublane-aligned batch

    # time-major, zero-pad batch/hidden, flatten to (T*Bp, Hp)
    x_tm = jnp.transpose(x, (1, 0, 2)).astype(jnp.float32)
    x_tm = jnp.pad(x_tm, ((0, 0), (0, Bp - B), (0, Hp - H)))
    x2d = x_tm.reshape(T * Bp, Hp)

    wih_all = jnp.stack([_pack_gate_matrix(w_ih, Hp, Hp)
                         for (w_ih, _, _, _) in flat_params])          # (L, Hp, 4Hp)
    whh_all = jnp.stack([_pack_gate_matrix(w_hh, Hp, Hp)
                         for (_, w_hh, _, _) in flat_params])          # (L, Hp, 4Hp)
    b_all = jnp.stack([_pack_gate_bias(b_ih + b_hh, Hp)
                       for (_, _, b_ih, b_hh) in flat_params])         # (L, 1, 4Hp)

    h_last = pl.pallas_call(
        _lstm_fused_kernel,
        out_shape=jax.ShapeDtypeStruct((Bp, Hp), jnp.float32),
        in_specs=[pl.BlockSpec(memory_space=pltpu.MemorySpace.VMEM)] * 4,
        out_specs=pl.BlockSpec(memory_space=pltpu.MemorySpace.VMEM),
        scratch_shapes=[
            pltpu.VMEM((T * Bp, 4 * Hp), jnp.float32),  # gate buffer (even layers)
            pltpu.VMEM((T * Bp, 4 * Hp), jnp.float32),  # gate buffer (odd layers)
        ],
    )(x2d, wih_all, whh_all, b_all)

    return h_last[:B, :H][:, None, :]  # (B, 1, H)


def init_lstm_params(key, hidden_size, num_layers):
    """Deterministic init matching nn.LSTM shapes: per layer
    W_ih (4H, Hin), W_hh (4H, H), b_ih (4H,), b_hh (4H,),
    uniform(-1/sqrt(H), 1/sqrt(H))."""
    H = hidden_size
    bound = 1.0 / jnp.sqrt(jnp.float32(H))
    params = []
    for _ in range(num_layers):
        key, k1, k2, k3, k4 = jax.random.split(key, 5)
        Hin = H  # input_size == hidden_size in this module
        w_ih = jax.random.uniform(k1, (4 * H, Hin), jnp.float32, -bound, bound)
        w_hh = jax.random.uniform(k2, (4 * H, H), jnp.float32, -bound, bound)
        b_ih = jax.random.uniform(k3, (4 * H,), jnp.float32, -bound, bound)
        b_hh = jax.random.uniform(k4, (4 * H,), jnp.float32, -bound, bound)
        params.append((w_ih, w_hh, b_ih, b_hh))
    return params


def lstm_model_reference(x, params):
    """Pure-JAX reference (lax.scan) with PyTorch gate order [i, f, g, o]."""
    B, T, H = x.shape
    out = x
    for (w_ih, w_hh, b_ih, b_hh) in params:
        def step(carry, x_t):
            h, c = carry
            gates = x_t @ w_ih.T + h @ w_hh.T + b_ih + b_hh
            i, f, g, o = jnp.split(gates, 4, axis=-1)
            i, f, o = jax.nn.sigmoid(i), jax.nn.sigmoid(f), jax.nn.sigmoid(o)
            g = jnp.tanh(g)
            c_new = f * c + i * g
            h_new = o * jnp.tanh(c_new)
            return (h_new, c_new), h_new

        h0 = jnp.zeros((B, H), jnp.float32)
        c0 = jnp.zeros((B, H), jnp.float32)
        (_, _), ys = jax.lax.scan(step, (h0, c0), jnp.transpose(out, (1, 0, 2)))
        out = jnp.transpose(ys, (1, 0, 2))
    return out[:, -1:, :]


if __name__ == "__main__":
    # Small shapes consistent with the module: batch=2, seq=8, hidden=32, 2 layers.
    B, T, H = 2, 8, 32
    num_layers = 2
    dropout_p = 0.0  # inference semantics; see TODO(synk) above

    key = jax.random.PRNGKey(0)
    k_x, k_p = jax.random.split(key)
    x = jax.random.normal(k_x, (B, T, H), jnp.float32)
    params = init_lstm_params(k_p, H, num_layers)

    out = lstm_model_forward(x, tuple(params), num_layers)
    out = jax.block_until_ready(out)

    ref = lstm_model_reference(x, params)
    assert out.shape == (B, 1, H), out.shape
    assert jnp.allclose(out, ref, atol=1e-5, rtol=1e-5), "mismatch vs reference"

    print("KERNEL_OK")
</pallas_src>

<mosaic_0001>
module attributes {stable_mosaic.version = 11 : i64} {
  func.func @_lstm_fused_kernel(%arg0: memref<64x128xf32, #tpu.memory_space<vmem>>, %arg1: memref<2x128x512xf32, #tpu.memory_space<vmem>>, %arg2: memref<2x128x512xf32, #tpu.memory_space<vmem>>, %arg3: memref<2x1x512xf32, #tpu.memory_space<vmem>>, %arg4: memref<8x128xf32, #tpu.memory_space<vmem>>, %arg5: memref<64x512xf32, #tpu.memory_space<vmem>>, %arg6: memref<64x512xf32, #tpu.memory_space<vmem>>) attributes {dimension_semantics = [], scalar_prefetch = 0 : i64, scratch_operands = 2 : i64, tpu.core_type = #tpu.core_type<tc>} {
    %c0 = arith.constant 0 : index
    %c0_0 = arith.constant 0 : index
    %0 = vector.load %arg0[%c0, %c0_0] : memref<64x128xf32, #tpu.memory_space<vmem>>, vector<64x128xf32>
    %c0_1 = arith.constant 0 : index
    %c0_2 = arith.constant 0 : index
    %c0_3 = arith.constant 0 : index
    %1 = vector.load %arg1[%c0_1, %c0_2, %c0_3] : memref<2x128x512xf32, #tpu.memory_space<vmem>>, vector<1x128x512xf32>
    %2 = vector.shape_cast %1 : vector<1x128x512xf32> to vector<128x512xf32>
    %cst = arith.constant dense<0.000000e+00> : vector<64x512xf32>
    %3 = tpu.matmul %0, %2, %cst {dimension_numbers = #tpu.dot_dimension_numbers<[1], [0], [0], [1], [0, 0, 1, 1], [], []>} : vector<64x128xf32>, vector<128x512xf32>, vector<64x512xf32> -> vector<64x512xf32>
    %c0_4 = arith.constant 0 : index
    %c0_5 = arith.constant 0 : index
    %c0_6 = arith.constant 0 : index
    %4 = vector.load %arg3[%c0_4, %c0_5, %c0_6] : memref<2x1x512xf32, #tpu.memory_space<vmem>>, vector<1x1x512xf32>
    %5 = vector.shape_cast %4 : vector<1x1x512xf32> to vector<1x512xf32>
    %6 = vector.broadcast %5 : vector<1x512xf32> to vector<64x512xf32>
    %7 = arith.addf %3, %6 : vector<64x512xf32>
    %c0_7 = arith.constant 0 : index
    %c0_8 = arith.constant 0 : index
    %8 = vector.load %arg5[%c0_7, %c0_8] : memref<64x512xf32, #tpu.memory_space<vmem>>, vector<64x512xf32>
    tpu.vector_store %arg5[%c0_7, %c0_8], %7 {strides = array<i32>} : memref<64x512xf32, #tpu.memory_space<vmem>>, vector<64x512xf32>,
    %cst_9 = arith.constant 0.000000e+00 : f32
    %9 = vector.broadcast %cst_9 : f32 to vector<8x128xf32>
    %cst_10 = arith.constant 0.000000e+00 : f32
    %10 = vector.broadcast %cst_10 : f32 to vector<8x128xf32>
    %c0_11 = arith.constant 0 : index
    %c0_12 = arith.constant 0 : index
    %11 = vector.load %arg5[%c0_11, %c0_12] : memref<64x512xf32, #tpu.memory_space<vmem>>, vector<8x512xf32>
    %c0_13 = arith.constant 0 : index
    %c0_14 = arith.constant 0 : index
    %c0_15 = arith.constant 0 : index
    %12 = vector.load %arg2[%c0_13, %c0_14, %c0_15] : memref<2x128x512xf32, #tpu.memory_space<vmem>>, vector<1x128x512xf32>
    %13 = vector.shape_cast %12 : vector<1x128x512xf32> to vector<128x512xf32>
    %cst_16 = arith.constant dense<0.000000e+00> : vector<8x512xf32>
    %14 = tpu.matmul %9, %13, %cst_16 {dimension_numbers = #tpu.dot_dimension_numbers<[1], [0], [0], [1], [0, 0, 1, 1], [], []>} : vector<8x128xf32>, vector<128x512xf32>, vector<8x512xf32> -> vector<8x512xf32>
    %15 = arith.addf %11, %14 : vector<8x512xf32>
    %16 = vector.extract_strided_slice %15 {offsets = [0, 0], sizes = [8, 128], strides = [1, 1]} : vector<8x512xf32> to vector<8x128xf32>
    %17 = arith.negf %16 : vector<8x128xf32>
    %18 = math.exp %17 : vector<8x128xf32>
    %cst_17 = arith.constant 1.000000e+00 : f32
    %19 = vector.broadcast %cst_17 : f32 to vector<8x128xf32>
    %20 = arith.addf %19, %18 : vector<8x128xf32>
    %21 = arith.divf %19, %20 : vector<8x128xf32>
    %22 = vector.extract_strided_slice %15 {offsets = [0, 128], sizes = [8, 128], strides = [1, 1]} : vector<8x512xf32> to vector<8x128xf32>
    %23 = arith.negf %22 : vector<8x128xf32>
    %24 = math.exp %23 : vector<8x128xf32>
    %cst_18 = arith.constant 1.000000e+00 : f32
    %25 = vector.broadcast %cst_18 : f32 to vector<8x128xf32>
    %26 = arith.addf %25, %24 : vector<8x128xf32>
    %27 = arith.divf %25, %26 : vector<8x128xf32>
    %28 = vector.extract_strided_slice %15 {offsets = [0, 256], sizes = [8, 128], strides = [1, 1]} : vector<8x512xf32> to vector<8x128xf32>
    %29 = math.tanh %28 : vector<8x128xf32>
    %30 = vector.extract_strided_slice %15 {offsets = [0, 384], sizes = [8, 128], strides = [1, 1]} : vector<8x512xf32> to vector<8x128xf32>
    %31 = arith.negf %30 : vector<8x128xf32>
    %32 = math.exp %31 : vector<8x128xf32>
    %cst_19 = arith.constant 1.000000e+00 : f32
    %33 = vector.broadcast %cst_19 : f32 to vector<8x128xf32>
    %34 = arith.addf %33, %32 : vector<8x128xf32>
    %35 = arith.divf %33, %34 : vector<8x128xf32>
    %36 = arith.mulf %27, %10 : vector<8x128xf32>
    %37 = arith.mulf %21, %29 : vector<8x128xf32>
    %38 = arith.addf %36, %37 : vector<8x128xf32>
    %39 = math.tanh %38 : vector<8x128xf32>
    %40 = arith.mulf %35, %39 : vector<8x128xf32>
    %c1 = arith.constant 1 : index
    %c0_20 = arith.constant 0 : index
    %c0_21 = arith.constant 0 : index
    %41 = vector.load %arg1[%c1, %c0_20, %c0_21] : memref<2x128x512xf32, #tpu.memory_space<vmem>>, vector<1x128x512xf32>
    %42 = vector.shape_cast %41 : vector<1x128x512xf32> to vector<128x512xf32>
    %cst_22 = arith.constant dense<0.000000e+00> : vector<8x512xf32>
    %43 = tpu.matmul %40, %42, %cst_22 {dimension_numbers = #tpu.dot_dimension_numbers<[1], [0], [0], [1], [0, 0, 1, 1], [], []>} : vector<8x128xf32>, vector<128x512xf32>, vector<8x512xf32> -> vector<8x512xf32>
    %c1_23 = arith.constant 1 : index
    %c0_24 = arith.constant 0 : index
    %c0_25 = arith.constant 0 : index
    %44 = vector.load %arg3[%c1_23, %c0_24, %c0_25] : memref<2x1x512xf32, #tpu.memory_space<vmem>>, vector<1x1x512xf32>
    %45 = vector.shape_cast %44 : vector<1x1x512xf32> to vector<1x512xf32>
    %46 = vector.broadcast %45 : vector<1x512xf32> to vector<8x512xf32>
    %47 = arith.addf %43, %46 : vector<8x512xf32>
    %c0_26 = arith.constant 0 : index
    %c0_27 = arith.constant 0 : index
    %48 = vector.load %arg6[%c0_26, %c0_27] : memref<64x512xf32, #tpu.memory_space<vmem>>, vector<8x512xf32>
    tpu.vector_store %arg6[%c0_26, %c0_27], %47 {strides = array<i32>} : memref<64x512xf32, #tpu.memory_space<vmem>>, vector<8x512xf32>,
    %c8 = arith.constant 8 : index
    %c0_28 = arith.constant 0 : index
    %49 = vector.load %arg5[%c8, %c0_28] : memref<64x512xf32, #tpu.memory_space<vmem>>, vector<8x512xf32>
    %c0_29 = arith.constant 0 : index
    %c0_30 = arith.constant 0 : index
    %c0_31 = arith.constant 0 : index
    %50 = vector.load %arg2[%c0_29, %c0_30, %c0_31] : memref<2x128x512xf32, #tpu.memory_space<vmem>>, vector<1x128x512xf32>
    %51 = vector.shape_cast %50 : vector<1x128x512xf32> to vector<128x512xf32>
    %cst_32 = arith.constant dense<0.000000e+00> : vector<8x512xf32>
    %52 = tpu.matmul %40, %51, %cst_32 {dimension_numbers = #tpu.dot_dimension_numbers<[1], [0], [0], [1], [0, 0, 1, 1], [], []>} : vector<8x128xf32>, vector<128x512xf32>, vector<8x512xf32> -> vector<8x512xf32>
    %53 = arith.addf %49, %52 : vector<8x512xf32>
    %54 = vector.extract_strided_slice %53 {offsets = [0, 0], sizes = [8, 128], strides = [1, 1]} : vector<8x512xf32> to vector<8x128xf32>
    %55 = arith.negf %54 : vector<8x128xf32>
    %56 = math.exp %55 : vector<8x128xf32>
    %cst_33 = arith.constant 1.000000e+00 : f32
    %57 = vector.broadcast %cst_33 : f32 to vector<8x128xf32>
    %58 = arith.addf %57, %56 : vector<8x128xf32>
    %59 = arith.divf %57, %58 : vector<8x128xf32>
    %60 = vector.extract_strided_slice %53 {offsets = [0, 128], sizes = [8, 128], strides = [1, 1]} : vector<8x512xf32> to vector<8x128xf32>
    %61 = arith.negf %60 : vector<8x128xf32>
    %62 = math.exp %61 : vector<8x128xf32>
    %cst_34 = arith.constant 1.000000e+00 : f32
    %63 = vector.broadcast %cst_34 : f32 to vector<8x128xf32>
    %64 = arith.addf %63, %62 : vector<8x128xf32>
    %65 = arith.divf %63, %64 : vector<8x128xf32>
    %66 = vector.extract_strided_slice %53 {offsets = [0, 256], sizes = [8, 128], strides = [1, 1]} : vector<8x512xf32> to vector<8x128xf32>
    %67 = math.tanh %66 : vector<8x128xf32>
    %68 = vector.extract_strided_slice %53 {offsets = [0, 384], sizes = [8, 128], strides = [1, 1]} : vector<8x512xf32> to vector<8x128xf32>
    %69 = arith.negf %68 : vector<8x128xf32>
    %70 = math.exp %69 : vector<8x128xf32>
    %cst_35 = arith.constant 1.000000e+00 : f32
    %71 = vector.broadcast %cst_35 : f32 to vector<8x128xf32>
    %72 = arith.addf %71, %70 : vector<8x128xf32>
    %73 = arith.divf %71, %72 : vector<8x128xf32>
    %74 = arith.mulf %65, %38 : vector<8x128xf32>
    %75 = arith.mulf %59, %67 : vector<8x128xf32>
    %76 = arith.addf %74, %75 : vector<8x128xf32>
    %77 = math.tanh %76 : vector<8x128xf32>
    %78 = arith.mulf %73, %77 : vector<8x128xf32>
    %c1_36 = arith.constant 1 : index
    %c0_37 = arith.constant 0 : index
    %c0_38 = arith.constant 0 : index
    %79 = vector.load %arg1[%c1_36, %c0_37, %c0_38] : memref<2x128x512xf32, #tpu.memory_space<vmem>>, vector<1x128x512xf32>
    %80 = vector.shape_cast %79 : vector<1x128x512xf32> to vector<128x512xf32>
    %cst_39 = arith.constant dense<0.000000e+00> : vector<8x512xf32>
    %81 = tpu.matmul %78, %80, %cst_39 {dimension_numbers = #tpu.dot_dimension_numbers<[1], [0], [0], [1], [0, 0, 1, 1], [], []>} : vector<8x128xf32>, vector<128x512xf32>, vector<8x512xf32> -> vector<8x512xf32>
    %c1_40 = arith.constant 1 : index
    %c0_41 = arith.constant 0 : index
    %c0_42 = arith.constant 0 : index
    %82 = vector.load %arg3[%c1_40, %c0_41, %c0_42] : memref<2x1x512xf32, #tpu.memory_space<vmem>>, vector<1x1x512xf32>
    %83 = vector.shape_cast %82 : vector<1x1x512xf32> to vector<1x512xf32>
    %84 = vector.broadcast %83 : vector<1x512xf32> to vector<8x512xf32>
    %85 = arith.addf %81, %84 : vector<8x512xf32>
    %c8_43 = arith.constant 8 : index
    %c0_44 = arith.constant 0 : index
    %86 = vector.load %arg6[%c8_43, %c0_44] : memref<64x512xf32, #tpu.memory_space<vmem>>, vector<8x512xf32>
    tpu.vector_store %arg6[%c8_43, %c0_44], %85 {strides = array<i32>} : memref<64x512xf32, #tpu.memory_space<vmem>>, vector<8x512xf32>,
    %c16 = arith.constant 16 : index
    %c0_45 = arith.constant 0 : index
    %87 = vector.load %arg5[%c16, %c0_45] : memref<64x512xf32, #tpu.memory_space<vmem>>, vector<8x512xf32>
    %c0_46 = arith.constant 0 : index
    %c0_47 = arith.constant 0 : index
    %c0_48 = arith.constant 0 : index
    %88 = vector.load %arg2[%c0_46, %c0_47, %c0_48] : memref<2x128x512xf32, #tpu.memory_space<vmem>>, vector<1x128x512xf32>
    %89 = vector.shape_cast %88 : vector<1x128x512xf32> to vector<128x512xf32>
    %cst_49 = arith.constant dense<0.000000e+00> : vector<8x512xf32>
    %90 = tpu.matmul %78, %89, %cst_49 {dimension_numbers = #tpu.dot_dimension_numbers<[1], [0], [0], [1], [0, 0, 1, 1], [], []>} : vector<8x128xf32>, vector<128x512xf32>, vector<8x512xf32> -> vector<8x512xf32>
    %91 = arith.addf %87, %90 : vector<8x512xf32>
    %92 = vector.extract_strided_slice %91 {offsets = [0, 0], sizes = [8, 128], strides = [1, 1]} : vector<8x512xf32> to vector<8x128xf32>
    %93 = arith.negf %92 : vector<8x128xf32>
    %94 = math.exp %93 : vector<8x128xf32>
    %cst_50 = arith.constant 1.000000e+00 : f32
    %95 = vector.broadcast %cst_50 : f32 to vector<8x128xf32>
    %96 = arith.addf %95, %94 : vector<8x128xf32>
    %97 = arith.divf %95, %96 : vector<8x128xf32>
    %98 = vector.extract_strided_slice %91 {offsets = [0, 128], sizes = [8, 128], strides = [1, 1]} : vector<8x512xf32> to vector<8x128xf32>
    %99 = arith.negf %98 : vector<8x128xf32>
    %100 = math.exp %99 : vector<8x128xf32>
    %cst_51 = arith.constant 1.000000e+00 : f32
    %101 = vector.broadcast %cst_51 : f32 to vector<8x128xf32>
    %102 = arith.addf %101, %100 : vector<8x128xf32>
    %103 = arith.divf %101, %102 : vector<8x128xf32>
    %104 = vector.extract_strided_slice %91 {offsets = [0, 256], sizes = [8, 128], strides = [1, 1]} : vector<8x512xf32> to vector<8x128xf32>
    %105 = math.tanh %104 : vector<8x128xf32>
    %106 = vector.extract_strided_slice %91 {offsets = [0, 384], sizes = [8, 128], strides = [1, 1]} : vector<8x512xf32> to vector<8x128xf32>
    %107 = arith.negf %106 : vector<8x128xf32>
    %108 = math.exp %107 : vector<8x128xf32>
    %cst_52 = arith.constant 1.000000e+00 : f32
    %109 = vector.broadcast %cst_52 : f32 to vector<8x128xf32>
    %110 = arith.addf %109, %108 : vector<8x128xf32>
    %111 = arith.divf %109, %110 : vector<8x128xf32>
    %112 = arith.mulf %103, %76 : vector<8x128xf32>
    %113 = arith.mulf %97, %105 : vector<8x128xf32>
    %114 = arith.addf %112, %113 : vector<8x128xf32>
    %115 = math.tanh %114 : vector<8x128xf32>
    %116 = arith.mulf %111, %115 : vector<8x128xf32>
    %c1_53 = arith.constant 1 : index
    %c0_54 = arith.constant 0 : index
    %c0_55 = arith.constant 0 : index
    %117 = vector.load %arg1[%c1_53, %c0_54, %c0_55] : memref<2x128x512xf32, #tpu.memory_space<vmem>>, vector<1x128x512xf32>
    %118 = vector.shape_cast %117 : vector<1x128x512xf32> to vector<128x512xf32>
    %cst_56 = arith.constant dense<0.000000e+00> : vector<8x512xf32>
    %119 = tpu.matmul %116, %118, %cst_56 {dimension_numbers = #tpu.dot_dimension_numbers<[1], [0], [0], [1], [0, 0, 1, 1], [], []>} : vector<8x128xf32>, vector<128x512xf32>, vector<8x512xf32> -> vector<8x512xf32>
    %c1_57 = arith.constant 1 : index
    %c0_58 = arith.constant 0 : index
    %c0_59 = arith.constant 0 : index
    %120 = vector.load %arg3[%c1_57, %c0_58, %c0_59] : memref<2x1x512xf32, #tpu.memory_space<vmem>>, vector<1x1x512xf32>
    %121 = vector.shape_cast %120 : vector<1x1x512xf32> to vector<1x512xf32>
    %122 = vector.broadcast %121 : vector<1x512xf32> to vector<8x512xf32>
    %123 = arith.addf %119, %122 : vector<8x512xf32>
    %c16_60 = arith.constant 16 : index
    %c0_61 = arith.constant 0 : index
    %124 = vector.load %arg6[%c16_60, %c0_61] : memref<64x512xf32, #tpu.memory_space<vmem>>, vector<8x512xf32>
    tpu.vector_store %arg6[%c16_60, %c0_61], %123 {strides = array<i32>} : memref<64x512xf32, #tpu.memory_space<vmem>>, vector<8x512xf32>,
    %c24 = arith.constant 24 : index
    %c0_62 = arith.constant 0 : index
    %125 = vector.load %arg5[%c24, %c0_62] : memref<64x512xf32, #tpu.memory_space<vmem>>, vector<8x512xf32>
    %c0_63 = arith.constant 0 : index
    %c0_64 = arith.constant 0 : index
    %c0_65 = arith.constant 0 : index
    %126 = vector.load %arg2[%c0_63, %c0_64, %c0_65] : memref<2x128x512xf32, #tpu.memory_space<vmem>>, vector<1x128x512xf32>
    %127 = vector.shape_cast %126 : vector<1x128x512xf32> to vector<128x512xf32>
    %cst_66 = arith.constant dense<0.000000e+00> : vector<8x512xf32>
    %128 = tpu.matmul %116, %127, %cst_66 {dimension_numbers = #tpu.dot_dimension_numbers<[1], [0], [0], [1], [0, 0, 1, 1], [], []>} : vector<8x128xf32>, vector<128x512xf32>, vector<8x512xf32> -> vector<8x512xf32>
    %129 = arith.addf %125, %128 : vector<8x512xf32>
    %130 = vector.extract_strided_slice %129 {offsets = [0, 0], sizes = [8, 128], strides = [1, 1]} : vector<8x512xf32> to vector<8x128xf32>
    %131 = arith.negf %130 : vector<8x128xf32>
    %132 = math.exp %131 : vector<8x128xf32>
    %cst_67 = arith.constant 1.000000e+00 : f32
    %133 = vector.broadcast %cst_67 : f32 to vector<8x128xf32>
    %134 = arith.addf %133, %132 : vector<8x128xf32>
    %135 = arith.divf %133, %134 : vector<8x128xf32>
    %136 = vector.extract_strided_slice %129 {offsets = [0, 128], sizes = [8, 128], strides = [1, 1]} : vector<8x512xf32> to vector<8x128xf32>
    %137 = arith.negf %136 : vector<8x128xf32>
    %138 = math.exp %137 : vector<8x128xf32>
    %cst_68 = arith.constant 1.000000e+00 : f32
    %139 = vector.broadcast %cst_68 : f32 to vector<8x128xf32>
    %140 = arith.addf %139, %138 : vector<8x128xf32>
    %141 = arith.divf %139, %140 : vector<8x128xf32>
    %142 = vector.extract_strided_slice %129 {offsets = [0, 256], sizes = [8, 128], strides = [1, 1]} : vector<8x512xf32> to vector<8x128xf32>
    %143 = math.tanh %142 : vector<8x128xf32>
    %144 = vector.extract_strided_slice %129 {offsets = [0, 384], sizes = [8, 128], strides = [1, 1]} : vector<8x512xf32> to vector<8x128xf32>
    %145 = arith.negf %144 : vector<8x128xf32>
    %146 = math.exp %145 : vector<8x128xf32>
    %cst_69 = arith.constant 1.000000e+00 : f32
    %147 = vector.broadcast %cst_69 : f32 to vector<8x128xf32>
    %148 = arith.addf %147, %146 : vector<8x128xf32>
    %149 = arith.divf %147, %148 : vector<8x128xf32>
    %150 = arith.mulf %141, %114 : vector<8x128xf32>
    %151 = arith.mulf %135, %143 : vector<8x128xf32>
    %152 = arith.addf %150, %151 : vector<8x128xf32>
    %153 = math.tanh %152 : vector<8x128xf32>
    %154 = arith.mulf %149, %153 : vector<8x128xf32>
    %c1_70 = arith.constant 1 : index
    %c0_71 = arith.constant 0 : index
    %c0_72 = arith.constant 0 : index
    %155 = vector.load %arg1[%c1_70, %c0_71, %c0_72] : memref<2x128x512xf32, #tpu.memory_space<vmem>>, vector<1x128x512xf32>
    %156 = vector.shape_cast %155 : vector<1x128x512xf32> to vector<128x512xf32>
    %cst_73 = arith.constant dense<0.000000e+00> : vector<8x512xf32>
    %157 = tpu.matmul %154, %156, %cst_73 {dimension_numbers = #tpu.dot_dimension_numbers<[1], [0], [0], [1], [0, 0, 1, 1], [], []>} : vector<8x128xf32>, vector<128x512xf32>, vector<8x512xf32> -> vector<8x512xf32>
    %c1_74 = arith.constant 1 : index
    %c0_75 = arith.constant 0 : index
    %c0_76 = arith.constant 0 : index
    %158 = vector.load %arg3[%c1_74, %c0_75, %c0_76] : memref<2x1x512xf32, #tpu.memory_space<vmem>>, vector<1x1x512xf32>
    %159 = vector.shape_cast %158 : vector<1x1x512xf32> to vector<1x512xf32>
    %160 = vector.broadcast %159 : vector<1x512xf32> to vector<8x512xf32>
    %161 = arith.addf %157, %160 : vector<8x512xf32>
    %c24_77 = arith.constant 24 : index
    %c0_78 = arith.constant 0 : index
    %162 = vector.load %arg6[%c24_77, %c0_78] : memref<64x512xf32, #tpu.memory_space<vmem>>, vector<8x512xf32>
    tpu.vector_store %arg6[%c24_77, %c0_78], %161 {strides = array<i32>} : memref<64x512xf32, #tpu.memory_space<vmem>>, vector<8x512xf32>,
    %c32 = arith.constant 32 : index
    %c0_79 = arith.constant 0 : index
    %163 = vector.load %arg5[%c32, %c0_79] : memref<64x512xf32, #tpu.memory_space<vmem>>, vector<8x512xf32>
    %c0_80 = arith.constant 0 : index
    %c0_81 = arith.constant 0 : index
    %c0_82 = arith.constant 0 : index
    %164 = vector.load %arg2[%c0_80, %c0_81, %c0_82] : memref<2x128x512xf32, #tpu.memory_space<vmem>>, vector<1x128x512xf32>
    %165 = vector.shape_cast %164 : vector<1x128x512xf32> to vector<128x512xf32>
    %cst_83 = arith.constant dense<0.000000e+00> : vector<8x512xf32>
    %166 = tpu.matmul %154, %165, %cst_83 {dimension_numbers = #tpu.dot_dimension_numbers<[1], [0], [0], [1], [0, 0, 1, 1], [], []>} : vector<8x128xf32>, vector<128x512xf32>, vector<8x512xf32> -> vector<8x512xf32>
    %167 = arith.addf %163, %166 : vector<8x512xf32>
    %168 = vector.extract_strided_slice %167 {offsets = [0, 0], sizes = [8, 128], strides = [1, 1]} : vector<8x512xf32> to vector<8x128xf32>
    %169 = arith.negf %168 : vector<8x128xf32>
    %170 = math.exp %169 : vector<8x128xf32>
    %cst_84 = arith.constant 1.000000e+00 : f32
    %171 = vector.broadcast %cst_84 : f32 to vector<8x128xf32>
    %172 = arith.addf %171, %170 : vector<8x128xf32>
    %173 = arith.divf %171, %172 : vector<8x128xf32>
    %174 = vector.extract_strided_slice %167 {offsets = [0, 128], sizes = [8, 128], strides = [1, 1]} : vector<8x512xf32> to vector<8x128xf32>
    %175 = arith.negf %174 : vector<8x128xf32>
    %176 = math.exp %175 : vector<8x128xf32>
    %cst_85 = arith.constant 1.000000e+00 : f32
    %177 = vector.broadcast %cst_85 : f32 to vector<8x128xf32>
    %178 = arith.addf %177, %176 : vector<8x128xf32>
    %179 = arith.divf %177, %178 : vector<8x128xf32>
    %180 = vector.extract_strided_slice %167 {offsets = [0, 256], sizes = [8, 128], strides = [1, 1]} : vector<8x512xf32> to vector<8x128xf32>
    %181 = math.tanh %180 : vector<8x128xf32>
    %182 = vector.extract_strided_slice %167 {offsets = [0, 384], sizes = [8, 128], strides = [1, 1]} : vector<8x512xf32> to vector<8x128xf32>
    %183 = arith.negf %182 : vector<8x128xf32>
    %184 = math.exp %183 : vector<8x128xf32>
    %cst_86 = arith.constant 1.000000e+00 : f32
    %185 = vector.broadcast %cst_86 : f32 to vector<8x128xf32>
    %186 = arith.addf %185, %184 : vector<8x128xf32>
    %187 = arith.divf %185, %186 : vector<8x128xf32>
    %188 = arith.mulf %179, %152 : vector<8x128xf32>
    %189 = arith.mulf %173, %181 : vector<8x128xf32>
    %190 = arith.addf %188, %189 : vector<8x128xf32>
    %191 = math.tanh %190 : vector<8x128xf32>
    %192 = arith.mulf %187, %191 : vector<8x128xf32>
    %c1_87 = arith.constant 1 : index
    %c0_88 = arith.constant 0 : index
    %c0_89 = arith.constant 0 : index
    %193 = vector.load %arg1[%c1_87, %c0_88, %c0_89] : memref<2x128x512xf32, #tpu.memory_space<vmem>>, vector<1x128x512xf32>
    %194 = vector.shape_cast %193 : vector<1x128x512xf32> to vector<128x512xf32>
    %cst_90 = arith.constant dense<0.000000e+00> : vector<8x512xf32>
    %195 = tpu.matmul %192, %194, %cst_90 {dimension_numbers = #tpu.dot_dimension_numbers<[1], [0], [0], [1], [0, 0, 1, 1], [], []>} : vector<8x128xf32>, vector<128x512xf32>, vector<8x512xf32> -> vector<8x512xf32>
    %c1_91 = arith.constant 1 : index
    %c0_92 = arith.constant 0 : index
    %c0_93 = arith.constant 0 : index
    %196 = vector.load %arg3[%c1_91, %c0_92, %c0_93] : memref<2x1x512xf32, #tpu.memory_space<vmem>>, vector<1x1x512xf32>
    %197 = vector.shape_cast %196 : vector<1x1x512xf32> to vector<1x512xf32>
    %198 = vector.broadcast %197 : vector<1x512xf32> to vector<8x512xf32>
    %199 = arith.addf %195, %198 : vector<8x512xf32>
    %c32_94 = arith.constant 32 : index
    %c0_95 = arith.constant 0 : index
    %200 = vector.load %arg6[%c32_94, %c0_95] : memref<64x512xf32, #tpu.memory_space<vmem>>, vector<8x512xf32>
    tpu.vector_store %arg6[%c32_94, %c0_95], %199 {strides = array<i32>} : memref<64x512xf32, #tpu.memory_space<vmem>>, vector<8x512xf32>,
    %c40 = arith.constant 40 : index
    %c0_96 = arith.constant 0 : index
    %201 = vector.load %arg5[%c40, %c0_96] : memref<64x512xf32, #tpu.memory_space<vmem>>, vector<8x512xf32>
    %c0_97 = arith.constant 0 : index
    %c0_98 = arith.constant 0 : index
    %c0_99 = arith.constant 0 : index
    %202 = vector.load %arg2[%c0_97, %c0_98, %c0_99] : memref<2x128x512xf32, #tpu.memory_space<vmem>>, vector<1x128x512xf32>
    %203 = vector.shape_cast %202 : vector<1x128x512xf32> to vector<128x512xf32>
    %cst_100 = arith.constant dense<0.000000e+00> : vector<8x512xf32>
    %204 = tpu.matmul %192, %203, %cst_100 {dimension_numbers = #tpu.dot_dimension_numbers<[1], [0], [0], [1], [0, 0, 1, 1], [], []>} : vector<8x128xf32>, vector<128x512xf32>, vector<8x512xf32> -> vector<8x512xf32>
    %205 = arith.addf %201, %204 : vector<8x512xf32>
    %206 = vector.extract_strided_slice %205 {offsets = [0, 0], sizes = [8, 128], strides = [1, 1]} : vector<8x512xf32> to vector<8x128xf32>
    %207 = arith.negf %206 : vector<8x128xf32>
    %208 = math.exp %207 : vector<8x128xf32>
    %cst_101 = arith.constant 1.000000e+00 : f32
    %209 = vector.broadcast %cst_101 : f32 to vector<8x128xf32>
    %210 = arith.addf %209, %208 : vector<8x128xf32>
    %211 = arith.divf %209, %210 : vector<8x128xf32>
    %212 = vector.extract_strided_slice %205 {offsets = [0, 128], sizes = [8, 128], strides = [1, 1]} : vector<8x512xf32> to vector<8x128xf32>
    %213 = arith.negf %212 : vector<8x128xf32>
    %214 = math.exp %213 : vector<8x128xf32>
    %cst_102 = arith.constant 1.000000e+00 : f32
    %215 = vector.broadcast %cst_102 : f32 to vector<8x128xf32>
    %216 = arith.addf %215, %214 : vector<8x128xf32>
    %217 = arith.divf %215, %216 : vector<8x128xf32>
    %218 = vector.extract_strided_slice %205 {offsets = [0, 256], sizes = [8, 128], strides = [1, 1]} : vector<8x512xf32> to vector<8x128xf32>
    %219 = math.tanh %218 : vector<8x128xf32>
    %220 = vector.extract_strided_slice %205 {offsets = [0, 384], sizes = [8, 128], strides = [1, 1]} : vector<8x512xf32> to vector<8x128xf32>
    %221 = arith.negf %220 : vector<8x128xf32>
    %222 = math.exp %221 : vector<8x128xf32>
    %cst_103 = arith.constant 1.000000e+00 : f32
    %223 = vector.broadcast %cst_103 : f32 to vector<8x128xf32>
    %224 = arith.addf %223, %222 : vector<8x128xf32>
    %225 = arith.divf %223, %224 : vector<8x128xf32>
    %226 = arith.mulf %217, %190 : vector<8x128xf32>
    %227 = arith.mulf %211, %219 : vector<8x128xf32>
    %228 = arith.addf %226, %227 : vector<8x128xf32>
    %229 = math.tanh %228 : vector<8x128xf32>
    %230 = arith.mulf %225, %229 : vector<8x128xf32>
    %c1_104 = arith.constant 1 : index
    %c0_105 = arith.constant 0 : index
    %c0_106 = arith.constant 0 : index
    %231 = vector.load %arg1[%c1_104, %c0_105, %c0_106] : memref<2x128x512xf32, #tpu.memory_space<vmem>>, vector<1x128x512xf32>
    %232 = vector.shape_cast %231 : vector<1x128x512xf32> to vector<128x512xf32>
    %cst_107 = arith.constant dense<0.000000e+00> : vector<8x512xf32>
    %233 = tpu.matmul %230, %232, %cst_107 {dimension_numbers = #tpu.dot_dimension_numbers<[1], [0], [0], [1], [0, 0, 1, 1], [], []>} : vector<8x128xf32>, vector<128x512xf32>, vector<8x512xf32> -> vector<8x512xf32>
    %c1_108 = arith.constant 1 : index
    %c0_109 = arith.constant 0 : index
    %c0_110 = arith.constant 0 : index
    %234 = vector.load %arg3[%c1_108, %c0_109, %c0_110] : memref<2x1x512xf32, #tpu.memory_space<vmem>>, vector<1x1x512xf32>
    %235 = vector.shape_cast %234 : vector<1x1x512xf32> to vector<1x512xf32>
    %236 = vector.broadcast %235 : vector<1x512xf32> to vector<8x512xf32>
    %237 = arith.addf %233, %236 : vector<8x512xf32>
    %c40_111 = arith.constant 40 : index
    %c0_112 = arith.constant 0 : index
    %238 = vector.load %arg6[%c40_111, %c0_112] : memref<64x512xf32, #tpu.memory_space<vmem>>, vector<8x512xf32>
    tpu.vector_store %arg6[%c40_111, %c0_112], %237 {strides = array<i32>} : memref<64x512xf32, #tpu.memory_space<vmem>>, vector<8x512xf32>,
    %c48 = arith.constant 48 : index
    %c0_113 = arith.constant 0 : index
    %239 = vector.load %arg5[%c48, %c0_113] : memref<64x512xf32, #tpu.memory_space<vmem>>, vector<8x512xf32>
    %c0_114 = arith.constant 0 : index
    %c0_115 = arith.constant 0 : index
    %c0_116 = arith.constant 0 : index
    %240 = vector.load %arg2[%c0_114, %c0_115, %c0_116] : memref<2x128x512xf32, #tpu.memory_space<vmem>>, vector<1x128x512xf32>
    %241 = vector.shape_cast %240 : vector<1x128x512xf32> to vector<128x512xf32>
    %cst_117 = arith.constant dense<0.000000e+00> : vector<8x512xf32>
    %242 = tpu.matmul %230, %241, %cst_117 {dimension_numbers = #tpu.dot_dimension_numbers<[1], [0], [0], [1], [0, 0, 1, 1], [], []>} : vector<8x128xf32>, vector<128x512xf32>, vector<8x512xf32> -> vector<8x512xf32>
    %243 = arith.addf %239, %242 : vector<8x512xf32>
    %244 = vector.extract_strided_slice %243 {offsets = [0, 0], sizes = [8, 128], strides = [1, 1]} : vector<8x512xf32> to vector<8x128xf32>
    %245 = arith.negf %244 : vector<8x128xf32>
    %246 = math.exp %245 : vector<8x128xf32>
    %cst_118 = arith.constant 1.000000e+00 : f32
    %247 = vector.broadcast %cst_118 : f32 to vector<8x128xf32>
    %248 = arith.addf %247, %246 : vector<8x128xf32>
    %249 = arith.divf %247, %248 : vector<8x128xf32>
    %250 = vector.extract_strided_slice %243 {offsets = [0, 128], sizes = [8, 128], strides = [1, 1]} : vector<8x512xf32> to vector<8x128xf32>
    %251 = arith.negf %250 : vector<8x128xf32>
    %252 = math.exp %251 : vector<8x128xf32>
    %cst_119 = arith.constant 1.000000e+00 : f32
    %253 = vector.broadcast %cst_119 : f32 to vector<8x128xf32>
    %254 = arith.addf %253, %252 : vector<8x128xf32>
    %255 = arith.divf %253, %254 : vector<8x128xf32>
    %256 = vector.extract_strided_slice %243 {offsets = [0, 256], sizes = [8, 128], strides = [1, 1]} : vector<8x512xf32> to vector<8x128xf32>
    %257 = math.tanh %256 : vector<8x128xf32>
    %258 = vector.extract_strided_slice %243 {offsets = [0, 384], sizes = [8, 128], strides = [1, 1]} : vector<8x512xf32> to vector<8x128xf32>
    %259 = arith.negf %258 : vector<8x128xf32>
    %260 = math.exp %259 : vector<8x128xf32>
    %cst_120 = arith.constant 1.000000e+00 : f32
    %261 = vector.broadcast %cst_120 : f32 to vector<8x128xf32>
    %262 = arith.addf %261, %260 : vector<8x128xf32>
    %263 = arith.divf %261, %262 : vector<8x128xf32>
    %264 = arith.mulf %255, %228 : vector<8x128xf32>
    %265 = arith.mulf %249, %257 : vector<8x128xf32>
    %266 = arith.addf %264, %265 : vector<8x128xf32>
    %267 = math.tanh %266 : vector<8x128xf32>
    %268 = arith.mulf %263, %267 : vector<8x128xf32>
    %c1_121 = arith.constant 1 : index
    %c0_122 = arith.constant 0 : index
    %c0_123 = arith.constant 0 : index
    %269 = vector.load %arg1[%c1_121, %c0_122, %c0_123] : memref<2x128x512xf32, #tpu.memory_space<vmem>>, vector<1x128x512xf32>
    %270 = vector.shape_cast %269 : vector<1x128x512xf32> to vector<128x512xf32>
    %cst_124 = arith.constant dense<0.000000e+00> : vector<8x512xf32>
    %271 = tpu.matmul %268, %270, %cst_124 {dimension_numbers = #tpu.dot_dimension_numbers<[1], [0], [0], [1], [0, 0, 1, 1], [], []>} : vector<8x128xf32>, vector<128x512xf32>, vector<8x512xf32> -> vector<8x512xf32>
    %c1_125 = arith.constant 1 : index
    %c0_126 = arith.constant 0 : index
    %c0_127 = arith.constant 0 : index
    %272 = vector.load %arg3[%c1_125, %c0_126, %c0_127] : memref<2x1x512xf32, #tpu.memory_space<vmem>>, vector<1x1x512xf32>
    %273 = vector.shape_cast %272 : vector<1x1x512xf32> to vector<1x512xf32>
    %274 = vector.broadcast %273 : vector<1x512xf32> to vector<8x512xf32>
    %275 = arith.addf %271, %274 : vector<8x512xf32>
    %c48_128 = arith.constant 48 : index
    %c0_129 = arith.constant 0 : index
    %276 = vector.load %arg6[%c48_128, %c0_129] : memref<64x512xf32, #tpu.memory_space<vmem>>, vector<8x512xf32>
    tpu.vector_store %arg6[%c48_128, %c0_129], %275 {strides = array<i32>} : memref<64x512xf32, #tpu.memory_space<vmem>>, vector<8x512xf32>,
    %c56 = arith.constant 56 : index
    %c0_130 = arith.constant 0 : index
    %277 = vector.load %arg5[%c56, %c0_130] : memref<64x512xf32, #tpu.memory_space<vmem>>, vector<8x512xf32>
    %c0_131 = arith.constant 0 : index
    %c0_132 = arith.constant 0 : index
    %c0_133 = arith.constant 0 : index
    %278 = vector.load %arg2[%c0_131, %c0_132, %c0_133] : memref<2x128x512xf32, #tpu.memory_space<vmem>>, vector<1x128x512xf32>
    %279 = vector.shape_cast %278 : vector<1x128x512xf32> to vector<128x512xf32>
    %cst_134 = arith.constant dense<0.000000e+00> : vector<8x512xf32>
    %280 = tpu.matmul %268, %279, %cst_134 {dimension_numbers = #tpu.dot_dimension_numbers<[1], [0], [0], [1], [0, 0, 1, 1], [], []>} : vector<8x128xf32>, vector<128x512xf32>, vector<8x512xf32> -> vector<8x512xf32>
    %281 = arith.addf %277, %280 : vector<8x512xf32>
    %282 = vector.extract_strided_slice %281 {offsets = [0, 0], sizes = [8, 128], strides = [1, 1]} : vector<8x512xf32> to vector<8x128xf32>
    %283 = arith.negf %282 : vector<8x128xf32>
    %284 = math.exp %283 : vector<8x128xf32>
    %cst_135 = arith.constant 1.000000e+00 : f32
    %285 = vector.broadcast %cst_135 : f32 to vector<8x128xf32>
    %286 = arith.addf %285, %284 : vector<8x128xf32>
    %287 = arith.divf %285, %286 : vector<8x128xf32>
    %288 = vector.extract_strided_slice %281 {offsets = [0, 128], sizes = [8, 128], strides = [1, 1]} : vector<8x512xf32> to vector<8x128xf32>
    %289 = arith.negf %288 : vector<8x128xf32>
    %290 = math.exp %289 : vector<8x128xf32>
    %cst_136 = arith.constant 1.000000e+00 : f32
    %291 = vector.broadcast %cst_136 : f32 to vector<8x128xf32>
    %292 = arith.addf %291, %290 : vector<8x128xf32>
    %293 = arith.divf %291, %292 : vector<8x128xf32>
    %294 = vector.extract_strided_slice %281 {offsets = [0, 256], sizes = [8, 128], strides = [1, 1]} : vector<8x512xf32> to vector<8x128xf32>
    %295 = math.tanh %294 : vector<8x128xf32>
    %296 = vector.extract_strided_slice %281 {offsets = [0, 384], sizes = [8, 128], strides = [1, 1]} : vector<8x512xf32> to vector<8x128xf32>
    %297 = arith.negf %296 : vector<8x128xf32>
    %298 = math.exp %297 : vector<8x128xf32>
    %cst_137 = arith.constant 1.000000e+00 : f32
    %299 = vector.broadcast %cst_137 : f32 to vector<8x128xf32>
    %300 = arith.addf %299, %298 : vector<8x128xf32>
    %301 = arith.divf %299, %300 : vector<8x128xf32>
    %302 = arith.mulf %293, %266 : vector<8x128xf32>
    %303 = arith.mulf %287, %295 : vector<8x128xf32>
    %304 = arith.addf %302, %303 : vector<8x128xf32>
    %305 = math.tanh %304 : vector<8x128xf32>
    %306 = arith.mulf %301, %305 : vector<8x128xf32>
    %c1_138 = arith.constant 1 : index
    %c0_139 = arith.constant 0 : index
    %c0_140 = arith.constant 0 : index
    %307 = vector.load %arg1[%c1_138, %c0_139, %c0_140] : memref<2x128x512xf32, #tpu.memory_space<vmem>>, vector<1x128x512xf32>
    %308 = vector.shape_cast %307 : vector<1x128x512xf32> to vector<128x512xf32>
    %cst_141 = arith.constant dense<0.000000e+00> : vector<8x512xf32>
    %309 = tpu.matmul %306, %308, %cst_141 {dimension_numbers = #tpu.dot_dimension_numbers<[1], [0], [0], [1], [0, 0, 1, 1], [], []>} : vector<8x128xf32>, vector<128x512xf32>, vector<8x512xf32> -> vector<8x512xf32>
    %c1_142 = arith.constant 1 : index
    %c0_143 = arith.constant 0 : index
    %c0_144 = arith.constant 0 : index
    %310 = vector.load %arg3[%c1_142, %c0_143, %c0_144] : memref<2x1x512xf32, #tpu.memory_space<vmem>>, vector<1x1x512xf32>
    %311 = vector.shape_cast %310 : vector<1x1x512xf32> to vector<1x512xf32>
    %312 = vector.broadcast %311 : vector<1x512xf32> to vector<8x512xf32>
    %313 = arith.addf %309, %312 : vector<8x512xf32>
    %c56_145 = arith.constant 56 : index
    %c0_146 = arith.constant 0 : index
    %314 = vector.load %arg6[%c56_145, %c0_146] : memref<64x512xf32, #tpu.memory_space<vmem>>, vector<8x512xf32>
    tpu.vector_store %arg6[%c56_145, %c0_146], %313 {strides = array<i32>} : memref<64x512xf32, #tpu.memory_space<vmem>>, vector<8x512xf32>,
    %cst_147 = arith.constant 0.000000e+00 : f32
    %315 = vector.broadcast %cst_147 : f32 to vector<8x128xf32>
    %cst_148 = arith.constant 0.000000e+00 : f32
    %316 = vector.broadcast %cst_148 : f32 to vector<8x128xf32>
    %c0_149 = arith.constant 0 : index
    %c0_150 = arith.constant 0 : index
    %317 = vector.load %arg6[%c0_149, %c0_150] : memref<64x512xf32, #tpu.memory_space<vmem>>, vector<8x512xf32>
    %c1_151 = arith.constant 1 : index
    %c0_152 = arith.constant 0 : index
    %c0_153 = arith.constant 0 : index
    %318 = vector.load %arg2[%c1_151, %c0_152, %c0_153] : memref<2x128x512xf32, #tpu.memory_space<vmem>>, vector<1x128x512xf32>
    %319 = vector.shape_cast %318 : vector<1x128x512xf32> to vector<128x512xf32>
    %cst_154 = arith.constant dense<0.000000e+00> : vector<8x512xf32>
    %320 = tpu.matmul %315, %319, %cst_154 {dimension_numbers = #tpu.dot_dimension_numbers<[1], [0], [0], [1], [0, 0, 1, 1], [], []>} : vector<8x128xf32>, vector<128x512xf32>, vector<8x512xf32> -> vector<8x512xf32>
    %321 = arith.addf %317, %320 : vector<8x512xf32>
    %322 = vector.extract_strided_slice %321 {offsets = [0, 0], sizes = [8, 128], strides = [1, 1]} : vector<8x512xf32> to vector<8x128xf32>
    %323 = arith.negf %322 : vector<8x128xf32>
    %324 = math.exp %323 : vector<8x128xf32>
    %cst_155 = arith.constant 1.000000e+00 : f32
    %325 = vector.broadcast %cst_155 : f32 to vector<8x128xf32>
    %326 = arith.addf %325, %324 : vector<8x128xf32>
    %327 = arith.divf %325, %326 : vector<8x128xf32>
    %328 = vector.extract_strided_slice %321 {offsets = [0, 128], sizes = [8, 128], strides = [1, 1]} : vector<8x512xf32> to vector<8x128xf32>
    %329 = arith.negf %328 : vector<8x128xf32>
    %330 = math.exp %329 : vector<8x128xf32>
    %cst_156 = arith.constant 1.000000e+00 : f32
    %331 = vector.broadcast %cst_156 : f32 to vector<8x128xf32>
    %332 = arith.addf %331, %330 : vector<8x128xf32>
    %333 = arith.divf %331, %332 : vector<8x128xf32>
    %334 = vector.extract_strided_slice %321 {offsets = [0, 256], sizes = [8, 128], strides = [1, 1]} : vector<8x512xf32> to vector<8x128xf32>
    %335 = math.tanh %334 : vector<8x128xf32>
    %336 = vector.extract_strided_slice %321 {offsets = [0, 384], sizes = [8, 128], strides = [1, 1]} : vector<8x512xf32> to vector<8x128xf32>
    %337 = arith.negf %336 : vector<8x128xf32>
    %338 = math.exp %337 : vector<8x128xf32>
    %cst_157 = arith.constant 1.000000e+00 : f32
    %339 = vector.broadcast %cst_157 : f32 to vector<8x128xf32>
    %340 = arith.addf %339, %338 : vector<8x128xf32>
    %341 = arith.divf %339, %340 : vector<8x128xf32>
    %342 = arith.mulf %333, %316 : vector<8x128xf32>
    %343 = arith.mulf %327, %335 : vector<8x128xf32>
    %344 = arith.addf %342, %343 : vector<8x128xf32>
    %345 = math.tanh %344 : vector<8x128xf32>
    %346 = arith.mulf %341, %345 : vector<8x128xf32>
    %c8_158 = arith.constant 8 : index
    %c0_159 = arith.constant 0 : index
    %347 = vector.load %arg6[%c8_158, %c0_159] : memref<64x512xf32, #tpu.memory_space<vmem>>, vector<8x512xf32>
    %c1_160 = arith.constant 1 : index
    %c0_161 = arith.constant 0 : index
    %c0_162 = arith.constant 0 : index
    %348 = vector.load %arg2[%c1_160, %c0_161, %c0_162] : memref<2x128x512xf32, #tpu.memory_space<vmem>>, vector<1x128x512xf32>
    %349 = vector.shape_cast %348 : vector<1x128x512xf32> to vector<128x512xf32>
    %cst_163 = arith.constant dense<0.000000e+00> : vector<8x512xf32>
    %350 = tpu.matmul %346, %349, %cst_163 {dimension_numbers = #tpu.dot_dimension_numbers<[1], [0], [0], [1], [0, 0, 1, 1], [], []>} : vector<8x128xf32>, vector<128x512xf32>, vector<8x512xf32> -> vector<8x512xf32>
    %351 = arith.addf %347, %350 : vector<8x512xf32>
    %352 = vector.extract_strided_slice %351 {offsets = [0, 0], sizes = [8, 128], strides = [1, 1]} : vector<8x512xf32> to vector<8x128xf32>
    %353 = arith.negf %352 : vector<8x128xf32>
    %354 = math.exp %353 : vector<8x128xf32>
    %cst_164 = arith.constant 1.000000e+00 : f32
    %355 = vector.broadcast %cst_164 : f32 to vector<8x128xf32>
    %356 = arith.addf %355, %354 : vector<8x128xf32>
    %357 = arith.divf %355, %356 : vector<8x128xf32>
    %358 = vector.extract_strided_slice %351 {offsets = [0, 128], sizes = [8, 128], strides = [1, 1]} : vector<8x512xf32> to vector<8x128xf32>
    %359 = arith.negf %358 : vector<8x128xf32>
    %360 = math.exp %359 : vector<8x128xf32>
    %cst_165 = arith.constant 1.000000e+00 : f32
    %361 = vector.broadcast %cst_165 : f32 to vector<8x128xf32>
    %362 = arith.addf %361, %360 : vector<8x128xf32>
    %363 = arith.divf %361, %362 : vector<8x128xf32>
    %364 = vector.extract_strided_slice %351 {offsets = [0, 256], sizes = [8, 128], strides = [1, 1]} : vector<8x512xf32> to vector<8x128xf32>
    %365 = math.tanh %364 : vector<8x128xf32>
    %366 = vector.extract_strided_slice %351 {offsets = [0, 384], sizes = [8, 128], strides = [1, 1]} : vector<8x512xf32> to vector<8x128xf32>
    %367 = arith.negf %366 : vector<8x128xf32>
    %368 = math.exp %367 : vector<8x128xf32>
    %cst_166 = arith.constant 1.000000e+00 : f32
    %369 = vector.broadcast %cst_166 : f32 to vector<8x128xf32>
    %370 = arith.addf %369, %368 : vector<8x128xf32>
    %371 = arith.divf %369, %370 : vector<8x128xf32>
    %372 = arith.mulf %363, %344 : vector<8x128xf32>
    %373 = arith.mulf %357, %365 : vector<8x128xf32>
    %374 = arith.addf %372, %373 : vector<8x128xf32>
    %375 = math.tanh %374 : vector<8x128xf32>
    %376 = arith.mulf %371, %375 : vector<8x128xf32>
    %c16_167 = arith.constant 16 : index
    %c0_168 = arith.constant 0 : index
    %377 = vector.load %arg6[%c16_167, %c0_168] : memref<64x512xf32, #tpu.memory_space<vmem>>, vector<8x512xf32>
    %c1_169 = arith.constant 1 : index
    %c0_170 = arith.constant 0 : index
    %c0_171 = arith.constant 0 : index
    %378 = vector.load %arg2[%c1_169, %c0_170, %c0_171] : memref<2x128x512xf32, #tpu.memory_space<vmem>>, vector<1x128x512xf32>
    %379 = vector.shape_cast %378 : vector<1x128x512xf32> to vector<128x512xf32>
    %cst_172 = arith.constant dense<0.000000e+00> : vector<8x512xf32>
    %380 = tpu.matmul %376, %379, %cst_172 {dimension_numbers = #tpu.dot_dimension_numbers<[1], [0], [0], [1], [0, 0, 1, 1], [], []>} : vector<8x128xf32>, vector<128x512xf32>, vector<8x512xf32> -> vector<8x512xf32>
    %381 = arith.addf %377, %380 : vector<8x512xf32>
    %382 = vector.extract_strided_slice %381 {offsets = [0, 0], sizes = [8, 128], strides = [1, 1]} : vector<8x512xf32> to vector<8x128xf32>
    %383 = arith.negf %382 : vector<8x128xf32>
    %384 = math.exp %383 : vector<8x128xf32>
    %cst_173 = arith.constant 1.000000e+00 : f32
    %385 = vector.broadcast %cst_173 : f32 to vector<8x128xf32>
    %386 = arith.addf %385, %384 : vector<8x128xf32>
    %387 = arith.divf %385, %386 : vector<8x128xf32>
    %388 = vector.extract_strided_slice %381 {offsets = [0, 128], sizes = [8, 128], strides = [1, 1]} : vector<8x512xf32> to vector<8x128xf32>
    %389 = arith.negf %388 : vector<8x128xf32>
    %390 = math.exp %389 : vector<8x128xf32>
    %cst_174 = arith.constant 1.000000e+00 : f32
    %391 = vector.broadcast %cst_174 : f32 to vector<8x128xf32>
    %392 = arith.addf %391, %390 : vector<8x128xf32>
    %393 = arith.divf %391, %392 : vector<8x128xf32>
    %394 = vector.extract_strided_slice %381 {offsets = [0, 256], sizes = [8, 128], strides = [1, 1]} : vector<8x512xf32> to vector<8x128xf32>
    %395 = math.tanh %394 : vector<8x128xf32>
    %396 = vector.extract_strided_slice %381 {offsets = [0, 384], sizes = [8, 128], strides = [1, 1]} : vector<8x512xf32> to vector<8x128xf32>
    %397 = arith.negf %396 : vector<8x128xf32>
    %398 = math.exp %397 : vector<8x128xf32>
    %cst_175 = arith.constant 1.000000e+00 : f32
    %399 = vector.broadcast %cst_175 : f32 to vector<8x128xf32>
    %400 = arith.addf %399, %398 : vector<8x128xf32>
    %401 = arith.divf %399, %400 : vector<8x128xf32>
    %402 = arith.mulf %393, %374 : vector<8x128xf32>
    %403 = arith.mulf %387, %395 : vector<8x128xf32>
    %404 = arith.addf %402, %403 : vector<8x128xf32>
    %405 = math.tanh %404 : vector<8x128xf32>
    %406 = arith.mulf %401, %405 : vector<8x128xf32>
    %c24_176 = arith.constant 24 : index
    %c0_177 = arith.constant 0 : index
    %407 = vector.load %arg6[%c24_176, %c0_177] : memref<64x512xf32, #tpu.memory_space<vmem>>, vector<8x512xf32>
    %c1_178 = arith.constant 1 : index
    %c0_179 = arith.constant 0 : index
    %c0_180 = arith.constant 0 : index
    %408 = vector.load %arg2[%c1_178, %c0_179, %c0_180] : memref<2x128x512xf32, #tpu.memory_space<vmem>>, vector<1x128x512xf32>
    %409 = vector.shape_cast %408 : vector<1x128x512xf32> to vector<128x512xf32>
    %cst_181 = arith.constant dense<0.000000e+00> : vector<8x512xf32>
    %410 = tpu.matmul %406, %409, %cst_181 {dimension_numbers = #tpu.dot_dimension_numbers<[1], [0], [0], [1], [0, 0, 1, 1], [], []>} : vector<8x128xf32>, vector<128x512xf32>, vector<8x512xf32> -> vector<8x512xf32>
    %411 = arith.addf %407, %410 : vector<8x512xf32>
    %412 = vector.extract_strided_slice %411 {offsets = [0, 0], sizes = [8, 128], strides = [1, 1]} : vector<8x512xf32> to vector<8x128xf32>
    %413 = arith.negf %412 : vector<8x128xf32>
    %414 = math.exp %413 : vector<8x128xf32>
    %cst_182 = arith.constant 1.000000e+00 : f32
    %415 = vector.broadcast %cst_182 : f32 to vector<8x128xf32>
    %416 = arith.addf %415, %414 : vector<8x128xf32>
    %417 = arith.divf %415, %416 : vector<8x128xf32>
    %418 = vector.extract_strided_slice %411 {offsets = [0, 128], sizes = [8, 128], strides = [1, 1]} : vector<8x512xf32> to vector<8x128xf32>
    %419 = arith.negf %418 : vector<8x128xf32>
    %420 = math.exp %419 : vector<8x128xf32>
    %cst_183 = arith.constant 1.000000e+00 : f32
    %421 = vector.broadcast %cst_183 : f32 to vector<8x128xf32>
    %422 = arith.addf %421, %420 : vector<8x128xf32>
    %423 = arith.divf %421, %422 : vector<8x128xf32>
    %424 = vector.extract_strided_slice %411 {offsets = [0, 256], sizes = [8, 128], strides = [1, 1]} : vector<8x512xf32> to vector<8x128xf32>
    %425 = math.tanh %424 : vector<8x128xf32>
    %426 = vector.extract_strided_slice %411 {offsets = [0, 384], sizes = [8, 128], strides = [1, 1]} : vector<8x512xf32> to vector<8x128xf32>
    %427 = arith.negf %426 : vector<8x128xf32>
    %428 = math.exp %427 : vector<8x128xf32>
    %cst_184 = arith.constant 1.000000e+00 : f32
    %429 = vector.broadcast %cst_184 : f32 to vector<8x128xf32>
    %430 = arith.addf %429, %428 : vector<8x128xf32>
    %431 = arith.divf %429, %430 : vector<8x128xf32>
    %432 = arith.mulf %423, %404 : vector<8x128xf32>
    %433 = arith.mulf %417, %425 : vector<8x128xf32>
    %434 = arith.addf %432, %433 : vector<8x128xf32>
    %435 = math.tanh %434 : vector<8x128xf32>
    %436 = arith.mulf %431, %435 : vector<8x128xf32>
    %c32_185 = arith.constant 32 : index
    %c0_186 = arith.constant 0 : index
    %437 = vector.load %arg6[%c32_185, %c0_186] : memref<64x512xf32, #tpu.memory_space<vmem>>, vector<8x512xf32>
    %c1_187 = arith.constant 1 : index
    %c0_188 = arith.constant 0 : index
    %c0_189 = arith.constant 0 : index
    %438 = vector.load %arg2[%c1_187, %c0_188, %c0_189] : memref<2x128x512xf32, #tpu.memory_space<vmem>>, vector<1x128x512xf32>
    %439 = vector.shape_cast %438 : vector<1x128x512xf32> to vector<128x512xf32>
    %cst_190 = arith.constant dense<0.000000e+00> : vector<8x512xf32>
    %440 = tpu.matmul %436, %439, %cst_190 {dimension_numbers = #tpu.dot_dimension_numbers<[1], [0], [0], [1], [0, 0, 1, 1], [], []>} : vector<8x128xf32>, vector<128x512xf32>, vector<8x512xf32> -> vector<8x512xf32>
    %441 = arith.addf %437, %440 : vector<8x512xf32>
    %442 = vector.extract_strided_slice %441 {offsets = [0, 0], sizes = [8, 128], strides = [1, 1]} : vector<8x512xf32> to vector<8x128xf32>
    %443 = arith.negf %442 : vector<8x128xf32>
    %444 = math.exp %443 : vector<8x128xf32>
    %cst_191 = arith.constant 1.000000e+00 : f32
    %445 = vector.broadcast %cst_191 : f32 to vector<8x128xf32>
    %446 = arith.addf %445, %444 : vector<8x128xf32>
    %447 = arith.divf %445, %446 : vector<8x128xf32>
    %448 = vector.extract_strided_slice %441 {offsets = [0, 128], sizes = [8, 128], strides = [1, 1]} : vector<8x512xf32> to vector<8x128xf32>
    %449 = arith.negf %448 : vector<8x128xf32>
    %450 = math.exp %449 : vector<8x128xf32>
    %cst_192 = arith.constant 1.000000e+00 : f32
    %451 = vector.broadcast %cst_192 : f32 to vector<8x128xf32>
    %452 = arith.addf %451, %450 : vector<8x128xf32>
    %453 = arith.divf %451, %452 : vector<8x128xf32>
    %454 = vector.extract_strided_slice %441 {offsets = [0, 256], sizes = [8, 128], strides = [1, 1]} : vector<8x512xf32> to vector<8x128xf32>
    %455 = math.tanh %454 : vector<8x128xf32>
    %456 = vector.extract_strided_slice %441 {offsets = [0, 384], sizes = [8, 128], strides = [1, 1]} : vector<8x512xf32> to vector<8x128xf32>
    %457 = arith.negf %456 : vector<8x128xf32>
    %458 = math.exp %457 : vector<8x128xf32>
    %cst_193 = arith.constant 1.000000e+00 : f32
    %459 = vector.broadcast %cst_193 : f32 to vector<8x128xf32>
    %460 = arith.addf %459, %458 : vector<8x128xf32>
    %461 = arith.divf %459, %460 : vector<8x128xf32>
    %462 = arith.mulf %453, %434 : vector<8x128xf32>
    %463 = arith.mulf %447, %455 : vector<8x128xf32>
    %464 = arith.addf %462, %463 : vector<8x128xf32>
    %465 = math.tanh %464 : vector<8x128xf32>
    %466 = arith.mulf %461, %465 : vector<8x128xf32>
    %c40_194 = arith.constant 40 : index
    %c0_195 = arith.constant 0 : index
    %467 = vector.load %arg6[%c40_194, %c0_195] : memref<64x512xf32, #tpu.memory_space<vmem>>, vector<8x512xf32>
    %c1_196 = arith.constant 1 : index
    %c0_197 = arith.constant 0 : index
    %c0_198 = arith.constant 0 : index
    %468 = vector.load %arg2[%c1_196, %c0_197, %c0_198] : memref<2x128x512xf32, #tpu.memory_space<vmem>>, vector<1x128x512xf32>
    %469 = vector.shape_cast %468 : vector<1x128x512xf32> to vector<128x512xf32>
    %cst_199 = arith.constant dense<0.000000e+00> : vector<8x512xf32>
    %470 = tpu.matmul %466, %469, %cst_199 {dimension_numbers = #tpu.dot_dimension_numbers<[1], [0], [0], [1], [0, 0, 1, 1], [], []>} : vector<8x128xf32>, vector<128x512xf32>, vector<8x512xf32> -> vector<8x512xf32>
    %471 = arith.addf %467, %470 : vector<8x512xf32>
    %472 = vector.extract_strided_slice %471 {offsets = [0, 0], sizes = [8, 128], strides = [1, 1]} : vector<8x512xf32> to vector<8x128xf32>
    %473 = arith.negf %472 : vector<8x128xf32>
    %474 = math.exp %473 : vector<8x128xf32>
    %cst_200 = arith.constant 1.000000e+00 : f32
    %475 = vector.broadcast %cst_200 : f32 to vector<8x128xf32>
    %476 = arith.addf %475, %474 : vector<8x128xf32>
    %477 = arith.divf %475, %476 : vector<8x128xf32>
    %478 = vector.extract_strided_slice %471 {offsets = [0, 128], sizes = [8, 128], strides = [1, 1]} : vector<8x512xf32> to vector<8x128xf32>
    %479 = arith.negf %478 : vector<8x128xf32>
    %480 = math.exp %479 : vector<8x128xf32>
    %cst_201 = arith.constant 1.000000e+00 : f32
    %481 = vector.broadcast %cst_201 : f32 to vector<8x128xf32>
    %482 = arith.addf %481, %480 : vector<8x128xf32>
    %483 = arith.divf %481, %482 : vector<8x128xf32>
    %484 = vector.extract_strided_slice %471 {offsets = [0, 256], sizes = [8, 128], strides = [1, 1]} : vector<8x512xf32> to vector<8x128xf32>
    %485 = math.tanh %484 : vector<8x128xf32>
    %486 = vector.extract_strided_slice %471 {offsets = [0, 384], sizes = [8, 128], strides = [1, 1]} : vector<8x512xf32> to vector<8x128xf32>
    %487 = arith.negf %486 : vector<8x128xf32>
    %488 = math.exp %487 : vector<8x128xf32>
    %cst_202 = arith.constant 1.000000e+00 : f32
    %489 = vector.broadcast %cst_202 : f32 to vector<8x128xf32>
    %490 = arith.addf %489, %488 : vector<8x128xf32>
    %491 = arith.divf %489, %490 : vector<8x128xf32>
    %492 = arith.mulf %483, %464 : vector<8x128xf32>
    %493 = arith.mulf %477, %485 : vector<8x128xf32>
    %494 = arith.addf %492, %493 : vector<8x128xf32>
    %495 = math.tanh %494 : vector<8x128xf32>
    %496 = arith.mulf %491, %495 : vector<8x128xf32>
    %c48_203 = arith.constant 48 : index
    %c0_204 = arith.constant 0 : index
    %497 = vector.load %arg6[%c48_203, %c0_204] : memref<64x512xf32, #tpu.memory_space<vmem>>, vector<8x512xf32>
    %c1_205 = arith.constant 1 : index
    %c0_206 = arith.constant 0 : index
    %c0_207 = arith.constant 0 : index
    %498 = vector.load %arg2[%c1_205, %c0_206, %c0_207] : memref<2x128x512xf32, #tpu.memory_space<vmem>>, vector<1x128x512xf32>
    %499 = vector.shape_cast %498 : vector<1x128x512xf32> to vector<128x512xf32>
    %cst_208 = arith.constant dense<0.000000e+00> : vector<8x512xf32>
    %500 = tpu.matmul %496, %499, %cst_208 {dimension_numbers = #tpu.dot_dimension_numbers<[1], [0], [0], [1], [0, 0, 1, 1], [], []>} : vector<8x128xf32>, vector<128x512xf32>, vector<8x512xf32> -> vector<8x512xf32>
    %501 = arith.addf %497, %500 : vector<8x512xf32>
    %502 = vector.extract_strided_slice %501 {offsets = [0, 0], sizes = [8, 128], strides = [1, 1]} : vector<8x512xf32> to vector<8x128xf32>
    %503 = arith.negf %502 : vector<8x128xf32>
    %504 = math.exp %503 : vector<8x128xf32>
    %cst_209 = arith.constant 1.000000e+00 : f32
    %505 = vector.broadcast %cst_209 : f32 to vector<8x128xf32>
    %506 = arith.addf %505, %504 : vector<8x128xf32>
    %507 = arith.divf %505, %506 : vector<8x128xf32>
    %508 = vector.extract_strided_slice %501 {offsets = [0, 128], sizes = [8, 128], strides = [1, 1]} : vector<8x512xf32> to vector<8x128xf32>
    %509 = arith.negf %508 : vector<8x128xf32>
    %510 = math.exp %509 : vector<8x128xf32>
    %cst_210 = arith.constant 1.000000e+00 : f32
    %511 = vector.broadcast %cst_210 : f32 to vector<8x128xf32>
    %512 = arith.addf %511, %510 : vector<8x128xf32>
    %513 = arith.divf %511, %512 : vector<8x128xf32>
    %514 = vector.extract_strided_slice %501 {offsets = [0, 256], sizes = [8, 128], strides = [1, 1]} : vector<8x512xf32> to vector<8x128xf32>
    %515 = math.tanh %514 : vector<8x128xf32>
    %516 = vector.extract_strided_slice %501 {offsets = [0, 384], sizes = [8, 128], strides = [1, 1]} : vector<8x512xf32> to vector<8x128xf32>
    %517 = arith.negf %516 : vector<8x128xf32>
    %518 = math.exp %517 : vector<8x128xf32>
    %cst_211 = arith.constant 1.000000e+00 : f32
    %519 = vector.broadcast %cst_211 : f32 to vector<8x128xf32>
    %520 = arith.addf %519, %518 : vector<8x128xf32>
    %521 = arith.divf %519, %520 : vector<8x128xf32>
    %522 = arith.mulf %513, %494 : vector<8x128xf32>
    %523 = arith.mulf %507, %515 : vector<8x128xf32>
    %524 = arith.addf %522, %523 : vector<8x128xf32>
    %525 = math.tanh %524 : vector<8x128xf32>
    %526 = arith.mulf %521, %525 : vector<8x128xf32>
    %c56_212 = arith.constant 56 : index
    %c0_213 = arith.constant 0 : index
    %527 = vector.load %arg6[%c56_212, %c0_213] : memref<64x512xf32, #tpu.memory_space<vmem>>, vector<8x512xf32>
    %c1_214 = arith.constant 1 : index
    %c0_215 = arith.constant 0 : index
    %c0_216 = arith.constant 0 : index
    %528 = vector.load %arg2[%c1_214, %c0_215, %c0_216] : memref<2x128x512xf32, #tpu.memory_space<vmem>>, vector<1x128x512xf32>
    %529 = vector.shape_cast %528 : vector<1x128x512xf32> to vector<128x512xf32>
    %cst_217 = arith.constant dense<0.000000e+00> : vector<8x512xf32>
    %530 = tpu.matmul %526, %529, %cst_217 {dimension_numbers = #tpu.dot_dimension_numbers<[1], [0], [0], [1], [0, 0, 1, 1], [], []>} : vector<8x128xf32>, vector<128x512xf32>, vector<8x512xf32> -> vector<8x512xf32>
    %531 = arith.addf %527, %530 : vector<8x512xf32>
    %532 = vector.extract_strided_slice %531 {offsets = [0, 0], sizes = [8, 128], strides = [1, 1]} : vector<8x512xf32> to vector<8x128xf32>
    %533 = arith.negf %532 : vector<8x128xf32>
    %534 = math.exp %533 : vector<8x128xf32>
    %cst_218 = arith.constant 1.000000e+00 : f32
    %535 = vector.broadcast %cst_218 : f32 to vector<8x128xf32>
    %536 = arith.addf %535, %534 : vector<8x128xf32>
    %537 = arith.divf %535, %536 : vector<8x128xf32>
    %538 = vector.extract_strided_slice %531 {offsets = [0, 128], sizes = [8, 128], strides = [1, 1]} : vector<8x512xf32> to vector<8x128xf32>
    %539 = arith.negf %538 : vector<8x128xf32>
    %540 = math.exp %539 : vector<8x128xf32>
    %cst_219 = arith.constant 1.000000e+00 : f32
    %541 = vector.broadcast %cst_219 : f32 to vector<8x128xf32>
    %542 = arith.addf %541, %540 : vector<8x128xf32>
    %543 = arith.divf %541, %542 : vector<8x128xf32>
    %544 = vector.extract_strided_slice %531 {offsets = [0, 256], sizes = [8, 128], strides = [1, 1]} : vector<8x512xf32> to vector<8x128xf32>
    %545 = math.tanh %544 : vector<8x128xf32>
    %546 = vector.extract_strided_slice %531 {offsets = [0, 384], sizes = [8, 128], strides = [1, 1]} : vector<8x512xf32> to vector<8x128xf32>
    %547 = arith.negf %546 : vector<8x128xf32>
    %548 = math.exp %547 : vector<8x128xf32>
    %cst_220 = arith.constant 1.000000e+00 : f32
    %549 = vector.broadcast %cst_220 : f32 to vector<8x128xf32>
    %550 = arith.addf %549, %548 : vector<8x128xf32>
    %551 = arith.divf %549, %550 : vector<8x128xf32>
    %552 = arith.mulf %543, %524 : vector<8x128xf32>
    %553 = arith.mulf %537, %545 : vector<8x128xf32>
    %554 = arith.addf %552, %553 : vector<8x128xf32>
    %555 = math.tanh %554 : vector<8x128xf32>
    %556 = arith.mulf %551, %555 : vector<8x128xf32>
    %c0_221 = arith.constant 0 : index
    %c0_222 = arith.constant 0 : index
    %557 = vector.load %arg4[%c0_221, %c0_222] : memref<8x128xf32, #tpu.memory_space<vmem>>, vector<8x128xf32>
    tpu.vector_store %arg4[%c0_221, %c0_222], %556 {strides = array<i32>} : memref<8x128xf32, #tpu.memory_space<vmem>>, vector<8x128xf32>,
    return
  }
}

</mosaic_0001>

<bundles_post_ra>
// kernel: lstm_model_forward.1
= control target key start
LH: loop header
LB: loop body
LE: loop exit
PB: predicated region body
PF: predicated region fallthrough
CT: control target
= control target key end

     0   :  { %s10885_s1 = inlined_call_operand.vmem [shape: f32[2,128,512], index: 1, kind: input, shape index: {}]   ;;  %s10886_s0 = inlined_call_operand.vmem [shape: f32[64,128], index: 0, kind: input, shape index: {}]   ;;  %s10887_s2 = inlined_call_operand.vmem [shape: f32[2,128,512], index: 2, kind: input, shape index: {}]   ;;  %s10888_s3 = inlined_call_operand.vmem [shape: f32[2,1,512], index: 3, kind: input, shape index: {}]   ;;  %s10889_s4 = inlined_call_operand.vmem [shape: f32[8,128], index: 4, kind: output, shape index: {}]  }
   0x1   :  { %v85_v0 = vld [vmem:[%s10885_s1 + $0x1e0] sm:$0xff]  ;;  %v86_v1 = vld [vmem:[%s10885_s1 + $0x1e8] sm:$0xff]  ;;  %v87_v2 = vld [vmem:[%s10885_s1 + $0x1f0] sm:$0xff] }
   0x2   :  { %99 = vmatpush.msra.mxu0 %v85_v0  ;;  %140 = vmatpush.msra.mxu1 %v86_v1  ;;  %v88_v3 = vld [vmem:[%s10885_s1 + $0x1f8] sm:$0xff]  ;;  %v81_v4 = vld [vmem:[%s10885_s1 + $0x1c0] sm:$0xff]  ;;  %v82_v5 = vld [vmem:[%s10885_s1 + $0x1c8] sm:$0xff] }
   0x3   :  { %181 = vmatpush.msra.mxu2 %v87_v2  ;;  %222 = vmatpush.msra.mxu3 %v88_v3  ;;  %v83_v6 = vld [vmem:[%s10885_s1 + $0x1d0] sm:$0xff]  ;;  %v84_v7 = vld [vmem:[%s10885_s1 + $0x1d8] sm:$0xff]  ;;  %v77_v8 = vld [vmem:[%s10885_s1 + $0x1a0] sm:$0xff] }
   0x4   :  { %100 = vmatpush.msra.mxu0 %v81_v4  ;;  %141 = vmatpush.msra.mxu1 %v82_v5  ;;  %v78_v9 = vld [vmem:[%s10885_s1 + $0x1a8] sm:$0xff]  ;;  %v79_v10 = vld [vmem:[%s10885_s1 + $0x1b0] sm:$0xff]  ;;  %v80_v11 = vld [vmem:[%s10885_s1 + $0x1b8] sm:$0xff] }
   0x5   :  { %182 = vmatpush.msra.mxu2 %v83_v6  ;;  %223 = vmatpush.msra.mxu3 %v84_v7  ;;  %v73_v12 = vld [vmem:[%s10885_s1 + $0x180] sm:$0xff]  ;;  %v74_v13 = vld [vmem:[%s10885_s1 + $0x188] sm:$0xff]  ;;  %v75_v14 = vld [vmem:[%s10885_s1 + $0x190] sm:$0xff] }
   0x6   :  { %101 = vmatpush.msra.mxu0 %v77_v8  ;;  %142 = vmatpush.msra.mxu1 %v78_v9  ;;  %v76_v15 = vld [vmem:[%s10885_s1 + $0x198] sm:$0xff]  ;;  %v69_v16 = vld [vmem:[%s10885_s1 + $0x160] sm:$0xff]  ;;  %v70_v17 = vld [vmem:[%s10885_s1 + $0x168] sm:$0xff] }
   0x7   :  { %183 = vmatpush.msra.mxu2 %v79_v10  ;;  %224 = vmatpush.msra.mxu3 %v80_v11  ;;  %v71_v18 = vld [vmem:[%s10885_s1 + $0x170] sm:$0xff]  ;;  %v72_v19 = vld [vmem:[%s10885_s1 + $0x178] sm:$0xff]  ;;  %v65_v20 = vld [vmem:[%s10885_s1 + $0x140] sm:$0xff] }
   0x8   :  { %102 = vmatpush.msra.mxu0 %v73_v12  ;;  %143 = vmatpush.msra.mxu1 %v74_v13  ;;  %v66_v21 = vld [vmem:[%s10885_s1 + $0x148] sm:$0xff]  ;;  %v67_v22 = vld [vmem:[%s10885_s1 + $0x150] sm:$0xff]  ;;  %v68_v23 = vld [vmem:[%s10885_s1 + $0x158] sm:$0xff] }
   0x9   :  { %184 = vmatpush.msra.mxu2 %v75_v14  ;;  %225 = vmatpush.msra.mxu3 %v76_v15  ;;  %v61_v24 = vld [vmem:[%s10885_s1 + $0x120] sm:$0xff]  ;;  %v62_v25 = vld [vmem:[%s10885_s1 + $0x128] sm:$0xff]  ;;  %v63_v26 = vld [vmem:[%s10885_s1 + $0x130] sm:$0xff] }
   0xa   :  { %103 = vmatpush.msra.mxu0 %v69_v16  ;;  %144 = vmatpush.msra.mxu1 %v70_v17  ;;  %v64_v27 = vld [vmem:[%s10885_s1 + $0x138] sm:$0xff]  ;;  %v57_v28 = vld [vmem:[%s10885_s1 + $0x100] sm:$0xff]  ;;  %v58_v29 = vld [vmem:[%s10885_s1 + $0x108] sm:$0xff] }
   0xb   :  { %185 = vmatpush.msra.mxu2 %v71_v18  ;;  %226 = vmatpush.msra.mxu3 %v72_v19  ;;  %v59_v30 = vld [vmem:[%s10885_s1 + $0x110] sm:$0xff]  ;;  %v60_v31 = vld [vmem:[%s10885_s1 + $0x118] sm:$0xff]  ;;  %v53_v32 = vld [vmem:[%s10885_s1 + $0xe0] sm:$0xff] }
   0xc   :  { %104 = vmatpush.msra.mxu0 %v65_v20  ;;  %145 = vmatpush.msra.mxu1 %v66_v21  ;;  %v54_v33 = vld [vmem:[%s10885_s1 + $0xe8] sm:$0xff]  ;;  %v55_v34 = vld [vmem:[%s10885_s1 + $0xf0] sm:$0xff]  ;;  %v56_v35 = vld [vmem:[%s10885_s1 + $0xf8] sm:$0xff] }
   0xd   :  { %186 = vmatpush.msra.mxu2 %v67_v22  ;;  %227 = vmatpush.msra.mxu3 %v68_v23  ;;  %v49_v36 = vld [vmem:[%s10885_s1 + $0xc0] sm:$0xff]  ;;  %v50_v37 = vld [vmem:[%s10885_s1 + $0xc8] sm:$0xff]  ;;  %v51_v38 = vld [vmem:[%s10885_s1 + $0xd0] sm:$0xff] }
   0xe   :  { %105 = vmatpush.msra.mxu0 %v61_v24  ;;  %146 = vmatpush.msra.mxu1 %v62_v25  ;;  %v52_v39 = vld [vmem:[%s10885_s1 + $0xd8] sm:$0xff]  ;;  %v45_v40 = vld [vmem:[%s10885_s1 + $0xa0] sm:$0xff]  ;;  %v46_v41 = vld [vmem:[%s10885_s1 + $0xa8] sm:$0xff] }
   0xf   :  { %187 = vmatpush.msra.mxu2 %v63_v26  ;;  %228 = vmatpush.msra.mxu3 %v64_v27  ;;  %v47_v42 = vld [vmem:[%s10885_s1 + $0xb0] sm:$0xff]  ;;  %v48_v43 = vld [vmem:[%s10885_s1 + $0xb8] sm:$0xff]  ;;  %v41_v44 = vld [vmem:[%s10885_s1 + $0x80] sm:$0xff] }
  0x10   :  { %106 = vmatpush.msra.mxu0 %v57_v28  ;;  %147 = vmatpush.msra.mxu1 %v58_v29  ;;  %v42_v45 = vld [vmem:[%s10885_s1 + $0x88] sm:$0xff]  ;;  %v43_v46 = vld [vmem:[%s10885_s1 + $0x90] sm:$0xff]  ;;  %v44_v47 = vld [vmem:[%s10885_s1 + $0x98] sm:$0xff] }
  0x11   :  { %188 = vmatpush.msra.mxu2 %v59_v30  ;;  %229 = vmatpush.msra.mxu3 %v60_v31  ;;  %v37_v48 = vld [vmem:[%s10885_s1 + $0x60] sm:$0xff]  ;;  %v38_v49 = vld [vmem:[%s10885_s1 + $0x68] sm:$0xff]  ;;  %v39_v50 = vld [vmem:[%s10885_s1 + $0x70] sm:$0xff] }
  0x12   :  { %107 = vmatpush.msra.mxu0 %v53_v32  ;;  %148 = vmatpush.msra.mxu1 %v54_v33  ;;  %v40_v51 = vld [vmem:[%s10885_s1 + $0x78] sm:$0xff]  ;;  %v33_v52 = vld [vmem:[%s10885_s1 + $0x40] sm:$0xff]  ;;  %v34_v53 = vld [vmem:[%s10885_s1 + $0x48] sm:$0xff] }
  0x13   :  { %189 = vmatpush.msra.mxu2 %v55_v34  ;;  %230 = vmatpush.msra.mxu3 %v56_v35  ;;  %v35_v54 = vld [vmem:[%s10885_s1 + $0x50] sm:$0xff]  ;;  %v36_v55 = vld [vmem:[%s10885_s1 + $0x58] sm:$0xff]  ;;  %v29_v56 = vld [vmem:[%s10885_s1 + $0x20] sm:$0xff] }
  0x14   :  { %108 = vmatpush.msra.mxu0 %v49_v36  ;;  %149 = vmatpush.msra.mxu1 %v50_v37  ;;  %v30_v57 = vld [vmem:[%s10885_s1 + $0x28] sm:$0xff]  ;;  %v31_v58 = vld [vmem:[%s10885_s1 + $0x30] sm:$0xff]  ;;  %v32_v59 = vld [vmem:[%s10885_s1 + $0x38] sm:$0xff] }
  0x15   :  { %190 = vmatpush.msra.mxu2 %v51_v38  ;;  %231 = vmatpush.msra.mxu3 %v52_v39  ;;  %v25_v60 = vld [vmem:[%s10885_s1] sm:$0xff]  ;;  %v26_v61 = vld [vmem:[%s10885_s1 + $0x8] sm:$0xff]  ;;  %v27_v62 = vld [vmem:[%s10885_s1 + $0x10] sm:$0xff] }
  0x16   :  { %109 = vmatpush.msra.mxu0 %v45_v40  ;;  %150 = vmatpush.msra.mxu1 %v46_v41  ;;  %v28_v63 = vld [vmem:[%s10885_s1 + $0x18] sm:$0xff]  ;;  %v17_v0 = vld [vmem:[%s10886_s0] sm:$0xff]  ;;  %v5741_v2 = vld [vmem:[%s10887_s2 + $0x1e8] sm:$0xff] }
  0x17   :  { %191 = vmatpush.msra.mxu2 %v47_v42  ;;  %232 = vmatpush.msra.mxu3 %v48_v43  ;;  %v5736_v1 = vld [vmem:[%s10887_s2 + $0x1e0] sm:$0xff]  ;;  %v5746_v3 = vld [vmem:[%s10887_s2 + $0x1f8] sm:$0xff]  ;;  %v5751_v4 = vld [vmem:[%s10887_s2 + $0x1f0] sm:$0xff] }
  0x18   :  { %110 = vmatpush.msra.mxu0 %v41_v44  ;;  %151 = vmatpush.msra.mxu1 %v42_v45  ;;  %v5756_v5 = vld [vmem:[%s10887_s2 + $0x1c0] sm:$0xff]  ;;  %v5761_v6 = vld [vmem:[%s10887_s2 + $0x1c8] sm:$0xff]  ;;  %v5768_v7 = vld [vmem:[%s10887_s2 + $0x1d8] sm:$0xff] }
  0x19   :  { %192 = vmatpush.msra.mxu2 %v43_v46  ;;  %233 = vmatpush.msra.mxu3 %v44_v47  ;;  %v5773_v8 = vld [vmem:[%s10887_s2 + $0x1d0] sm:$0xff]  ;;  %v5779_v9 = vld [vmem:[%s10887_s2 + $0x1a0] sm:$0xff]  ;;  %v5784_v10 = vld [vmem:[%s10887_s2 + $0x1a8] sm:$0xff] }
  0x1a   :  { %111 = vmatpush.msra.mxu0 %v37_v48  ;;  %152 = vmatpush.msra.mxu1 %v38_v49  ;;  %v5792_v11 = vld [vmem:[%s10887_s2 + $0x1b8] sm:$0xff]  ;;  %v5797_v12 = vld [vmem:[%s10887_s2 + $0x1b0] sm:$0xff]  ;;  %v18_v13 = vld [vmem:[%s10886_s0 + $0x8] sm:$0xff] }
  0x1b   :  { %193 = vmatpush.msra.mxu2 %v39_v50  ;;  %234 = vmatpush.msra.mxu3 %v40_v51  ;;  %v5809_v14 = vld [vmem:[%s10887_s2 + $0x180] sm:$0xff]  ;;  %v5814_v15 = vld [vmem:[%s10887_s2 + $0x188] sm:$0xff]  ;;  %v5821_v16 = vld [vmem:[%s10887_s2 + $0x198] sm:$0xff] }
  0x1c   :  { %112 = vmatpush.msra.mxu0 %v33_v52  ;;  %153 = vmatpush.msra.mxu1 %v34_v53  ;;  %v5826_v17 = vld [vmem:[%s10887_s2 + $0x190] sm:$0xff]  ;;  %v5831_v18 = vld [vmem:[%s10887_s2 + $0x160] sm:$0xff]  ;;  %v5836_v19 = vld [vmem:[%s10887_s2 + $0x168] sm:$0xff] }
  0x1d   :  { %194 = vmatpush.msra.mxu2 %v35_v54  ;;  %235 = vmatpush.msra.mxu3 %v36_v55  ;;  %v5843_v20 = vld [vmem:[%s10887_s2 + $0x178] sm:$0xff]  ;;  %v5848_v21 = vld [vmem:[%s10887_s2 + $0x170] sm:$0xff]  ;;  %v5854_v22 = vld [vmem:[%s10887_s2 + $0x140] sm:$0xff] }
  0x1e   :  { %113 = vmatpush.msra.mxu0 %v29_v56  ;;  %154 = vmatpush.msra.mxu1 %v30_v57  ;;  %v5859_v23 = vld [vmem:[%s10887_s2 + $0x148] sm:$0xff]  ;;  %v5867_v24 = vld [vmem:[%s10887_s2 + $0x158] sm:$0xff]  ;;  %v5872_v25 = vld [vmem:[%s10887_s2 + $0x150] sm:$0xff] }
  0x1f   :  { %195 = vmatpush.msra.mxu2 %v31_v58  ;;  %236 = vmatpush.msra.mxu3 %v32_v59  ;;  %v19_v26 = vld [vmem:[%s10886_s0 + $0x10] sm:$0xff]  ;;  %v5884_v27 = vld [vmem:[%s10887_s2 + $0x120] sm:$0xff]  ;;  %v5889_v28 = vld [vmem:[%s10887_s2 + $0x128] sm:$0xff] }
  0x20   :  { %114 = vmatpush.msra.mxu0 %v25_v60  ;;  %155 = vmatpush.msra.mxu1 %v26_v61  ;;  %v5896_v29 = vld [vmem:[%s10887_s2 + $0x138] sm:$0xff]  ;;  %v5901_v30 = vld [vmem:[%s10887_s2 + $0x130] sm:$0xff]  ;;  %v5906_v31 = vld [vmem:[%s10887_s2 + $0x100] sm:$0xff] }
  0x21   :  { %196 = vmatpush.msra.mxu2 %v27_v62  ;;  %237 = vmatpush.msra.mxu3 %v28_v63  ;;  %v5911_v32 = vld [vmem:[%s10887_s2 + $0x108] sm:$0xff]  ;;  %v5918_v33 = vld [vmem:[%s10887_s2 + $0x118] sm:$0xff]  ;;  %v5923_v34 = vld [vmem:[%s10887_s2 + $0x110] sm:$0xff] }
  0x22   :  { %115 = vmatmul.f32.vlgmr.msra.gmra.mxu0 %v17_v0  ;;  %156 = vmatmul.f32.vlgmr.msra.gmra.mxu1 %v17_v0  ;;  %v5929_v35 = vld [vmem:[%s10887_s2 + $0xe0] sm:$0xff]  ;;  %v5934_v36 = vld [vmem:[%s10887_s2 + $0xe8] sm:$0xff]  ;;  %v5942_v37 = vld [vmem:[%s10887_s2 + $0xf8] sm:$0xff] }
  0x23   :  { %197 = vmatmul.f32.vlgmr.msra.gmra.mxu2 %v17_v0  ;;  %238 = vmatmul.f32.vlgmr.msra.gmra.mxu3 %v17_v0  ;;  %v5947_v38 = vld [vmem:[%s10887_s2 + $0xf0] sm:$0xff]  ;;  %v20_v39 = vld [vmem:[%s10886_s0 + $0x18] sm:$0xff]  ;;  %v5959_v40 = vld [vmem:[%s10887_s2 + $0xc0] sm:$0xff] }
  0x24   :  { %363 = vmatpush.msrb.mxu0 %v5736_v1  ;;  %383 = vmatpush.msrb.mxu1 %v5741_v2  ;;  %v5964_v41 = vld [vmem:[%s10887_s2 + $0xc8] sm:$0xff]  ;;  %v5971_v42 = vld [vmem:[%s10887_s2 + $0xd8] sm:$0xff]  ;;  %v5976_v43 = vld [vmem:[%s10887_s2 + $0xd0] sm:$0xff] }
  0x25   :  { %423 = vmatpush.msrb.mxu3 %v5746_v3  ;;  %403 = vmatpush.msrb.mxu2 %v5751_v4  ;;  %v5981_v44 = vld [vmem:[%s10887_s2 + $0xa0] sm:$0xff]  ;;  %v5986_v45 = vld [vmem:[%s10887_s2 + $0xa8] sm:$0xff]  ;;  %v5993_v46 = vld [vmem:[%s10887_s2 + $0xb8] sm:$0xff] }
  0x26   :  { %364 = vmatpush.msrb.mxu0 %v5756_v5  ;;  %384 = vmatpush.msrb.mxu1 %v5761_v6  ;;  %v5998_v47 = vld [vmem:[%s10887_s2 + $0xb0] sm:$0xff]  ;;  %v6004_v48 = vld [vmem:[%s10887_s2 + $0x80] sm:$0xff]  ;;  %v6009_v49 = vld [vmem:[%s10887_s2 + $0x88] sm:$0xff] }
  0x27   :  { %424 = vmatpush.msrb.mxu3 %v5768_v7  ;;  %404 = vmatpush.msrb.mxu2 %v5773_v8  ;;  %v6017_v50 = vld [vmem:[%s10887_s2 + $0x98] sm:$0xff]  ;;  %v6022_v51 = vld [vmem:[%s10887_s2 + $0x90] sm:$0xff]  ;;  %v21_v52 = vld [vmem:[%s10886_s0 + $0x20] sm:$0xff] }
  0x28   :  { %365 = vmatpush.msrb.mxu0 %v5779_v9  ;;  %385 = vmatpush.msrb.mxu1 %v5784_v10  ;;  %v6034_v53 = vld [vmem:[%s10887_s2 + $0x60] sm:$0xff]  ;;  %v6039_v54 = vld [vmem:[%s10887_s2 + $0x68] sm:$0xff]  ;;  %v6046_v55 = vld [vmem:[%s10887_s2 + $0x78] sm:$0xff] }
  0x29   :  { %425 = vmatpush.msrb.mxu3 %v5792_v11  ;;  %405 = vmatpush.msrb.mxu2 %v5797_v12  ;;  %v6051_v56 = vld [vmem:[%s10887_s2 + $0x70] sm:$0xff]  ;;  %v6056_v57 = vld [vmem:[%s10887_s2 + $0x40] sm:$0xff]  ;;  %v6061_v58 = vld [vmem:[%s10887_s2 + $0x48] sm:$0xff] }
  0x2a   :  { %118 = vmatmul.f32.gmra.mxu0 %v18_v13  ;;  %159 = vmatmul.f32.gmra.mxu1 %v18_v13  ;;  %11309 = vst [vmem:[#allocation4_spill] sm:$0xff] %v6056_v57  ;;  %v6068_v59 = vld [vmem:[%s10887_s2 + $0x58] sm:$0xff]  ;;  %v6073_v60 = vld [vmem:[%s10887_s2 + $0x50] sm:$0xff]  ;;  %v6079_v61 = vld [vmem:[%s10887_s2 + $0x20] sm:$0xff] }
  0x2b   :  { %200 = vmatmul.f32.gmra.mxu2 %v18_v13  ;;  %241 = vmatmul.f32.gmra.mxu3 %v18_v13  ;;  %11310 = vst [vmem:[#allocation5_spill] sm:$0xff] %v6061_v58  ;;  %v6084_v62 = vld [vmem:[%s10887_s2 + $0x28] sm:$0xff]  ;;  %v6092_v63 = vld [vmem:[%s10887_s2 + $0x30] sm:$0xff]  ;;  %v6097_v0 = vld [vmem:[%s10887_s2 + $0x38] sm:$0xff] }
  0x2c   :  { %366 = vmatpush.msrb.mxu0 %v5809_v14  ;;  %386 = vmatpush.msrb.mxu1 %v5814_v15  ;;  %11311 = vst [vmem:[#allocation6_spill] sm:$0xff] %v6068_v59  ;;  %v22_v13 = vld [vmem:[%s10886_s0 + $0x28] sm:$0xff] }
  0x2d   :  { %426 = vmatpush.msrb.mxu3 %v5821_v16  ;;  %406 = vmatpush.msrb.mxu2 %v5826_v17  ;;  %11312 = vst [vmem:[#allocation7_spill] sm:$0xff] %v6073_v60 }
  0x2e   :  { %367 = vmatpush.msrb.mxu0 %v5831_v18  ;;  %387 = vmatpush.msrb.mxu1 %v5836_v19  ;;  %11313 = vst [vmem:[#allocation8_spill] sm:$0xff] %v6079_v61 }
  0x2f   :  { %427 = vmatpush.msrb.mxu3 %v5843_v20  ;;  %407 = vmatpush.msrb.mxu2 %v5848_v21  ;;  %11314 = vst [vmem:[#allocation9_spill] sm:$0xff] %v6084_v62 }
  0x30   :  { %368 = vmatpush.msrb.mxu0 %v5854_v22  ;;  %388 = vmatpush.msrb.mxu1 %v5859_v23  ;;  %11315 = vst [vmem:[#allocation10_spill] sm:$0xff] %v6092_v63 }
  0x31   :  { %428 = vmatpush.msrb.mxu3 %v5867_v24  ;;  %408 = vmatpush.msrb.mxu2 %v5872_v25  ;;  %11316 = vst [vmem:[#allocation11_spill] sm:$0xff] %v6097_v0 }
  0x32   :  { %121 = vmatmul.f32.gmra.mxu0 %v19_v26  ;;  %162 = vmatmul.f32.gmra.mxu1 %v19_v26 }
  0x33   :  { %203 = vmatmul.f32.gmra.mxu2 %v19_v26  ;;  %244 = vmatmul.f32.gmra.mxu3 %v19_v26  ;;  %v6109_v26 = vld [vmem:[%s10887_s2] sm:$0xff] }
  0x34   :  { %369 = vmatpush.msrb.mxu0 %v5884_v27  ;;  %389 = vmatpush.msrb.mxu1 %v5889_v28  ;;  %11317 = vst [vmem:[#allocation12_spill] sm:$0xff] %v6109_v26 }
  0x35   :  { %429 = vmatpush.msrb.mxu3 %v5896_v29  ;;  %409 = vmatpush.msrb.mxu2 %v5901_v30 }
  0x36   :  { %370 = vmatpush.msrb.mxu0 %v5906_v31  ;;  %390 = vmatpush.msrb.mxu1 %v5911_v32 }
  0x37   :  { %430 = vmatpush.msrb.mxu3 %v5918_v33  ;;  %410 = vmatpush.msrb.mxu2 %v5923_v34 }
  0x38   :  { %371 = vmatpush.msrb.mxu0 %v5929_v35  ;;  %391 = vmatpush.msrb.mxu1 %v5934_v36 }
  0x39   :  { %431 = vmatpush.msrb.mxu3 %v5942_v37  ;;  %411 = vmatpush.msrb.mxu2 %v5947_v38 }
  0x3a   :  { %124 = vmatmul.f32.gmra.mxu0 %v20_v39  ;;  %165 = vmatmul.f32.gmra.mxu1 %v20_v39 }
  0x3b   :  { %206 = vmatmul.f32.gmra.mxu2 %v20_v39  ;;  %247 = vmatmul.f32.gmra.mxu3 %v20_v39  ;;  %v6114_v39 = vld [vmem:[%s10887_s2 + $0x8] sm:$0xff] }
  0x3c   :  { %372 = vmatpush.msrb.mxu0 %v5959_v40  ;;  %392 = vmatpush.msrb.mxu1 %v5964_v41  ;;  %11318 = vst [vmem:[#allocation13_spill] sm:$0xff] %v6114_v39 }
  0x3d   :  { %432 = vmatpush.msrb.mxu3 %v5971_v42  ;;  %412 = vmatpush.msrb.mxu2 %v5976_v43 }
  0x3e   :  { %373 = vmatpush.msrb.mxu0 %v5981_v44  ;;  %393 = vmatpush.msrb.mxu1 %v5986_v45 }
  0x3f   :  { %433 = vmatpush.msrb.mxu3 %v5993_v46  ;;  %413 = vmatpush.msrb.mxu2 %v5998_v47 }
  0x40   :  { %374 = vmatpush.msrb.mxu0 %v6004_v48  ;;  %394 = vmatpush.msrb.mxu1 %v6009_v49 }
  0x41   :  { %434 = vmatpush.msrb.mxu3 %v6017_v50  ;;  %414 = vmatpush.msrb.mxu2 %v6022_v51 }
  0x42   :  { %127 = vmatmul.f32.gmra.mxu0 %v21_v52  ;;  %168 = vmatmul.f32.gmra.mxu1 %v21_v52 }
  0x43   :  { %209 = vmatmul.f32.gmra.mxu2 %v21_v52  ;;  %250 = vmatmul.f32.gmra.mxu3 %v21_v52  ;;  %v6121_v52 = vld [vmem:[%s10887_s2 + $0x10] sm:$0xff] }
  0x44   :  { %375 = vmatpush.msrb.mxu0 %v6034_v53  ;;  %395 = vmatpush.msrb.mxu1 %v6039_v54  ;;  %11319 = vst [vmem:[#allocation14_spill] sm:$0xff] %v6121_v52 }
  0x45   :  { %435 = vmatpush.msrb.mxu3 %v6046_v55  ;;  %415 = vmatpush.msrb.mxu2 %v6051_v56 }
  0x46   :  { %376 = vmatpush.msrb.mxu0 %v6056_v57  ;;  %396 = vmatpush.msrb.mxu1 %v6061_v58  ;;  %v6170_v57 = vld [vmem:[%s10885_s1 + $0x3e8] sm:$0xff] }
  0x47   :  { %436 = vmatpush.msrb.mxu3 %v6068_v59  ;;  %416 = vmatpush.msrb.mxu2 %v6073_v60  ;;  %11328 = vst [vmem:[#allocation23_spill] sm:$0xff] %v6170_v57 }
  0x48   :  { %377 = vmatpush.msrb.mxu0 %v6079_v61  ;;  %397 = vmatpush.msrb.mxu1 %v6084_v62  ;;  %v6126_v62 = vld [vmem:[%s10887_s2 + $0x18] sm:$0xff] }
  0x49   :  { %417 = vmatpush.msrb.mxu2 %v6092_v63  ;;  %437 = vmatpush.msrb.mxu3 %v6097_v0  ;;  %11320 = vst [vmem:[#allocation15_spill] sm:$0xff] %v6126_v62  ;;  %v23_v0 = vld [vmem:[%s10886_s0 + $0x30] sm:$0xff] }
  0x4a   :  { %130 = vmatmul.f32.gmra.mxu0 %v22_v13  ;;  %171 = vmatmul.f32.gmra.mxu1 %v22_v13 }
  0x4b   :  { %212 = vmatmul.f32.gmra.mxu2 %v22_v13  ;;  %253 = vmatmul.f32.gmra.mxu3 %v22_v13  ;;  %v24_v13 = vld [vmem:[%s10886_s0 + $0x38] sm:$0xff] }
  0x4c   :  { %378 = vmatpush.msrb.mxu0 %v6109_v26  ;;  %398 = vmatpush.msrb.mxu1 %v6114_v39  ;;  %v10901_v39 = vmov 0.0  }
  0x4d   :  { %418 = vmatpush.msrb.mxu2 %v6121_v52  ;;  %438 = vmatpush.msrb.mxu3 %v6126_v62 }
  0x4e   :  { %606 = vmatpush.msra.mxu1 %v6170_v57  ;;  %v6241_v57 = vld [vmem:[%s10885_s1 + $0x380] sm:$0xff] }
  0x4f   :  { %11343 = vst [vmem:[#allocation38_spill] sm:$0xff] %v6241_v57 }
  0x52   :  { %133 = vmatmul.f32.gmra.mxu0 %v23_v0  ;;  %174 = vmatmul.f32.gmra.mxu1 %v23_v0 }
  0x53   :  { %215 = vmatmul.f32.gmra.mxu2 %v23_v0  ;;  %256 = vmatmul.f32.gmra.mxu3 %v23_v0 }
  0x5a   :  { %136 = vmatmul.f32.gmra.mxu0 %v24_v13  ;;  %177 = vmatmul.f32.gmra.mxu1 %v24_v13 }
  0x5b   :  { %218 = vmatmul.f32.gmra.mxu2 %v24_v13  ;;  %259 = vmatmul.f32.gmra.mxu3 %v24_v13 }
  0x62   :  { %379 = vmatmul.f32.vlgmr.msrb.gmra.mxu0 %v10901_v39  ;;  %399 = vmatmul.f32.vlgmr.msrb.gmra.mxu1 %v10901_v39 }
  0x63   :  { %419 = vmatmul.f32.vlgmr.msrb.gmra.mxu2 %v10901_v39  ;;  %439 = vmatmul.f32.vlgmr.msrb.gmra.mxu3 %v10901_v39  ;;  %v6165_v39 = vld [vmem:[%s10885_s1 + $0x3e0] sm:$0xff] }
  0x64   :  { %11327 = vst [vmem:[#allocation22_spill] sm:$0xff] %v6165_v39  ;;  %586 = vmatpush.msra.mxu0 %v6165_v39  ;;  %v6258_v39 = vld [vmem:[%s10885_s1 + $0x398] sm:$0xff] }
  0x65   :  { %11346 = vst [vmem:[#allocation41_spill] sm:$0xff] %v6258_v39 }
  0x9f   :  { %v6142_v62 = vpop.f32.mrf.mxu0  ;;  %v6144_v0 = vpop.f32.mrf.mxu1 }
  0xa6   :  { %v6146_v52 = vpop.f32.mrf.mxu2  ;;  %v6148_v26 = vpop.f32.mrf.mxu3 }
  0xa7   :  { %v6150_v63 = vpop.f32.mrf.mxu0  ;;  %v6152_v13 = vpop.f32.mrf.mxu1 }
  0xa8   :  { %11321 = vst [vmem:[#allocation16_spill] sm:$0xff] %v6150_v63 }
  0xa9   :  { %11322 = vst [vmem:[#allocation17_spill] sm:$0xff] %v6152_v13 }
  0xae   :  { %v6154_v61 = vpop.f32.mrf.mxu2  ;;  %v6156_v59 = vpop.f32.mrf.mxu3 }
  0xaf   :  { %11323 = vst [vmem:[#allocation18_spill] sm:$0xff] %v6154_v61  ;;  %v6158_v60 = vpop.f32.mrf.mxu0  ;;  %v6160_v58 = vpop.f32.mrf.mxu1  ;;  %v6175_v61 = vld [vmem:[%s10885_s1 + $0x3f0] sm:$0xff] }
  0xb0   :  { %11324 = vst [vmem:[#allocation19_spill] sm:$0xff] %v6156_v59  ;;  %626 = vmatpush.msra.mxu2 %v6175_v61 }
  0xb1   :  { %11325 = vst [vmem:[#allocation20_spill] sm:$0xff] %v6158_v60 }
  0xb2   :  { %11326 = vst [vmem:[#allocation21_spill] sm:$0xff] %v6160_v58  ;;  %v6186_v58 = vld [vmem:[%s10885_s1 + $0x3f8] sm:$0xff] }
  0xb3   :  { %11329 = vst [vmem:[#allocation24_spill] sm:$0xff] %v6175_v61  ;;  %646 = vmatpush.msra.mxu3 %v6186_v58  ;;  %v6224_v61 = vld [vmem:[%s10885_s1 + $0x3a8] sm:$0xff] }
  0xb4   :  { %11332 = vst [vmem:[#allocation27_spill] sm:$0xff] %v6186_v58  ;;  %v6219_v58 = vld [vmem:[%s10885_s1 + $0x3a0] sm:$0xff] }
  0xb5   :  { %11339 = vst [vmem:[#allocation34_spill] sm:$0xff] %v6219_v58 }
  0xb6   :  { %v6177_v59 = vpop.f32.mrf.mxu2  ;;  %v6179_v60 = vpop.f32.mrf.mxu3  ;;  %11340 = vst [vmem:[#allocation35_spill] sm:$0xff] %v6224_v61 }
  0xb7   :  { %11330 = vst [vmem:[#allocation25_spill] sm:$0xff] %v6177_v59  ;;  %v6188_v13 = vpop.f32.mrf.mxu0  ;;  %v6190_v63 = vpop.f32.mrf.mxu1  ;;  %v6197_v59 = vld [vmem:[%s10885_s1 + $0x3c0] sm:$0xff] }
  0xb8   :  { %11331 = vst [vmem:[#allocation26_spill] sm:$0xff] %v6179_v60  ;;  %v6202_v60 = vld [vmem:[%s10885_s1 + $0x3c8] sm:$0xff]  ;;  %587 = vmatpush.msra.mxu0 %v6197_v59 }
  0xb9   :  { %11333 = vst [vmem:[#allocation28_spill] sm:$0xff] %v6188_v13  ;;  %v6207_v13 = vld [vmem:[%s10885_s1 + $0x3d0] sm:$0xff]  ;;  %607 = vmatpush.msra.mxu1 %v6202_v60 }
  0xba   :  { %11334 = vst [vmem:[#allocation29_spill] sm:$0xff] %v6190_v63  ;;  %v6214_v63 = vld [vmem:[%s10885_s1 + $0x3d8] sm:$0xff]  ;;  %627 = vmatpush.msra.mxu2 %v6207_v13  ;;  %588 = vmatpush.msra.mxu0 %v6219_v58  ;;  %v6274_v58 = vld [vmem:[%s10885_s1 + $0x368] sm:$0xff] }
  0xbb   :  { %11335 = vst [vmem:[#allocation30_spill] sm:$0xff] %v6197_v59  ;;  %647 = vmatpush.msra.mxu3 %v6214_v63  ;;  %v6236_v59 = vld [vmem:[%s10885_s1 + $0x3b8] sm:$0xff]  ;;  %608 = vmatpush.msra.mxu1 %v6224_v61  ;;  %v6269_v61 = vld [vmem:[%s10885_s1 + $0x360] sm:$0xff] }
  0xbc   :  { %11336 = vst [vmem:[#allocation31_spill] sm:$0xff] %v6202_v60  ;;  %v6231_v60 = vld [vmem:[%s10885_s1 + $0x3b0] sm:$0xff]  ;;  %589 = vmatpush.msra.mxu0 %v6241_v57 }
  0xbd   :  { %11337 = vst [vmem:[#allocation32_spill] sm:$0xff] %v6207_v13  ;;  %v6253_v13 = vld [vmem:[%s10885_s1 + $0x390] sm:$0xff]  ;;  %628 = vmatpush.msra.mxu2 %v6231_v60  ;;  %648 = vmatpush.msra.mxu3 %v6236_v59 }
  0xbe   :  { %11338 = vst [vmem:[#allocation33_spill] sm:$0xff] %v6214_v63  ;;  %v6248_v63 = vld [vmem:[%s10885_s1 + $0x388] sm:$0xff]  ;;  %v6279_v57 = vld [vmem:[%s10885_s1 + $0x370] sm:$0xff]  ;;  %590 = vmatpush.msra.mxu0 %v6269_v61 }
  0xbf   :  { %11341 = vst [vmem:[#allocation36_spill] sm:$0xff] %v6231_v60  ;;  %609 = vmatpush.msra.mxu1 %v6248_v63  ;;  %629 = vmatpush.msra.mxu2 %v6253_v13  ;;  %v6294_v60 = vpop.f32.mrf.mxu1 }
  0xc0   :  { %11342 = vst [vmem:[#allocation37_spill] sm:$0xff] %v6236_v59  ;;  %649 = vmatpush.msra.mxu3 %v6258_v39  ;;  %v6290_v39 = vld [vmem:[%s10885_s1 + $0x378] sm:$0xff]  ;;  %v6292_v59 = vpop.f32.mrf.mxu0 }
  0xc1   :  { %11344 = vst [vmem:[#allocation39_spill] sm:$0xff] %v6248_v63  ;;  %v6281_v63 = vpop.f32.mrf.mxu2  ;;  %610 = vmatpush.msra.mxu1 %v6274_v58  ;;  %630 = vmatpush.msra.mxu2 %v6279_v57 }
  0xc2   :  { %11345 = vst [vmem:[#allocation40_spill] sm:$0xff] %v6253_v13  ;;  %v6283_v13 = vpop.f32.mrf.mxu3  ;;  %650 = vmatpush.msra.mxu3 %v6290_v39 }
  0xc3   :  { %11347 = vst [vmem:[#allocation42_spill] sm:$0xff] %v6274_v58 }
  0xc4   :  { %11348 = vst [vmem:[#allocation43_spill] sm:$0xff] %v6279_v57  ;;  %v6375_v57 = vld [vmem:[%s10885_s1 + $0x2e0] sm:$0xff] }
  0xc5   :  { %11349 = vst [vmem:[#allocation44_spill] sm:$0xff] %v6281_v63  ;;  %v6301_v63 = vld [vmem:[%s10885_s1 + $0x340] sm:$0xff] }
  0xc6   :  { %11350 = vst [vmem:[#allocation45_spill] sm:$0xff] %v6283_v13  ;;  %v6306_v13 = vld [vmem:[%s10885_s1 + $0x348] sm:$0xff]  ;;  %591 = vmatpush.msra.mxu0 %v6301_v63 }
  0xc7   :  { %11351 = vst [vmem:[#allocation46_spill] sm:$0xff] %v6290_v39  ;;  %611 = vmatpush.msra.mxu1 %v6306_v13  ;;  %v6325_v39 = vld [vmem:[%s10885_s1 + $0x320] sm:$0xff] }
  0xc8   :  { %11352 = vst [vmem:[#allocation47_spill] sm:$0xff] %v6292_v59  ;;  %v6311_v59 = vld [vmem:[%s10885_s1 + $0x350] sm:$0xff]  ;;  %592 = vmatpush.msra.mxu0 %v6325_v39 }
  0xc9   :  { %11353 = vst [vmem:[#allocation48_spill] sm:$0xff] %v6294_v60  ;;  %v6318_v60 = vld [vmem:[%s10885_s1 + $0x358] sm:$0xff]  ;;  %631 = vmatpush.msra.mxu2 %v6311_v59  ;;  %v6398_v58 = vpop.f32.mrf.mxu2 }
  0xca   :  { %11354 = vst [vmem:[#allocation49_spill] sm:$0xff] %v6301_v63  ;;  %651 = vmatpush.msra.mxu3 %v6318_v60  ;;  %v6330_v63 = vld [vmem:[%s10885_s1 + $0x328] sm:$0xff] }
  0xcb   :  { %11355 = vst [vmem:[#allocation50_spill] sm:$0xff] %v6306_v13  ;;  %v6335_v13 = vld [vmem:[%s10885_s1 + $0x330] sm:$0xff]  ;;  %612 = vmatpush.msra.mxu1 %v6330_v63 }
  0xcc   :  { %11356 = vst [vmem:[#allocation51_spill] sm:$0xff] %v6311_v59  ;;  %632 = vmatpush.msra.mxu2 %v6335_v13  ;;  %v6349_v59 = vld [vmem:[%s10885_s1 + $0x300] sm:$0xff] }
  0xcd   :  { %11357 = vst [vmem:[#allocation52_spill] sm:$0xff] %v6318_v60  ;;  %v6342_v60 = vld [vmem:[%s10885_s1 + $0x338] sm:$0xff]  ;;  %593 = vmatpush.msra.mxu0 %v6349_v59 }
  0xce   :  { %11358 = vst [vmem:[#allocation53_spill] sm:$0xff] %v6325_v39  ;;  %652 = vmatpush.msra.mxu3 %v6342_v60  ;;  %v6354_v39 = vld [vmem:[%s10885_s1 + $0x308] sm:$0xff] }
  0xcf   :  { %11359 = vst [vmem:[#allocation54_spill] sm:$0xff] %v6330_v63  ;;  %v6359_v63 = vld [vmem:[%s10885_s1 + $0x310] sm:$0xff]  ;;  %613 = vmatpush.msra.mxu1 %v6354_v39  ;;  %594 = vmatpush.msra.mxu0 %v6375_v57 }
  0xd0   :  { %11360 = vst [vmem:[#allocation55_spill] sm:$0xff] %v6335_v13  ;;  %633 = vmatpush.msra.mxu2 %v6359_v63  ;;  %v6370_v13 = vpop.f32.mrf.mxu3 }
  0xd1   :  { %11361 = vst [vmem:[#allocation56_spill] sm:$0xff] %v6342_v60  ;;  %v6366_v60 = vld [vmem:[%s10885_s1 + $0x318] sm:$0xff] }
  0xd2   :  { %11362 = vst [vmem:[#allocation57_spill] sm:$0xff] %v6349_v59  ;;  %653 = vmatpush.msra.mxu3 %v6366_v60  ;;  %v6385_v59 = vld [vmem:[%s10885_s1 + $0x2f0] sm:$0xff] }
  0xd3   :  { %11363 = vst [vmem:[#allocation58_spill] sm:$0xff] %v6354_v39  ;;  %v6380_v39 = vld [vmem:[%s10885_s1 + $0x2e8] sm:$0xff]  ;;  %634 = vmatpush.msra.mxu2 %v6385_v59 }
  0xd4   :  { %11364 = vst [vmem:[#allocation59_spill] sm:$0xff] %v6359_v63  ;;  %v6387_v63 = vpop.f32.mrf.mxu0  ;;  %614 = vmatpush.msra.mxu1 %v6380_v39 }
  0xd5   :  { %11365 = vst [vmem:[#allocation60_spill] sm:$0xff] %v6366_v60  ;;  %v6389_v60 = vpop.f32.mrf.mxu1 }
  0xd6   :  { %11366 = vst [vmem:[#allocation61_spill] sm:$0xff] %v6370_v13  ;;  %v6396_v13 = vld [vmem:[%s10885_s1 + $0x2f8] sm:$0xff] }
  0xd7   :  { %11367 = vst [vmem:[#allocation62_spill] sm:$0xff] %v6375_v57  ;;  %654 = vmatpush.msra.mxu3 %v6396_v13  ;;  %v6507_v57 = vld [vmem:[%s10885_s1 + $0x240] sm:$0xff] }
  0xd8   :  { %11368 = vst [vmem:[#allocation63_spill] sm:$0xff] %v6380_v39  ;;  %v6415_v39 = vld [vmem:[%s10885_s1 + $0x2d0] sm:$0xff] }
  0xd9   :  { %11369 = vst [vmem:[#allocation64_spill] sm:$0xff] %v6385_v59  ;;  %635 = vmatpush.msra.mxu2 %v6415_v39  ;;  %v6479_v59 = vld [vmem:[%s10885_s1 + $0x260] sm:$0xff] }
  0xda   :  { %11370 = vst [vmem:[#allocation65_spill] sm:$0xff] %v6387_v63  ;;  %v6405_v63 = vld [vmem:[%s10885_s1 + $0x2c0] sm:$0xff] }
  0xdb   :  { %11371 = vst [vmem:[#allocation66_spill] sm:$0xff] %v6389_v60  ;;  %v6410_v60 = vld [vmem:[%s10885_s1 + $0x2c8] sm:$0xff]  ;;  %595 = vmatpush.msra.mxu0 %v6405_v63 }
  0xdc   :  { %11372 = vst [vmem:[#allocation67_spill] sm:$0xff] %v6396_v13  ;;  %615 = vmatpush.msra.mxu1 %v6410_v60  ;;  %v6429_v13 = vld [vmem:[%s10885_s1 + $0x2a0] sm:$0xff] }
  0xdd   :  { %11373 = vst [vmem:[#allocation68_spill] sm:$0xff] %v6398_v58  ;;  %v6422_v58 = vld [vmem:[%s10885_s1 + $0x2d8] sm:$0xff]  ;;  %596 = vmatpush.msra.mxu0 %v6429_v13 }
  0xde   :  { %11374 = vst [vmem:[#allocation69_spill] sm:$0xff] %v6405_v63  ;;  %655 = vmatpush.msra.mxu3 %v6422_v58  ;;  %v6434_v63 = vld [vmem:[%s10885_s1 + $0x2a8] sm:$0xff] }
  0xdf   :  { %11375 = vst [vmem:[#allocation70_spill] sm:$0xff] %v6410_v60  ;;  %v6439_v60 = vld [vmem:[%s10885_s1 + $0x2b0] sm:$0xff]  ;;  %616 = vmatpush.msra.mxu1 %v6434_v63 }
  0xe0   :  { %11376 = vst [vmem:[#allocation71_spill] sm:$0xff] %v6415_v39  ;;  %636 = vmatpush.msra.mxu2 %v6439_v60  ;;  %v6453_v39 = vld [vmem:[%s10885_s1 + $0x280] sm:$0xff] }
  0xe1   :  { %11377 = vst [vmem:[#allocation72_spill] sm:$0xff] %v6422_v58  ;;  %v6446_v58 = vld [vmem:[%s10885_s1 + $0x2b8] sm:$0xff]  ;;  %597 = vmatpush.msra.mxu0 %v6453_v39 }
  0xe2   :  { %11378 = vst [vmem:[#allocation73_spill] sm:$0xff] %v6429_v13  ;;  %656 = vmatpush.msra.mxu3 %v6446_v58  ;;  %v6458_v13 = vld [vmem:[%s10885_s1 + $0x288] sm:$0xff] }
  0xe3   :  { %11379 = vst [vmem:[#allocation74_spill] sm:$0xff] %v6434_v63  ;;  %v6463_v63 = vld [vmem:[%s10885_s1 + $0x290] sm:$0xff]  ;;  %617 = vmatpush.msra.mxu1 %v6458_v13  ;;  %598 = vmatpush.msra.mxu0 %v6479_v59 }
  0xe4   :  { %11380 = vst [vmem:[#allocation75_spill] sm:$0xff] %v6439_v60  ;;  %v6472_v60 = vpop.f32.mrf.mxu3  ;;  %637 = vmatpush.msra.mxu2 %v6463_v63 }
  0xe5   :  { %11381 = vst [vmem:[#allocation76_spill] sm:$0xff] %v6446_v58  ;;  %v6470_v58 = vld [vmem:[%s10885_s1 + $0x298] sm:$0xff]  ;;  %599 = vmatpush.msra.mxu0 %v6507_v57 }
  0xe6   :  { %11382 = vst [vmem:[#allocation77_spill] sm:$0xff] %v6453_v39  ;;  %657 = vmatpush.msra.mxu3 %v6470_v58  ;;  %v6489_v39 = vld [vmem:[%s10885_s1 + $0x270] sm:$0xff] }
  0xe7   :  { %11383 = vst [vmem:[#allocation78_spill] sm:$0xff] %v6458_v13  ;;  %v6484_v13 = vld [vmem:[%s10885_s1 + $0x268] sm:$0xff]  ;;  %638 = vmatpush.msra.mxu2 %v6489_v39 }
  0xe8   :  { %11384 = vst [vmem:[#allocation79_spill] sm:$0xff] %v6463_v63  ;;  %v6493_v63 = vpop.f32.mrf.mxu1  ;;  %618 = vmatpush.msra.mxu1 %v6484_v13 }
  0xe9   :  { %11385 = vst [vmem:[#allocation80_spill] sm:$0xff] %v6470_v58  ;;  %v6500_v58 = vld [vmem:[%s10885_s1 + $0x278] sm:$0xff] }
  0xea   :  { %11386 = vst [vmem:[#allocation81_spill] sm:$0xff] %v6472_v60  ;;  %v6491_v60 = vpop.f32.mrf.mxu0  ;;  %658 = vmatpush.msra.mxu3 %v6500_v58 }
  0xeb   :  { %11387 = vst [vmem:[#allocation82_spill] sm:$0xff] %v6479_v59 }
  0xec   :  { %11388 = vst [vmem:[#allocation83_spill] sm:$0xff] %v6484_v13  ;;  %v6533_v13 = vld [vmem:[%s10885_s1 + $0x220] sm:$0xff] }
  0xed   :  { %11389 = vst [vmem:[#allocation84_spill] sm:$0xff] %v6489_v39  ;;  %v6526_v39 = vpop.f32.mrf.mxu2  ;;  %600 = vmatpush.msra.mxu0 %v6533_v13 }
  0xee   :  { %11390 = vst [vmem:[#allocation85_spill] sm:$0xff] %v6491_v60  ;;  %v6517_v60 = vld [vmem:[%s10885_s1 + $0x250] sm:$0xff] }
  0xef   :  { %11391 = vst [vmem:[#allocation86_spill] sm:$0xff] %v6493_v63  ;;  %v6512_v63 = vld [vmem:[%s10885_s1 + $0x248] sm:$0xff]  ;;  %639 = vmatpush.msra.mxu2 %v6517_v60 }
  0xf0   :  { %11392 = vst [vmem:[#allocation87_spill] sm:$0xff] %v6500_v58  ;;  %619 = vmatpush.msra.mxu1 %v6512_v63  ;;  %v6524_v58 = vld [vmem:[%s10885_s1 + $0x258] sm:$0xff] }
  0xf1   :  { %11393 = vst [vmem:[#allocation88_spill] sm:$0xff] %v6507_v57  ;;  %659 = vmatpush.msra.mxu3 %v6524_v58  ;;  %v6543_v57 = vld [vmem:[%s10885_s1 + $0x230] sm:$0xff] }
  0xf2   :  { %11394 = vst [vmem:[#allocation89_spill] sm:$0xff] %v6512_v63  ;;  %v6538_v63 = vld [vmem:[%s10885_s1 + $0x228] sm:$0xff]  ;;  %640 = vmatpush.msra.mxu2 %v6543_v57  ;;  %v6585_v59 = vpop.f32.mrf.mxu0 }
  0xf3   :  { %11395 = vst [vmem:[#allocation90_spill] sm:$0xff] %v6517_v60  ;;  %620 = vmatpush.msra.mxu1 %v6538_v63  ;;  %v6583_v60 = vld [vmem:[%s10888_s3] sm:$0xf] }
  0xf4   :  { %11396 = vst [vmem:[#allocation91_spill] sm:$0xff] %v6524_v58  ;;  %v6557_v58 = vld [vmem:[%s10885_s1 + $0x200] sm:$0xff] }
  0xf5   :  { %11397 = vst [vmem:[#allocation92_spill] sm:$0xff] %v6526_v39  ;;  %v6550_v39 = vld [vmem:[%s10885_s1 + $0x238] sm:$0xff]  ;;  %601 = vmatpush.msra.mxu0 %v6557_v58 }
  0xf6   :  { %11398 = vst [vmem:[#allocation93_spill] sm:$0xff] %v6533_v13  ;;  %660 = vmatpush.msra.mxu3 %v6550_v39  ;;  %v6562_v13 = vld [vmem:[%s10885_s1 + $0x208] sm:$0xff] }
  0xf7   :  { %11399 = vst [vmem:[#allocation94_spill] sm:$0xff] %v6538_v63  ;;  %v6567_v63 = vld [vmem:[%s10885_s1 + $0x210] sm:$0xff]  ;;  %621 = vmatpush.msra.mxu1 %v6562_v13  ;;  %738 = vmatpush.msrb.mxu0 %v5736_v1  ;;  %v6605_v1 = vpop.f32.mrf.mxu2 }
  0xf8   :  { %11400 = vst [vmem:[#allocation95_spill] sm:$0xff] %v6543_v57  ;;  %v6576_v57 = vpop.f32.mrf.mxu3  ;;  %641 = vmatpush.msra.mxu2 %v6567_v63 }
  0xf9   :  { %11401 = vst [vmem:[#allocation96_spill] sm:$0xff] %v6550_v39  ;;  %v6574_v39 = vld [vmem:[%s10885_s1 + $0x218] sm:$0xff]  ;;  %758 = vmatpush.msrb.mxu1 %v5741_v2  ;;  %739 = vmatpush.msrb.mxu0 %v5756_v5 }
  0xfa   :  { %11402 = vst [vmem:[#allocation97_spill] sm:$0xff] %v6557_v58  ;;  %661 = vmatpush.msra.mxu3 %v6574_v39  ;;  %v6587_v58 = vpop.f32.mrf.mxu1  ;;  %778 = vmatpush.msrb.mxu2 %v5751_v4  ;;  %v380_v5 = vpop.f32.mrf.mxu0 }
  0xfb   :  { %11403 = vst [vmem:[#allocation98_spill] sm:$0xff] %v6574_v39  ;;  %759 = vmatpush.msrb.mxu1 %v5761_v6  ;;  %v6599_v39 = vperm.slane %v6583_v60, 1  ;;  %740 = vmatpush.msrb.mxu0 %v5779_v9  ;;  %v6624_v9 = vperm.slane %v6583_v60, 3 }
  0xfc   :  { %11404 = vst [vmem:[#allocation99_spill] sm:$0xff] %v6576_v57  ;;  %798 = vmatpush.msrb.mxu3 %v5746_v3  ;;  %v6596_v57 = vperm.slane %v6583_v60, 0  ;;  %779 = vmatpush.msrb.mxu2 %v5773_v8 }
  0xfd   :  { %11405 = vst [vmem:[#allocation100_spill] sm:$0xff] %v6585_v59  ;;  %760 = vmatpush.msrb.mxu1 %v5784_v10  ;;  %741 = vmatpush.msrb.mxu0 %v5809_v14  ;;  %v158_v3 = vadd.f32 %v6144_v0, %v6599_v39  ;;  %v7103_v59 = vld [vmem:[%s10887_s2 + $0x58] sm:$0xff] }
  0xfe   :  { %11406 = vst [vmem:[#allocation101_spill] sm:$0xff] %v6587_v58  ;;  %799 = vmatpush.msrb.mxu3 %v5768_v7  ;;  %780 = vmatpush.msrb.mxu2 %v5797_v12  ;;  %v117_v2 = vadd.f32 %v6142_v62, %v6596_v57  ;;  %v240_v12 = vadd.f32 %v6148_v26, %v6624_v9  ;;  %v7098_v58 = vld [vmem:[%s10887_s2 + $0x50] sm:$0xff] }
  0xff   :  { %11407 = vst [vmem:[#allocation102_spill] sm:$0xff] %v6605_v1  ;;  %761 = vmatpush.msrb.mxu1 %v5814_v15  ;;  %742 = vmatpush.msrb.mxu0 %v5831_v18  ;;  %v6638_v14 = vpop.f32.mrf.mxu2  ;;  %v7108_v1 = vld [vmem:[%s10887_s2 + $0x20] sm:$0xff] }
 0x100   :  { %800 = vmatpush.msrb.mxu3 %v5792_v11  ;;  %v6615_v4 = vpop.f32.mrf.mxu3  ;;  %781 = vmatpush.msrb.mxu2 %v5826_v17  ;;  %v443_v7 = vadd.f32 %v380_v5, %v117_v2  ;;  %11409 = vst [vmem:[#allocation104_spill] sm:$0xff] %v6638_v14  ;;  %v7086_v14 = vld [vmem:[%s10887_s2 + $0x40] sm:$0xff] }
 0x101   :  { %11408 = vst [vmem:[#allocation103_spill] sm:$0xff] %v6615_v4  ;;  %762 = vmatpush.msrb.mxu1 %v5836_v19  ;;  %743 = vmatpush.msrb.mxu0 %v5854_v22  ;;  %v6657_v22 = vperm.slane %v6583_v60, 2  ;;  %v7091_v4 = vld [vmem:[%s10887_s2 + $0x48] sm:$0xff] }
 0x102   :  { %801 = vmatpush.msrb.mxu3 %v5821_v16  ;;  %v400_v6 = vpop.f32.mrf.mxu1  ;;  %782 = vmatpush.msrb.mxu2 %v5848_v21  ;;  %v4559_v10 = vmul.f32 -1.442695, %v443_v7 }
 0x103   :  { %v444_v8 = vadd.f32 %v400_v6, %v158_v3  ;;  %763 = vmatpush.msrb.mxu1 %v5859_v23  ;;  %744 = vmatpush.msrb.mxu0 %v5884_v27  ;;  %11410 = vst [vmem:[#allocation105_spill] sm:$0xff] %v6657_v22  ;;  %v11411_v27 = vld [vmem:[#allocation4_spill] sm:$0xff] }
 0x104   :  { %802 = vmatpush.msrb.mxu3 %v5843_v20  ;;  %783 = vmatpush.msrb.mxu2 %v5872_v25  ;;  %5192 = vpow2.f32 %v4559_v10  ;;  %v199_v25 = vadd.f32 %v6146_v52, %v6657_v22 }
 0x105   :  { %v4560_v11 = vmul.f32 -1.442695, %v444_v8  ;;  %764 = vmatpush.msrb.mxu1 %v5889_v28  ;;  %745 = vmatpush.msrb.mxu0 %v5906_v31  ;;  %v11412_v28 = vld [vmem:[#allocation5_spill] sm:$0xff]  ;;  %v11414_v31 = vld [vmem:[#allocation6_spill] sm:$0xff] }
 0x106   :  { %803 = vmatpush.msrb.mxu3 %v5867_v24  ;;  %784 = vmatpush.msrb.mxu2 %v5901_v30  ;;  %v11413_v30 = vld [vmem:[#allocation7_spill] sm:$0xff] }
 0x107   :  { %5194 = vpow2.f32 %v4560_v11  ;;  %765 = vmatpush.msrb.mxu1 %v5911_v32  ;;  %746 = vmatpush.msrb.mxu0 %v5929_v35  ;;  %v420_v23 = vpop.f32.mrf.mxu2  ;;  %v11416_v35 = vld [vmem:[#allocation9_spill] sm:$0xff] }
 0x108   :  { %804 = vmatpush.msrb.mxu3 %v5896_v29  ;;  %v440_v15 = vpop.f32.mrf.mxu3  ;;  %785 = vmatpush.msrb.mxu2 %v5923_v34  ;;  %v11415_v34 = vld [vmem:[#allocation8_spill] sm:$0xff] }
 0x109   :  { %v446_v16 = vadd.f32 %v440_v15, %v240_v12  ;;  %766 = vmatpush.msrb.mxu1 %v5934_v36  ;;  %747 = vmatpush.msrb.mxu0 %v5959_v40  ;;  %v11418_v40 = vld [vmem:[#allocation11_spill] sm:$0xff] }
 0x10a   :  { %805 = vmatpush.msrb.mxu3 %v5918_v33  ;;  %786 = vmatpush.msrb.mxu2 %v5947_v38  ;;  %v5193_v18 = vpop.eup %5192  ;;  %v445_v33 = vadd.f32 %v420_v23, %v199_v25  ;;  %v11417_v38 = vld [vmem:[#allocation10_spill] sm:$0xff]  ;;  %v11424_v25 = vld [vmem:[#allocation23_spill] sm:$0xff] }
 0x10b   :  { %v4561_v17 = vmul.f32 -1.442695, %v446_v16  ;;  %767 = vmatpush.msrb.mxu1 %v5964_v41  ;;  %v450_v20 = vadd.f32 1.0, %v5193_v18  ;;  %748 = vmatpush.msrb.mxu0 %v5981_v44 }
 0x10c   :  { %806 = vmatpush.msrb.mxu3 %v5942_v37  ;;  %787 = vmatpush.msrb.mxu2 %v5976_v43  ;;  %v11420_v43 = vld [vmem:[#allocation13_spill] sm:$0xff] }
 0x10d   :  { %v5195_v19 = vpop.eup %5194  ;;  %5196 = vpow2.f32 %v4561_v17  ;;  %768 = vmatpush.msrb.mxu1 %v5986_v45  ;;  %749 = vmatpush.msrb.mxu0 %v6004_v48  ;;  %v11421_v45 = vld [vmem:[#allocation14_spill] sm:$0xff]  ;;  %v462_v48 = vand.u32 2147483648, %v450_v20  ;;  %vm456_vm2 = vweird.f32 %v450_v20 }
 0x10e   :  { %807 = vmatpush.msrb.mxu3 %v5971_v42  ;;  %v6652_v21 = vadd.f32 1.0, %v5195_v19  ;;  %788 = vmatpush.msrb.mxu2 %v5998_v47  ;;  %5198 = vrcp.f32 %v450_v20  ;;  %v11419_v42 = vld [vmem:[#allocation12_spill] sm:$0xff] }
 0x10f   :  { %769 = vmatpush.msrb.mxu1 %v6009_v49  ;;  %750 = vmatpush.msrb.mxu0 %v6034_v53  ;;  %v463_v60 = vor.u32 1.1754944e-38, %v462_v48  ;;  %v11445_v48 = vld [vmem:[#allocation52_spill] sm:$0xff] }
 0x110   :  { %808 = vmatpush.msrb.mxu3 %v5993_v46  ;;  %5200 = vrcp.f32 %v6652_v21  ;;  %789 = vmatpush.msrb.mxu2 %v6022_v51  ;;  %v11422_v46 = vld [vmem:[#allocation15_spill] sm:$0xff]  ;;  %v481_v49 = vand.u32 2147483648, %v6652_v21  ;;  %v460_v51 = vand.u32 2147483647, %v450_v20  ;;  %vm475_vm3 = vweird.f32 %v6652_v21 }
 0x111   :  { %770 = vmatpush.msrb.mxu1 %v6039_v54  ;;  %751 = vmatpush.msrb.mxu0 %v11411_v27  ;;  %v479_v54 = vand.u32 2147483647, %v6652_v21  ;;  %v11425_v27 = vld [vmem:[#allocation24_spill] sm:$0xff] }
 0x112   :  { %809 = vmatpush.msrb.mxu3 %v6017_v50  ;;  %790 = vmatpush.msrb.mxu2 %v6051_v56  ;;  %v482_v52 = vor.u32 1.1754944e-38, %v481_v49  ;;  %vm461_vm5 = vcmp.eq.f32.partialorder %v460_v51, 8.507059e+37  ;;  %v11446_v49 = vld [vmem:[#allocation53_spill] sm:$0xff]  ;;  %v11448_v51 = vld [vmem:[#allocation55_spill] sm:$0xff] }
 0x113   :  { %v5197_v24 = vpop.eup %5196  ;;  %771 = vmatpush.msrb.mxu1 %v11412_v28  ;;  %752 = vmatpush.msrb.mxu0 %v11415_v34  ;;  %vm480_vm7 = vcmp.eq.f32.partialorder %v479_v54, 8.507059e+37  ;;  %v11426_v28 = vld [vmem:[#allocation27_spill] sm:$0xff]  ;;  %v11451_v54 = vld [vmem:[#allocation58_spill] sm:$0xff] }
 0x114   :  { %810 = vmatpush.msrb.mxu3 %v6046_v55  ;;  %v489_v29 = vadd.f32 1.0, %v5197_v24  ;;  %791 = vmatpush.msrb.mxu2 %v11413_v30  ;;  %v5199_v32 = vpop.eup %5198  ;;  %v11423_v24 = vld [vmem:[#allocation22_spill] sm:$0xff]  ;;  %v11428_v30 = vld [vmem:[#allocation31_spill] sm:$0xff] }
 0x115   :  { %772 = vmatpush.msrb.mxu1 %v11416_v35  ;;  %v452_v37 = vmul.f32 %v5199_v32, %v450_v20  ;;  %753 = vmatpush.msrb.mxu0 %v11419_v42  ;;  %vm457_vm0 = vweird.f32 %v5199_v32  ;;  %v11432_v34 = vld [vmem:[#allocation35_spill] sm:$0xff]  ;;  %v11433_v35 = vld [vmem:[#allocation36_spill] sm:$0xff]  ;;  %v11439_v42 = vld [vmem:[#allocation42_spill] sm:$0xff] }
 0x116   :  { %811 = vmatpush.msrb.mxu3 %v11414_v31  ;;  %v5201_v36 = vpop.eup %5200  ;;  %5202 = vrcp.f32 %v489_v29  ;;  %792 = vmatpush.msrb.mxu2 %v11417_v38  ;;  %vm458_vm4 = vmor %vm456_vm2, %vm457_vm0  ;;  %v501_v16 = vand.u32 2147483648, %v489_v29  ;;  %vm495_vm9 = vweird.f32 %v489_v29  ;;  %v499_v17 = vand.u32 2147483647, %v489_v29  ;;  %v11429_v31 = vld [vmem:[#allocation32_spill] sm:$0xff]  ;;  %v11436_v38 = vld [vmem:[#allocation39_spill] sm:$0xff]  ;;  %11508 = vst [vmem:[#allocation35_spill] sm:$0xff] %v7086_v14 }
 0x117   :  { %v471_v41 = vmul.f32 %v5201_v36, %v6652_v21  ;;  %773 = vmatpush.msrb.mxu1 %v11420_v43  ;;  %v453_v44 = vsub.f32 1.0, %v452_v37  ;;  %5204 = vtanh.f32 %v445_v33  ;;  %vm476_vm1 = vweird.f32 %v5201_v36  ;;  %v11431_v33 = vld [vmem:[#allocation34_spill] sm:$0xff]  ;;  %v11440_v43 = vld [vmem:[#allocation43_spill] sm:$0xff]  ;;  %11509 = vst [vmem:[#allocation36_spill] sm:$0xff] %v7091_v4 }
 0x118   :  { %812 = vmatpush.msrb.mxu3 %v11418_v40  ;;  %793 = vmatpush.msrb.mxu2 %v11421_v45  ;;  %vm477_vm6 = vmor %vm475_vm3, %vm476_vm1  ;;  %v502_v19 = vor.u32 1.1754944e-38, %v501_v16  ;;  %vm500_vm11 = vcmp.eq.f32.partialorder %v499_v17, 8.507059e+37  ;;  %v11435_v37 = vld [vmem:[#allocation38_spill] sm:$0xff]  ;;  %v11437_v40 = vld [vmem:[#allocation40_spill] sm:$0xff]  ;;  %11512 = vst [vmem:[#allocation39_spill] sm:$0xff] %v7108_v1 }
 0x119   :  { %v472_v47 = vsub.f32 1.0, %v471_v41  ;;  %v454_v50 = vmul.f32 %v5199_v32, %v453_v44  ;;  %v11438_v41 = vld [vmem:[#allocation41_spill] sm:$0xff]  ;;  %v11441_v44 = vld [vmem:[#allocation46_spill] sm:$0xff]  ;;  %v11468_v16 = vld [vmem:[#allocation79_spill] sm:$0xff]  ;;  %11511 = vst [vmem:[#allocation38_spill] sm:$0xff] %v7103_v59 }
 0x11a   :  { %813 = vmatpush.msrb.mxu3 %v11422_v46  ;;  %v11442_v45 = vld [vmem:[#allocation49_spill] sm:$0xff]  ;;  %v11443_v46 = vld [vmem:[#allocation50_spill] sm:$0xff]  ;;  %v11469_v17 = vld [vmem:[#allocation80_spill] sm:$0xff] }
 0x11b   :  { %v473_v53 = vmul.f32 %v5201_v36, %v472_v47  ;;  %v455_v56 = vadd.f32 %v5199_v32, %v454_v50  ;;  %v11444_v47 = vld [vmem:[#allocation51_spill] sm:$0xff]  ;;  %v11447_v50 = vld [vmem:[#allocation54_spill] sm:$0xff] }
 0x11c   :  { %v5203_v55 = vpop.eup %5202 }
 0x11d   :  { %v474_v62 = vadd.f32 %v5201_v36, %v473_v53  ;;  %v491_v26 = vmul.f32 %v5203_v55, %v489_v29  ;;  %v459_v0 = vsel %vm458_vm4, %v5199_v32, %v455_v56  ;;  %v5205_v2 = vpop.eup %5204  ;;  %vm496_vm8 = vweird.f32 %v5203_v55  ;;  %v11427_v29 = vld [vmem:[#allocation30_spill] sm:$0xff]  ;;  %v11430_v32 = vld [vmem:[#allocation33_spill] sm:$0xff]  ;;  %v11453_v56 = vld [vmem:[#allocation60_spill] sm:$0xff] }
 0x11e   :  { %v464_v3 = vsel %vm461_vm5, %v463_v60, %v459_v0  ;;  %vm497_vm10 = vmor %vm495_vm9, %vm496_vm8  ;;  %v11450_v53 = vld [vmem:[#allocation57_spill] sm:$0xff]  ;;  %v11454_v60 = vld [vmem:[#allocation62_spill] sm:$0xff] }
 0x11f   :  { %v478_v5 = vsel %vm477_vm6, %v5201_v36, %v474_v62  ;;  %v492_v6 = vsub.f32 1.0, %v491_v26  ;;  %v506_v8 = vmul.f32 %v5205_v2, %v464_v3  ;;  %v11434_v36 = vld [vmem:[#allocation37_spill] sm:$0xff]  ;;  %v11455_v62 = vld [vmem:[#allocation63_spill] sm:$0xff]  ;;  %v11456_v26 = vld [vmem:[#allocation64_spill] sm:$0xff] }
 0x120   :  { %v483_v7 = vsel %vm480_vm7, %v482_v52, %v478_v5  ;;  %v11457_v52 = vld [vmem:[#allocation67_spill] sm:$0xff]  ;;  %v11458_v0 = vld [vmem:[#allocation69_spill] sm:$0xff]  ;;  %v11459_v2 = vld [vmem:[#allocation70_spill] sm:$0xff]  ;;  %11510 = vst [vmem:[#allocation37_spill] sm:$0xff] %v7098_v58 }
 0x121   :  { %v505_v10 = vmul.f32 0.0, %v483_v7  ;;  %v493_v11 = vmul.f32 %v5203_v55, %v492_v6  ;;  %v11460_v3 = vld [vmem:[#allocation71_spill] sm:$0xff]  ;;  %v11461_v5 = vld [vmem:[#allocation72_spill] sm:$0xff]  ;;  %v11462_v6 = vld [vmem:[#allocation73_spill] sm:$0xff] }
 0x122   :  { %v11463_v7 = vld [vmem:[#allocation74_spill] sm:$0xff] }
 0x123   :  { %v6686_v12 = vadd.f32 %v506_v8, %v505_v10  ;;  %v494_v15 = vadd.f32 %v5203_v55, %v493_v11  ;;  %v11464_v8 = vld [vmem:[#allocation75_spill] sm:$0xff]  ;;  %v11465_v10 = vld [vmem:[#allocation76_spill] sm:$0xff]  ;;  %v11466_v11 = vld [vmem:[#allocation77_spill] sm:$0xff] }
 0x125   :  { %5206 = vtanh.f32 %v6686_v12  ;;  %v498_v18 = vsel %vm497_vm10, %v5203_v55, %v494_v15  ;;  %v11452_v55 = vld [vmem:[#allocation59_spill] sm:$0xff]  ;;  %v11467_v15 = vld [vmem:[#allocation78_spill] sm:$0xff] }
 0x126   :  { %v503_v21 = vsel %vm500_vm11, %v502_v19, %v498_v18  ;;  %v11470_v18 = vld [vmem:[#allocation82_spill] sm:$0xff]  ;;  %v11471_v19 = vld [vmem:[#allocation83_spill] sm:$0xff] }
 0x12b   :  { %v5207_v20 = vpop.eup %5206 }
 0x12c   :  { %v509_v23 = vmul.f32 %v5207_v20, %v503_v21  ;;  %v11472_v20 = vld [vmem:[#allocation84_spill] sm:$0xff]  ;;  %v11473_v21 = vld [vmem:[#allocation87_spill] sm:$0xff] }
 0x12e   :  { %602 = vmatmul.f32.vlgmr.msra.gmra.mxu0 %v509_v23  ;;  %622 = vmatmul.f32.vlgmr.msra.gmra.mxu1 %v509_v23 }
 0x12f   :  { %642 = vmatmul.f32.vlgmr.msra.gmra.mxu2 %v509_v23  ;;  %662 = vmatmul.f32.vlgmr.msra.gmra.mxu3 %v509_v23 }
 0x130   :  { %959 = vmatpush.msra.mxu0 %v11423_v24  ;;  %979 = vmatpush.msra.mxu1 %v11424_v25  ;;  %v11475_v24 = vld [vmem:[#allocation89_spill] sm:$0xff]  ;;  %v11476_v25 = vld [vmem:[#allocation90_spill] sm:$0xff] }
 0x131   :  { %999 = vmatpush.msra.mxu2 %v11425_v27  ;;  %1019 = vmatpush.msra.mxu3 %v11426_v28  ;;  %v11477_v27 = vld [vmem:[#allocation91_spill] sm:$0xff]  ;;  %v11478_v28 = vld [vmem:[#allocation93_spill] sm:$0xff] }
 0x132   :  { %960 = vmatpush.msra.mxu0 %v11427_v29  ;;  %980 = vmatpush.msra.mxu1 %v11428_v30  ;;  %v11479_v29 = vld [vmem:[#allocation94_spill] sm:$0xff]  ;;  %v11480_v30 = vld [vmem:[#allocation95_spill] sm:$0xff] }
 0x133   :  { %1000 = vmatpush.msra.mxu2 %v11429_v31  ;;  %1020 = vmatpush.msra.mxu3 %v11430_v32  ;;  %v11481_v31 = vld [vmem:[#allocation96_spill] sm:$0xff]  ;;  %v11482_v32 = vld [vmem:[#allocation97_spill] sm:$0xff] }
 0x134   :  { %961 = vmatpush.msra.mxu0 %v11431_v33  ;;  %981 = vmatpush.msra.mxu1 %v11432_v34  ;;  %v11483_v33 = vld [vmem:[#allocation98_spill] sm:$0xff]  ;;  %v6756_v34 = vld [vmem:[%s10887_s2 + $0x1e0] sm:$0xff] }
 0x135   :  { %1001 = vmatpush.msra.mxu2 %v11433_v35  ;;  %1021 = vmatpush.msra.mxu3 %v11434_v36  ;;  %v6761_v35 = vld [vmem:[%s10887_s2 + $0x1e8] sm:$0xff]  ;;  %v6766_v36 = vld [vmem:[%s10887_s2 + $0x1f0] sm:$0xff] }
 0x136   :  { %754 = vmatmul.f32.vlgmr.msrb.gmra.mxu0 %v509_v23  ;;  %774 = vmatmul.f32.vlgmr.msrb.gmra.mxu1 %v509_v23 }
 0x137   :  { %794 = vmatmul.f32.vlgmr.msrb.gmra.mxu2 %v509_v23  ;;  %814 = vmatmul.f32.vlgmr.msrb.gmra.mxu3 %v509_v23  ;;  %v11474_v23 = vld [vmem:[#allocation88_spill] sm:$0xff] }
 0x138   :  { %962 = vmatpush.msra.mxu0 %v11435_v37  ;;  %982 = vmatpush.msra.mxu1 %v11436_v38  ;;  %v6784_v38 = vld [vmem:[%s10887_s2 + $0x1c0] sm:$0xff] }
 0x139   :  { %1002 = vmatpush.msra.mxu2 %v11437_v40  ;;  %1022 = vmatpush.msra.mxu3 %v11438_v41  ;;  %v6789_v40 = vld [vmem:[%s10887_s2 + $0x1c8] sm:$0xff]  ;;  %v6794_v41 = vld [vmem:[%s10887_s2 + $0x1d0] sm:$0xff] }
 0x13a   :  { %963 = vmatpush.msra.mxu0 %v6269_v61  ;;  %983 = vmatpush.msra.mxu1 %v11439_v42  ;;  %v11449_v61 = vld [vmem:[#allocation56_spill] sm:$0xff]  ;;  %v6801_v42 = vld [vmem:[%s10887_s2 + $0x1d8] sm:$0xff] }
 0x13b   :  { %1003 = vmatpush.msra.mxu2 %v11440_v43  ;;  %1023 = vmatpush.msra.mxu3 %v11441_v44  ;;  %v6808_v43 = vld [vmem:[%s10887_s2 + $0x1a0] sm:$0xff]  ;;  %v6813_v44 = vld [vmem:[%s10887_s2 + $0x1a8] sm:$0xff] }
 0x13c   :  { %964 = vmatpush.msra.mxu0 %v11442_v45  ;;  %984 = vmatpush.msra.mxu1 %v11443_v46  ;;  %v6818_v45 = vld [vmem:[%s10887_s2 + $0x1b0] sm:$0xff]  ;;  %v6825_v46 = vld [vmem:[%s10887_s2 + $0x1b8] sm:$0xff] }
 0x13d   :  { %1004 = vmatpush.msra.mxu2 %v11444_v47  ;;  %1024 = vmatpush.msra.mxu3 %v11445_v48  ;;  %v6832_v47 = vld [vmem:[%s10887_s2 + $0x180] sm:$0xff]  ;;  %v6837_v48 = vld [vmem:[%s10887_s2 + $0x188] sm:$0xff] }
 0x13e   :  { %965 = vmatpush.msra.mxu0 %v11446_v49  ;;  %985 = vmatpush.msra.mxu1 %v11447_v50  ;;  %v6842_v49 = vld [vmem:[%s10887_s2 + $0x190] sm:$0xff]  ;;  %v6849_v50 = vld [vmem:[%s10887_s2 + $0x198] sm:$0xff] }
 0x13f   :  { %1005 = vmatpush.msra.mxu2 %v11448_v51  ;;  %1025 = vmatpush.msra.mxu3 %v11449_v61  ;;  %v6856_v51 = vld [vmem:[%s10887_s2 + $0x160] sm:$0xff]  ;;  %v6861_v61 = vld [vmem:[%s10887_s2 + $0x168] sm:$0xff] }
 0x140   :  { %966 = vmatpush.msra.mxu0 %v11450_v53  ;;  %986 = vmatpush.msra.mxu1 %v11451_v54  ;;  %v6866_v53 = vld [vmem:[%s10887_s2 + $0x170] sm:$0xff]  ;;  %v11486_v54 = vld [vmem:[#allocation16_spill] sm:$0xff] }
 0x141   :  { %1006 = vmatpush.msra.mxu2 %v11452_v55  ;;  %1026 = vmatpush.msra.mxu3 %v11453_v56  ;;  %v120_v55 = vadd.f32 %v11486_v54, %v6596_v57  ;;  %v11487_v56 = vld [vmem:[#allocation17_spill] sm:$0xff]  ;;  %v6986_v54 = vld [vmem:[%s10887_s2 + $0xc0] sm:$0xff] }
 0x142   :  { %967 = vmatpush.msra.mxu0 %v11454_v60  ;;  %987 = vmatpush.msra.mxu1 %v11455_v62  ;;  %v161_v60 = vadd.f32 %v11487_v56, %v6599_v39  ;;  %11492 = vst [vmem:[#allocation9_spill] sm:$0xff] %v6986_v54  ;;  %v6996_v56 = vld [vmem:[%s10887_s2 + $0xd0] sm:$0xff] }
 0x143   :  { %1007 = vmatpush.msra.mxu2 %v11456_v26  ;;  %1027 = vmatpush.msra.mxu3 %v11457_v52  ;;  %v6879_v26 = vld [vmem:[%s10887_s2 + $0x178] sm:$0xff]  ;;  %11494 = vst [vmem:[#allocation11_spill] sm:$0xff] %v6996_v56 }
 0x144   :  { %968 = vmatpush.msra.mxu0 %v11458_v0  ;;  %988 = vmatpush.msra.mxu1 %v11459_v2  ;;  %v6886_v2 = vld [vmem:[%s10887_s2 + $0x140] sm:$0xff] }
 0x145   :  { %1008 = vmatpush.msra.mxu2 %v11460_v3  ;;  %1028 = vmatpush.msra.mxu3 %v11461_v5  ;;  %v6891_v3 = vld [vmem:[%s10887_s2 + $0x148] sm:$0xff]  ;;  %v6896_v5 = vld [vmem:[%s10887_s2 + $0x150] sm:$0xff] }
 0x146   :  { %969 = vmatpush.msra.mxu0 %v11462_v6  ;;  %989 = vmatpush.msra.mxu1 %v11463_v7 }
 0x147   :  { %1009 = vmatpush.msra.mxu2 %v11464_v8  ;;  %1029 = vmatpush.msra.mxu3 %v11465_v10  ;;  %v6903_v8 = vld [vmem:[%s10887_s2 + $0x158] sm:$0xff]  ;;  %v6910_v10 = vld [vmem:[%s10887_s2 + $0x120] sm:$0xff] }
 0x148   :  { %970 = vmatpush.msra.mxu0 %v11466_v11  ;;  %990 = vmatpush.msra.mxu1 %v11467_v15  ;;  %v6915_v11 = vld [vmem:[%s10887_s2 + $0x128] sm:$0xff]  ;;  %v6920_v15 = vld [vmem:[%s10887_s2 + $0x130] sm:$0xff] }
 0x149   :  { %1010 = vmatpush.msra.mxu2 %v11468_v16  ;;  %1030 = vmatpush.msra.mxu3 %v11469_v17 }
 0x14a   :  { %971 = vmatpush.msra.mxu0 %v11470_v18  ;;  %991 = vmatpush.msra.mxu1 %v11471_v19  ;;  %v6927_v18 = vld [vmem:[%s10887_s2 + $0x138] sm:$0xff]  ;;  %v6934_v19 = vld [vmem:[%s10887_s2 + $0x100] sm:$0xff] }
 0x14b   :  { %1011 = vmatpush.msra.mxu2 %v11472_v20  ;;  %1031 = vmatpush.msra.mxu3 %v11473_v21  ;;  %v6939_v20 = vld [vmem:[%s10887_s2 + $0x108] sm:$0xff]  ;;  %v6944_v21 = vld [vmem:[%s10887_s2 + $0x110] sm:$0xff] }
 0x14c   :  { %972 = vmatpush.msra.mxu0 %v11474_v23  ;;  %992 = vmatpush.msra.mxu1 %v11475_v24  ;;  %v6951_v23 = vld [vmem:[%s10887_s2 + $0x118] sm:$0xff] }
 0x14d   :  { %1012 = vmatpush.msra.mxu2 %v11476_v25  ;;  %1032 = vmatpush.msra.mxu3 %v11477_v27  ;;  %v11489_v24 = vld [vmem:[#allocation19_spill] sm:$0xff]  ;;  %v6960_v27 = vld [vmem:[%s10887_s2 + $0xe0] sm:$0xff] }
 0x14e   :  { %973 = vmatpush.msra.mxu0 %v11478_v28  ;;  %993 = vmatpush.msra.mxu1 %v11479_v29  ;;  %v243_v25 = vadd.f32 %v11489_v24, %v6624_v9  ;;  %v6965_v28 = vld [vmem:[%s10887_s2 + $0xe8] sm:$0xff]  ;;  %v6970_v29 = vld [vmem:[%s10887_s2 + $0xf0] sm:$0xff]  ;;  %v7032_v24 = vld [vmem:[%s10887_s2 + $0x80] sm:$0xff] }
 0x14f   :  { %1013 = vmatpush.msra.mxu2 %v11480_v30  ;;  %1033 = vmatpush.msra.mxu3 %v11481_v31  ;;  %11500 = vst [vmem:[#allocation23_spill] sm:$0xff] %v7032_v24 }
 0x150   :  { %974 = vmatpush.msra.mxu0 %v11482_v32  ;;  %994 = vmatpush.msra.mxu1 %v6562_v13  ;;  %v6979_v32 = vld [vmem:[%s10887_s2 + $0xf8] sm:$0xff] }
 0x151   :  { %1014 = vmatpush.msra.mxu2 %v6567_v63  ;;  %1034 = vmatpush.msra.mxu3 %v11483_v33  ;;  %v6773_v63 = vld [vmem:[%s10887_s2 + $0x1f8] sm:$0xff]  ;;  %11491 = vst [vmem:[#allocation8_spill] sm:$0xff] %v6979_v32 }
 0x152   :  { %1111 = vmatpush.msrb.mxu0 %v6756_v34  ;;  %1131 = vmatpush.msrb.mxu1 %v6761_v35 }
 0x153   :  { %1151 = vmatpush.msrb.mxu2 %v6766_v36  ;;  %1171 = vmatpush.msrb.mxu3 %v6773_v63 }
 0x154   :  { %1112 = vmatpush.msrb.mxu0 %v6784_v38  ;;  %1132 = vmatpush.msrb.mxu1 %v6789_v40 }
 0x155   :  { %1152 = vmatpush.msrb.mxu2 %v6794_v41  ;;  %1172 = vmatpush.msrb.mxu3 %v6801_v42 }
 0x156   :  { %1113 = vmatpush.msrb.mxu0 %v6808_v43  ;;  %1133 = vmatpush.msrb.mxu1 %v6813_v44 }
 0x157   :  { %1153 = vmatpush.msrb.mxu2 %v6818_v45  ;;  %1173 = vmatpush.msrb.mxu3 %v6825_v46 }
 0x158   :  { %1114 = vmatpush.msrb.mxu0 %v6832_v47  ;;  %1134 = vmatpush.msrb.mxu1 %v6837_v48 }
 0x159   :  { %1154 = vmatpush.msrb.mxu2 %v6842_v49  ;;  %1174 = vmatpush.msrb.mxu3 %v6849_v50 }
 0x15a   :  { %1115 = vmatpush.msrb.mxu0 %v6856_v51  ;;  %1135 = vmatpush.msrb.mxu1 %v6861_v61 }
 0x15b   :  { %1155 = vmatpush.msrb.mxu2 %v6866_v53  ;;  %1175 = vmatpush.msrb.mxu3 %v6879_v26 }
 0x15c   :  { %1116 = vmatpush.msrb.mxu0 %v6886_v2  ;;  %1136 = vmatpush.msrb.mxu1 %v6891_v3 }
 0x15d   :  { %1156 = vmatpush.msrb.mxu2 %v6896_v5  ;;  %1176 = vmatpush.msrb.mxu3 %v6903_v8 }
 0x15e   :  { %1117 = vmatpush.msrb.mxu0 %v6910_v10  ;;  %1137 = vmatpush.msrb.mxu1 %v6915_v11 }
 0x15f   :  { %1157 = vmatpush.msrb.mxu2 %v6920_v15  ;;  %1177 = vmatpush.msrb.mxu3 %v6927_v18 }
 0x160   :  { %1118 = vmatpush.msrb.mxu0 %v6934_v19  ;;  %1138 = vmatpush.msrb.mxu1 %v6939_v20 }
 0x161   :  { %1158 = vmatpush.msrb.mxu2 %v6944_v21  ;;  %1178 = vmatpush.msrb.mxu3 %v6951_v23 }
 0x162   :  { %1119 = vmatpush.msrb.mxu0 %v6960_v27  ;;  %1139 = vmatpush.msrb.mxu1 %v6965_v28 }
 0x163   :  { %1159 = vmatpush.msrb.mxu2 %v6970_v29  ;;  %1179 = vmatpush.msrb.mxu3 %v6979_v32 }
 0x164   :  { %1120 = vmatpush.msrb.mxu0 %v6986_v54 }
 0x165   :  { %1160 = vmatpush.msrb.mxu2 %v6996_v56 }
 0x1ab   :  { %v6775_v13 = vpop.f32.mrf.mxu0  ;;  %v6777_v37 = vpop.f32.mrf.mxu1 }
 0x1ac   :  { %11484 = vst [vmem:[#allocation4_spill] sm:$0xff] %v6775_v13  ;;  %v7081_v13 = vld [vmem:[%s10887_s2 + $0x78] sm:$0xff] }
 0x1ad   :  { %11485 = vst [vmem:[#allocation5_spill] sm:$0xff] %v6777_v37 }
 0x1ae   :  { %11507 = vst [vmem:[#allocation34_spill] sm:$0xff] %v7081_v13 }
 0x1b2   :  { %v6872_v62 = vpop.f32.mrf.mxu3  ;;  %v6972_v30 = vpop.f32.mrf.mxu2 }
 0x1b3   :  { %11488 = vst [vmem:[#allocation7_spill] sm:$0xff] %v6872_v62  ;;  %v755_v52 = vpop.f32.mrf.mxu0  ;;  %v775_v0 = vpop.f32.mrf.mxu1  ;;  %v7051_v62 = vld [vmem:[%s10887_s2 + $0x98] sm:$0xff] }
 0x1b4   :  { %v818_v6 = vadd.f32 %v755_v52, %v120_v55  ;;  %v819_v7 = vadd.f32 %v775_v0, %v161_v60  ;;  %11490 = vst [vmem:[#allocation6_spill] sm:$0xff] %v6972_v30  ;;  %v6991_v55 = vld [vmem:[%s10887_s2 + $0xc8] sm:$0xff]  ;;  %v7003_v60 = vld [vmem:[%s10887_s2 + $0xd8] sm:$0xff]  ;;  %v7010_v0 = vld [vmem:[%s10887_s2 + $0xa0] sm:$0xff] }
 0x1b5   :  { %11493 = vst [vmem:[#allocation10_spill] sm:$0xff] %v6991_v55  ;;  %1140 = vmatpush.msrb.mxu1 %v6991_v55  ;;  %1180 = vmatpush.msrb.mxu3 %v7003_v60  ;;  %v7046_v30 = vld [vmem:[%s10887_s2 + $0x90] sm:$0xff] }
 0x1b6   :  { %v4627_v16 = vmul.f32 -1.442695, %v818_v6  ;;  %v4628_v17 = vmul.f32 -1.442695, %v819_v7  ;;  %11495 = vst [vmem:[#allocation12_spill] sm:$0xff] %v7003_v60  ;;  %v7015_v6 = vld [vmem:[%s10887_s2 + $0xa8] sm:$0xff]  ;;  %1121 = vmatpush.msrb.mxu0 %v7010_v0 }
 0x1b7   :  { %11496 = vst [vmem:[#allocation13_spill] sm:$0xff] %v7010_v0  ;;  %v7020_v7 = vld [vmem:[%s10887_s2 + $0xb0] sm:$0xff]  ;;  %1141 = vmatpush.msrb.mxu1 %v7015_v6 }
 0x1b8   :  { %5208 = vpow2.f32 %v4627_v16  ;;  %11497 = vst [vmem:[#allocation14_spill] sm:$0xff] %v7015_v6  ;;  %1161 = vmatpush.msrb.mxu2 %v7020_v7  ;;  %1122 = vmatpush.msrb.mxu0 %v7032_v24 }
 0x1b9   :  { %5210 = vpow2.f32 %v4628_v17  ;;  %11498 = vst [vmem:[#allocation15_spill] sm:$0xff] %v7020_v7  ;;  %v7027_v17 = vld [vmem:[%s10887_s2 + $0xb8] sm:$0xff] }
 0x1ba   :  { %v815_v31 = vpop.f32.mrf.mxu3  ;;  %11499 = vst [vmem:[#allocation22_spill] sm:$0xff] %v7027_v17  ;;  %1181 = vmatpush.msrb.mxu3 %v7027_v17  ;;  %1162 = vmatpush.msrb.mxu2 %v7046_v30 }
 0x1bb   :  { %v821_v33 = vadd.f32 %v815_v31, %v243_v25  ;;  %v7037_v25 = vld [vmem:[%s10887_s2 + $0x88] sm:$0xff]  ;;  %11502 = vst [vmem:[#allocation27_spill] sm:$0xff] %v7046_v30 }
 0x1bc   :  { %11501 = vst [vmem:[#allocation24_spill] sm:$0xff] %v7037_v25  ;;  %1142 = vmatpush.msrb.mxu1 %v7037_v25  ;;  %1182 = vmatpush.msrb.mxu3 %v7051_v62  ;;  %v7139_v25 = vld [vmem:[%s10887_s2 + $0x8] sm:$0xff] }
 0x1bd   :  { %v4629_v52 = vmul.f32 -1.442695, %v821_v33  ;;  %11503 = vst [vmem:[#allocation30_spill] sm:$0xff] %v7051_v62 }
 0x1be   :  { %v5209_v16 = vpop.eup %5208  ;;  %1183 = vmatpush.msrb.mxu3 %v7081_v13  ;;  %v7115_v13 = vld [vmem:[%s10887_s2 + $0x28] sm:$0xff]  ;;  %11518 = vst [vmem:[#allocation46_spill] sm:$0xff] %v7139_v25 }
 0x1bf   :  { %v5211_v31 = vpop.eup %5210  ;;  %v7039_v33 = vadd.f32 1.0, %v5209_v16  ;;  %5212 = vpow2.f32 %v4629_v52  ;;  %v7063_v52 = vld [vmem:[%s10887_s2 + $0x60] sm:$0xff]  ;;  %v7068_v16 = vld [vmem:[%s10887_s2 + $0x68] sm:$0xff]  ;;  %11513 = vst [vmem:[#allocation40_spill] sm:$0xff] %v7115_v13 }
 0x1c0   :  { %v7053_v37 = vadd.f32 1.0, %v5211_v31  ;;  %11504 = vst [vmem:[#allocation31_spill] sm:$0xff] %v7063_v52  ;;  %v7073_v31 = vld [vmem:[%s10887_s2 + $0x70] sm:$0xff]  ;;  %1123 = vmatpush.msrb.mxu0 %v7063_v52  ;;  %1143 = vmatpush.msrb.mxu1 %v7068_v16  ;;  %v7125_v52 = vld [vmem:[%s10887_s2 + $0x38] sm:$0xff] }
 0x1c1   :  { %5214 = vrcp.f32 %v7039_v33  ;;  %11505 = vst [vmem:[#allocation32_spill] sm:$0xff] %v7068_v16  ;;  %1163 = vmatpush.msrb.mxu2 %v7073_v31  ;;  %v795_v16 = vpop.f32.mrf.mxu2  ;;  %1184 = vmatpush.msrb.mxu3 %v7103_v59  ;;  %v7151_v59 = vld [vmem:[%s10887_s2 + $0x18] sm:$0xff]  ;;  %v835_v7 = vand.u32 2147483647, %v7039_v33  ;;  %vm831_vm14 = vweird.f32 %v7039_v33 }
 0x1c2   :  { %11506 = vst [vmem:[#allocation33_spill] sm:$0xff] %v7073_v31  ;;  %5216 = vrcp.f32 %v7053_v37  ;;  %1124 = vmatpush.msrb.mxu0 %v7086_v14  ;;  %1144 = vmatpush.msrb.mxu1 %v7091_v4  ;;  %v7120_v31 = vld [vmem:[%s10887_s2 + $0x30] sm:$0xff]  ;;  %v7134_v4 = vld [vmem:[%s10887_s2] sm:$0xff]  ;;  %vm850_vm15 = vweird.f32 %v7053_v37 }
 0x1c3   :  { %11514 = vst [vmem:[#allocation41_spill] sm:$0xff] %v7120_v31  ;;  %v11516_v14 = vld [vmem:[#allocation18_spill] sm:$0xff]  ;;  %1164 = vmatpush.msrb.mxu2 %v7098_v58  ;;  %1185 = vmatpush.msrb.mxu3 %v7125_v52  ;;  %vm836_vm2 = vcmp.eq.f32.partialorder %v835_v7, 8.507059e+37 }
 0x1c4   :  { %11515 = vst [vmem:[#allocation42_spill] sm:$0xff] %v7125_v52  ;;  %v202_v30 = vadd.f32 %v11516_v14, %v6657_v22  ;;  %1125 = vmatpush.msrb.mxu0 %v7108_v1  ;;  %1145 = vmatpush.msrb.mxu1 %v7115_v13  ;;  %v7146_v14 = vld [vmem:[%s10887_s2 + $0x10] sm:$0xff]  ;;  %v856_v52 = vand.u32 2147483648, %v7053_v37 }
 0x1c5   :  { %v5213_v62 = vpop.eup %5212  ;;  %11517 = vst [vmem:[#allocation43_spill] sm:$0xff] %v7134_v4  ;;  %1165 = vmatpush.msrb.mxu2 %v7120_v31  ;;  %1186 = vmatpush.msrb.mxu3 %v7151_v59 }
 0x1c6   :  { %v864_v24 = vadd.f32 1.0, %v5213_v62  ;;  %11519 = vst [vmem:[#allocation49_spill] sm:$0xff] %v7146_v14  ;;  %v820_v22 = vadd.f32 %v795_v16, %v202_v30  ;;  %1126 = vmatpush.msrb.mxu0 %v7134_v4  ;;  %1146 = vmatpush.msrb.mxu1 %v7139_v25  ;;  %v837_v16 = vand.u32 2147483648, %v7039_v33  ;;  %v854_v25 = vand.u32 2147483647, %v7053_v37 }
 0x1c7   :  { %11520 = vst [vmem:[#allocation50_spill] sm:$0xff] %v7151_v59  ;;  %v5215_v58 = vpop.eup %5214  ;;  %1166 = vmatpush.msrb.mxu2 %v7146_v14  ;;  %v857_v59 = vor.u32 1.1754944e-38, %v856_v52 }
 0x1c8   :  { %v5217_v62 = vpop.eup %5216  ;;  %v827_v1 = vmul.f32 %v5215_v58, %v7039_v33  ;;  %5218 = vrcp.f32 %v864_v24  ;;  %vm832_vm12 = vweird.f32 %v5215_v58  ;;  %vm855_vm3 = vcmp.eq.f32.partialorder %v854_v25, 8.507059e+37 }
 0x1c9   :  { %v846_v13 = vmul.f32 %v5217_v62, %v7053_v37  ;;  %5220 = vtanh.f32 %v820_v22  ;;  %vm851_vm13 = vweird.f32 %v5217_v62  ;;  %vm833_vm0 = vmor %vm831_vm14, %vm832_vm12  ;;  %vm870_vm5 = vweird.f32 %v864_v24 }
 0x1ca   :  { %v828_v17 = vsub.f32 1.0, %v827_v1  ;;  %v838_v1 = vor.u32 1.1754944e-38, %v837_v16  ;;  %vm852_vm1 = vmor %vm850_vm15, %vm851_vm13  ;;  %v7225_v16 = vld [vmem:[%s10885_s1 + $0x3a8] sm:$0xff] }
 0x1cb   :  { %v847_v30 = vsub.f32 1.0, %v846_v13 }
 0x1cc   :  { %v829_v31 = vmul.f32 %v5215_v58, %v828_v17 }
 0x1cd   :  { %v848_v4 = vmul.f32 %v5217_v62, %v847_v30 }
 0x1ce   :  { %v5219_v6 = vpop.eup %5218  ;;  %v830_v0 = vadd.f32 %v5215_v58, %v829_v31 }
 0x1cf   :  { %v849_v13 = vadd.f32 %v5217_v62, %v848_v4  ;;  %v866_v22 = vmul.f32 %v5219_v6, %v864_v24  ;;  %v5221_v14 = vpop.eup %5220  ;;  %vm871_vm4 = vweird.f32 %v5219_v6  ;;  %v876_v4 = vand.u32 2147483648, %v864_v24 }
 0x1d0   :  { %v834_v17 = vsel %vm833_vm0, %v5215_v58, %v830_v0  ;;  %v874_v58 = vand.u32 2147483647, %v864_v24  ;;  %vm872_vm6 = vmor %vm870_vm5, %vm871_vm4  ;;  %v7208_v24 = vld [vmem:[%s10885_s1 + $0x3d0] sm:$0xff] }
 0x1d1   :  { %v839_v60 = vsel %vm836_vm2, %v838_v1, %v834_v17  ;;  %v853_v30 = vsel %vm852_vm1, %v5217_v62, %v849_v13  ;;  %v867_v56 = vsub.f32 1.0, %v866_v22  ;;  %v877_v7 = vor.u32 1.1754944e-38, %v876_v4  ;;  %v7220_v62 = vld [vmem:[%s10885_s1 + $0x3a0] sm:$0xff]  ;;  %v7232_v1 = vld [vmem:[%s10885_s1 + $0x3b0] sm:$0xff]  ;;  %v7237_v13 = vld [vmem:[%s10885_s1 + $0x3b8] sm:$0xff] }
 0x1d2   :  { %v858_v55 = vsel %vm855_vm3, %v857_v59, %v853_v30  ;;  %v881_v54 = vmul.f32 %v5221_v14, %v839_v60  ;;  %vm875_vm7 = vcmp.eq.f32.partialorder %v874_v58, 8.507059e+37  ;;  %v7198_v60 = vld [vmem:[%s10885_s1 + $0x3c0] sm:$0xff]  ;;  %v7215_v14 = vld [vmem:[%s10885_s1 + $0x3d8] sm:$0xff]  ;;  %v7249_v17 = vld [vmem:[%s10885_s1 + $0x388] sm:$0xff] }
 0x1d3   :  { %v880_v31 = vmul.f32 %v858_v55, %v6686_v12  ;;  %v868_v33 = vmul.f32 %v5219_v6, %v867_v56  ;;  %v7174_v12 = vld [vmem:[%s10885_s1 + $0x3e0] sm:$0xff]  ;;  %v7184_v55 = vld [vmem:[%s10885_s1 + $0x3f0] sm:$0xff]  ;;  %v7189_v56 = vld [vmem:[%s10885_s1 + $0x3f8] sm:$0xff] }
 0x1d4   :  { %v7242_v22 = vld [vmem:[%s10885_s1 + $0x380] sm:$0xff]  ;;  %v7254_v30 = vld [vmem:[%s10885_s1 + $0x390] sm:$0xff]  ;;  %v7287_v58 = vld [vmem:[%s10885_s1 + $0x378] sm:$0xff] }
 0x1d5   :  { %v7168_v32 = vadd.f32 %v881_v54, %v880_v31  ;;  %v869_v37 = vadd.f32 %v5219_v6, %v868_v33  ;;  %v7179_v54 = vld [vmem:[%s10885_s1 + $0x3e8] sm:$0xff]  ;;  %v7259_v31 = vld [vmem:[%s10885_s1 + $0x398] sm:$0xff]  ;;  %v7270_v33 = vld [vmem:[%s10885_s1 + $0x360] sm:$0xff]  ;;  %11521 = vst [vmem:[#allocation51_spill] sm:$0xff] %v7287_v58 }
 0x1d6   :  { %v7280_v4 = vld [vmem:[%s10885_s1 + $0x370] sm:$0xff] }
 0x1d7   :  { %5222 = vtanh.f32 %v7168_v32  ;;  %v873_v0 = vsel %vm872_vm6, %v5219_v6, %v869_v37  ;;  %v7203_v6 = vld [vmem:[%s10885_s1 + $0x3c8] sm:$0xff] }
 0x1d8   :  { %v878_v52 = vsel %vm875_vm7, %v877_v7, %v873_v0  ;;  %v7275_v37 = vld [vmem:[%s10885_s1 + $0x368] sm:$0xff]  ;;  %v7294_v0 = vld [vmem:[%s10885_s1 + $0x340] sm:$0xff] }
 0x1d9   :  { %11522 = vst [vmem:[#allocation52_spill] sm:$0xff] %v7294_v0  ;;  %v7299_v7 = vld [vmem:[%s10885_s1 + $0x348] sm:$0xff] }
 0x1da   :  { %11523 = vst [vmem:[#allocation53_spill] sm:$0xff] %v7299_v7 }
 0x1dd   :  { %v5223_v25 = vpop.eup %5222 }
 0x1de   :  { %v884_v59 = vmul.f32 %v5223_v25, %v878_v52  ;;  %v7304_v25 = vld [vmem:[%s10885_s1 + $0x350] sm:$0xff]  ;;  %v7311_v52 = vld [vmem:[%s10885_s1 + $0x358] sm:$0xff] }
 0x1df   :  { %11524 = vst [vmem:[#allocation54_spill] sm:$0xff] %v7304_v25 }
 0x1e0   :  { %975 = vmatmul.f32.vlgmr.msra.gmra.mxu0 %v884_v59  ;;  %995 = vmatmul.f32.vlgmr.msra.gmra.mxu1 %v884_v59  ;;  %11525 = vst [vmem:[#allocation55_spill] sm:$0xff] %v7311_v52 }
 0x1e1   :  { %1015 = vmatmul.f32.vlgmr.msra.gmra.mxu2 %v884_v59  ;;  %1035 = vmatmul.f32.vlgmr.msra.gmra.mxu3 %v884_v59 }
 0x1e2   :  { %1332 = vmatpush.msra.mxu0 %v7174_v12  ;;  %1352 = vmatpush.msra.mxu1 %v7179_v54 }
 0x1e3   :  { %1372 = vmatpush.msra.mxu2 %v7184_v55  ;;  %1392 = vmatpush.msra.mxu3 %v7189_v56 }
 0x1e4   :  { %1333 = vmatpush.msra.mxu0 %v7198_v60  ;;  %1353 = vmatpush.msra.mxu1 %v7203_v6 }
 0x1e5   :  { %1373 = vmatpush.msra.mxu2 %v7208_v24  ;;  %1393 = vmatpush.msra.mxu3 %v7215_v14 }
 0x1e6   :  { %1334 = vmatpush.msra.mxu0 %v7220_v62  ;;  %1354 = vmatpush.msra.mxu1 %v7225_v16 }
 0x1e7   :  { %1374 = vmatpush.msra.mxu2 %v7232_v1  ;;  %1394 = vmatpush.msra.mxu3 %v7237_v13 }
 0x1e8   :  { %1127 = vmatmul.f32.vlgmr.msrb.gmra.mxu0 %v884_v59  ;;  %1147 = vmatmul.f32.vlgmr.msrb.gmra.mxu1 %v884_v59 }
 0x1e9   :  { %1167 = vmatmul.f32.vlgmr.msrb.gmra.mxu2 %v884_v59  ;;  %1187 = vmatmul.f32.vlgmr.msrb.gmra.mxu3 %v884_v59  ;;  %v7318_v59 = vld [vmem:[%s10885_s1 + $0x320] sm:$0xff] }
 0x1ea   :  { %1335 = vmatpush.msra.mxu0 %v7242_v22  ;;  %1355 = vmatpush.msra.mxu1 %v7249_v17  ;;  %11526 = vst [vmem:[#allocation56_spill] sm:$0xff] %v7318_v59 }
 0x1eb   :  { %1375 = vmatpush.msra.mxu2 %v7254_v30  ;;  %1395 = vmatpush.msra.mxu3 %v7259_v31 }
 0x1ec   :  { %1336 = vmatpush.msra.mxu0 %v7270_v33  ;;  %1356 = vmatpush.msra.mxu1 %v7275_v37 }
 0x1ed   :  { %1376 = vmatpush.msra.mxu2 %v7280_v4  ;;  %1396 = vmatpush.msra.mxu3 %v7287_v58 }
 0x1ee   :  { %1337 = vmatpush.msra.mxu0 %v7294_v0  ;;  %1357 = vmatpush.msra.mxu1 %v7299_v7  ;;  %v7323_v0 = vld [vmem:[%s10885_s1 + $0x328] sm:$0xff]  ;;  %v7328_v7 = vld [vmem:[%s10885_s1 + $0x330] sm:$0xff] }
 0x1ef   :  { %1377 = vmatpush.msra.mxu2 %v7304_v25  ;;  %1397 = vmatpush.msra.mxu3 %v7311_v52  ;;  %11527 = vst [vmem:[#allocation57_spill] sm:$0xff] %v7323_v0  ;;  %v7335_v52 = vld [vmem:[%s10885_s1 + $0x338] sm:$0xff]  ;;  %v7342_v25 = vld [vmem:[%s10885_s1 + $0x300] sm:$0xff] }
 0x1f0   :  { %11528 = vst [vmem:[#allocation58_spill] sm:$0xff] %v7328_v7  ;;  %1338 = vmatpush.msra.mxu0 %v7318_v59  ;;  %1358 = vmatpush.msra.mxu1 %v7323_v0  ;;  %v7347_v59 = vld [vmem:[%s10885_s1 + $0x308] sm:$0xff]  ;;  %v7352_v0 = vld [vmem:[%s10885_s1 + $0x310] sm:$0xff] }
 0x1f1   :  { %11529 = vst [vmem:[#allocation59_spill] sm:$0xff] %v7335_v52  ;;  %1378 = vmatpush.msra.mxu2 %v7328_v7  ;;  %1398 = vmatpush.msra.mxu3 %v7335_v52  ;;  %v7359_v52 = vld [vmem:[%s10885_s1 + $0x318] sm:$0xff]  ;;  %v7366_v7 = vld [vmem:[%s10885_s1 + $0x2e0] sm:$0xff] }
 0x1f2   :  { %11530 = vst [vmem:[#allocation60_spill] sm:$0xff] %v7342_v25  ;;  %1339 = vmatpush.msra.mxu0 %v7342_v25  ;;  %1359 = vmatpush.msra.mxu1 %v7347_v59  ;;  %v7371_v25 = vld [vmem:[%s10885_s1 + $0x2e8] sm:$0xff] }
 0x1f3   :  { %11531 = vst [vmem:[#allocation62_spill] sm:$0xff] %v7347_v59  ;;  %1379 = vmatpush.msra.mxu2 %v7352_v0  ;;  %1399 = vmatpush.msra.mxu3 %v7359_v52  ;;  %v7376_v59 = vld [vmem:[%s10885_s1 + $0x2f0] sm:$0xff] }
 0x1f4   :  { %11532 = vst [vmem:[#allocation63_spill] sm:$0xff] %v7352_v0  ;;  %1340 = vmatpush.msra.mxu0 %v7366_v7  ;;  %1360 = vmatpush.msra.mxu1 %v7371_v25  ;;  %v7390_v0 = vld [vmem:[%s10885_s1 + $0x2c0] sm:$0xff] }
 0x1f5   :  { %11533 = vst [vmem:[#allocation64_spill] sm:$0xff] %v7359_v52  ;;  %v7383_v52 = vld [vmem:[%s10885_s1 + $0x2f8] sm:$0xff]  ;;  %1380 = vmatpush.msra.mxu2 %v7376_v59 }
 0x1f6   :  { %11534 = vst [vmem:[#allocation67_spill] sm:$0xff] %v7366_v7  ;;  %1400 = vmatpush.msra.mxu3 %v7383_v52  ;;  %v7395_v7 = vld [vmem:[%s10885_s1 + $0x2c8] sm:$0xff]  ;;  %1341 = vmatpush.msra.mxu0 %v7390_v0 }
 0x1f7   :  { %11535 = vst [vmem:[#allocation69_spill] sm:$0xff] %v7371_v25  ;;  %v7400_v25 = vld [vmem:[%s10885_s1 + $0x2d0] sm:$0xff]  ;;  %1361 = vmatpush.msra.mxu1 %v7395_v7 }
 0x1f8   :  { %11536 = vst [vmem:[#allocation70_spill] sm:$0xff] %v7376_v59  ;;  %1381 = vmatpush.msra.mxu2 %v7400_v25  ;;  %v7414_v59 = vld [vmem:[%s10885_s1 + $0x2a0] sm:$0xff] }
 0x1f9   :  { %11537 = vst [vmem:[#allocation71_spill] sm:$0xff] %v7383_v52  ;;  %v7407_v52 = vld [vmem:[%s10885_s1 + $0x2d8] sm:$0xff]  ;;  %1342 = vmatpush.msra.mxu0 %v7414_v59 }
 0x1fa   :  { %11538 = vst [vmem:[#allocation72_spill] sm:$0xff] %v7390_v0  ;;  %1401 = vmatpush.msra.mxu3 %v7407_v52  ;;  %v7419_v0 = vld [vmem:[%s10885_s1 + $0x2a8] sm:$0xff] }
 0x1fb   :  { %11539 = vst [vmem:[#allocation73_spill] sm:$0xff] %v7395_v7  ;;  %v7424_v7 = vld [vmem:[%s10885_s1 + $0x2b0] sm:$0xff]  ;;  %1362 = vmatpush.msra.mxu1 %v7419_v0 }
 0x1fc   :  { %11540 = vst [vmem:[#allocation74_spill] sm:$0xff] %v7400_v25  ;;  %1382 = vmatpush.msra.mxu2 %v7424_v7  ;;  %v7438_v25 = vld [vmem:[%s10885_s1 + $0x280] sm:$0xff] }
 0x1fd   :  { %11541 = vst [vmem:[#allocation75_spill] sm:$0xff] %v7407_v52  ;;  %v7431_v52 = vld [vmem:[%s10885_s1 + $0x2b8] sm:$0xff]  ;;  %1343 = vmatpush.msra.mxu0 %v7438_v25 }
 0x1fe   :  { %11542 = vst [vmem:[#allocation76_spill] sm:$0xff] %v7414_v59  ;;  %1402 = vmatpush.msra.mxu3 %v7431_v52  ;;  %v7443_v59 = vld [vmem:[%s10885_s1 + $0x288] sm:$0xff] }
 0x1ff   :  { %11543 = vst [vmem:[#allocation77_spill] sm:$0xff] %v7419_v0  ;;  %v7448_v0 = vld [vmem:[%s10885_s1 + $0x290] sm:$0xff]  ;;  %1363 = vmatpush.msra.mxu1 %v7443_v59 }
 0x200   :  { %11544 = vst [vmem:[#allocation78_spill] sm:$0xff] %v7424_v7  ;;  %1383 = vmatpush.msra.mxu2 %v7448_v0  ;;  %v7462_v7 = vld [vmem:[%s10885_s1 + $0x260] sm:$0xff] }
 0x201   :  { %11545 = vst [vmem:[#allocation79_spill] sm:$0xff] %v7431_v52  ;;  %v7455_v52 = vld [vmem:[%s10885_s1 + $0x298] sm:$0xff]  ;;  %1344 = vmatpush.msra.mxu0 %v7462_v7 }
 0x202   :  { %11546 = vst [vmem:[#allocation80_spill] sm:$0xff] %v7438_v25  ;;  %1403 = vmatpush.msra.mxu3 %v7455_v52  ;;  %v7467_v25 = vld [vmem:[%s10885_s1 + $0x268] sm:$0xff] }
 0x203   :  { %11547 = vst [vmem:[#allocation82_spill] sm:$0xff] %v7443_v59  ;;  %v7472_v59 = vld [vmem:[%s10885_s1 + $0x270] sm:$0xff]  ;;  %1364 = vmatpush.msra.mxu1 %v7467_v25 }
 0x204   :  { %11548 = vst [vmem:[#allocation83_spill] sm:$0xff] %v7448_v0  ;;  %1384 = vmatpush.msra.mxu2 %v7472_v59  ;;  %v7486_v0 = vld [vmem:[%s10885_s1 + $0x240] sm:$0xff] }
 0x205   :  { %11549 = vst [vmem:[#allocation84_spill] sm:$0xff] %v7455_v52  ;;  %v7479_v52 = vld [vmem:[%s10885_s1 + $0x278] sm:$0xff]  ;;  %1345 = vmatpush.msra.mxu0 %v7486_v0 }
 0x206   :  { %11550 = vst [vmem:[#allocation87_spill] sm:$0xff] %v7462_v7  ;;  %1404 = vmatpush.msra.mxu3 %v7479_v52  ;;  %v7491_v7 = vld [vmem:[%s10885_s1 + $0x248] sm:$0xff] }
 0x207   :  { %11551 = vst [vmem:[#allocation88_spill] sm:$0xff] %v7467_v25  ;;  %v7496_v25 = vld [vmem:[%s10885_s1 + $0x250] sm:$0xff]  ;;  %1365 = vmatpush.msra.mxu1 %v7491_v7 }
 0x208   :  { %11552 = vst [vmem:[#allocation89_spill] sm:$0xff] %v7472_v59  ;;  %1385 = vmatpush.msra.mxu2 %v7496_v25  ;;  %v7510_v59 = vld [vmem:[%s10885_s1 + $0x220] sm:$0xff] }
 0x209   :  { %11553 = vst [vmem:[#allocation90_spill] sm:$0xff] %v7479_v52  ;;  %v7503_v52 = vld [vmem:[%s10885_s1 + $0x258] sm:$0xff]  ;;  %1346 = vmatpush.msra.mxu0 %v7510_v59 }
 0x20a   :  { %11554 = vst [vmem:[#allocation91_spill] sm:$0xff] %v7486_v0  ;;  %1405 = vmatpush.msra.mxu3 %v7503_v52  ;;  %v7515_v0 = vld [vmem:[%s10885_s1 + $0x228] sm:$0xff] }
 0x20b   :  { %11555 = vst [vmem:[#allocation93_spill] sm:$0xff] %v7491_v7  ;;  %v7520_v7 = vld [vmem:[%s10885_s1 + $0x230] sm:$0xff]  ;;  %1366 = vmatpush.msra.mxu1 %v7515_v0 }
 0x20c   :  { %11556 = vst [vmem:[#allocation94_spill] sm:$0xff] %v7496_v25  ;;  %1386 = vmatpush.msra.mxu2 %v7520_v7  ;;  %v7534_v25 = vld [vmem:[%s10885_s1 + $0x200] sm:$0xff] }
 0x20d   :  { %11557 = vst [vmem:[#allocation95_spill] sm:$0xff] %v7503_v52  ;;  %v7527_v52 = vld [vmem:[%s10885_s1 + $0x238] sm:$0xff]  ;;  %1347 = vmatpush.msra.mxu0 %v7534_v25 }
 0x20e   :  { %11558 = vst [vmem:[#allocation96_spill] sm:$0xff] %v7510_v59  ;;  %1406 = vmatpush.msra.mxu3 %v7527_v52  ;;  %v7539_v59 = vld [vmem:[%s10885_s1 + $0x208] sm:$0xff] }
 0x20f   :  { %11559 = vst [vmem:[#allocation97_spill] sm:$0xff] %v7515_v0  ;;  %v7544_v0 = vld [vmem:[%s10885_s1 + $0x210] sm:$0xff]  ;;  %1367 = vmatpush.msra.mxu1 %v7539_v59  ;;  %1484 = vmatpush.msrb.mxu0 %v6756_v34  ;;  %v11564_v34 = vld [vmem:[#allocation20_spill] sm:$0xff] }
 0x210   :  { %11560 = vst [vmem:[#allocation98_spill] sm:$0xff] %v7520_v7  ;;  %1387 = vmatpush.msra.mxu2 %v7544_v0 }
 0x211   :  { %11561 = vst [vmem:[#allocation16_spill] sm:$0xff] %v7527_v52  ;;  %v7551_v52 = vld [vmem:[%s10885_s1 + $0x218] sm:$0xff]  ;;  %1504 = vmatpush.msrb.mxu1 %v6761_v35  ;;  %1485 = vmatpush.msrb.mxu0 %v6784_v38  ;;  %v123_v35 = vadd.f32 %v11564_v34, %v6596_v57  ;;  %v11583_v34 = vld [vmem:[#allocation32_spill] sm:$0xff] }
 0x212   :  { %1407 = vmatpush.msra.mxu3 %v7551_v52  ;;  %1524 = vmatpush.msrb.mxu2 %v6766_v36  ;;  %v11565_v36 = vld [vmem:[#allocation21_spill] sm:$0xff] }
 0x213   :  { %1505 = vmatpush.msrb.mxu1 %v6789_v40  ;;  %1486 = vmatpush.msrb.mxu0 %v6808_v43 }
 0x214   :  { %1544 = vmatpush.msrb.mxu3 %v6773_v63  ;;  %1525 = vmatpush.msrb.mxu2 %v6794_v41  ;;  %v164_v63 = vadd.f32 %v11565_v36, %v6599_v39  ;;  %v11584_v36 = vld [vmem:[#allocation33_spill] sm:$0xff] }
 0x215   :  { %1506 = vmatpush.msrb.mxu1 %v6813_v44  ;;  %1487 = vmatpush.msrb.mxu0 %v6832_v47 }
 0x216   :  { %1545 = vmatpush.msrb.mxu3 %v6801_v42  ;;  %1526 = vmatpush.msrb.mxu2 %v6818_v45 }
 0x217   :  { %1507 = vmatpush.msrb.mxu1 %v6837_v48  ;;  %1488 = vmatpush.msrb.mxu0 %v6856_v51  ;;  %v11569_v51 = vld [vmem:[#allocation8_spill] sm:$0xff] }
 0x218   :  { %1546 = vmatpush.msrb.mxu3 %v6825_v46  ;;  %1527 = vmatpush.msrb.mxu2 %v6842_v49  ;;  %v11567_v46 = vld [vmem:[#allocation26_spill] sm:$0xff] }
 0x219   :  { %1508 = vmatpush.msrb.mxu1 %v6861_v61  ;;  %1489 = vmatpush.msrb.mxu0 %v6886_v2  ;;  %v246_v47 = vadd.f32 %v11567_v46, %v6624_v9 }
 0x21a   :  { %1547 = vmatpush.msrb.mxu3 %v6849_v50  ;;  %1528 = vmatpush.msrb.mxu2 %v6866_v53  ;;  %v11570_v53 = vld [vmem:[#allocation9_spill] sm:$0xff] }
 0x21b   :  { %1509 = vmatpush.msrb.mxu1 %v6891_v3  ;;  %1490 = vmatpush.msrb.mxu0 %v6910_v10  ;;  %v11572_v3 = vld [vmem:[#allocation11_spill] sm:$0xff] }
 0x21c   :  { %1548 = vmatpush.msrb.mxu3 %v6879_v26  ;;  %1529 = vmatpush.msrb.mxu2 %v6896_v5  ;;  %v11571_v26 = vld [vmem:[#allocation10_spill] sm:$0xff]  ;;  %v11573_v5 = vld [vmem:[#allocation12_spill] sm:$0xff] }
 0x21d   :  { %1510 = vmatpush.msrb.mxu1 %v6915_v11  ;;  %1491 = vmatpush.msrb.mxu0 %v6934_v19  ;;  %v11574_v11 = vld [vmem:[#allocation13_spill] sm:$0xff]  ;;  %v11576_v19 = vld [vmem:[#allocation15_spill] sm:$0xff] }
 0x21e   :  { %1549 = vmatpush.msrb.mxu3 %v6903_v8  ;;  %1530 = vmatpush.msrb.mxu2 %v6920_v15  ;;  %v11575_v15 = vld [vmem:[#allocation14_spill] sm:$0xff] }
 0x21f   :  { %1511 = vmatpush.msrb.mxu1 %v6939_v20  ;;  %1492 = vmatpush.msrb.mxu0 %v6960_v27  ;;  %v11577_v20 = vld [vmem:[#allocation22_spill] sm:$0xff]  ;;  %v11580_v27 = vld [vmem:[#allocation27_spill] sm:$0xff] }
 0x220   :  { %1550 = vmatpush.msrb.mxu3 %v6927_v18  ;;  %1531 = vmatpush.msrb.mxu2 %v6944_v21  ;;  %v11578_v21 = vld [vmem:[#allocation23_spill] sm:$0xff] }
 0x221   :  { %1512 = vmatpush.msrb.mxu1 %v6965_v28  ;;  %1493 = vmatpush.msrb.mxu0 %v11570_v53  ;;  %v11581_v28 = vld [vmem:[#allocation30_spill] sm:$0xff]  ;;  %v11593_v53 = vld [vmem:[#allocation40_spill] sm:$0xff] }
 0x222   :  { %1551 = vmatpush.msrb.mxu3 %v6951_v23  ;;  %1532 = vmatpush.msrb.mxu2 %v6970_v29  ;;  %v11579_v23 = vld [vmem:[#allocation24_spill] sm:$0xff]  ;;  %v11582_v29 = vld [vmem:[#allocation31_spill] sm:$0xff] }
 0x223   :  { %1513 = vmatpush.msrb.mxu1 %v11571_v26  ;;  %1494 = vmatpush.msrb.mxu0 %v11574_v11  ;;  %v11596_v11 = vld [vmem:[#allocation43_spill] sm:$0xff] }
 0x224   :  { %1552 = vmatpush.msrb.mxu3 %v11569_v51  ;;  %1533 = vmatpush.msrb.mxu2 %v11572_v3  ;;  %v11594_v3 = vld [vmem:[#allocation41_spill] sm:$0xff] }
 0x225   :  { %1514 = vmatpush.msrb.mxu1 %v11575_v15  ;;  %1495 = vmatpush.msrb.mxu0 %v11578_v21  ;;  %v11597_v15 = vld [vmem:[#allocation46_spill] sm:$0xff] }
 0x226   :  { %1553 = vmatpush.msrb.mxu3 %v11573_v5  ;;  %1534 = vmatpush.msrb.mxu2 %v11576_v19  ;;  %v11595_v5 = vld [vmem:[#allocation42_spill] sm:$0xff] }
 0x227   :  { %1515 = vmatpush.msrb.mxu1 %v11579_v23  ;;  %1496 = vmatpush.msrb.mxu0 %v11582_v29  ;;  %v11599_v21 = vld [vmem:[#allocation50_spill] sm:$0xff] }
 0x228   :  { %1554 = vmatpush.msrb.mxu3 %v11577_v20  ;;  %1535 = vmatpush.msrb.mxu2 %v11580_v27  ;;  %v11598_v20 = vld [vmem:[#allocation49_spill] sm:$0xff] }
 0x229   :  { %1516 = vmatpush.msrb.mxu1 %v11583_v34 }
 0x22a   :  { %1555 = vmatpush.msrb.mxu3 %v11581_v28  ;;  %1536 = vmatpush.msrb.mxu2 %v11584_v36 }
 0x25d   :  { %v7555_v7 = vpop.f32.mrf.mxu0  ;;  %v7557_v58 = vpop.f32.mrf.mxu1 }
 0x25e   :  { %11562 = vst [vmem:[#allocation17_spill] sm:$0xff] %v7555_v7  ;;  %v8058_v7 = vld [vmem:[%s10887_s2 + $0x20] sm:$0xff] }
 0x25f   :  { %11563 = vst [vmem:[#allocation19_spill] sm:$0xff] %v7557_v58  ;;  %v8053_v58 = vld [vmem:[%s10887_s2 + $0x58] sm:$0xff] }
 0x260   :  { %11669 = vst [vmem:[#allocation40_spill] sm:$0xff] %v8058_v7 }
 0x264   :  { %v7577_v38 = vpop.f32.mrf.mxu3  ;;  %v7597_v48 = vpop.f32.mrf.mxu2 }
 0x265   :  { %11566 = vst [vmem:[#allocation18_spill] sm:$0xff] %v7577_v38  ;;  %v1128_v40 = vpop.f32.mrf.mxu0  ;;  %v1148_v41 = vpop.f32.mrf.mxu1  ;;  %v8048_v38 = vld [vmem:[%s10887_s2 + $0x50] sm:$0xff] }
 0x266   :  { %v1191_v42 = vadd.f32 %v1128_v40, %v123_v35  ;;  %v1192_v43 = vadd.f32 %v1148_v41, %v164_v63  ;;  %11568 = vst [vmem:[#allocation20_spill] sm:$0xff] %v7597_v48  ;;  %v11585_v63 = vld [vmem:[#allocation34_spill] sm:$0xff]  ;;  %v11586_v41 = vld [vmem:[#allocation105_spill] sm:$0xff] }
 0x267   :  { %1556 = vmatpush.msrb.mxu3 %v11585_v63  ;;  %v8041_v48 = vld [vmem:[%s10887_s2 + $0x48] sm:$0xff] }
 0x268   :  { %v4695_v44 = vmul.f32 -1.442695, %v1191_v42  ;;  %v4696_v45 = vmul.f32 -1.442695, %v1192_v43  ;;  %v11587_v42 = vld [vmem:[#allocation25_spill] sm:$0xff] }
 0x269   :  { %v205_v43 = vadd.f32 %v11587_v42, %v11586_v41 }
 0x26a   :  { %5224 = vpow2.f32 %v4695_v44  ;;  %v11588_v44 = vld [vmem:[#allocation35_spill] sm:$0xff] }
 0x26b   :  { %5226 = vpow2.f32 %v4696_v45  ;;  %1497 = vmatpush.msrb.mxu0 %v11588_v44  ;;  %v11589_v45 = vld [vmem:[#allocation36_spill] sm:$0xff] }
 0x26c   :  { %v1188_v49 = vpop.f32.mrf.mxu3  ;;  %v1168_v35 = vpop.f32.mrf.mxu2  ;;  %1517 = vmatpush.msrb.mxu1 %v11589_v45 }
 0x26d   :  { %v1194_v50 = vadd.f32 %v1188_v49, %v246_v47  ;;  %v11590_v47 = vld [vmem:[#allocation37_spill] sm:$0xff]  ;;  %v11591_v49 = vld [vmem:[#allocation38_spill] sm:$0xff]  ;;  %v1193_v51 = vadd.f32 %v1168_v35, %v205_v43 }
 0x26e   :  { %1537 = vmatpush.msrb.mxu2 %v11590_v47  ;;  %1557 = vmatpush.msrb.mxu3 %v11591_v49  ;;  %11666 = vst [vmem:[#allocation37_spill] sm:$0xff] %v8041_v48 }
 0x26f   :  { %v4697_v61 = vmul.f32 -1.442695, %v1194_v50  ;;  %1518 = vmatpush.msrb.mxu1 %v11593_v53  ;;  %11667 = vst [vmem:[#allocation38_spill] sm:$0xff] %v8048_v38 }
 0x270   :  { %v5225_v2 = vpop.eup %5224  ;;  %1538 = vmatpush.msrb.mxu2 %v11594_v3  ;;  %1558 = vmatpush.msrb.mxu3 %v11595_v5 }
 0x271   :  { %v5227_v8 = vpop.eup %5226  ;;  %v1198_v10 = vadd.f32 1.0, %v5225_v2  ;;  %5228 = vpow2.f32 %v4697_v61  ;;  %v11592_v61 = vld [vmem:[#allocation39_spill] sm:$0xff]  ;;  %1519 = vmatpush.msrb.mxu1 %v11597_v15 }
 0x272   :  { %v1217_v18 = vadd.f32 1.0, %v5227_v8  ;;  %1498 = vmatpush.msrb.mxu0 %v11592_v61  ;;  %1539 = vmatpush.msrb.mxu2 %v11598_v20  ;;  %11668 = vst [vmem:[#allocation39_spill] sm:$0xff] %v8053_v58 }
 0x273   :  { %5230 = vrcp.f32 %v1198_v10  ;;  %1559 = vmatpush.msrb.mxu3 %v11599_v21  ;;  %v1210_v27 = vand.u32 2147483648, %v1198_v10  ;;  %v1208_v34 = vand.u32 2147483647, %v1198_v10  ;;  %vm1204_vm10 = vweird.f32 %v1198_v10 }
 0x274   :  { %5232 = vrcp.f32 %v1217_v18  ;;  %1499 = vmatpush.msrb.mxu0 %v11596_v11  ;;  %v1229_v28 = vand.u32 2147483648, %v1217_v18  ;;  %v1227_v36 = vand.u32 2147483647, %v1217_v18  ;;  %vm1223_vm11 = vweird.f32 %v1217_v18 }
 0x275   :  { %v1211_v42 = vor.u32 1.1754944e-38, %v1210_v27  ;;  %vm1209_vm14 = vcmp.eq.f32.partialorder %v1208_v34, 8.507059e+37  ;;  %v11622_v27 = vld [vmem:[#allocation77_spill] sm:$0xff]  ;;  %v11625_v34 = vld [vmem:[#allocation80_spill] sm:$0xff] }
 0x276   :  { %v1230_v45 = vor.u32 1.1754944e-38, %v1229_v28  ;;  %vm1228_vm15 = vcmp.eq.f32.partialorder %v1227_v36, 8.507059e+37  ;;  %v11623_v28 = vld [vmem:[#allocation78_spill] sm:$0xff]  ;;  %v11627_v36 = vld [vmem:[#allocation83_spill] sm:$0xff] }
 0x277   :  { %v5229_v40 = vpop.eup %5228 }
 0x278   :  { %v1237_v46 = vadd.f32 1.0, %v5229_v40 }
 0x279   :  { %v5231_v50 = vpop.eup %5230 }
 0x27a   :  { %v5233_v26 = vpop.eup %5232  ;;  %v1200_v2 = vmul.f32 %v5231_v50, %v1198_v10  ;;  %5234 = vrcp.f32 %v1237_v46  ;;  %vm1205_vm8 = vweird.f32 %v5231_v50  ;;  %v1249_v11 = vand.u32 2147483648, %v1237_v46 }
 0x27b   :  { %v1219_v8 = vmul.f32 %v5233_v26, %v1217_v18  ;;  %5236 = vtanh.f32 %v1193_v51  ;;  %vm1224_vm9 = vweird.f32 %v5233_v26  ;;  %vm1206_vm12 = vmor %vm1204_vm10, %vm1205_vm8  ;;  %vm1243_vm1 = vweird.f32 %v1237_v46 }
 0x27c   :  { %v1201_v19 = vsub.f32 1.0, %v1200_v2  ;;  %vm1225_vm13 = vmor %vm1223_vm11, %vm1224_vm9 }
 0x27d   :  { %v1220_v23 = vsub.f32 1.0, %v1219_v8 }
 0x27e   :  { %v1202_v29 = vmul.f32 %v5231_v50, %v1201_v19  ;;  %v1250_v19 = vor.u32 1.1754944e-38, %v1249_v11  ;;  %v7739_v11 = vld [vmem:[%s10887_s2 + $0x1c8] sm:$0xff] }
 0x27f   :  { %v1221_v35 = vmul.f32 %v5233_v26, %v1220_v23  ;;  %v11621_v23 = vld [vmem:[#allocation76_spill] sm:$0xff] }
 0x280   :  { %v5235_v63 = vpop.eup %5234  ;;  %v1203_v40 = vadd.f32 %v5231_v50, %v1202_v29  ;;  %v11624_v29 = vld [vmem:[#allocation79_spill] sm:$0xff] }
 0x281   :  { %v1222_v43 = vadd.f32 %v5233_v26, %v1221_v35  ;;  %v1239_v44 = vmul.f32 %v5235_v63, %v1237_v46  ;;  %v5237_v49 = vpop.eup %5236  ;;  %vm1244_vm0 = vweird.f32 %v5235_v63  ;;  %v11626_v35 = vld [vmem:[#allocation82_spill] sm:$0xff] }
 0x282   :  { %v1207_v47 = vsel %vm1206_vm12, %v5231_v50, %v1203_v40  ;;  %v1247_v50 = vand.u32 2147483647, %v1237_v46  ;;  %vm1245_vm2 = vmor %vm1243_vm1, %vm1244_vm0  ;;  %v11620_v46 = vld [vmem:[#allocation75_spill] sm:$0xff] }
 0x283   :  { %v1212_v51 = vsel %vm1209_vm14, %v1211_v42, %v1207_v47  ;;  %v1226_v61 = vsel %vm1225_vm13, %v5233_v26, %v1222_v43  ;;  %v1240_v53 = vsub.f32 1.0, %v1239_v44  ;;  %v11629_v40 = vld [vmem:[#allocation87_spill] sm:$0xff]  ;;  %v11630_v42 = vld [vmem:[#allocation88_spill] sm:$0xff]  ;;  %v11631_v43 = vld [vmem:[#allocation89_spill] sm:$0xff] }
 0x284   :  { %v1231_v2 = vsel %vm1228_vm15, %v1230_v45, %v1226_v61  ;;  %v1254_v3 = vmul.f32 %v5237_v49, %v1212_v51  ;;  %vm1248_vm3 = vcmp.eq.f32.partialorder %v1247_v50, 8.507059e+37  ;;  %v11632_v44 = vld [vmem:[#allocation90_spill] sm:$0xff]  ;;  %v11633_v45 = vld [vmem:[#allocation91_spill] sm:$0xff]  ;;  %v11634_v47 = vld [vmem:[#allocation93_spill] sm:$0xff] }
 0x285   :  { %v1253_v5 = vmul.f32 %v1231_v2, %v7168_v32  ;;  %v1241_v8 = vmul.f32 %v5235_v63, %v1240_v53  ;;  %v11600_v32 = vld [vmem:[#allocation51_spill] sm:$0xff]  ;;  %v11635_v49 = vld [vmem:[#allocation94_spill] sm:$0xff]  ;;  %v11637_v61 = vld [vmem:[#allocation96_spill] sm:$0xff] }
 0x286   :  { %v11636_v51 = vld [vmem:[#allocation95_spill] sm:$0xff]  ;;  %v11638_v53 = vld [vmem:[#allocation97_spill] sm:$0xff]  ;;  %v11639_v2 = vld [vmem:[#allocation98_spill] sm:$0xff] }
 0x287   :  { %v7636_v10 = vadd.f32 %v1254_v3, %v1253_v5  ;;  %v1242_v18 = vadd.f32 %v5235_v63, %v1241_v8  ;;  %v11640_v3 = vld [vmem:[#allocation16_spill] sm:$0xff]  ;;  %v7711_v8 = vld [vmem:[%s10887_s2 + $0x1e8] sm:$0xff]  ;;  %v7744_v50 = vld [vmem:[%s10887_s2 + $0x1d0] sm:$0xff] }
 0x288   :  { %v7706_v5 = vld [vmem:[%s10887_s2 + $0x1e0] sm:$0xff] }
 0x289   :  { %5238 = vtanh.f32 %v7636_v10  ;;  %v1246_v15 = vsel %vm1245_vm2, %v5235_v63, %v1242_v18  ;;  %v11628_v63 = vld [vmem:[#allocation84_spill] sm:$0xff] }
 0x28a   :  { %v1251_v20 = vsel %vm1248_vm3, %v1250_v19, %v1246_v15  ;;  %v7734_v18 = vld [vmem:[%s10887_s2 + $0x1c0] sm:$0xff]  ;;  %v7751_v15 = vld [vmem:[%s10887_s2 + $0x1d8] sm:$0xff] }
 0x28b   :  { %v7758_v19 = vld [vmem:[%s10887_s2 + $0x1a0] sm:$0xff] }
 0x28f   :  { %v5239_v26 = vpop.eup %5238 }
 0x290   :  { %v1257_v21 = vmul.f32 %v5239_v26, %v1251_v20  ;;  %v7763_v26 = vld [vmem:[%s10887_s2 + $0x1a8] sm:$0xff]  ;;  %v7768_v20 = vld [vmem:[%s10887_s2 + $0x1b0] sm:$0xff] }
 0x292   :  { %1348 = vmatmul.f32.vlgmr.msra.gmra.mxu0 %v1257_v21  ;;  %1368 = vmatmul.f32.vlgmr.msra.gmra.mxu1 %v1257_v21 }
 0x293   :  { %1388 = vmatmul.f32.vlgmr.msra.gmra.mxu2 %v1257_v21  ;;  %1408 = vmatmul.f32.vlgmr.msra.gmra.mxu3 %v1257_v21 }
 0x294   :  { %1705 = vmatpush.msra.mxu0 %v7174_v12  ;;  %1725 = vmatpush.msra.mxu1 %v7179_v54  ;;  %v11601_v12 = vld [vmem:[#allocation52_spill] sm:$0xff]  ;;  %v11602_v54 = vld [vmem:[#allocation53_spill] sm:$0xff] }
 0x295   :  { %1745 = vmatpush.msra.mxu2 %v7184_v55  ;;  %1765 = vmatpush.msra.mxu3 %v7189_v56  ;;  %v11603_v55 = vld [vmem:[#allocation54_spill] sm:$0xff]  ;;  %v11604_v56 = vld [vmem:[#allocation55_spill] sm:$0xff] }
 0x296   :  { %1706 = vmatpush.msra.mxu0 %v7198_v60  ;;  %1726 = vmatpush.msra.mxu1 %v7203_v6  ;;  %v11605_v60 = vld [vmem:[#allocation56_spill] sm:$0xff]  ;;  %v11606_v6 = vld [vmem:[#allocation57_spill] sm:$0xff] }
 0x297   :  { %1746 = vmatpush.msra.mxu2 %v7208_v24  ;;  %1766 = vmatpush.msra.mxu3 %v7215_v14  ;;  %v11607_v24 = vld [vmem:[#allocation58_spill] sm:$0xff]  ;;  %v11608_v14 = vld [vmem:[#allocation59_spill] sm:$0xff] }
 0x298   :  { %1707 = vmatpush.msra.mxu0 %v7220_v62  ;;  %1727 = vmatpush.msra.mxu1 %v7225_v16  ;;  %v11609_v62 = vld [vmem:[#allocation60_spill] sm:$0xff]  ;;  %v11610_v16 = vld [vmem:[#allocation62_spill] sm:$0xff] }
 0x299   :  { %1747 = vmatpush.msra.mxu2 %v7232_v1  ;;  %1767 = vmatpush.msra.mxu3 %v7237_v13  ;;  %v11611_v1 = vld [vmem:[#allocation63_spill] sm:$0xff]  ;;  %v11612_v13 = vld [vmem:[#allocation64_spill] sm:$0xff] }
 0x29a   :  { %1500 = vmatmul.f32.vlgmr.msrb.gmra.mxu0 %v1257_v21  ;;  %1520 = vmatmul.f32.vlgmr.msrb.gmra.mxu1 %v1257_v21 }
 0x29b   :  { %1540 = vmatmul.f32.vlgmr.msrb.gmra.mxu2 %v1257_v21  ;;  %1560 = vmatmul.f32.vlgmr.msrb.gmra.mxu3 %v1257_v21  ;;  %v7775_v21 = vld [vmem:[%s10887_s2 + $0x1b8] sm:$0xff] }
 0x29c   :  { %1708 = vmatpush.msra.mxu0 %v7242_v22  ;;  %1728 = vmatpush.msra.mxu1 %v7249_v17  ;;  %v11613_v22 = vld [vmem:[#allocation67_spill] sm:$0xff]  ;;  %v11614_v17 = vld [vmem:[#allocation69_spill] sm:$0xff] }
 0x29d   :  { %1748 = vmatpush.msra.mxu2 %v7254_v30  ;;  %1768 = vmatpush.msra.mxu3 %v7259_v31  ;;  %v11615_v30 = vld [vmem:[#allocation70_spill] sm:$0xff]  ;;  %v11616_v31 = vld [vmem:[#allocation71_spill] sm:$0xff] }
 0x29e   :  { %1709 = vmatpush.msra.mxu0 %v7270_v33  ;;  %1729 = vmatpush.msra.mxu1 %v7275_v37  ;;  %v11617_v33 = vld [vmem:[#allocation72_spill] sm:$0xff]  ;;  %v11618_v37 = vld [vmem:[#allocation73_spill] sm:$0xff] }
 0x29f   :  { %1749 = vmatpush.msra.mxu2 %v7280_v4  ;;  %1769 = vmatpush.msra.mxu3 %v11600_v32  ;;  %v11619_v4 = vld [vmem:[#allocation74_spill] sm:$0xff]  ;;  %v7782_v32 = vld [vmem:[%s10887_s2 + $0x180] sm:$0xff] }
 0x2a0   :  { %1710 = vmatpush.msra.mxu0 %v11601_v12  ;;  %1730 = vmatpush.msra.mxu1 %v11602_v54  ;;  %v7787_v12 = vld [vmem:[%s10887_s2 + $0x188] sm:$0xff]  ;;  %v7792_v54 = vld [vmem:[%s10887_s2 + $0x190] sm:$0xff] }
 0x2a1   :  { %1750 = vmatpush.msra.mxu2 %v11603_v55  ;;  %1770 = vmatpush.msra.mxu3 %v11604_v56  ;;  %v7799_v55 = vld [vmem:[%s10887_s2 + $0x198] sm:$0xff]  ;;  %v7806_v56 = vld [vmem:[%s10887_s2 + $0x160] sm:$0xff] }
 0x2a2   :  { %1711 = vmatpush.msra.mxu0 %v11605_v60  ;;  %1731 = vmatpush.msra.mxu1 %v11606_v6  ;;  %v7811_v60 = vld [vmem:[%s10887_s2 + $0x168] sm:$0xff]  ;;  %v7816_v6 = vld [vmem:[%s10887_s2 + $0x170] sm:$0xff] }
 0x2a3   :  { %1751 = vmatpush.msra.mxu2 %v11607_v24  ;;  %1771 = vmatpush.msra.mxu3 %v11608_v14  ;;  %v11643_v24 = vld [vmem:[#allocation28_spill] sm:$0xff] }
 0x2a4   :  { %1712 = vmatpush.msra.mxu0 %v11609_v62  ;;  %1732 = vmatpush.msra.mxu1 %v11610_v16  ;;  %v126_v14 = vadd.f32 %v11643_v24, %v6596_v57  ;;  %v11644_v62 = vld [vmem:[#allocation29_spill] sm:$0xff] }
 0x2a5   :  { %1752 = vmatpush.msra.mxu2 %v11611_v1  ;;  %1772 = vmatpush.msra.mxu3 %v11612_v13  ;;  %v167_v16 = vadd.f32 %v11644_v62, %v6599_v39  ;;  %v7829_v13 = vld [vmem:[%s10887_s2 + $0x178] sm:$0xff]  ;;  %v7941_v24 = vld [vmem:[%s10887_s2 + $0xc8] sm:$0xff] }
 0x2a6   :  { %1713 = vmatpush.msra.mxu0 %v11613_v22  ;;  %1733 = vmatpush.msra.mxu1 %v11614_v17  ;;  %11650 = vst [vmem:[#allocation12_spill] sm:$0xff] %v7941_v24  ;;  %v7953_v62 = vld [vmem:[%s10887_s2 + $0xd8] sm:$0xff] }
 0x2a7   :  { %1753 = vmatpush.msra.mxu2 %v11615_v30  ;;  %1773 = vmatpush.msra.mxu3 %v11616_v31  ;;  %v7836_v30 = vld [vmem:[%s10887_s2 + $0x140] sm:$0xff]  ;;  %v7841_v31 = vld [vmem:[%s10887_s2 + $0x148] sm:$0xff]  ;;  %11652 = vst [vmem:[#allocation14_spill] sm:$0xff] %v7953_v62 }
 0x2a8   :  { %1714 = vmatpush.msra.mxu0 %v11617_v33  ;;  %1734 = vmatpush.msra.mxu1 %v11618_v37  ;;  %v7846_v33 = vld [vmem:[%s10887_s2 + $0x150] sm:$0xff] }
 0x2a9   :  { %1754 = vmatpush.msra.mxu2 %v11619_v4  ;;  %1774 = vmatpush.msra.mxu3 %v11620_v46  ;;  %v7853_v46 = vld [vmem:[%s10887_s2 + $0x158] sm:$0xff] }
 0x2aa   :  { %1715 = vmatpush.msra.mxu0 %v11621_v23  ;;  %1735 = vmatpush.msra.mxu1 %v11622_v27  ;;  %v7860_v23 = vld [vmem:[%s10887_s2 + $0x120] sm:$0xff]  ;;  %v7865_v27 = vld [vmem:[%s10887_s2 + $0x128] sm:$0xff] }
 0x2ab   :  { %1755 = vmatpush.msra.mxu2 %v11623_v28  ;;  %1775 = vmatpush.msra.mxu3 %v11624_v29  ;;  %v7870_v28 = vld [vmem:[%s10887_s2 + $0x130] sm:$0xff] }
 0x2ac   :  { %1716 = vmatpush.msra.mxu0 %v11625_v34  ;;  %1736 = vmatpush.msra.mxu1 %v11626_v35  ;;  %v7877_v35 = vld [vmem:[%s10887_s2 + $0x138] sm:$0xff] }
 0x2ad   :  { %1756 = vmatpush.msra.mxu2 %v11627_v36  ;;  %1776 = vmatpush.msra.mxu3 %v11628_v63  ;;  %v7884_v36 = vld [vmem:[%s10887_s2 + $0x100] sm:$0xff]  ;;  %v7889_v63 = vld [vmem:[%s10887_s2 + $0x108] sm:$0xff] }
 0x2ae   :  { %1717 = vmatpush.msra.mxu0 %v11629_v40  ;;  %1737 = vmatpush.msra.mxu1 %v11630_v42  ;;  %v7894_v40 = vld [vmem:[%s10887_s2 + $0x110] sm:$0xff]  ;;  %v7901_v42 = vld [vmem:[%s10887_s2 + $0x118] sm:$0xff] }
 0x2af   :  { %1757 = vmatpush.msra.mxu2 %v11631_v43  ;;  %1777 = vmatpush.msra.mxu3 %v11632_v44  ;;  %v11646_v43 = vld [vmem:[#allocation45_spill] sm:$0xff] }
 0x2b0   :  { %1718 = vmatpush.msra.mxu0 %v11633_v45  ;;  %1738 = vmatpush.msra.mxu1 %v11634_v47  ;;  %v249_v44 = vadd.f32 %v11646_v43, %v6624_v9  ;;  %v7910_v45 = vld [vmem:[%s10887_s2 + $0xe0] sm:$0xff]  ;;  %v7915_v47 = vld [vmem:[%s10887_s2 + $0xe8] sm:$0xff] }
 0x2b1   :  { %1758 = vmatpush.msra.mxu2 %v11635_v49  ;;  %1778 = vmatpush.msra.mxu3 %v11636_v51  ;;  %v7920_v49 = vld [vmem:[%s10887_s2 + $0xf0] sm:$0xff]  ;;  %v7987_v43 = vld [vmem:[%s10887_s2 + $0x88] sm:$0xff] }
 0x2b2   :  { %1719 = vmatpush.msra.mxu0 %v11637_v61  ;;  %1739 = vmatpush.msra.mxu1 %v11638_v53  ;;  %v7929_v53 = vld [vmem:[%s10887_s2 + $0xf8] sm:$0xff]  ;;  %11658 = vst [vmem:[#allocation30_spill] sm:$0xff] %v7987_v43 }
 0x2b3   :  { %1759 = vmatpush.msra.mxu2 %v11639_v2  ;;  %1779 = vmatpush.msra.mxu3 %v11640_v3  ;;  %11648 = vst [vmem:[#allocation10_spill] sm:$0xff] %v7929_v53  ;;  %v7936_v3 = vld [vmem:[%s10887_s2 + $0xc0] sm:$0xff] }
 0x2b4   :  { %1720 = vmatpush.msra.mxu0 %v7534_v25  ;;  %1740 = vmatpush.msra.mxu1 %v7539_v59  ;;  %v7716_v25 = vld [vmem:[%s10887_s2 + $0x1f0] sm:$0xff]  ;;  %11649 = vst [vmem:[#allocation11_spill] sm:$0xff] %v7936_v3 }
 0x2b5   :  { %1760 = vmatpush.msra.mxu2 %v7544_v0  ;;  %1780 = vmatpush.msra.mxu3 %v7551_v52  ;;  %v7723_v0 = vld [vmem:[%s10887_s2 + $0x1f8] sm:$0xff] }
 0x2b6   :  { %1857 = vmatpush.msrb.mxu0 %v7706_v5  ;;  %1877 = vmatpush.msrb.mxu1 %v7711_v8 }
 0x2b7   :  { %1897 = vmatpush.msrb.mxu2 %v7716_v25  ;;  %1917 = vmatpush.msrb.mxu3 %v7723_v0 }
 0x2b8   :  { %1858 = vmatpush.msrb.mxu0 %v7734_v18  ;;  %1878 = vmatpush.msrb.mxu1 %v7739_v11 }
 0x2b9   :  { %1898 = vmatpush.msrb.mxu2 %v7744_v50  ;;  %1918 = vmatpush.msrb.mxu3 %v7751_v15 }
 0x2ba   :  { %1859 = vmatpush.msrb.mxu0 %v7758_v19  ;;  %1879 = vmatpush.msrb.mxu1 %v7763_v26 }
 0x2bb   :  { %1899 = vmatpush.msrb.mxu2 %v7768_v20  ;;  %1919 = vmatpush.msrb.mxu3 %v7775_v21 }
 0x2bc   :  { %1860 = vmatpush.msrb.mxu0 %v7782_v32  ;;  %1880 = vmatpush.msrb.mxu1 %v7787_v12 }
 0x2bd   :  { %1900 = vmatpush.msrb.mxu2 %v7792_v54  ;;  %1920 = vmatpush.msrb.mxu3 %v7799_v55 }
 0x2be   :  { %1861 = vmatpush.msrb.mxu0 %v7806_v56  ;;  %1881 = vmatpush.msrb.mxu1 %v7811_v60 }
 0x2bf   :  { %1901 = vmatpush.msrb.mxu2 %v7816_v6  ;;  %1921 = vmatpush.msrb.mxu3 %v7829_v13 }
 0x2c0   :  { %1862 = vmatpush.msrb.mxu0 %v7836_v30  ;;  %1882 = vmatpush.msrb.mxu1 %v7841_v31 }
 0x2c1   :  { %1902 = vmatpush.msrb.mxu2 %v7846_v33  ;;  %1922 = vmatpush.msrb.mxu3 %v7853_v46 }
 0x2c2   :  { %1863 = vmatpush.msrb.mxu0 %v7860_v23  ;;  %1883 = vmatpush.msrb.mxu1 %v7865_v27 }
 0x2c3   :  { %1903 = vmatpush.msrb.mxu2 %v7870_v28  ;;  %1923 = vmatpush.msrb.mxu3 %v7877_v35 }
 0x2c4   :  { %1864 = vmatpush.msrb.mxu0 %v7884_v36  ;;  %1884 = vmatpush.msrb.mxu1 %v7889_v63 }
 0x2c5   :  { %1904 = vmatpush.msrb.mxu2 %v7894_v40  ;;  %1924 = vmatpush.msrb.mxu3 %v7901_v42 }
 0x2c6   :  { %1865 = vmatpush.msrb.mxu0 %v7910_v45  ;;  %1885 = vmatpush.msrb.mxu1 %v7915_v47 }
 0x2c7   :  { %1905 = vmatpush.msrb.mxu2 %v7920_v49  ;;  %1925 = vmatpush.msrb.mxu3 %v7929_v53 }
 0x2c8   :  { %1866 = vmatpush.msrb.mxu0 %v7936_v3  ;;  %1886 = vmatpush.msrb.mxu1 %v7941_v24 }
 0x2c9   :  { %1926 = vmatpush.msrb.mxu3 %v7953_v62 }
 0x30f   :  { %v7725_v52 = vpop.f32.mrf.mxu0  ;;  %v7727_v59 = vpop.f32.mrf.mxu1 }
 0x310   :  { %11641 = vst [vmem:[#allocation21_spill] sm:$0xff] %v7725_v52  ;;  %v8036_v52 = vld [vmem:[%s10887_s2 + $0x40] sm:$0xff] }
 0x311   :  { %11642 = vst [vmem:[#allocation26_spill] sm:$0xff] %v7727_v59  ;;  %v8031_v59 = vld [vmem:[%s10887_s2 + $0x78] sm:$0xff] }
 0x312   :  { %11664 = vst [vmem:[#allocation35_spill] sm:$0xff] %v8031_v59 }
 0x313   :  { %11665 = vst [vmem:[#allocation36_spill] sm:$0xff] %v8036_v52 }
 0x316   :  { %v7822_v1 = vpop.f32.mrf.mxu3  ;;  %v7922_v51 = vpop.f32.mrf.mxu2 }
 0x317   :  { %11645 = vst [vmem:[#allocation8_spill] sm:$0xff] %v7822_v1  ;;  %v1501_v22 = vpop.f32.mrf.mxu0  ;;  %v1521_v17 = vpop.f32.mrf.mxu1 }
 0x318   :  { %v1564_v37 = vadd.f32 %v1501_v22, %v126_v14  ;;  %v1565_v4 = vadd.f32 %v1521_v17, %v167_v16  ;;  %11647 = vst [vmem:[#allocation9_spill] sm:$0xff] %v7922_v51  ;;  %v7946_v14 = vld [vmem:[%s10887_s2 + $0xd0] sm:$0xff]  ;;  %v7960_v22 = vld [vmem:[%s10887_s2 + $0xa0] sm:$0xff]  ;;  %v7965_v17 = vld [vmem:[%s10887_s2 + $0xa8] sm:$0xff] }
 0x319   :  { %11651 = vst [vmem:[#allocation13_spill] sm:$0xff] %v7946_v14  ;;  %1906 = vmatpush.msrb.mxu2 %v7946_v14  ;;  %1867 = vmatpush.msrb.mxu0 %v7960_v22  ;;  %v8001_v51 = vld [vmem:[%s10887_s2 + $0x98] sm:$0xff] }
 0x31a   :  { %v4763_v29 = vmul.f32 -1.442695, %v1564_v37  ;;  %v4764_v34 = vmul.f32 -1.442695, %v1565_v4  ;;  %11653 = vst [vmem:[#allocation15_spill] sm:$0xff] %v7960_v22  ;;  %v7970_v37 = vld [vmem:[%s10887_s2 + $0xb0] sm:$0xff]  ;;  %1887 = vmatpush.msrb.mxu1 %v7965_v17 }
 0x31b   :  { %11654 = vst [vmem:[#allocation22_spill] sm:$0xff] %v7965_v17  ;;  %1907 = vmatpush.msrb.mxu2 %v7970_v37 }
 0x31c   :  { %5240 = vpow2.f32 %v4763_v29  ;;  %11655 = vst [vmem:[#allocation23_spill] sm:$0xff] %v7970_v37  ;;  %v7977_v29 = vld [vmem:[%s10887_s2 + $0xb8] sm:$0xff]  ;;  %1888 = vmatpush.msrb.mxu1 %v7987_v43  ;;  %v8089_v43 = vld [vmem:[%s10887_s2 + $0x8] sm:$0xff] }
 0x31d   :  { %5242 = vpow2.f32 %v4764_v34  ;;  %11656 = vst [vmem:[#allocation24_spill] sm:$0xff] %v7977_v29  ;;  %v7982_v34 = vld [vmem:[%s10887_s2 + $0x80] sm:$0xff]  ;;  %1927 = vmatpush.msrb.mxu3 %v7977_v29 }
 0x31e   :  { %v1561_v61 = vpop.f32.mrf.mxu3  ;;  %11657 = vst [vmem:[#allocation27_spill] sm:$0xff] %v7982_v34  ;;  %1868 = vmatpush.msrb.mxu0 %v7982_v34 }
 0x31f   :  { %v1567_v2 = vadd.f32 %v1561_v61, %v249_v44  ;;  %11660 = vst [vmem:[#allocation32_spill] sm:$0xff] %v8001_v51  ;;  %1928 = vmatpush.msrb.mxu3 %v8001_v51 }
 0x320   :  { %11675 = vst [vmem:[#allocation49_spill] sm:$0xff] %v8089_v43 }
 0x321   :  { %v4765_v16 = vmul.f32 -1.442695, %v1567_v2  ;;  %v7996_v2 = vld [vmem:[%s10887_s2 + $0x90] sm:$0xff]  ;;  %1929 = vmatpush.msrb.mxu3 %v8031_v59  ;;  %v8065_v59 = vld [vmem:[%s10887_s2 + $0x28] sm:$0xff] }
 0x322   :  { %v5241_v4 = vpop.eup %5240  ;;  %11659 = vst [vmem:[#allocation31_spill] sm:$0xff] %v7996_v2  ;;  %1908 = vmatpush.msrb.mxu2 %v7996_v2 }
 0x323   :  { %v5243_v44 = vpop.eup %5242  ;;  %v7989_v61 = vadd.f32 1.0, %v5241_v4  ;;  %5244 = vpow2.f32 %v4765_v16  ;;  %v8013_v16 = vld [vmem:[%s10887_s2 + $0x60] sm:$0xff]  ;;  %v8018_v4 = vld [vmem:[%s10887_s2 + $0x68] sm:$0xff]  ;;  %11670 = vst [vmem:[#allocation41_spill] sm:$0xff] %v8065_v59  ;;  %1930 = vmatpush.msrb.mxu3 %v8053_v58  ;;  %v8101_v58 = vld [vmem:[%s10887_s2 + $0x18] sm:$0xff] }
 0x324   :  { %v8003_v1 = vadd.f32 1.0, %v5243_v44  ;;  %11661 = vst [vmem:[#allocation33_spill] sm:$0xff] %v8013_v16  ;;  %v8023_v44 = vld [vmem:[%s10887_s2 + $0x70] sm:$0xff]  ;;  %1869 = vmatpush.msrb.mxu0 %v8013_v16  ;;  %1889 = vmatpush.msrb.mxu1 %v8018_v4  ;;  %v8075_v16 = vld [vmem:[%s10887_s2 + $0x38] sm:$0xff] }
 0x325   :  { %5246 = vrcp.f32 %v7989_v61  ;;  %11662 = vst [vmem:[#allocation34_spill] sm:$0xff] %v8018_v4  ;;  %1909 = vmatpush.msrb.mxu2 %v8023_v44  ;;  %v1541_v4 = vpop.f32.mrf.mxu2  ;;  %1931 = vmatpush.msrb.mxu3 %v8075_v16  ;;  %v1581_v37 = vand.u32 2147483647, %v7989_v61  ;;  %vm1577_vm6 = vweird.f32 %v7989_v61 }
 0x326   :  { %11663 = vst [vmem:[#allocation25_spill] sm:$0xff] %v8023_v44  ;;  %5248 = vrcp.f32 %v8003_v1  ;;  %1870 = vmatpush.msrb.mxu0 %v8036_v52  ;;  %1890 = vmatpush.msrb.mxu1 %v8041_v48  ;;  %v8070_v44 = vld [vmem:[%s10887_s2 + $0x30] sm:$0xff]  ;;  %v11673_v52 = vld [vmem:[#allocation44_spill] sm:$0xff]  ;;  %vm1596_vm7 = vweird.f32 %v8003_v1 }
 0x327   :  { %11671 = vst [vmem:[#allocation42_spill] sm:$0xff] %v8070_v44  ;;  %v208_v2 = vadd.f32 %v11673_v52, %v11586_v41  ;;  %1910 = vmatpush.msrb.mxu2 %v8048_v38  ;;  %v8084_v48 = vld [vmem:[%s10887_s2] sm:$0xff]  ;;  %v8096_v52 = vld [vmem:[%s10887_s2 + $0x10] sm:$0xff]  ;;  %1932 = vmatpush.msrb.mxu3 %v8101_v58  ;;  %vm1582_vm10 = vcmp.eq.f32.partialorder %v1581_v37, 8.507059e+37 }
 0x328   :  { %11672 = vst [vmem:[#allocation43_spill] sm:$0xff] %v8075_v16  ;;  %1871 = vmatpush.msrb.mxu0 %v8058_v7  ;;  %1891 = vmatpush.msrb.mxu1 %v8065_v59  ;;  %v1602_v16 = vand.u32 2147483648, %v8003_v1 }
 0x329   :  { %v5245_v51 = vpop.eup %5244  ;;  %11674 = vst [vmem:[#allocation46_spill] sm:$0xff] %v8084_v48  ;;  %v1566_v41 = vadd.f32 %v1541_v4, %v208_v2  ;;  %1911 = vmatpush.msrb.mxu2 %v8070_v44  ;;  %v1583_v4 = vand.u32 2147483648, %v7989_v61 }
 0x32a   :  { %v1610_v34 = vadd.f32 1.0, %v5245_v51  ;;  %11676 = vst [vmem:[#allocation50_spill] sm:$0xff] %v8096_v52  ;;  %1872 = vmatpush.msrb.mxu0 %v8084_v48  ;;  %1892 = vmatpush.msrb.mxu1 %v8089_v43  ;;  %v1600_v43 = vand.u32 2147483647, %v8003_v1 }
 0x32b   :  { %11677 = vst [vmem:[#allocation51_spill] sm:$0xff] %v8101_v58  ;;  %v5247_v38 = vpop.eup %5246  ;;  %1912 = vmatpush.msrb.mxu2 %v8096_v52  ;;  %v1603_v58 = vor.u32 1.1754944e-38, %v1602_v16 }
 0x32c   :  { %v5249_v51 = vpop.eup %5248  ;;  %v1573_v7 = vmul.f32 %v5247_v38, %v7989_v61  ;;  %5250 = vrcp.f32 %v1610_v34  ;;  %vm1578_vm4 = vweird.f32 %v5247_v38  ;;  %vm1601_vm11 = vcmp.eq.f32.partialorder %v1600_v43, 8.507059e+37 }
 0x32d   :  { %v1592_v59 = vmul.f32 %v5249_v51, %v8003_v1  ;;  %5252 = vtanh.f32 %v1566_v41  ;;  %vm1597_vm5 = vweird.f32 %v5249_v51  ;;  %vm1579_vm8 = vmor %vm1577_vm6, %vm1578_vm4  ;;  %vm1616_vm13 = vweird.f32 %v1610_v34 }
 0x32e   :  { %v1574_v29 = vsub.f32 1.0, %v1573_v7  ;;  %v1584_v7 = vor.u32 1.1754944e-38, %v1583_v4  ;;  %vm1598_vm9 = vmor %vm1596_vm7, %vm1597_vm5  ;;  %v8175_v4 = vld [vmem:[%s10885_s1 + $0x3a8] sm:$0xff] }
 0x32f   :  { %v1593_v2 = vsub.f32 1.0, %v1592_v59 }
 0x330   :  { %v1575_v44 = vmul.f32 %v5247_v38, %v1574_v29 }
 0x331   :  { %v1594_v48 = vmul.f32 %v5249_v51, %v1593_v2 }
 0x332   :  { %v5251_v17 = vpop.eup %5250  ;;  %v1576_v22 = vadd.f32 %v5247_v38, %v1575_v44 }
 0x333   :  { %v1595_v59 = vadd.f32 %v5249_v51, %v1594_v48  ;;  %v1612_v41 = vmul.f32 %v5251_v17, %v1610_v34  ;;  %v5253_v52 = vpop.eup %5252  ;;  %vm1617_vm12 = vweird.f32 %v5251_v17  ;;  %v1622_v48 = vand.u32 2147483648, %v1610_v34 }
 0x334   :  { %v1580_v29 = vsel %vm1579_vm8, %v5247_v38, %v1576_v22  ;;  %v1620_v38 = vand.u32 2147483647, %v1610_v34  ;;  %vm1618_vm14 = vmor %vm1616_vm13, %vm1617_vm12  ;;  %v8158_v34 = vld [vmem:[%s10885_s1 + $0x3d0] sm:$0xff] }
 0x335   :  { %v1585_v62 = vsel %vm1582_vm10, %v1584_v7, %v1580_v29  ;;  %v1599_v2 = vsel %vm1598_vm9, %v5249_v51, %v1595_v59  ;;  %v1613_v14 = vsub.f32 1.0, %v1612_v41  ;;  %v1623_v37 = vor.u32 1.1754944e-38, %v1622_v48  ;;  %v8170_v51 = vld [vmem:[%s10885_s1 + $0x3a0] sm:$0xff]  ;;  %v8182_v7 = vld [vmem:[%s10885_s1 + $0x3b0] sm:$0xff]  ;;  %v8187_v59 = vld [vmem:[%s10885_s1 + $0x3b8] sm:$0xff] }
 0x336   :  { %v1604_v24 = vsel %vm1601_vm11, %v1603_v58, %v1599_v2  ;;  %v1627_v3 = vmul.f32 %v5253_v52, %v1585_v62  ;;  %vm1621_vm15 = vcmp.eq.f32.partialorder %v1620_v38, 8.507059e+37  ;;  %v8148_v62 = vld [vmem:[%s10885_s1 + $0x3c0] sm:$0xff]  ;;  %v8165_v52 = vld [vmem:[%s10885_s1 + $0x3d8] sm:$0xff]  ;;  %v8199_v29 = vld [vmem:[%s10885_s1 + $0x388] sm:$0xff] }
 0x337   :  { %v1626_v44 = vmul.f32 %v1604_v24, %v7636_v10  ;;  %v1614_v61 = vmul.f32 %v5251_v17, %v1613_v14  ;;  %v8124_v10 = vld [vmem:[%s10885_s1 + $0x3e0] sm:$0xff]  ;;  %v8134_v24 = vld [vmem:[%s10885_s1 + $0x3f0] sm:$0xff]  ;;  %v8139_v14 = vld [vmem:[%s10885_s1 + $0x3f8] sm:$0xff] }
 0x338   :  { %v8192_v41 = vld [vmem:[%s10885_s1 + $0x380] sm:$0xff]  ;;  %v8204_v2 = vld [vmem:[%s10885_s1 + $0x390] sm:$0xff]  ;;  %v8237_v38 = vld [vmem:[%s10885_s1 + $0x378] sm:$0xff] }
 0x339   :  { %v8118_v53 = vadd.f32 %v1627_v3, %v1626_v44  ;;  %v1615_v1 = vadd.f32 %v5251_v17, %v1614_v61  ;;  %v8129_v3 = vld [vmem:[%s10885_s1 + $0x3e8] sm:$0xff]  ;;  %v8209_v44 = vld [vmem:[%s10885_s1 + $0x398] sm:$0xff]  ;;  %v8220_v61 = vld [vmem:[%s10885_s1 + $0x360] sm:$0xff]  ;;  %11678 = vst [vmem:[#allocation52_spill] sm:$0xff] %v8237_v38 }
 0x33a   :  { %v8230_v48 = vld [vmem:[%s10885_s1 + $0x370] sm:$0xff] }
 0x33b   :  { %5254 = vtanh.f32 %v8118_v53  ;;  %v1619_v22 = vsel %vm1618_vm14, %v5251_v17, %v1615_v1  ;;  %v8153_v17 = vld [vmem:[%s10885_s1 + $0x3c8] sm:$0xff] }
 0x33c   :  { %v1624_v16 = vsel %vm1621_vm15, %v1623_v37, %v1619_v22  ;;  %v8225_v1 = vld [vmem:[%s10885_s1 + $0x368] sm:$0xff]  ;;  %v8244_v22 = vld [vmem:[%s10885_s1 + $0x340] sm:$0xff] }
 0x33d   :  { %11679 = vst [vmem:[#allocation53_spill] sm:$0xff] %v8244_v22  ;;  %v8249_v37 = vld [vmem:[%s10885_s1 + $0x348] sm:$0xff] }
 0x33e   :  { %11680 = vst [vmem:[#allocation54_spill] sm:$0xff] %v8249_v37 }
 0x341   :  { %v5255_v43 = vpop.eup %5254 }
 0x342   :  { %v1630_v58 = vmul.f32 %v5255_v43, %v1624_v16  ;;  %v8254_v43 = vld [vmem:[%s10885_s1 + $0x350] sm:$0xff]  ;;  %v8261_v16 = vld [vmem:[%s10885_s1 + $0x358] sm:$0xff] }
 0x343   :  { %11681 = vst [vmem:[#allocation55_spill] sm:$0xff] %v8254_v43 }
 0x344   :  { %1721 = vmatmul.f32.vlgmr.msra.gmra.mxu0 %v1630_v58  ;;  %1741 = vmatmul.f32.vlgmr.msra.gmra.mxu1 %v1630_v58  ;;  %11682 = vst [vmem:[#allocation56_spill] sm:$0xff] %v8261_v16 }
 0x345   :  { %1761 = vmatmul.f32.vlgmr.msra.gmra.mxu2 %v1630_v58  ;;  %1781 = vmatmul.f32.vlgmr.msra.gmra.mxu3 %v1630_v58 }
 0x346   :  { %2078 = vmatpush.msra.mxu0 %v8124_v10  ;;  %2098 = vmatpush.msra.mxu1 %v8129_v3 }
 0x347   :  { %2118 = vmatpush.msra.mxu2 %v8134_v24  ;;  %2138 = vmatpush.msra.mxu3 %v8139_v14 }
 0x348   :  { %2079 = vmatpush.msra.mxu0 %v8148_v62  ;;  %2099 = vmatpush.msra.mxu1 %v8153_v17 }
 0x349   :  { %2119 = vmatpush.msra.mxu2 %v8158_v34  ;;  %2139 = vmatpush.msra.mxu3 %v8165_v52 }
 0x34a   :  { %2080 = vmatpush.msra.mxu0 %v8170_v51  ;;  %2100 = vmatpush.msra.mxu1 %v8175_v4 }
 0x34b   :  { %2120 = vmatpush.msra.mxu2 %v8182_v7  ;;  %2140 = vmatpush.msra.mxu3 %v8187_v59 }
 0x34c   :  { %1873 = vmatmul.f32.vlgmr.msrb.gmra.mxu0 %v1630_v58  ;;  %1893 = vmatmul.f32.vlgmr.msrb.gmra.mxu1 %v1630_v58 }
 0x34d   :  { %1913 = vmatmul.f32.vlgmr.msrb.gmra.mxu2 %v1630_v58  ;;  %1933 = vmatmul.f32.vlgmr.msrb.gmra.mxu3 %v1630_v58  ;;  %v8268_v58 = vld [vmem:[%s10885_s1 + $0x320] sm:$0xff] }
 0x34e   :  { %2081 = vmatpush.msra.mxu0 %v8192_v41  ;;  %2101 = vmatpush.msra.mxu1 %v8199_v29  ;;  %11683 = vst [vmem:[#allocation57_spill] sm:$0xff] %v8268_v58 }
 0x34f   :  { %2121 = vmatpush.msra.mxu2 %v8204_v2  ;;  %2141 = vmatpush.msra.mxu3 %v8209_v44 }
 0x350   :  { %2082 = vmatpush.msra.mxu0 %v8220_v61  ;;  %2102 = vmatpush.msra.mxu1 %v8225_v1 }
 0x351   :  { %2122 = vmatpush.msra.mxu2 %v8230_v48  ;;  %2142 = vmatpush.msra.mxu3 %v8237_v38 }
 0x352   :  { %2083 = vmatpush.msra.mxu0 %v8244_v22  ;;  %2103 = vmatpush.msra.mxu1 %v8249_v37  ;;  %v8273_v22 = vld [vmem:[%s10885_s1 + $0x328] sm:$0xff]  ;;  %v8278_v37 = vld [vmem:[%s10885_s1 + $0x330] sm:$0xff] }
 0x353   :  { %2123 = vmatpush.msra.mxu2 %v8254_v43  ;;  %2143 = vmatpush.msra.mxu3 %v8261_v16  ;;  %11684 = vst [vmem:[#allocation58_spill] sm:$0xff] %v8273_v22  ;;  %v8285_v16 = vld [vmem:[%s10885_s1 + $0x338] sm:$0xff]  ;;  %v8292_v43 = vld [vmem:[%s10885_s1 + $0x300] sm:$0xff] }
 0x354   :  { %11685 = vst [vmem:[#allocation59_spill] sm:$0xff] %v8278_v37  ;;  %2084 = vmatpush.msra.mxu0 %v8268_v58  ;;  %2104 = vmatpush.msra.mxu1 %v8273_v22  ;;  %v8297_v58 = vld [vmem:[%s10885_s1 + $0x308] sm:$0xff]  ;;  %v8302_v22 = vld [vmem:[%s10885_s1 + $0x310] sm:$0xff] }
 0x355   :  { %11686 = vst [vmem:[#allocation60_spill] sm:$0xff] %v8285_v16  ;;  %2124 = vmatpush.msra.mxu2 %v8278_v37  ;;  %2144 = vmatpush.msra.mxu3 %v8285_v16  ;;  %v8309_v16 = vld [vmem:[%s10885_s1 + $0x318] sm:$0xff]  ;;  %v8316_v37 = vld [vmem:[%s10885_s1 + $0x2e0] sm:$0xff] }
 0x356   :  { %11687 = vst [vmem:[#allocation62_spill] sm:$0xff] %v8292_v43  ;;  %2085 = vmatpush.msra.mxu0 %v8292_v43  ;;  %2105 = vmatpush.msra.mxu1 %v8297_v58  ;;  %v8321_v43 = vld [vmem:[%s10885_s1 + $0x2e8] sm:$0xff] }
 0x357   :  { %11688 = vst [vmem:[#allocation63_spill] sm:$0xff] %v8297_v58  ;;  %2125 = vmatpush.msra.mxu2 %v8302_v22  ;;  %2145 = vmatpush.msra.mxu3 %v8309_v16  ;;  %v8326_v58 = vld [vmem:[%s10885_s1 + $0x2f0] sm:$0xff] }
 0x358   :  { %11689 = vst [vmem:[#allocation64_spill] sm:$0xff] %v8302_v22  ;;  %2086 = vmatpush.msra.mxu0 %v8316_v37  ;;  %2106 = vmatpush.msra.mxu1 %v8321_v43  ;;  %v8340_v22 = vld [vmem:[%s10885_s1 + $0x2c0] sm:$0xff] }
 0x359   :  { %11690 = vst [vmem:[#allocation67_spill] sm:$0xff] %v8309_v16  ;;  %v8333_v16 = vld [vmem:[%s10885_s1 + $0x2f8] sm:$0xff]  ;;  %2126 = vmatpush.msra.mxu2 %v8326_v58 }
 0x35a   :  { %11691 = vst [vmem:[#allocation69_spill] sm:$0xff] %v8316_v37  ;;  %2146 = vmatpush.msra.mxu3 %v8333_v16  ;;  %v8345_v37 = vld [vmem:[%s10885_s1 + $0x2c8] sm:$0xff]  ;;  %2087 = vmatpush.msra.mxu0 %v8340_v22 }
 0x35b   :  { %11692 = vst [vmem:[#allocation70_spill] sm:$0xff] %v8321_v43  ;;  %v8350_v43 = vld [vmem:[%s10885_s1 + $0x2d0] sm:$0xff]  ;;  %2107 = vmatpush.msra.mxu1 %v8345_v37 }
 0x35c   :  { %11693 = vst [vmem:[#allocation71_spill] sm:$0xff] %v8326_v58  ;;  %2127 = vmatpush.msra.mxu2 %v8350_v43  ;;  %v8364_v58 = vld [vmem:[%s10885_s1 + $0x2a0] sm:$0xff] }
 0x35d   :  { %11694 = vst [vmem:[#allocation72_spill] sm:$0xff] %v8333_v16  ;;  %v8357_v16 = vld [vmem:[%s10885_s1 + $0x2d8] sm:$0xff]  ;;  %2088 = vmatpush.msra.mxu0 %v8364_v58 }
 0x35e   :  { %11695 = vst [vmem:[#allocation73_spill] sm:$0xff] %v8340_v22  ;;  %2147 = vmatpush.msra.mxu3 %v8357_v16  ;;  %v8369_v22 = vld [vmem:[%s10885_s1 + $0x2a8] sm:$0xff] }
 0x35f   :  { %11696 = vst [vmem:[#allocation74_spill] sm:$0xff] %v8345_v37  ;;  %v8374_v37 = vld [vmem:[%s10885_s1 + $0x2b0] sm:$0xff]  ;;  %2108 = vmatpush.msra.mxu1 %v8369_v22 }
 0x360   :  { %11697 = vst [vmem:[#allocation75_spill] sm:$0xff] %v8350_v43  ;;  %2128 = vmatpush.msra.mxu2 %v8374_v37  ;;  %v8388_v43 = vld [vmem:[%s10885_s1 + $0x280] sm:$0xff] }
 0x361   :  { %11698 = vst [vmem:[#allocation76_spill] sm:$0xff] %v8357_v16  ;;  %v8381_v16 = vld [vmem:[%s10885_s1 + $0x2b8] sm:$0xff]  ;;  %2089 = vmatpush.msra.mxu0 %v8388_v43 }
 0x362   :  { %11699 = vst [vmem:[#allocation77_spill] sm:$0xff] %v8364_v58  ;;  %2148 = vmatpush.msra.mxu3 %v8381_v16  ;;  %v8393_v58 = vld [vmem:[%s10885_s1 + $0x288] sm:$0xff] }
 0x363   :  { %11700 = vst [vmem:[#allocation78_spill] sm:$0xff] %v8369_v22  ;;  %v8398_v22 = vld [vmem:[%s10885_s1 + $0x290] sm:$0xff]  ;;  %2109 = vmatpush.msra.mxu1 %v8393_v58 }
 0x364   :  { %11701 = vst [vmem:[#allocation79_spill] sm:$0xff] %v8374_v37  ;;  %2129 = vmatpush.msra.mxu2 %v8398_v22  ;;  %v8412_v37 = vld [vmem:[%s10885_s1 + $0x260] sm:$0xff] }
 0x365   :  { %11702 = vst [vmem:[#allocation80_spill] sm:$0xff] %v8381_v16  ;;  %v8405_v16 = vld [vmem:[%s10885_s1 + $0x298] sm:$0xff]  ;;  %2090 = vmatpush.msra.mxu0 %v8412_v37 }
 0x366   :  { %11703 = vst [vmem:[#allocation82_spill] sm:$0xff] %v8388_v43  ;;  %2149 = vmatpush.msra.mxu3 %v8405_v16  ;;  %v8417_v43 = vld [vmem:[%s10885_s1 + $0x268] sm:$0xff] }
 0x367   :  { %11704 = vst [vmem:[#allocation83_spill] sm:$0xff] %v8393_v58  ;;  %v8422_v58 = vld [vmem:[%s10885_s1 + $0x270] sm:$0xff]  ;;  %2110 = vmatpush.msra.mxu1 %v8417_v43 }
 0x368   :  { %11705 = vst [vmem:[#allocation84_spill] sm:$0xff] %v8398_v22  ;;  %2130 = vmatpush.msra.mxu2 %v8422_v58  ;;  %v8436_v22 = vld [vmem:[%s10885_s1 + $0x240] sm:$0xff] }
 0x369   :  { %11706 = vst [vmem:[#allocation87_spill] sm:$0xff] %v8405_v16  ;;  %v8429_v16 = vld [vmem:[%s10885_s1 + $0x278] sm:$0xff]  ;;  %2091 = vmatpush.msra.mxu0 %v8436_v22 }
 0x36a   :  { %11707 = vst [vmem:[#allocation88_spill] sm:$0xff] %v8412_v37  ;;  %2150 = vmatpush.msra.mxu3 %v8429_v16  ;;  %v8441_v37 = vld [vmem:[%s10885_s1 + $0x248] sm:$0xff] }
 0x36b   :  { %11708 = vst [vmem:[#allocation89_spill] sm:$0xff] %v8417_v43  ;;  %v8446_v43 = vld [vmem:[%s10885_s1 + $0x250] sm:$0xff]  ;;  %2111 = vmatpush.msra.mxu1 %v8441_v37 }
 0x36c   :  { %11709 = vst [vmem:[#allocation90_spill] sm:$0xff] %v8422_v58  ;;  %2131 = vmatpush.msra.mxu2 %v8446_v43  ;;  %v8460_v58 = vld [vmem:[%s10885_s1 + $0x220] sm:$0xff] }
 0x36d   :  { %11710 = vst [vmem:[#allocation91_spill] sm:$0xff] %v8429_v16  ;;  %v8453_v16 = vld [vmem:[%s10885_s1 + $0x258] sm:$0xff]  ;;  %2092 = vmatpush.msra.mxu0 %v8460_v58 }
 0x36e   :  { %11711 = vst [vmem:[#allocation93_spill] sm:$0xff] %v8436_v22  ;;  %2151 = vmatpush.msra.mxu3 %v8453_v16  ;;  %v8465_v22 = vld [vmem:[%s10885_s1 + $0x228] sm:$0xff] }
 0x36f   :  { %11712 = vst [vmem:[#allocation94_spill] sm:$0xff] %v8441_v37  ;;  %v8470_v37 = vld [vmem:[%s10885_s1 + $0x230] sm:$0xff]  ;;  %2112 = vmatpush.msra.mxu1 %v8465_v22 }
 0x370   :  { %11713 = vst [vmem:[#allocation95_spill] sm:$0xff] %v8446_v43  ;;  %2132 = vmatpush.msra.mxu2 %v8470_v37  ;;  %v8484_v43 = vld [vmem:[%s10885_s1 + $0x200] sm:$0xff] }
 0x371   :  { %11714 = vst [vmem:[#allocation96_spill] sm:$0xff] %v8453_v16  ;;  %v8477_v16 = vld [vmem:[%s10885_s1 + $0x238] sm:$0xff]  ;;  %2093 = vmatpush.msra.mxu0 %v8484_v43 }
 0x372   :  { %11715 = vst [vmem:[#allocation97_spill] sm:$0xff] %v8460_v58  ;;  %2152 = vmatpush.msra.mxu3 %v8477_v16  ;;  %v8489_v58 = vld [vmem:[%s10885_s1 + $0x208] sm:$0xff] }
 0x373   :  { %11716 = vst [vmem:[#allocation98_spill] sm:$0xff] %v8465_v22  ;;  %v8494_v22 = vld [vmem:[%s10885_s1 + $0x210] sm:$0xff]  ;;  %2113 = vmatpush.msra.mxu1 %v8489_v58  ;;  %2230 = vmatpush.msrb.mxu0 %v7706_v5  ;;  %v11721_v5 = vld [vmem:[#allocation47_spill] sm:$0xff] }
 0x374   :  { %11717 = vst [vmem:[#allocation16_spill] sm:$0xff] %v8470_v37  ;;  %2133 = vmatpush.msra.mxu2 %v8494_v22 }
 0x375   :  { %11718 = vst [vmem:[#allocation28_spill] sm:$0xff] %v8477_v16  ;;  %v8501_v16 = vld [vmem:[%s10885_s1 + $0x218] sm:$0xff]  ;;  %2250 = vmatpush.msrb.mxu1 %v7711_v8  ;;  %2231 = vmatpush.msrb.mxu0 %v7734_v18  ;;  %v129_v8 = vadd.f32 %v11721_v5, %v6596_v57  ;;  %v11740_v5 = vld [vmem:[#allocation34_spill] sm:$0xff] }
 0x376   :  { %2153 = vmatpush.msra.mxu3 %v8501_v16  ;;  %2270 = vmatpush.msrb.mxu2 %v7716_v25  ;;  %v11722_v25 = vld [vmem:[#allocation48_spill] sm:$0xff] }
 0x377   :  { %2251 = vmatpush.msrb.mxu1 %v7739_v11  ;;  %2232 = vmatpush.msrb.mxu0 %v7758_v19 }
 0x378   :  { %2290 = vmatpush.msrb.mxu3 %v7723_v0  ;;  %2271 = vmatpush.msrb.mxu2 %v7744_v50  ;;  %v170_v0 = vadd.f32 %v11722_v25, %v6599_v39  ;;  %v11741_v25 = vld [vmem:[#allocation25_spill] sm:$0xff] }
 0x379   :  { %2252 = vmatpush.msrb.mxu1 %v7763_v26  ;;  %2233 = vmatpush.msrb.mxu0 %v7782_v32 }
 0x37a   :  { %2291 = vmatpush.msrb.mxu3 %v7751_v15  ;;  %2272 = vmatpush.msrb.mxu2 %v7768_v20 }
 0x37b   :  { %2253 = vmatpush.msrb.mxu1 %v7787_v12  ;;  %2234 = vmatpush.msrb.mxu0 %v7806_v56  ;;  %v11726_v56 = vld [vmem:[#allocation10_spill] sm:$0xff] }
 0x37c   :  { %2292 = vmatpush.msrb.mxu3 %v7775_v21  ;;  %2273 = vmatpush.msrb.mxu2 %v7792_v54  ;;  %v11724_v21 = vld [vmem:[#allocation61_spill] sm:$0xff] }
 0x37d   :  { %2254 = vmatpush.msrb.mxu1 %v7811_v60  ;;  %2235 = vmatpush.msrb.mxu0 %v7836_v30  ;;  %v252_v32 = vadd.f32 %v11724_v21, %v6624_v9 }
 0x37e   :  { %2293 = vmatpush.msrb.mxu3 %v7799_v55  ;;  %2274 = vmatpush.msrb.mxu2 %v7816_v6  ;;  %v11727_v6 = vld [vmem:[#allocation11_spill] sm:$0xff] }
 0x37f   :  { %2255 = vmatpush.msrb.mxu1 %v7841_v31  ;;  %2236 = vmatpush.msrb.mxu0 %v7860_v23  ;;  %v11729_v31 = vld [vmem:[#allocation13_spill] sm:$0xff] }
 0x380   :  { %2294 = vmatpush.msrb.mxu3 %v7829_v13  ;;  %2275 = vmatpush.msrb.mxu2 %v7846_v33  ;;  %v11728_v13 = vld [vmem:[#allocation12_spill] sm:$0xff]  ;;  %v11730_v33 = vld [vmem:[#allocation14_spill] sm:$0xff] }
 0x381   :  { %2256 = vmatpush.msrb.mxu1 %v7865_v27  ;;  %2237 = vmatpush.msrb.mxu0 %v7884_v36  ;;  %v11731_v27 = vld [vmem:[#allocation15_spill] sm:$0xff] }
 0x382   :  { %2295 = vmatpush.msrb.mxu3 %v7853_v46  ;;  %2276 = vmatpush.msrb.mxu2 %v7870_v28  ;;  %v11732_v28 = vld [vmem:[#allocation22_spill] sm:$0xff]  ;;  %v11733_v36 = vld [vmem:[#allocation23_spill] sm:$0xff] }
 0x383   :  { %2257 = vmatpush.msrb.mxu1 %v7889_v63  ;;  %2238 = vmatpush.msrb.mxu0 %v7910_v45  ;;  %v11734_v63 = vld [vmem:[#allocation24_spill] sm:$0xff]  ;;  %v11737_v45 = vld [vmem:[#allocation31_spill] sm:$0xff] }
 0x384   :  { %2296 = vmatpush.msrb.mxu3 %v7877_v35  ;;  %2277 = vmatpush.msrb.mxu2 %v7894_v40  ;;  %v11735_v40 = vld [vmem:[#allocation27_spill] sm:$0xff] }
 0x385   :  { %2258 = vmatpush.msrb.mxu1 %v7915_v47  ;;  %2239 = vmatpush.msrb.mxu0 %v11727_v6  ;;  %v11738_v47 = vld [vmem:[#allocation32_spill] sm:$0xff]  ;;  %v11750_v6 = vld [vmem:[#allocation41_spill] sm:$0xff] }
 0x386   :  { %2297 = vmatpush.msrb.mxu3 %v7901_v42  ;;  %2278 = vmatpush.msrb.mxu2 %v7920_v49  ;;  %v11736_v42 = vld [vmem:[#allocation30_spill] sm:$0xff]  ;;  %v11739_v49 = vld [vmem:[#allocation33_spill] sm:$0xff] }
 0x387   :  { %2259 = vmatpush.msrb.mxu1 %v11728_v13  ;;  %2240 = vmatpush.msrb.mxu0 %v11731_v27  ;;  %v11753_v27 = vld [vmem:[#allocation46_spill] sm:$0xff] }
 0x388   :  { %2298 = vmatpush.msrb.mxu3 %v11726_v56  ;;  %2279 = vmatpush.msrb.mxu2 %v11729_v31  ;;  %v11751_v31 = vld [vmem:[#allocation42_spill] sm:$0xff] }
 0x389   :  { %2260 = vmatpush.msrb.mxu1 %v11732_v28  ;;  %2241 = vmatpush.msrb.mxu0 %v11735_v40  ;;  %v11754_v28 = vld [vmem:[#allocation49_spill] sm:$0xff]  ;;  %v11756_v40 = vld [vmem:[#allocation51_spill] sm:$0xff] }
 0x38a   :  { %2299 = vmatpush.msrb.mxu3 %v11730_v33  ;;  %2280 = vmatpush.msrb.mxu2 %v11733_v36  ;;  %v11752_v33 = vld [vmem:[#allocation43_spill] sm:$0xff] }
 0x38b   :  { %2261 = vmatpush.msrb.mxu1 %v11736_v42  ;;  %2242 = vmatpush.msrb.mxu0 %v11739_v49 }
 0x38c   :  { %2300 = vmatpush.msrb.mxu3 %v11734_v63  ;;  %2281 = vmatpush.msrb.mxu2 %v11737_v45  ;;  %v11755_v63 = vld [vmem:[#allocation50_spill] sm:$0xff] }
 0x38d   :  { %2262 = vmatpush.msrb.mxu1 %v11740_v5 }
 0x38e   :  { %2301 = vmatpush.msrb.mxu3 %v11738_v47  ;;  %2282 = vmatpush.msrb.mxu2 %v11741_v25 }
 0x3c1   :  { %v8505_v37 = vpop.f32.mrf.mxu0  ;;  %v8507_v38 = vpop.f32.mrf.mxu1 }
 0x3c2   :  { %11719 = vst [vmem:[#allocation29_spill] sm:$0xff] %v8505_v37  ;;  %v9008_v37 = vld [vmem:[%s10887_s2 + $0x20] sm:$0xff] }
 0x3c3   :  { %11720 = vst [vmem:[#allocation45_spill] sm:$0xff] %v8507_v38  ;;  %v9003_v38 = vld [vmem:[%s10887_s2 + $0x58] sm:$0xff] }
 0x3c4   :  { %11826 = vst [vmem:[#allocation41_spill] sm:$0xff] %v9008_v37 }
 0x3c8   :  { %v8527_v18 = vpop.f32.mrf.mxu3  ;;  %v8547_v12 = vpop.f32.mrf.mxu2 }
 0x3c9   :  { %11723 = vst [vmem:[#allocation44_spill] sm:$0xff] %v8527_v18  ;;  %v1874_v11 = vpop.f32.mrf.mxu0  ;;  %v1894_v50 = vpop.f32.mrf.mxu1  ;;  %v8998_v18 = vld [vmem:[%s10887_s2 + $0x50] sm:$0xff] }
 0x3ca   :  { %v1937_v15 = vadd.f32 %v1874_v11, %v129_v8  ;;  %v1938_v19 = vadd.f32 %v1894_v50, %v170_v0  ;;  %11725 = vst [vmem:[#allocation47_spill] sm:$0xff] %v8547_v12  ;;  %v11742_v0 = vld [vmem:[#allocation35_spill] sm:$0xff]  ;;  %v11743_v50 = vld [vmem:[#allocation105_spill] sm:$0xff] }
 0x3cb   :  { %2302 = vmatpush.msrb.mxu3 %v11742_v0  ;;  %v8991_v12 = vld [vmem:[%s10887_s2 + $0x48] sm:$0xff] }
 0x3cc   :  { %v4831_v26 = vmul.f32 -1.442695, %v1937_v15  ;;  %v4832_v20 = vmul.f32 -1.442695, %v1938_v19  ;;  %v11744_v15 = vld [vmem:[#allocation68_spill] sm:$0xff] }
 0x3cd   :  { %v211_v19 = vadd.f32 %v11744_v15, %v11743_v50 }
 0x3ce   :  { %5256 = vpow2.f32 %v4831_v26  ;;  %v11745_v26 = vld [vmem:[#allocation36_spill] sm:$0xff] }
 0x3cf   :  { %5258 = vpow2.f32 %v4832_v20  ;;  %2243 = vmatpush.msrb.mxu0 %v11745_v26  ;;  %v11746_v20 = vld [vmem:[#allocation37_spill] sm:$0xff] }
 0x3d0   :  { %v1934_v54 = vpop.f32.mrf.mxu3  ;;  %v1914_v8 = vpop.f32.mrf.mxu2  ;;  %2263 = vmatpush.msrb.mxu1 %v11746_v20 }
 0x3d1   :  { %v1940_v55 = vadd.f32 %v1934_v54, %v252_v32  ;;  %v11747_v32 = vld [vmem:[#allocation38_spill] sm:$0xff]  ;;  %v11748_v54 = vld [vmem:[#allocation39_spill] sm:$0xff]  ;;  %v1939_v56 = vadd.f32 %v1914_v8, %v211_v19 }
 0x3d2   :  { %2283 = vmatpush.msrb.mxu2 %v11747_v32  ;;  %2303 = vmatpush.msrb.mxu3 %v11748_v54  ;;  %11823 = vst [vmem:[#allocation38_spill] sm:$0xff] %v8991_v12 }
 0x3d3   :  { %v4833_v60 = vmul.f32 -1.442695, %v1940_v55  ;;  %2264 = vmatpush.msrb.mxu1 %v11750_v6  ;;  %11824 = vst [vmem:[#allocation39_spill] sm:$0xff] %v8998_v18 }
 0x3d4   :  { %v5257_v30 = vpop.eup %5256  ;;  %2284 = vmatpush.msrb.mxu2 %v11751_v31  ;;  %2304 = vmatpush.msrb.mxu3 %v11752_v33 }
 0x3d5   :  { %v5259_v46 = vpop.eup %5258  ;;  %v1944_v23 = vadd.f32 1.0, %v5257_v30  ;;  %5260 = vpow2.f32 %v4833_v60  ;;  %v11749_v60 = vld [vmem:[#allocation40_spill] sm:$0xff]  ;;  %2265 = vmatpush.msrb.mxu1 %v11754_v28 }
 0x3d6   :  { %v1963_v35 = vadd.f32 1.0, %v5259_v46  ;;  %2244 = vmatpush.msrb.mxu0 %v11749_v60  ;;  %2285 = vmatpush.msrb.mxu2 %v11755_v63  ;;  %11825 = vst [vmem:[#allocation40_spill] sm:$0xff] %v9003_v38 }
 0x3d7   :  { %5262 = vrcp.f32 %v1944_v23  ;;  %2305 = vmatpush.msrb.mxu3 %v11756_v40  ;;  %v1956_v45 = vand.u32 2147483648, %v1944_v23  ;;  %v1954_v5 = vand.u32 2147483647, %v1944_v23  ;;  %vm1950_vm2 = vweird.f32 %v1944_v23 }
 0x3d8   :  { %5264 = vrcp.f32 %v1963_v35  ;;  %2245 = vmatpush.msrb.mxu0 %v11753_v27  ;;  %v1975_v47 = vand.u32 2147483648, %v1963_v35  ;;  %v1973_v25 = vand.u32 2147483647, %v1963_v35  ;;  %vm1969_vm3 = vweird.f32 %v1963_v35 }
 0x3d9   :  { %v1957_v15 = vor.u32 1.1754944e-38, %v1956_v45  ;;  %vm1955_vm6 = vcmp.eq.f32.partialorder %v1954_v5, 8.507059e+37  ;;  %v11779_v45 = vld [vmem:[#allocation78_spill] sm:$0xff] }
 0x3da   :  { %v1976_v20 = vor.u32 1.1754944e-38, %v1975_v47  ;;  %vm1974_vm7 = vcmp.eq.f32.partialorder %v1973_v25, 8.507059e+37  ;;  %v11780_v47 = vld [vmem:[#allocation79_spill] sm:$0xff]  ;;  %v11782_v5 = vld [vmem:[#allocation82_spill] sm:$0xff]  ;;  %v11784_v25 = vld [vmem:[#allocation84_spill] sm:$0xff] }
 0x3db   :  { %v5261_v11 = vpop.eup %5260 }
 0x3dc   :  { %v1983_v21 = vadd.f32 1.0, %v5261_v11 }
 0x3dd   :  { %v5263_v55 = vpop.eup %5262 }
 0x3de   :  { %v5265_v13 = vpop.eup %5264  ;;  %v1946_v30 = vmul.f32 %v5263_v55, %v1944_v23  ;;  %5266 = vrcp.f32 %v1983_v21  ;;  %vm1951_vm0 = vweird.f32 %v5263_v55  ;;  %v1995_v27 = vand.u32 2147483648, %v1983_v21 }
 0x3df   :  { %v1965_v46 = vmul.f32 %v5265_v13, %v1963_v35  ;;  %5268 = vtanh.f32 %v1939_v56  ;;  %vm1970_vm1 = vweird.f32 %v5265_v13  ;;  %vm1952_vm4 = vmor %vm1950_vm2, %vm1951_vm0  ;;  %vm1989_vm9 = vweird.f32 %v1983_v21 }
 0x3e0   :  { %v1947_v36 = vsub.f32 1.0, %v1946_v30  ;;  %vm1971_vm5 = vmor %vm1969_vm3, %vm1970_vm1 }
 0x3e1   :  { %v1966_v42 = vsub.f32 1.0, %v1965_v46 }
 0x3e2   :  { %v1948_v49 = vmul.f32 %v5263_v55, %v1947_v36  ;;  %v1996_v36 = vor.u32 1.1754944e-38, %v1995_v27  ;;  %v8689_v27 = vld [vmem:[%s10887_s2 + $0x1c8] sm:$0xff] }
 0x3e3   :  { %v1967_v8 = vmul.f32 %v5265_v13, %v1966_v42  ;;  %v11778_v42 = vld [vmem:[#allocation77_spill] sm:$0xff] }
 0x3e4   :  { %v5267_v0 = vpop.eup %5266  ;;  %v1949_v11 = vadd.f32 %v5263_v55, %v1948_v49  ;;  %v11781_v49 = vld [vmem:[#allocation80_spill] sm:$0xff] }
 0x3e5   :  { %v1968_v19 = vadd.f32 %v5265_v13, %v1967_v8  ;;  %v1985_v26 = vmul.f32 %v5267_v0, %v1983_v21  ;;  %v5269_v54 = vpop.eup %5268  ;;  %vm1990_vm8 = vweird.f32 %v5267_v0  ;;  %v11783_v8 = vld [vmem:[#allocation83_spill] sm:$0xff] }
 0x3e6   :  { %v1953_v32 = vsel %vm1952_vm4, %v5263_v55, %v1949_v11  ;;  %v1993_v55 = vand.u32 2147483647, %v1983_v21  ;;  %vm1991_vm10 = vmor %vm1989_vm9, %vm1990_vm8  ;;  %v11777_v21 = vld [vmem:[#allocation76_spill] sm:$0xff] }
 0x3e7   :  { %v1958_v56 = vsel %vm1955_vm6, %v1957_v15, %v1953_v32  ;;  %v1972_v60 = vsel %vm1971_vm5, %v5265_v13, %v1968_v19  ;;  %v1986_v6 = vsub.f32 1.0, %v1985_v26  ;;  %v11786_v11 = vld [vmem:[#allocation88_spill] sm:$0xff]  ;;  %v11787_v15 = vld [vmem:[#allocation89_spill] sm:$0xff]  ;;  %v11788_v19 = vld [vmem:[#allocation90_spill] sm:$0xff] }
 0x3e8   :  { %v1977_v30 = vsel %vm1974_vm7, %v1976_v20, %v1972_v60  ;;  %v2000_v31 = vmul.f32 %v5269_v54, %v1958_v56  ;;  %vm1994_vm11 = vcmp.eq.f32.partialorder %v1993_v55, 8.507059e+37  ;;  %v11789_v26 = vld [vmem:[#allocation91_spill] sm:$0xff]  ;;  %v11790_v20 = vld [vmem:[#allocation93_spill] sm:$0xff]  ;;  %v11791_v32 = vld [vmem:[#allocation94_spill] sm:$0xff] }
 0x3e9   :  { %v1999_v33 = vmul.f32 %v1977_v30, %v8118_v53  ;;  %v1987_v46 = vmul.f32 %v5267_v0, %v1986_v6  ;;  %v11757_v53 = vld [vmem:[#allocation52_spill] sm:$0xff]  ;;  %v11792_v54 = vld [vmem:[#allocation95_spill] sm:$0xff]  ;;  %v11794_v60 = vld [vmem:[#allocation97_spill] sm:$0xff] }
 0x3ea   :  { %v11793_v56 = vld [vmem:[#allocation96_spill] sm:$0xff]  ;;  %v11795_v6 = vld [vmem:[#allocation98_spill] sm:$0xff] }
 0x3eb   :  { %v8586_v23 = vadd.f32 %v2000_v31, %v1999_v33  ;;  %v1988_v35 = vadd.f32 %v5267_v0, %v1987_v46  ;;  %v11796_v30 = vld [vmem:[#allocation16_spill] sm:$0xff]  ;;  %v8661_v46 = vld [vmem:[%s10887_s2 + $0x1e8] sm:$0xff]  ;;  %v8694_v55 = vld [vmem:[%s10887_s2 + $0x1d0] sm:$0xff] }
 0x3ec   :  { %v11797_v31 = vld [vmem:[#allocation28_spill] sm:$0xff] }
 0x3ed   :  { %5270 = vtanh.f32 %v8586_v23  ;;  %v1992_v28 = vsel %vm1991_vm10, %v5267_v0, %v1988_v35  ;;  %v11785_v0 = vld [vmem:[#allocation87_spill] sm:$0xff]  ;;  %v8656_v33 = vld [vmem:[%s10887_s2 + $0x1e0] sm:$0xff] }
 0x3ee   :  { %v1997_v63 = vsel %vm1994_vm11, %v1996_v36, %v1992_v28  ;;  %v8684_v35 = vld [vmem:[%s10887_s2 + $0x1c0] sm:$0xff]  ;;  %v8701_v28 = vld [vmem:[%s10887_s2 + $0x1d8] sm:$0xff] }
 0x3ef   :  { %v8708_v36 = vld [vmem:[%s10887_s2 + $0x1a0] sm:$0xff] }
 0x3f3   :  { %v5271_v13 = vpop.eup %5270 }
 0x3f4   :  { %v2003_v40 = vmul.f32 %v5271_v13, %v1997_v63  ;;  %v8713_v13 = vld [vmem:[%s10887_s2 + $0x1a8] sm:$0xff]  ;;  %v8718_v63 = vld [vmem:[%s10887_s2 + $0x1b0] sm:$0xff] }
 0x3f6   :  { %2094 = vmatmul.f32.vlgmr.msra.gmra.mxu0 %v2003_v40  ;;  %2114 = vmatmul.f32.vlgmr.msra.gmra.mxu1 %v2003_v40 }
 0x3f7   :  { %2134 = vmatmul.f32.vlgmr.msra.gmra.mxu2 %v2003_v40  ;;  %2154 = vmatmul.f32.vlgmr.msra.gmra.mxu3 %v2003_v40 }
 0x3f8   :  { %2451 = vmatpush.msra.mxu0 %v8124_v10  ;;  %2471 = vmatpush.msra.mxu1 %v8129_v3  ;;  %v11758_v10 = vld [vmem:[#allocation53_spill] sm:$0xff]  ;;  %v11759_v3 = vld [vmem:[#allocation54_spill] sm:$0xff] }
 0x3f9   :  { %2491 = vmatpush.msra.mxu2 %v8134_v24  ;;  %2511 = vmatpush.msra.mxu3 %v8139_v14  ;;  %v11760_v24 = vld [vmem:[#allocation55_spill] sm:$0xff]  ;;  %v11761_v14 = vld [vmem:[#allocation56_spill] sm:$0xff] }
 0x3fa   :  { %2452 = vmatpush.msra.mxu0 %v8148_v62  ;;  %2472 = vmatpush.msra.mxu1 %v8153_v17  ;;  %v11762_v62 = vld [vmem:[#allocation57_spill] sm:$0xff]  ;;  %v11763_v17 = vld [vmem:[#allocation58_spill] sm:$0xff] }
 0x3fb   :  { %2492 = vmatpush.msra.mxu2 %v8158_v34  ;;  %2512 = vmatpush.msra.mxu3 %v8165_v52  ;;  %v11764_v34 = vld [vmem:[#allocation59_spill] sm:$0xff]  ;;  %v11765_v52 = vld [vmem:[#allocation60_spill] sm:$0xff] }
 0x3fc   :  { %2453 = vmatpush.msra.mxu0 %v8170_v51  ;;  %2473 = vmatpush.msra.mxu1 %v8175_v4  ;;  %v11766_v51 = vld [vmem:[#allocation62_spill] sm:$0xff]  ;;  %v11767_v4 = vld [vmem:[#allocation63_spill] sm:$0xff] }
 0x3fd   :  { %2493 = vmatpush.msra.mxu2 %v8182_v7  ;;  %2513 = vmatpush.msra.mxu3 %v8187_v59  ;;  %v11768_v7 = vld [vmem:[#allocation64_spill] sm:$0xff]  ;;  %v11769_v59 = vld [vmem:[#allocation67_spill] sm:$0xff] }
 0x3fe   :  { %2246 = vmatmul.f32.vlgmr.msrb.gmra.mxu0 %v2003_v40  ;;  %2266 = vmatmul.f32.vlgmr.msrb.gmra.mxu1 %v2003_v40 }
 0x3ff   :  { %2286 = vmatmul.f32.vlgmr.msrb.gmra.mxu2 %v2003_v40  ;;  %2306 = vmatmul.f32.vlgmr.msrb.gmra.mxu3 %v2003_v40  ;;  %v8725_v40 = vld [vmem:[%s10887_s2 + $0x1b8] sm:$0xff] }
 0x400   :  { %2454 = vmatpush.msra.mxu0 %v8192_v41  ;;  %2474 = vmatpush.msra.mxu1 %v8199_v29  ;;  %v11770_v41 = vld [vmem:[#allocation69_spill] sm:$0xff]  ;;  %v11771_v29 = vld [vmem:[#allocation70_spill] sm:$0xff] }
 0x401   :  { %2494 = vmatpush.msra.mxu2 %v8204_v2  ;;  %2514 = vmatpush.msra.mxu3 %v8209_v44  ;;  %v11772_v2 = vld [vmem:[#allocation71_spill] sm:$0xff]  ;;  %v11773_v44 = vld [vmem:[#allocation72_spill] sm:$0xff] }
 0x402   :  { %2455 = vmatpush.msra.mxu0 %v8220_v61  ;;  %2475 = vmatpush.msra.mxu1 %v8225_v1  ;;  %v11774_v61 = vld [vmem:[#allocation73_spill] sm:$0xff]  ;;  %v11775_v1 = vld [vmem:[#allocation74_spill] sm:$0xff] }
 0x403   :  { %2495 = vmatpush.msra.mxu2 %v8230_v48  ;;  %2515 = vmatpush.msra.mxu3 %v11757_v53  ;;  %v11776_v48 = vld [vmem:[#allocation75_spill] sm:$0xff]  ;;  %v8732_v53 = vld [vmem:[%s10887_s2 + $0x180] sm:$0xff] }
 0x404   :  { %2456 = vmatpush.msra.mxu0 %v11758_v10  ;;  %2476 = vmatpush.msra.mxu1 %v11759_v3  ;;  %v8737_v10 = vld [vmem:[%s10887_s2 + $0x188] sm:$0xff]  ;;  %v8742_v3 = vld [vmem:[%s10887_s2 + $0x190] sm:$0xff] }
 0x405   :  { %2496 = vmatpush.msra.mxu2 %v11760_v24  ;;  %2516 = vmatpush.msra.mxu3 %v11761_v14  ;;  %v8749_v24 = vld [vmem:[%s10887_s2 + $0x198] sm:$0xff]  ;;  %v8756_v14 = vld [vmem:[%s10887_s2 + $0x160] sm:$0xff] }
 0x406   :  { %2457 = vmatpush.msra.mxu0 %v11762_v62  ;;  %2477 = vmatpush.msra.mxu1 %v11763_v17  ;;  %v8761_v62 = vld [vmem:[%s10887_s2 + $0x168] sm:$0xff]  ;;  %v8766_v17 = vld [vmem:[%s10887_s2 + $0x170] sm:$0xff] }
 0x407   :  { %2497 = vmatpush.msra.mxu2 %v11764_v34  ;;  %2517 = vmatpush.msra.mxu3 %v11765_v52  ;;  %v11800_v34 = vld [vmem:[#allocation65_spill] sm:$0xff] }
 0x408   :  { %2458 = vmatpush.msra.mxu0 %v11766_v51  ;;  %2478 = vmatpush.msra.mxu1 %v11767_v4  ;;  %v132_v52 = vadd.f32 %v11800_v34, %v6596_v57  ;;  %v11801_v51 = vld [vmem:[#allocation66_spill] sm:$0xff]  ;;  %v8891_v34 = vld [vmem:[%s10887_s2 + $0xc8] sm:$0xff] }
 0x409   :  { %2498 = vmatpush.msra.mxu2 %v11768_v7  ;;  %2518 = vmatpush.msra.mxu3 %v11769_v59  ;;  %v173_v4 = vadd.f32 %v11801_v51, %v6599_v39  ;;  %v8779_v59 = vld [vmem:[%s10887_s2 + $0x178] sm:$0xff]  ;;  %11807 = vst [vmem:[#allocation14_spill] sm:$0xff] %v8891_v34 }
 0x40a   :  { %2459 = vmatpush.msra.mxu0 %v11770_v41  ;;  %2479 = vmatpush.msra.mxu1 %v11771_v29  ;;  %v8903_v51 = vld [vmem:[%s10887_s2 + $0xd8] sm:$0xff] }
 0x40b   :  { %2499 = vmatpush.msra.mxu2 %v11772_v2  ;;  %2519 = vmatpush.msra.mxu3 %v11773_v44  ;;  %v8786_v2 = vld [vmem:[%s10887_s2 + $0x140] sm:$0xff]  ;;  %v8791_v44 = vld [vmem:[%s10887_s2 + $0x148] sm:$0xff]  ;;  %11809 = vst [vmem:[#allocation22_spill] sm:$0xff] %v8903_v51 }
 0x40c   :  { %2460 = vmatpush.msra.mxu0 %v11774_v61  ;;  %2480 = vmatpush.msra.mxu1 %v11775_v1  ;;  %v8796_v61 = vld [vmem:[%s10887_s2 + $0x150] sm:$0xff] }
 0x40d   :  { %2500 = vmatpush.msra.mxu2 %v11776_v48  ;;  %2520 = vmatpush.msra.mxu3 %v11777_v21  ;;  %v8803_v21 = vld [vmem:[%s10887_s2 + $0x158] sm:$0xff] }
 0x40e   :  { %2461 = vmatpush.msra.mxu0 %v11778_v42  ;;  %2481 = vmatpush.msra.mxu1 %v11779_v45  ;;  %v8810_v42 = vld [vmem:[%s10887_s2 + $0x120] sm:$0xff]  ;;  %v8815_v45 = vld [vmem:[%s10887_s2 + $0x128] sm:$0xff] }
 0x40f   :  { %2501 = vmatpush.msra.mxu2 %v11780_v47  ;;  %2521 = vmatpush.msra.mxu3 %v11781_v49  ;;  %v8820_v47 = vld [vmem:[%s10887_s2 + $0x130] sm:$0xff] }
 0x410   :  { %2462 = vmatpush.msra.mxu0 %v11782_v5  ;;  %2482 = vmatpush.msra.mxu1 %v11783_v8  ;;  %v8827_v8 = vld [vmem:[%s10887_s2 + $0x138] sm:$0xff] }
 0x411   :  { %2502 = vmatpush.msra.mxu2 %v11784_v25  ;;  %2522 = vmatpush.msra.mxu3 %v11785_v0  ;;  %v8834_v25 = vld [vmem:[%s10887_s2 + $0x100] sm:$0xff]  ;;  %v8839_v0 = vld [vmem:[%s10887_s2 + $0x108] sm:$0xff] }
 0x412   :  { %2463 = vmatpush.msra.mxu0 %v11786_v11  ;;  %2483 = vmatpush.msra.mxu1 %v11787_v15  ;;  %v8844_v11 = vld [vmem:[%s10887_s2 + $0x110] sm:$0xff]  ;;  %v8851_v15 = vld [vmem:[%s10887_s2 + $0x118] sm:$0xff] }
 0x413   :  { %2503 = vmatpush.msra.mxu2 %v11788_v19  ;;  %2523 = vmatpush.msra.mxu3 %v11789_v26  ;;  %v11803_v19 = vld [vmem:[#allocation81_spill] sm:$0xff] }
 0x414   :  { %2464 = vmatpush.msra.mxu0 %v11790_v20  ;;  %2484 = vmatpush.msra.mxu1 %v11791_v32  ;;  %v255_v26 = vadd.f32 %v11803_v19, %v6624_v9  ;;  %v8860_v20 = vld [vmem:[%s10887_s2 + $0xe0] sm:$0xff]  ;;  %v8865_v32 = vld [vmem:[%s10887_s2 + $0xe8] sm:$0xff] }
 0x415   :  { %2504 = vmatpush.msra.mxu2 %v11792_v54  ;;  %2524 = vmatpush.msra.mxu3 %v11793_v56  ;;  %v8870_v54 = vld [vmem:[%s10887_s2 + $0xf0] sm:$0xff]  ;;  %v8937_v19 = vld [vmem:[%s10887_s2 + $0x88] sm:$0xff] }
 0x416   :  { %2465 = vmatpush.msra.mxu0 %v11794_v60  ;;  %2485 = vmatpush.msra.mxu1 %v11795_v6  ;;  %v8879_v6 = vld [vmem:[%s10887_s2 + $0xf8] sm:$0xff]  ;;  %11815 = vst [vmem:[#allocation32_spill] sm:$0xff] %v8937_v19 }
 0x417   :  { %2505 = vmatpush.msra.mxu2 %v11796_v30  ;;  %2525 = vmatpush.msra.mxu3 %v11797_v31  ;;  %11805 = vst [vmem:[#allocation12_spill] sm:$0xff] %v8879_v6  ;;  %v8886_v31 = vld [vmem:[%s10887_s2 + $0xc0] sm:$0xff] }
 0x418   :  { %2466 = vmatpush.msra.mxu0 %v8484_v43  ;;  %2486 = vmatpush.msra.mxu1 %v8489_v58  ;;  %v8666_v43 = vld [vmem:[%s10887_s2 + $0x1f0] sm:$0xff]  ;;  %11806 = vst [vmem:[#allocation13_spill] sm:$0xff] %v8886_v31 }
 0x419   :  { %2506 = vmatpush.msra.mxu2 %v8494_v22  ;;  %2526 = vmatpush.msra.mxu3 %v8501_v16  ;;  %v8673_v22 = vld [vmem:[%s10887_s2 + $0x1f8] sm:$0xff] }
 0x41a   :  { %2603 = vmatpush.msrb.mxu0 %v8656_v33  ;;  %2623 = vmatpush.msrb.mxu1 %v8661_v46 }
 0x41b   :  { %2643 = vmatpush.msrb.mxu2 %v8666_v43  ;;  %2663 = vmatpush.msrb.mxu3 %v8673_v22 }
 0x41c   :  { %2604 = vmatpush.msrb.mxu0 %v8684_v35  ;;  %2624 = vmatpush.msrb.mxu1 %v8689_v27 }
 0x41d   :  { %2644 = vmatpush.msrb.mxu2 %v8694_v55  ;;  %2664 = vmatpush.msrb.mxu3 %v8701_v28 }
 0x41e   :  { %2605 = vmatpush.msrb.mxu0 %v8708_v36  ;;  %2625 = vmatpush.msrb.mxu1 %v8713_v13 }
 0x41f   :  { %2645 = vmatpush.msrb.mxu2 %v8718_v63  ;;  %2665 = vmatpush.msrb.mxu3 %v8725_v40 }
 0x420   :  { %2606 = vmatpush.msrb.mxu0 %v8732_v53  ;;  %2626 = vmatpush.msrb.mxu1 %v8737_v10 }
 0x421   :  { %2646 = vmatpush.msrb.mxu2 %v8742_v3  ;;  %2666 = vmatpush.msrb.mxu3 %v8749_v24 }
 0x422   :  { %2607 = vmatpush.msrb.mxu0 %v8756_v14  ;;  %2627 = vmatpush.msrb.mxu1 %v8761_v62 }
 0x423   :  { %2647 = vmatpush.msrb.mxu2 %v8766_v17  ;;  %2667 = vmatpush.msrb.mxu3 %v8779_v59 }
 0x424   :  { %2608 = vmatpush.msrb.mxu0 %v8786_v2  ;;  %2628 = vmatpush.msrb.mxu1 %v8791_v44 }
 0x425   :  { %2648 = vmatpush.msrb.mxu2 %v8796_v61  ;;  %2668 = vmatpush.msrb.mxu3 %v8803_v21 }
 0x426   :  { %2609 = vmatpush.msrb.mxu0 %v8810_v42  ;;  %2629 = vmatpush.msrb.mxu1 %v8815_v45 }
 0x427   :  { %2649 = vmatpush.msrb.mxu2 %v8820_v47  ;;  %2669 = vmatpush.msrb.mxu3 %v8827_v8 }
 0x428   :  { %2610 = vmatpush.msrb.mxu0 %v8834_v25  ;;  %2630 = vmatpush.msrb.mxu1 %v8839_v0 }
 0x429   :  { %2650 = vmatpush.msrb.mxu2 %v8844_v11  ;;  %2670 = vmatpush.msrb.mxu3 %v8851_v15 }
 0x42a   :  { %2611 = vmatpush.msrb.mxu0 %v8860_v20  ;;  %2631 = vmatpush.msrb.mxu1 %v8865_v32 }
 0x42b   :  { %2651 = vmatpush.msrb.mxu2 %v8870_v54  ;;  %2671 = vmatpush.msrb.mxu3 %v8879_v6 }
 0x42c   :  { %2612 = vmatpush.msrb.mxu0 %v8886_v31  ;;  %2632 = vmatpush.msrb.mxu1 %v8891_v34 }
 0x42d   :  { %2672 = vmatpush.msrb.mxu3 %v8903_v51 }
 0x473   :  { %v8675_v16 = vpop.f32.mrf.mxu0  ;;  %v8677_v58 = vpop.f32.mrf.mxu1 }
 0x474   :  { %11798 = vst [vmem:[#allocation48_spill] sm:$0xff] %v8675_v16  ;;  %v8986_v16 = vld [vmem:[%s10887_s2 + $0x40] sm:$0xff] }
 0x475   :  { %11799 = vst [vmem:[#allocation61_spill] sm:$0xff] %v8677_v58  ;;  %v8981_v58 = vld [vmem:[%s10887_s2 + $0x78] sm:$0xff] }
 0x476   :  { %11821 = vst [vmem:[#allocation36_spill] sm:$0xff] %v8981_v58 }
 0x477   :  { %11822 = vst [vmem:[#allocation37_spill] sm:$0xff] %v8986_v16 }
 0x47a   :  { %v8772_v7 = vpop.f32.mrf.mxu3  ;;  %v8872_v56 = vpop.f32.mrf.mxu2 }
 0x47b   :  { %11802 = vst [vmem:[#allocation10_spill] sm:$0xff] %v8772_v7  ;;  %v2247_v41 = vpop.f32.mrf.mxu0  ;;  %v2267_v29 = vpop.f32.mrf.mxu1 }
 0x47c   :  { %v2310_v1 = vadd.f32 %v2247_v41, %v132_v52  ;;  %v2311_v48 = vadd.f32 %v2267_v29, %v173_v4  ;;  %11804 = vst [vmem:[#allocation11_spill] sm:$0xff] %v8872_v56  ;;  %v8896_v52 = vld [vmem:[%s10887_s2 + $0xd0] sm:$0xff]  ;;  %v8910_v41 = vld [vmem:[%s10887_s2 + $0xa0] sm:$0xff]  ;;  %v8915_v29 = vld [vmem:[%s10887_s2 + $0xa8] sm:$0xff] }
 0x47d   :  { %11808 = vst [vmem:[#allocation15_spill] sm:$0xff] %v8896_v52  ;;  %2652 = vmatpush.msrb.mxu2 %v8896_v52  ;;  %2613 = vmatpush.msrb.mxu0 %v8910_v41  ;;  %v8951_v56 = vld [vmem:[%s10887_s2 + $0x98] sm:$0xff] }
 0x47e   :  { %v4899_v49 = vmul.f32 -1.442695, %v2310_v1  ;;  %v4900_v5 = vmul.f32 -1.442695, %v2311_v48  ;;  %11810 = vst [vmem:[#allocation23_spill] sm:$0xff] %v8910_v41  ;;  %v8920_v1 = vld [vmem:[%s10887_s2 + $0xb0] sm:$0xff]  ;;  %2633 = vmatpush.msrb.mxu1 %v8915_v29 }
 0x47f   :  { %11811 = vst [vmem:[#allocation24_spill] sm:$0xff] %v8915_v29  ;;  %2653 = vmatpush.msrb.mxu2 %v8920_v1 }
 0x480   :  { %5272 = vpow2.f32 %v4899_v49  ;;  %11812 = vst [vmem:[#allocation27_spill] sm:$0xff] %v8920_v1  ;;  %v8927_v49 = vld [vmem:[%s10887_s2 + $0xb8] sm:$0xff]  ;;  %2634 = vmatpush.msrb.mxu1 %v8937_v19  ;;  %v9039_v19 = vld [vmem:[%s10887_s2 + $0x8] sm:$0xff] }
 0x481   :  { %5274 = vpow2.f32 %v4900_v5  ;;  %11813 = vst [vmem:[#allocation30_spill] sm:$0xff] %v8927_v49  ;;  %v8932_v5 = vld [vmem:[%s10887_s2 + $0x80] sm:$0xff]  ;;  %2673 = vmatpush.msrb.mxu3 %v8927_v49 }
 0x482   :  { %v2307_v60 = vpop.f32.mrf.mxu3  ;;  %11814 = vst [vmem:[#allocation31_spill] sm:$0xff] %v8932_v5  ;;  %2614 = vmatpush.msrb.mxu0 %v8932_v5 }
 0x483   :  { %v2313_v30 = vadd.f32 %v2307_v60, %v255_v26  ;;  %11817 = vst [vmem:[#allocation34_spill] sm:$0xff] %v8951_v56  ;;  %2674 = vmatpush.msrb.mxu3 %v8951_v56 }
 0x484   :  { %11832 = vst [vmem:[#allocation50_spill] sm:$0xff] %v9039_v19 }
 0x485   :  { %v4901_v4 = vmul.f32 -1.442695, %v2313_v30  ;;  %v8946_v30 = vld [vmem:[%s10887_s2 + $0x90] sm:$0xff]  ;;  %2675 = vmatpush.msrb.mxu3 %v8981_v58  ;;  %v9015_v58 = vld [vmem:[%s10887_s2 + $0x28] sm:$0xff] }
 0x486   :  { %v5273_v48 = vpop.eup %5272  ;;  %11816 = vst [vmem:[#allocation33_spill] sm:$0xff] %v8946_v30  ;;  %2654 = vmatpush.msrb.mxu2 %v8946_v30 }
 0x487   :  { %v5275_v26 = vpop.eup %5274  ;;  %v8939_v60 = vadd.f32 1.0, %v5273_v48  ;;  %5276 = vpow2.f32 %v4901_v4  ;;  %v8963_v4 = vld [vmem:[%s10887_s2 + $0x60] sm:$0xff]  ;;  %v8968_v48 = vld [vmem:[%s10887_s2 + $0x68] sm:$0xff]  ;;  %11827 = vst [vmem:[#allocation42_spill] sm:$0xff] %v9015_v58  ;;  %2676 = vmatpush.msrb.mxu3 %v9003_v38  ;;  %v9051_v38 = vld [vmem:[%s10887_s2 + $0x18] sm:$0xff] }
 0x488   :  { %v8953_v7 = vadd.f32 1.0, %v5275_v26  ;;  %11818 = vst [vmem:[#allocation25_spill] sm:$0xff] %v8963_v4  ;;  %v8973_v26 = vld [vmem:[%s10887_s2 + $0x70] sm:$0xff]  ;;  %2615 = vmatpush.msrb.mxu0 %v8963_v4  ;;  %2635 = vmatpush.msrb.mxu1 %v8968_v48  ;;  %v9025_v4 = vld [vmem:[%s10887_s2 + $0x38] sm:$0xff] }
 0x489   :  { %5278 = vrcp.f32 %v8939_v60  ;;  %11819 = vst [vmem:[#allocation35_spill] sm:$0xff] %v8968_v48  ;;  %2655 = vmatpush.msrb.mxu2 %v8973_v26  ;;  %v2287_v48 = vpop.f32.mrf.mxu2  ;;  %2677 = vmatpush.msrb.mxu3 %v9025_v4  ;;  %v2327_v1 = vand.u32 2147483647, %v8939_v60  ;;  %vm2323_vm14 = vweird.f32 %v8939_v60 }
 0x48a   :  { %11820 = vst [vmem:[#allocation68_spill] sm:$0xff] %v8973_v26  ;;  %5280 = vrcp.f32 %v8953_v7  ;;  %2616 = vmatpush.msrb.mxu0 %v8986_v16  ;;  %2636 = vmatpush.msrb.mxu1 %v8991_v12  ;;  %v9020_v26 = vld [vmem:[%s10887_s2 + $0x30] sm:$0xff]  ;;  %v11830_v16 = vld [vmem:[#allocation92_spill] sm:$0xff]  ;;  %vm2342_vm15 = vweird.f32 %v8953_v7 }
 0x48b   :  { %11828 = vst [vmem:[#allocation43_spill] sm:$0xff] %v9020_v26  ;;  %v214_v30 = vadd.f32 %v11830_v16, %v11743_v50  ;;  %2656 = vmatpush.msrb.mxu2 %v8998_v18  ;;  %v9034_v12 = vld [vmem:[%s10887_s2] sm:$0xff]  ;;  %v9046_v16 = vld [vmem:[%s10887_s2 + $0x10] sm:$0xff]  ;;  %2678 = vmatpush.msrb.mxu3 %v9051_v38  ;;  %vm2328_vm2 = vcmp.eq.f32.partialorder %v2327_v1, 8.507059e+37 }
 0x48c   :  { %11829 = vst [vmem:[#allocation46_spill] sm:$0xff] %v9025_v4  ;;  %2617 = vmatpush.msrb.mxu0 %v9008_v37  ;;  %2637 = vmatpush.msrb.mxu1 %v9015_v58  ;;  %v2348_v4 = vand.u32 2147483648, %v8953_v7 }
 0x48d   :  { %v5277_v56 = vpop.eup %5276  ;;  %11831 = vst [vmem:[#allocation49_spill] sm:$0xff] %v9034_v12  ;;  %v2312_v50 = vadd.f32 %v2287_v48, %v214_v30  ;;  %2657 = vmatpush.msrb.mxu2 %v9020_v26  ;;  %v2329_v48 = vand.u32 2147483648, %v8939_v60 }
 0x48e   :  { %v2356_v5 = vadd.f32 1.0, %v5277_v56  ;;  %11833 = vst [vmem:[#allocation51_spill] sm:$0xff] %v9046_v16  ;;  %2618 = vmatpush.msrb.mxu0 %v9034_v12  ;;  %2638 = vmatpush.msrb.mxu1 %v9039_v19  ;;  %v2346_v19 = vand.u32 2147483647, %v8953_v7 }
 0x48f   :  { %11834 = vst [vmem:[#allocation52_spill] sm:$0xff] %v9051_v38  ;;  %v5279_v18 = vpop.eup %5278  ;;  %2658 = vmatpush.msrb.mxu2 %v9046_v16  ;;  %v2349_v38 = vor.u32 1.1754944e-38, %v2348_v4 }
 0x490   :  { %v5281_v56 = vpop.eup %5280  ;;  %v2319_v37 = vmul.f32 %v5279_v18, %v8939_v60  ;;  %5282 = vrcp.f32 %v2356_v5  ;;  %vm2324_vm12 = vweird.f32 %v5279_v18  ;;  %vm2347_vm3 = vcmp.eq.f32.partialorder %v2346_v19, 8.507059e+37 }
 0x491   :  { %v2338_v58 = vmul.f32 %v5281_v56, %v8953_v7  ;;  %5284 = vtanh.f32 %v2312_v50  ;;  %vm2343_vm13 = vweird.f32 %v5281_v56  ;;  %vm2325_vm0 = vmor %vm2323_vm14, %vm2324_vm12  ;;  %vm2362_vm5 = vweird.f32 %v2356_v5 }
 0x492   :  { %v2320_v49 = vsub.f32 1.0, %v2319_v37  ;;  %v2330_v37 = vor.u32 1.1754944e-38, %v2329_v48  ;;  %vm2344_vm1 = vmor %vm2342_vm15, %vm2343_vm13  ;;  %v9125_v48 = vld [vmem:[%s10885_s1 + $0x3a8] sm:$0xff] }
 0x493   :  { %v2339_v30 = vsub.f32 1.0, %v2338_v58 }
 0x494   :  { %v2321_v26 = vmul.f32 %v5279_v18, %v2320_v49 }
 0x495   :  { %v2340_v12 = vmul.f32 %v5281_v56, %v2339_v30 }
 0x496   :  { %v5283_v29 = vpop.eup %5282  ;;  %v2322_v41 = vadd.f32 %v5279_v18, %v2321_v26 }
 0x497   :  { %v2341_v58 = vadd.f32 %v5281_v56, %v2340_v12  ;;  %v2358_v50 = vmul.f32 %v5283_v29, %v2356_v5  ;;  %v5285_v16 = vpop.eup %5284  ;;  %vm2363_vm4 = vweird.f32 %v5283_v29  ;;  %v2368_v12 = vand.u32 2147483648, %v2356_v5 }
 0x498   :  { %v2326_v49 = vsel %vm2325_vm0, %v5279_v18, %v2322_v41  ;;  %v2366_v18 = vand.u32 2147483647, %v2356_v5  ;;  %vm2364_vm6 = vmor %vm2362_vm5, %vm2363_vm4  ;;  %v9108_v5 = vld [vmem:[%s10885_s1 + $0x3d0] sm:$0xff] }
 0x499   :  { %v2331_v51 = vsel %vm2328_vm2, %v2330_v37, %v2326_v49  ;;  %v2345_v30 = vsel %vm2344_vm1, %v5281_v56, %v2341_v58  ;;  %v2359_v52 = vsub.f32 1.0, %v2358_v50  ;;  %v2369_v1 = vor.u32 1.1754944e-38, %v2368_v12  ;;  %v9120_v56 = vld [vmem:[%s10885_s1 + $0x3a0] sm:$0xff]  ;;  %v9132_v37 = vld [vmem:[%s10885_s1 + $0x3b0] sm:$0xff]  ;;  %v9137_v58 = vld [vmem:[%s10885_s1 + $0x3b8] sm:$0xff] }
 0x49a   :  { %v2350_v34 = vsel %vm2347_vm3, %v2349_v38, %v2345_v30  ;;  %v2373_v31 = vmul.f32 %v5285_v16, %v2331_v51  ;;  %vm2367_vm7 = vcmp.eq.f32.partialorder %v2366_v18, 8.507059e+37  ;;  %v9098_v51 = vld [vmem:[%s10885_s1 + $0x3c0] sm:$0xff]  ;;  %v9115_v16 = vld [vmem:[%s10885_s1 + $0x3d8] sm:$0xff]  ;;  %v9149_v49 = vld [vmem:[%s10885_s1 + $0x388] sm:$0xff] }
 0x49b   :  { %v2372_v26 = vmul.f32 %v2350_v34, %v8586_v23  ;;  %v2360_v60 = vmul.f32 %v5283_v29, %v2359_v52  ;;  %v9074_v23 = vld [vmem:[%s10885_s1 + $0x3e0] sm:$0xff]  ;;  %v9084_v34 = vld [vmem:[%s10885_s1 + $0x3f0] sm:$0xff]  ;;  %v9089_v52 = vld [vmem:[%s10885_s1 + $0x3f8] sm:$0xff] }
 0x49c   :  { %v9142_v50 = vld [vmem:[%s10885_s1 + $0x380] sm:$0xff]  ;;  %v9154_v30 = vld [vmem:[%s10885_s1 + $0x390] sm:$0xff]  ;;  %v9187_v18 = vld [vmem:[%s10885_s1 + $0x378] sm:$0xff] }
 0x49d   :  { %v9068_v6 = vadd.f32 %v2373_v31, %v2372_v26  ;;  %v2361_v7 = vadd.f32 %v5283_v29, %v2360_v60  ;;  %v9079_v31 = vld [vmem:[%s10885_s1 + $0x3e8] sm:$0xff]  ;;  %v9159_v26 = vld [vmem:[%s10885_s1 + $0x398] sm:$0xff]  ;;  %v9170_v60 = vld [vmem:[%s10885_s1 + $0x360] sm:$0xff]  ;;  %11835 = vst [vmem:[#allocation53_spill] sm:$0xff] %v9187_v18 }
 0x49e   :  { %v9180_v12 = vld [vmem:[%s10885_s1 + $0x370] sm:$0xff] }
 0x49f   :  { %5286 = vtanh.f32 %v9068_v6  ;;  %v2365_v41 = vsel %vm2364_vm6, %v5283_v29, %v2361_v7  ;;  %v9103_v29 = vld [vmem:[%s10885_s1 + $0x3c8] sm:$0xff] }
 0x4a0   :  { %v2370_v4 = vsel %vm2367_vm7, %v2369_v1, %v2365_v41  ;;  %v9175_v7 = vld [vmem:[%s10885_s1 + $0x368] sm:$0xff]  ;;  %v9194_v41 = vld [vmem:[%s10885_s1 + $0x340] sm:$0xff] }
 0x4a1   :  { %11836 = vst [vmem:[#allocation54_spill] sm:$0xff] %v9194_v41  ;;  %v9199_v1 = vld [vmem:[%s10885_s1 + $0x348] sm:$0xff] }
 0x4a2   :  { %11837 = vst [vmem:[#allocation55_spill] sm:$0xff] %v9199_v1 }
 0x4a5   :  { %v5287_v19 = vpop.eup %5286 }
 0x4a6   :  { %v2376_v38 = vmul.f32 %v5287_v19, %v2370_v4  ;;  %v9204_v19 = vld [vmem:[%s10885_s1 + $0x350] sm:$0xff]  ;;  %v9211_v4 = vld [vmem:[%s10885_s1 + $0x358] sm:$0xff] }
 0x4a7   :  { %11838 = vst [vmem:[#allocation56_spill] sm:$0xff] %v9204_v19 }
 0x4a8   :  { %2467 = vmatmul.f32.vlgmr.msra.gmra.mxu0 %v2376_v38  ;;  %2487 = vmatmul.f32.vlgmr.msra.gmra.mxu1 %v2376_v38  ;;  %11839 = vst [vmem:[#allocation57_spill] sm:$0xff] %v9211_v4 }
 0x4a9   :  { %2507 = vmatmul.f32.vlgmr.msra.gmra.mxu2 %v2376_v38  ;;  %2527 = vmatmul.f32.vlgmr.msra.gmra.mxu3 %v2376_v38 }
 0x4aa   :  { %2824 = vmatpush.msra.mxu0 %v9074_v23  ;;  %2844 = vmatpush.msra.mxu1 %v9079_v31 }
 0x4ab   :  { %2864 = vmatpush.msra.mxu2 %v9084_v34  ;;  %2884 = vmatpush.msra.mxu3 %v9089_v52 }
 0x4ac   :  { %2825 = vmatpush.msra.mxu0 %v9098_v51  ;;  %2845 = vmatpush.msra.mxu1 %v9103_v29 }
 0x4ad   :  { %2865 = vmatpush.msra.mxu2 %v9108_v5  ;;  %2885 = vmatpush.msra.mxu3 %v9115_v16 }
 0x4ae   :  { %2826 = vmatpush.msra.mxu0 %v9120_v56  ;;  %2846 = vmatpush.msra.mxu1 %v9125_v48 }
 0x4af   :  { %2866 = vmatpush.msra.mxu2 %v9132_v37  ;;  %2886 = vmatpush.msra.mxu3 %v9137_v58 }
 0x4b0   :  { %2619 = vmatmul.f32.vlgmr.msrb.gmra.mxu0 %v2376_v38  ;;  %2639 = vmatmul.f32.vlgmr.msrb.gmra.mxu1 %v2376_v38 }
 0x4b1   :  { %2659 = vmatmul.f32.vlgmr.msrb.gmra.mxu2 %v2376_v38  ;;  %2679 = vmatmul.f32.vlgmr.msrb.gmra.mxu3 %v2376_v38  ;;  %v9218_v38 = vld [vmem:[%s10885_s1 + $0x320] sm:$0xff] }
 0x4b2   :  { %2827 = vmatpush.msra.mxu0 %v9142_v50  ;;  %2847 = vmatpush.msra.mxu1 %v9149_v49  ;;  %11840 = vst [vmem:[#allocation58_spill] sm:$0xff] %v9218_v38 }
 0x4b3   :  { %2867 = vmatpush.msra.mxu2 %v9154_v30  ;;  %2887 = vmatpush.msra.mxu3 %v9159_v26 }
 0x4b4   :  { %2828 = vmatpush.msra.mxu0 %v9170_v60  ;;  %2848 = vmatpush.msra.mxu1 %v9175_v7 }
 0x4b5   :  { %2868 = vmatpush.msra.mxu2 %v9180_v12  ;;  %2888 = vmatpush.msra.mxu3 %v9187_v18 }
 0x4b6   :  { %2829 = vmatpush.msra.mxu0 %v9194_v41  ;;  %2849 = vmatpush.msra.mxu1 %v9199_v1  ;;  %v9223_v41 = vld [vmem:[%s10885_s1 + $0x328] sm:$0xff]  ;;  %v9228_v1 = vld [vmem:[%s10885_s1 + $0x330] sm:$0xff] }
 0x4b7   :  { %2869 = vmatpush.msra.mxu2 %v9204_v19  ;;  %2889 = vmatpush.msra.mxu3 %v9211_v4  ;;  %11841 = vst [vmem:[#allocation59_spill] sm:$0xff] %v9223_v41  ;;  %v9235_v4 = vld [vmem:[%s10885_s1 + $0x338] sm:$0xff]  ;;  %v9242_v19 = vld [vmem:[%s10885_s1 + $0x300] sm:$0xff] }
 0x4b8   :  { %11842 = vst [vmem:[#allocation60_spill] sm:$0xff] %v9228_v1  ;;  %2830 = vmatpush.msra.mxu0 %v9218_v38  ;;  %2850 = vmatpush.msra.mxu1 %v9223_v41  ;;  %v9247_v38 = vld [vmem:[%s10885_s1 + $0x308] sm:$0xff]  ;;  %v9252_v41 = vld [vmem:[%s10885_s1 + $0x310] sm:$0xff] }
 0x4b9   :  { %11843 = vst [vmem:[#allocation62_spill] sm:$0xff] %v9235_v4  ;;  %2870 = vmatpush.msra.mxu2 %v9228_v1  ;;  %2890 = vmatpush.msra.mxu3 %v9235_v4  ;;  %v9259_v4 = vld [vmem:[%s10885_s1 + $0x318] sm:$0xff]  ;;  %v9266_v1 = vld [vmem:[%s10885_s1 + $0x2e0] sm:$0xff] }
 0x4ba   :  { %11844 = vst [vmem:[#allocation63_spill] sm:$0xff] %v9242_v19  ;;  %2831 = vmatpush.msra.mxu0 %v9242_v19  ;;  %2851 = vmatpush.msra.mxu1 %v9247_v38  ;;  %v9271_v19 = vld [vmem:[%s10885_s1 + $0x2e8] sm:$0xff] }
 0x4bb   :  { %11845 = vst [vmem:[#allocation64_spill] sm:$0xff] %v9247_v38  ;;  %2871 = vmatpush.msra.mxu2 %v9252_v41  ;;  %2891 = vmatpush.msra.mxu3 %v9259_v4  ;;  %v9276_v38 = vld [vmem:[%s10885_s1 + $0x2f0] sm:$0xff] }
 0x4bc   :  { %11846 = vst [vmem:[#allocation67_spill] sm:$0xff] %v9252_v41  ;;  %2832 = vmatpush.msra.mxu0 %v9266_v1  ;;  %2852 = vmatpush.msra.mxu1 %v9271_v19  ;;  %v9290_v41 = vld [vmem:[%s10885_s1 + $0x2c0] sm:$0xff] }
 0x4bd   :  { %11847 = vst [vmem:[#allocation69_spill] sm:$0xff] %v9259_v4  ;;  %v9283_v4 = vld [vmem:[%s10885_s1 + $0x2f8] sm:$0xff]  ;;  %2872 = vmatpush.msra.mxu2 %v9276_v38 }
 0x4be   :  { %11848 = vst [vmem:[#allocation70_spill] sm:$0xff] %v9266_v1  ;;  %2892 = vmatpush.msra.mxu3 %v9283_v4  ;;  %v9295_v1 = vld [vmem:[%s10885_s1 + $0x2c8] sm:$0xff]  ;;  %2833 = vmatpush.msra.mxu0 %v9290_v41 }
 0x4bf   :  { %11849 = vst [vmem:[#allocation71_spill] sm:$0xff] %v9271_v19  ;;  %v9300_v19 = vld [vmem:[%s10885_s1 + $0x2d0] sm:$0xff]  ;;  %2853 = vmatpush.msra.mxu1 %v9295_v1 }
 0x4c0   :  { %11850 = vst [vmem:[#allocation72_spill] sm:$0xff] %v9276_v38  ;;  %2873 = vmatpush.msra.mxu2 %v9300_v19  ;;  %v9314_v38 = vld [vmem:[%s10885_s1 + $0x2a0] sm:$0xff] }
 0x4c1   :  { %11851 = vst [vmem:[#allocation73_spill] sm:$0xff] %v9283_v4  ;;  %v9307_v4 = vld [vmem:[%s10885_s1 + $0x2d8] sm:$0xff]  ;;  %2834 = vmatpush.msra.mxu0 %v9314_v38 }
 0x4c2   :  { %11852 = vst [vmem:[#allocation74_spill] sm:$0xff] %v9290_v41  ;;  %2893 = vmatpush.msra.mxu3 %v9307_v4  ;;  %v9319_v41 = vld [vmem:[%s10885_s1 + $0x2a8] sm:$0xff] }
 0x4c3   :  { %11853 = vst [vmem:[#allocation75_spill] sm:$0xff] %v9295_v1  ;;  %v9324_v1 = vld [vmem:[%s10885_s1 + $0x2b0] sm:$0xff]  ;;  %2854 = vmatpush.msra.mxu1 %v9319_v41 }
 0x4c4   :  { %11854 = vst [vmem:[#allocation76_spill] sm:$0xff] %v9300_v19  ;;  %2874 = vmatpush.msra.mxu2 %v9324_v1  ;;  %v9338_v19 = vld [vmem:[%s10885_s1 + $0x280] sm:$0xff] }
 0x4c5   :  { %11855 = vst [vmem:[#allocation77_spill] sm:$0xff] %v9307_v4  ;;  %v9331_v4 = vld [vmem:[%s10885_s1 + $0x2b8] sm:$0xff]  ;;  %2835 = vmatpush.msra.mxu0 %v9338_v19 }
 0x4c6   :  { %11856 = vst [vmem:[#allocation78_spill] sm:$0xff] %v9314_v38  ;;  %2894 = vmatpush.msra.mxu3 %v9331_v4  ;;  %v9343_v38 = vld [vmem:[%s10885_s1 + $0x288] sm:$0xff] }
 0x4c7   :  { %11857 = vst [vmem:[#allocation79_spill] sm:$0xff] %v9319_v41  ;;  %v9348_v41 = vld [vmem:[%s10885_s1 + $0x290] sm:$0xff]  ;;  %2855 = vmatpush.msra.mxu1 %v9343_v38 }
 0x4c8   :  { %11858 = vst [vmem:[#allocation80_spill] sm:$0xff] %v9324_v1  ;;  %2875 = vmatpush.msra.mxu2 %v9348_v41  ;;  %v9362_v1 = vld [vmem:[%s10885_s1 + $0x260] sm:$0xff] }
 0x4c9   :  { %11859 = vst [vmem:[#allocation82_spill] sm:$0xff] %v9331_v4  ;;  %v9355_v4 = vld [vmem:[%s10885_s1 + $0x298] sm:$0xff]  ;;  %2836 = vmatpush.msra.mxu0 %v9362_v1 }
 0x4ca   :  { %11860 = vst [vmem:[#allocation83_spill] sm:$0xff] %v9338_v19  ;;  %2895 = vmatpush.msra.mxu3 %v9355_v4  ;;  %v9367_v19 = vld [vmem:[%s10885_s1 + $0x268] sm:$0xff] }
 0x4cb   :  { %11861 = vst [vmem:[#allocation84_spill] sm:$0xff] %v9343_v38  ;;  %v9372_v38 = vld [vmem:[%s10885_s1 + $0x270] sm:$0xff]  ;;  %2856 = vmatpush.msra.mxu1 %v9367_v19 }
 0x4cc   :  { %11862 = vst [vmem:[#allocation87_spill] sm:$0xff] %v9348_v41  ;;  %2876 = vmatpush.msra.mxu2 %v9372_v38  ;;  %v9386_v41 = vld [vmem:[%s10885_s1 + $0x240] sm:$0xff] }
 0x4cd   :  { %11863 = vst [vmem:[#allocation88_spill] sm:$0xff] %v9355_v4  ;;  %v9379_v4 = vld [vmem:[%s10885_s1 + $0x278] sm:$0xff]  ;;  %2837 = vmatpush.msra.mxu0 %v9386_v41 }
 0x4ce   :  { %11864 = vst [vmem:[#allocation89_spill] sm:$0xff] %v9362_v1  ;;  %2896 = vmatpush.msra.mxu3 %v9379_v4  ;;  %v9391_v1 = vld [vmem:[%s10885_s1 + $0x248] sm:$0xff] }
 0x4cf   :  { %11865 = vst [vmem:[#allocation90_spill] sm:$0xff] %v9367_v19  ;;  %v9396_v19 = vld [vmem:[%s10885_s1 + $0x250] sm:$0xff]  ;;  %2857 = vmatpush.msra.mxu1 %v9391_v1 }
 0x4d0   :  { %11866 = vst [vmem:[#allocation91_spill] sm:$0xff] %v9372_v38  ;;  %2877 = vmatpush.msra.mxu2 %v9396_v19  ;;  %v9410_v38 = vld [vmem:[%s10885_s1 + $0x220] sm:$0xff] }
 0x4d1   :  { %11867 = vst [vmem:[#allocation93_spill] sm:$0xff] %v9379_v4  ;;  %v9403_v4 = vld [vmem:[%s10885_s1 + $0x258] sm:$0xff]  ;;  %2838 = vmatpush.msra.mxu0 %v9410_v38 }
 0x4d2   :  { %11868 = vst [vmem:[#allocation94_spill] sm:$0xff] %v9386_v41  ;;  %2897 = vmatpush.msra.mxu3 %v9403_v4  ;;  %v9415_v41 = vld [vmem:[%s10885_s1 + $0x228] sm:$0xff] }
 0x4d3   :  { %11869 = vst [vmem:[#allocation95_spill] sm:$0xff] %v9391_v1  ;;  %v9420_v1 = vld [vmem:[%s10885_s1 + $0x230] sm:$0xff]  ;;  %2858 = vmatpush.msra.mxu1 %v9415_v41 }
 0x4d4   :  { %11870 = vst [vmem:[#allocation96_spill] sm:$0xff] %v9396_v19  ;;  %2878 = vmatpush.msra.mxu2 %v9420_v1  ;;  %v9434_v19 = vld [vmem:[%s10885_s1 + $0x200] sm:$0xff] }
 0x4d5   :  { %11871 = vst [vmem:[#allocation97_spill] sm:$0xff] %v9403_v4  ;;  %v9427_v4 = vld [vmem:[%s10885_s1 + $0x238] sm:$0xff]  ;;  %2839 = vmatpush.msra.mxu0 %v9434_v19 }
 0x4d6   :  { %11872 = vst [vmem:[#allocation98_spill] sm:$0xff] %v9410_v38  ;;  %2898 = vmatpush.msra.mxu3 %v9427_v4  ;;  %v9439_v38 = vld [vmem:[%s10885_s1 + $0x208] sm:$0xff] }
 0x4d7   :  { %11873 = vst [vmem:[#allocation16_spill] sm:$0xff] %v9415_v41  ;;  %v9444_v41 = vld [vmem:[%s10885_s1 + $0x210] sm:$0xff]  ;;  %2859 = vmatpush.msra.mxu1 %v9439_v38  ;;  %2976 = vmatpush.msrb.mxu0 %v8656_v33  ;;  %v11878_v33 = vld [vmem:[#allocation85_spill] sm:$0xff] }
 0x4d8   :  { %11874 = vst [vmem:[#allocation28_spill] sm:$0xff] %v9420_v1  ;;  %2879 = vmatpush.msra.mxu2 %v9444_v41 }
 0x4d9   :  { %11875 = vst [vmem:[#allocation65_spill] sm:$0xff] %v9427_v4  ;;  %v9451_v4 = vld [vmem:[%s10885_s1 + $0x218] sm:$0xff]  ;;  %2996 = vmatpush.msrb.mxu1 %v8661_v46  ;;  %2977 = vmatpush.msrb.mxu0 %v8684_v35  ;;  %v135_v46 = vadd.f32 %v11878_v33, %v6596_v57 }
 0x4da   :  { %2899 = vmatpush.msra.mxu3 %v9451_v4  ;;  %3016 = vmatpush.msrb.mxu2 %v8666_v43  ;;  %v11879_v43 = vld [vmem:[#allocation86_spill] sm:$0xff]  ;;  %v11897_v33 = vld [vmem:[#allocation35_spill] sm:$0xff] }
 0x4db   :  { %2997 = vmatpush.msrb.mxu1 %v8689_v27  ;;  %2978 = vmatpush.msrb.mxu0 %v8708_v36 }
 0x4dc   :  { %3036 = vmatpush.msrb.mxu3 %v8673_v22  ;;  %3017 = vmatpush.msrb.mxu2 %v8694_v55  ;;  %v176_v22 = vadd.f32 %v11879_v43, %v6599_v39  ;;  %v11898_v43 = vld [vmem:[#allocation68_spill] sm:$0xff] }
 0x4dd   :  { %2998 = vmatpush.msrb.mxu1 %v8713_v13  ;;  %2979 = vmatpush.msrb.mxu0 %v8732_v53 }
 0x4de   :  { %3037 = vmatpush.msrb.mxu3 %v8701_v28  ;;  %3018 = vmatpush.msrb.mxu2 %v8718_v63 }
 0x4df   :  { %2999 = vmatpush.msrb.mxu1 %v8737_v10  ;;  %2980 = vmatpush.msrb.mxu0 %v8756_v14  ;;  %v11883_v14 = vld [vmem:[#allocation12_spill] sm:$0xff] }
 0x4e0   :  { %3038 = vmatpush.msrb.mxu3 %v8725_v40  ;;  %3019 = vmatpush.msrb.mxu2 %v8742_v3  ;;  %v11881_v40 = vld [vmem:[#allocation99_spill] sm:$0xff] }
 0x4e1   :  { %3000 = vmatpush.msrb.mxu1 %v8761_v62  ;;  %2981 = vmatpush.msrb.mxu0 %v8786_v2  ;;  %v258_v53 = vadd.f32 %v11881_v40, %v6624_v9 }
 0x4e2   :  { %3039 = vmatpush.msrb.mxu3 %v8749_v24  ;;  %3020 = vmatpush.msrb.mxu2 %v8766_v17  ;;  %v11884_v17 = vld [vmem:[#allocation13_spill] sm:$0xff] }
 0x4e3   :  { %3001 = vmatpush.msrb.mxu1 %v8791_v44  ;;  %2982 = vmatpush.msrb.mxu0 %v8810_v42  ;;  %v11886_v44 = vld [vmem:[#allocation15_spill] sm:$0xff] }
 0x4e4   :  { %3040 = vmatpush.msrb.mxu3 %v8779_v59  ;;  %3021 = vmatpush.msrb.mxu2 %v8796_v61  ;;  %v11885_v59 = vld [vmem:[#allocation14_spill] sm:$0xff] }
 0x4e5   :  { %3002 = vmatpush.msrb.mxu1 %v8815_v45  ;;  %2983 = vmatpush.msrb.mxu0 %v8834_v25  ;;  %v11887_v61 = vld [vmem:[#allocation22_spill] sm:$0xff]  ;;  %v11888_v45 = vld [vmem:[#allocation23_spill] sm:$0xff] }
 0x4e6   :  { %3041 = vmatpush.msrb.mxu3 %v8803_v21  ;;  %3022 = vmatpush.msrb.mxu2 %v8820_v47  ;;  %v11889_v47 = vld [vmem:[#allocation24_spill] sm:$0xff]  ;;  %v11890_v25 = vld [vmem:[#allocation27_spill] sm:$0xff] }
 0x4e7   :  { %3003 = vmatpush.msrb.mxu1 %v8839_v0  ;;  %2984 = vmatpush.msrb.mxu0 %v8860_v20  ;;  %v11891_v0 = vld [vmem:[#allocation30_spill] sm:$0xff]  ;;  %v11894_v20 = vld [vmem:[#allocation33_spill] sm:$0xff] }
 0x4e8   :  { %3042 = vmatpush.msrb.mxu3 %v8827_v8  ;;  %3023 = vmatpush.msrb.mxu2 %v8844_v11  ;;  %v11892_v11 = vld [vmem:[#allocation31_spill] sm:$0xff] }
 0x4e9   :  { %3004 = vmatpush.msrb.mxu1 %v8865_v32  ;;  %2985 = vmatpush.msrb.mxu0 %v11884_v17  ;;  %v11895_v32 = vld [vmem:[#allocation34_spill] sm:$0xff] }
 0x4ea   :  { %3043 = vmatpush.msrb.mxu3 %v8851_v15  ;;  %3024 = vmatpush.msrb.mxu2 %v8870_v54  ;;  %v11893_v15 = vld [vmem:[#allocation32_spill] sm:$0xff]  ;;  %v11896_v54 = vld [vmem:[#allocation25_spill] sm:$0xff]  ;;  %v11907_v17 = vld [vmem:[#allocation42_spill] sm:$0xff] }
 0x4eb   :  { %3005 = vmatpush.msrb.mxu1 %v11885_v59  ;;  %2986 = vmatpush.msrb.mxu0 %v11888_v45  ;;  %v11910_v45 = vld [vmem:[#allocation49_spill] sm:$0xff] }
 0x4ec   :  { %3044 = vmatpush.msrb.mxu3 %v11883_v14  ;;  %3025 = vmatpush.msrb.mxu2 %v11886_v44  ;;  %v11908_v44 = vld [vmem:[#allocation43_spill] sm:$0xff] }
 0x4ed   :  { %3006 = vmatpush.msrb.mxu1 %v11889_v47  ;;  %2987 = vmatpush.msrb.mxu0 %v11892_v11  ;;  %v11911_v47 = vld [vmem:[#allocation50_spill] sm:$0xff]  ;;  %v11913_v11 = vld [vmem:[#allocation52_spill] sm:$0xff] }
 0x4ee   :  { %3045 = vmatpush.msrb.mxu3 %v11887_v61  ;;  %3026 = vmatpush.msrb.mxu2 %v11890_v25  ;;  %v11909_v61 = vld [vmem:[#allocation46_spill] sm:$0xff] }
 0x4ef   :  { %3007 = vmatpush.msrb.mxu1 %v11893_v15  ;;  %2988 = vmatpush.msrb.mxu0 %v11896_v54 }
 0x4f0   :  { %3046 = vmatpush.msrb.mxu3 %v11891_v0  ;;  %3027 = vmatpush.msrb.mxu2 %v11894_v20  ;;  %v11912_v0 = vld [vmem:[#allocation51_spill] sm:$0xff] }
 0x4f1   :  { %3008 = vmatpush.msrb.mxu1 %v11897_v33 }
 0x4f2   :  { %3047 = vmatpush.msrb.mxu3 %v11895_v32  ;;  %3028 = vmatpush.msrb.mxu2 %v11898_v43 }
 0x525   :  { %v9455_v1 = vpop.f32.mrf.mxu0  ;;  %v9457_v18 = vpop.f32.mrf.mxu1 }
 0x526   :  { %11876 = vst [vmem:[#allocation66_spill] sm:$0xff] %v9455_v1  ;;  %v9970_v1 = vld [vmem:[%s10887_s2 + $0x230] sm:$0xff] }
 0x527   :  { %11877 = vst [vmem:[#allocation81_spill] sm:$0xff] %v9457_v18  ;;  %v9965_v18 = vld [vmem:[%s10887_s2 + $0x228] sm:$0xff] }
 0x52c   :  { %v9477_v35 = vpop.f32.mrf.mxu3  ;;  %v9497_v10 = vpop.f32.mrf.mxu2 }
 0x52d   :  { %11880 = vst [vmem:[#allocation92_spill] sm:$0xff] %v9477_v35  ;;  %v2620_v27 = vpop.f32.mrf.mxu0  ;;  %v2640_v55 = vpop.f32.mrf.mxu1 }
 0x52e   :  { %v2683_v28 = vadd.f32 %v2620_v27, %v135_v46  ;;  %v2684_v36 = vadd.f32 %v2640_v55, %v176_v22  ;;  %11882 = vst [vmem:[#allocation85_spill] sm:$0xff] %v9497_v10  ;;  %v11899_v22 = vld [vmem:[#allocation36_spill] sm:$0xff]  ;;  %v11900_v55 = vld [vmem:[#allocation105_spill] sm:$0xff] }
 0x52f   :  { %3048 = vmatpush.msrb.mxu3 %v11899_v22  ;;  %v9958_v10 = vld [vmem:[%s10887_s2 + $0x220] sm:$0xff] }
 0x530   :  { %v4967_v13 = vmul.f32 -1.442695, %v2683_v28  ;;  %v4968_v63 = vmul.f32 -1.442695, %v2684_v36  ;;  %v11901_v28 = vld [vmem:[#allocation102_spill] sm:$0xff] }
 0x531   :  { %v217_v36 = vadd.f32 %v11901_v28, %v11900_v55 }
 0x532   :  { %5288 = vpow2.f32 %v4967_v13  ;;  %v11902_v13 = vld [vmem:[#allocation37_spill] sm:$0xff] }
 0x533   :  { %5290 = vpow2.f32 %v4968_v63  ;;  %2989 = vmatpush.msrb.mxu0 %v11902_v13  ;;  %v11903_v63 = vld [vmem:[#allocation38_spill] sm:$0xff] }
 0x534   :  { %v2680_v3 = vpop.f32.mrf.mxu3  ;;  %v2660_v46 = vpop.f32.mrf.mxu2  ;;  %3009 = vmatpush.msrb.mxu1 %v11903_v63  ;;  %11980 = vst [vmem:[#allocation38_spill] sm:$0xff] %v9958_v10 }
 0x535   :  { %v2686_v24 = vadd.f32 %v2680_v3, %v258_v53  ;;  %v11904_v53 = vld [vmem:[#allocation39_spill] sm:$0xff]  ;;  %v11905_v3 = vld [vmem:[#allocation40_spill] sm:$0xff]  ;;  %v2685_v14 = vadd.f32 %v2660_v46, %v217_v36 }
 0x536   :  { %3029 = vmatpush.msrb.mxu2 %v11904_v53  ;;  %3049 = vmatpush.msrb.mxu3 %v11905_v3  ;;  %11981 = vst [vmem:[#allocation39_spill] sm:$0xff] %v9965_v18 }
 0x537   :  { %v4969_v62 = vmul.f32 -1.442695, %v2686_v24  ;;  %3010 = vmatpush.msrb.mxu1 %v11907_v17  ;;  %11982 = vst [vmem:[#allocation40_spill] sm:$0xff] %v9970_v1 }
 0x538   :  { %v5289_v2 = vpop.eup %5288  ;;  %3030 = vmatpush.msrb.mxu2 %v11908_v44  ;;  %3050 = vmatpush.msrb.mxu3 %v11909_v61 }
 0x539   :  { %v5291_v21 = vpop.eup %5290  ;;  %v2690_v42 = vadd.f32 1.0, %v5289_v2  ;;  %5292 = vpow2.f32 %v4969_v62  ;;  %v11906_v62 = vld [vmem:[#allocation41_spill] sm:$0xff]  ;;  %3011 = vmatpush.msrb.mxu1 %v11911_v47 }
 0x53a   :  { %v2709_v8 = vadd.f32 1.0, %v5291_v21  ;;  %2990 = vmatpush.msrb.mxu0 %v11906_v62  ;;  %3031 = vmatpush.msrb.mxu2 %v11912_v0 }
 0x53b   :  { %5294 = vrcp.f32 %v2690_v42  ;;  %3051 = vmatpush.msrb.mxu3 %v11913_v11  ;;  %v2702_v20 = vand.u32 2147483648, %v2690_v42  ;;  %v2700_v33 = vand.u32 2147483647, %v2690_v42  ;;  %vm2696_vm10 = vweird.f32 %v2690_v42 }
 0x53c   :  { %5296 = vrcp.f32 %v2709_v8  ;;  %2991 = vmatpush.msrb.mxu0 %v11910_v45  ;;  %v2721_v32 = vand.u32 2147483648, %v2709_v8  ;;  %v2719_v43 = vand.u32 2147483647, %v2709_v8  ;;  %vm2715_vm11 = vweird.f32 %v2709_v8 }
 0x53d   :  { %v2703_v28 = vor.u32 1.1754944e-38, %v2702_v20  ;;  %vm2701_vm14 = vcmp.eq.f32.partialorder %v2700_v33, 8.507059e+37  ;;  %v11936_v20 = vld [vmem:[#allocation79_spill] sm:$0xff] }
 0x53e   :  { %v2722_v63 = vor.u32 1.1754944e-38, %v2721_v32  ;;  %vm2720_vm15 = vcmp.eq.f32.partialorder %v2719_v43, 8.507059e+37  ;;  %v11937_v32 = vld [vmem:[#allocation80_spill] sm:$0xff]  ;;  %v11939_v33 = vld [vmem:[#allocation83_spill] sm:$0xff] }
 0x53f   :  { %v5293_v27 = vpop.eup %5292  ;;  %v11941_v43 = vld [vmem:[#allocation87_spill] sm:$0xff] }
 0x540   :  { %v2729_v40 = vadd.f32 1.0, %v5293_v27 }
 0x541   :  { %v5295_v24 = vpop.eup %5294 }
 0x542   :  { %v5297_v59 = vpop.eup %5296  ;;  %v2692_v2 = vmul.f32 %v5295_v24, %v2690_v42  ;;  %5298 = vrcp.f32 %v2729_v40  ;;  %vm2697_vm8 = vweird.f32 %v5295_v24  ;;  %v2741_v45 = vand.u32 2147483648, %v2729_v40 }
 0x543   :  { %v2711_v21 = vmul.f32 %v5297_v59, %v2709_v8  ;;  %5300 = vtanh.f32 %v2685_v14  ;;  %vm2716_vm9 = vweird.f32 %v5297_v59  ;;  %vm2698_vm12 = vmor %vm2696_vm10, %vm2697_vm8  ;;  %vm2735_vm1 = vweird.f32 %v2729_v40 }
 0x544   :  { %v2693_v25 = vsub.f32 1.0, %v2692_v2  ;;  %vm2717_vm13 = vmor %vm2715_vm11, %vm2716_vm9 }
 0x545   :  { %v2712_v15 = vsub.f32 1.0, %v2711_v21 }
 0x546   :  { %v2694_v54 = vmul.f32 %v5295_v24, %v2693_v25  ;;  %v2742_v25 = vor.u32 1.1754944e-38, %v2741_v45 }
 0x547   :  { %v2713_v46 = vmul.f32 %v5297_v59, %v2712_v15  ;;  %v11935_v15 = vld [vmem:[#allocation78_spill] sm:$0xff] }
 0x548   :  { %v5299_v22 = vpop.eup %5298  ;;  %v2695_v27 = vadd.f32 %v5295_v24, %v2694_v54  ;;  %v11938_v54 = vld [vmem:[#allocation82_spill] sm:$0xff] }
 0x549   :  { %v2714_v36 = vadd.f32 %v5297_v59, %v2713_v46  ;;  %v2731_v13 = vmul.f32 %v5299_v22, %v2729_v40  ;;  %v5301_v3 = vpop.eup %5300  ;;  %vm2736_vm0 = vweird.f32 %v5299_v22  ;;  %v11940_v46 = vld [vmem:[#allocation84_spill] sm:$0xff] }
 0x54a   :  { %v2699_v53 = vsel %vm2698_vm12, %v5295_v24, %v2695_v27  ;;  %v2739_v24 = vand.u32 2147483647, %v2729_v40  ;;  %vm2737_vm2 = vmor %vm2735_vm1, %vm2736_vm0  ;;  %v11934_v40 = vld [vmem:[#allocation77_spill] sm:$0xff] }
 0x54b   :  { %v2704_v14 = vsel %vm2701_vm14, %v2703_v28, %v2699_v53  ;;  %v2718_v62 = vsel %vm2717_vm13, %v5297_v59, %v2714_v36  ;;  %v2732_v17 = vsub.f32 1.0, %v2731_v13  ;;  %v11943_v27 = vld [vmem:[#allocation89_spill] sm:$0xff]  ;;  %v11944_v28 = vld [vmem:[#allocation90_spill] sm:$0xff]  ;;  %v11945_v36 = vld [vmem:[#allocation91_spill] sm:$0xff] }
 0x54c   :  { %v2723_v2 = vsel %vm2720_vm15, %v2722_v63, %v2718_v62  ;;  %v2746_v44 = vmul.f32 %v5301_v3, %v2704_v14  ;;  %vm2740_vm3 = vcmp.eq.f32.partialorder %v2739_v24, 8.507059e+37  ;;  %v11946_v13 = vld [vmem:[#allocation93_spill] sm:$0xff]  ;;  %v11947_v63 = vld [vmem:[#allocation94_spill] sm:$0xff]  ;;  %v11948_v53 = vld [vmem:[#allocation95_spill] sm:$0xff] }
 0x54d   :  { %v2745_v61 = vmul.f32 %v2723_v2, %v9068_v6  ;;  %v2733_v21 = vmul.f32 %v5299_v22, %v2732_v17  ;;  %v11914_v6 = vld [vmem:[#allocation53_spill] sm:$0xff]  ;;  %v11949_v3 = vld [vmem:[#allocation96_spill] sm:$0xff]  ;;  %v11951_v62 = vld [vmem:[#allocation98_spill] sm:$0xff] }
 0x54e   :  { %v11950_v14 = vld [vmem:[#allocation97_spill] sm:$0xff]  ;;  %v11952_v17 = vld [vmem:[#allocation16_spill] sm:$0xff] }
 0x54f   :  { %v9536_v42 = vadd.f32 %v2746_v44, %v2745_v61  ;;  %v2734_v8 = vadd.f32 %v5299_v22, %v2733_v21  ;;  %v11953_v2 = vld [vmem:[#allocation28_spill] sm:$0xff]  ;;  %v11954_v44 = vld [vmem:[#allocation65_spill] sm:$0xff] }
 0x550   :  { %v9606_v61 = vld [vmem:[%s10887_s2 + $0x3e0] sm:$0xff]  ;;  %v9611_v21 = vld [vmem:[%s10887_s2 + $0x3e8] sm:$0xff] }
 0x551   :  { %5302 = vtanh.f32 %v9536_v42  ;;  %v2738_v47 = vsel %vm2737_vm2, %v5299_v22, %v2734_v8  ;;  %v11942_v22 = vld [vmem:[#allocation88_spill] sm:$0xff]  ;;  %v9640_v8 = vld [vmem:[%s10887_s2 + $0x3d0] sm:$0xff] }
 0x552   :  { %v2743_v0 = vsel %vm2740_vm3, %v2742_v25, %v2738_v47  ;;  %v9651_v47 = vld [vmem:[%s10887_s2 + $0x3d8] sm:$0xff]  ;;  %v9658_v25 = vld [vmem:[%s10887_s2 + $0x3a0] sm:$0xff] }
 0x557   :  { %v5303_v59 = vpop.eup %5302 }
 0x558   :  { %v2749_v11 = vmul.f32 %v5303_v59, %v2743_v0  ;;  %v9663_v59 = vld [vmem:[%s10887_s2 + $0x3a8] sm:$0xff]  ;;  %v9668_v0 = vld [vmem:[%s10887_s2 + $0x3b0] sm:$0xff] }
 0x55a   :  { %2840 = vmatmul.f32.vlgmr.msra.gmra.mxu0 %v2749_v11  ;;  %2860 = vmatmul.f32.vlgmr.msra.gmra.mxu1 %v2749_v11 }
 0x55b   :  { %2880 = vmatmul.f32.vlgmr.msra.gmra.mxu2 %v2749_v11  ;;  %2900 = vmatmul.f32.vlgmr.msra.gmra.mxu3 %v2749_v11 }
 0x55c   :  { %3197 = vmatpush.msra.mxu0 %v9074_v23  ;;  %3217 = vmatpush.msra.mxu1 %v9079_v31  ;;  %v11915_v23 = vld [vmem:[#allocation54_spill] sm:$0xff]  ;;  %v11916_v31 = vld [vmem:[#allocation55_spill] sm:$0xff] }
 0x55d   :  { %3237 = vmatpush.msra.mxu2 %v9084_v34  ;;  %3257 = vmatpush.msra.mxu3 %v9089_v52  ;;  %v11917_v34 = vld [vmem:[#allocation56_spill] sm:$0xff]  ;;  %v11918_v52 = vld [vmem:[#allocation57_spill] sm:$0xff] }
 0x55e   :  { %3198 = vmatpush.msra.mxu0 %v9098_v51  ;;  %3218 = vmatpush.msra.mxu1 %v9103_v29  ;;  %v11919_v51 = vld [vmem:[#allocation58_spill] sm:$0xff]  ;;  %v11920_v29 = vld [vmem:[#allocation59_spill] sm:$0xff] }
 0x55f   :  { %3238 = vmatpush.msra.mxu2 %v9108_v5  ;;  %3258 = vmatpush.msra.mxu3 %v9115_v16  ;;  %v11921_v5 = vld [vmem:[#allocation60_spill] sm:$0xff]  ;;  %v11922_v16 = vld [vmem:[#allocation62_spill] sm:$0xff] }
 0x560   :  { %3199 = vmatpush.msra.mxu0 %v9120_v56  ;;  %3219 = vmatpush.msra.mxu1 %v9125_v48  ;;  %v11923_v56 = vld [vmem:[#allocation63_spill] sm:$0xff]  ;;  %v11924_v48 = vld [vmem:[#allocation64_spill] sm:$0xff] }
 0x561   :  { %3239 = vmatpush.msra.mxu2 %v9132_v37  ;;  %3259 = vmatpush.msra.mxu3 %v9137_v58  ;;  %v11925_v37 = vld [vmem:[#allocation67_spill] sm:$0xff]  ;;  %v11926_v58 = vld [vmem:[#allocation69_spill] sm:$0xff] }
 0x562   :  { %2992 = vmatmul.f32.vlgmr.msrb.gmra.mxu0 %v2749_v11  ;;  %3012 = vmatmul.f32.vlgmr.msrb.gmra.mxu1 %v2749_v11 }
 0x563   :  { %3032 = vmatmul.f32.vlgmr.msrb.gmra.mxu2 %v2749_v11  ;;  %3052 = vmatmul.f32.vlgmr.msrb.gmra.mxu3 %v2749_v11  ;;  %v9675_v11 = vld [vmem:[%s10887_s2 + $0x3b8] sm:$0xff] }
 0x564   :  { %3200 = vmatpush.msra.mxu0 %v9142_v50  ;;  %3220 = vmatpush.msra.mxu1 %v9149_v49  ;;  %v11927_v50 = vld [vmem:[#allocation70_spill] sm:$0xff]  ;;  %v11928_v49 = vld [vmem:[#allocation71_spill] sm:$0xff] }
 0x565   :  { %3240 = vmatpush.msra.mxu2 %v9154_v30  ;;  %3260 = vmatpush.msra.mxu3 %v9159_v26  ;;  %v11929_v30 = vld [vmem:[#allocation72_spill] sm:$0xff]  ;;  %v11930_v26 = vld [vmem:[#allocation73_spill] sm:$0xff] }
 0x566   :  { %3201 = vmatpush.msra.mxu0 %v9170_v60  ;;  %3221 = vmatpush.msra.mxu1 %v9175_v7  ;;  %v11931_v60 = vld [vmem:[#allocation74_spill] sm:$0xff]  ;;  %v11932_v7 = vld [vmem:[#allocation75_spill] sm:$0xff] }
 0x567   :  { %3241 = vmatpush.msra.mxu2 %v9180_v12  ;;  %3261 = vmatpush.msra.mxu3 %v11914_v6  ;;  %v11933_v12 = vld [vmem:[#allocation76_spill] sm:$0xff] }
 0x568   :  { %3202 = vmatpush.msra.mxu0 %v11915_v23  ;;  %3222 = vmatpush.msra.mxu1 %v11916_v31  ;;  %v9682_v6 = vld [vmem:[%s10887_s2 + $0x380] sm:$0xff]  ;;  %v9687_v23 = vld [vmem:[%s10887_s2 + $0x388] sm:$0xff]  ;;  %v9692_v31 = vld [vmem:[%s10887_s2 + $0x390] sm:$0xff] }
 0x569   :  { %3242 = vmatpush.msra.mxu2 %v11917_v34  ;;  %3262 = vmatpush.msra.mxu3 %v11918_v52  ;;  %v9699_v34 = vld [vmem:[%s10887_s2 + $0x398] sm:$0xff]  ;;  %v9706_v52 = vld [vmem:[%s10887_s2 + $0x360] sm:$0xff] }
 0x56a   :  { %3203 = vmatpush.msra.mxu0 %v11919_v51  ;;  %3223 = vmatpush.msra.mxu1 %v11920_v29  ;;  %v9711_v51 = vld [vmem:[%s10887_s2 + $0x368] sm:$0xff]  ;;  %v9716_v29 = vld [vmem:[%s10887_s2 + $0x370] sm:$0xff] }
 0x56b   :  { %3243 = vmatpush.msra.mxu2 %v11921_v5  ;;  %3263 = vmatpush.msra.mxu3 %v11922_v16  ;;  %v9723_v5 = vld [vmem:[%s10887_s2 + $0x378] sm:$0xff]  ;;  %v11957_v16 = vld [vmem:[#allocation100_spill] sm:$0xff] }
 0x56c   :  { %3204 = vmatpush.msra.mxu0 %v11923_v56  ;;  %3224 = vmatpush.msra.mxu1 %v11924_v48  ;;  %v138_v56 = vadd.f32 %v11957_v16, %v6596_v57  ;;  %v11958_v48 = vld [vmem:[#allocation101_spill] sm:$0xff]  ;;  %v9746_v57 = vld [vmem:[%s10887_s2 + $0x350] sm:$0xff] }
 0x56d   :  { %3244 = vmatpush.msra.mxu2 %v11925_v37  ;;  %3264 = vmatpush.msra.mxu3 %v11926_v58  ;;  %v179_v37 = vadd.f32 %v11958_v48, %v6599_v39  ;;  %v9861_v16 = vld [vmem:[%s10887_s2 + $0x2a8] sm:$0xff]  ;;  %v9868_v48 = vld [vmem:[%s10887_s2 + $0x2b0] sm:$0xff] }
 0x56e   :  { %3205 = vmatpush.msra.mxu0 %v11927_v50  ;;  %3225 = vmatpush.msra.mxu1 %v11928_v49  ;;  %v9736_v50 = vld [vmem:[%s10887_s2 + $0x340] sm:$0xff]  ;;  %v9741_v49 = vld [vmem:[%s10887_s2 + $0x348] sm:$0xff]  ;;  %11965 = vst [vmem:[#allocation23_spill] sm:$0xff] %v9861_v16 }
 0x56f   :  { %3245 = vmatpush.msra.mxu2 %v11929_v30  ;;  %3265 = vmatpush.msra.mxu3 %v11930_v26  ;;  %v9753_v26 = vld [vmem:[%s10887_s2 + $0x358] sm:$0xff]  ;;  %11966 = vst [vmem:[#allocation24_spill] sm:$0xff] %v9868_v48 }
 0x570   :  { %3206 = vmatpush.msra.mxu0 %v11931_v60  ;;  %3226 = vmatpush.msra.mxu1 %v11932_v7 }
 0x571   :  { %3246 = vmatpush.msra.mxu2 %v11933_v12  ;;  %3266 = vmatpush.msra.mxu3 %v11934_v40  ;;  %v9760_v12 = vld [vmem:[%s10887_s2 + $0x320] sm:$0xff]  ;;  %v9765_v40 = vld [vmem:[%s10887_s2 + $0x328] sm:$0xff] }
 0x572   :  { %3207 = vmatpush.msra.mxu0 %v11935_v15  ;;  %3227 = vmatpush.msra.mxu1 %v11936_v20  ;;  %v9770_v15 = vld [vmem:[%s10887_s2 + $0x330] sm:$0xff]  ;;  %v9777_v20 = vld [vmem:[%s10887_s2 + $0x338] sm:$0xff] }
 0x573   :  { %3247 = vmatpush.msra.mxu2 %v11937_v32  ;;  %3267 = vmatpush.msra.mxu3 %v11938_v54 }
 0x574   :  { %3208 = vmatpush.msra.mxu0 %v11939_v33  ;;  %3228 = vmatpush.msra.mxu1 %v11940_v46  ;;  %v9784_v33 = vld [vmem:[%s10887_s2 + $0x300] sm:$0xff]  ;;  %v9789_v46 = vld [vmem:[%s10887_s2 + $0x308] sm:$0xff] }
 0x575   :  { %3248 = vmatpush.msra.mxu2 %v11941_v43  ;;  %3268 = vmatpush.msra.mxu3 %v11942_v22  ;;  %v9796_v43 = vld [vmem:[%s10887_s2 + $0x310] sm:$0xff]  ;;  %v9801_v22 = vld [vmem:[%s10887_s2 + $0x318] sm:$0xff] }
 0x576   :  { %3209 = vmatpush.msra.mxu0 %v11943_v27  ;;  %3229 = vmatpush.msra.mxu1 %v11944_v28  ;;  %v9806_v27 = vld [vmem:[%s10887_s2 + $0x2e0] sm:$0xff]  ;;  %v9813_v28 = vld [vmem:[%s10887_s2 + $0x2e8] sm:$0xff] }
 0x577   :  { %3249 = vmatpush.msra.mxu2 %v11945_v36  ;;  %3269 = vmatpush.msra.mxu3 %v11946_v13  ;;  %v9818_v36 = vld [vmem:[%s10887_s2 + $0x2f0] sm:$0xff]  ;;  %v9823_v13 = vld [vmem:[%s10887_s2 + $0x2f8] sm:$0xff] }
 0x578   :  { %3210 = vmatpush.msra.mxu0 %v11947_v63  ;;  %3230 = vmatpush.msra.mxu1 %v11948_v53  ;;  %v11960_v63 = vld [vmem:[#allocation103_spill] sm:$0xff] }
 0x579   :  { %3250 = vmatpush.msra.mxu2 %v11949_v3  ;;  %3270 = vmatpush.msra.mxu3 %v11950_v14  ;;  %v261_v53 = vadd.f32 %v11960_v63, %v6624_v9  ;;  %v9832_v3 = vld [vmem:[%s10887_s2 + $0x2c0] sm:$0xff]  ;;  %v9837_v14 = vld [vmem:[%s10887_s2 + $0x2c8] sm:$0xff] }
 0x57a   :  { %3211 = vmatpush.msra.mxu0 %v11951_v62  ;;  %3231 = vmatpush.msra.mxu1 %v11952_v17  ;;  %v9842_v62 = vld [vmem:[%s10887_s2 + $0x2d0] sm:$0xff] }
 0x57b   :  { %3251 = vmatpush.msra.mxu2 %v11953_v2  ;;  %3271 = vmatpush.msra.mxu3 %v11954_v44  ;;  %11961 = vst [vmem:[#allocation13_spill] sm:$0xff] %v9842_v62  ;;  %v9851_v2 = vld [vmem:[%s10887_s2 + $0x2d8] sm:$0xff]  ;;  %v9856_v44 = vld [vmem:[%s10887_s2 + $0x2a0] sm:$0xff] }
 0x57c   :  { %3212 = vmatpush.msra.mxu0 %v9434_v19  ;;  %3232 = vmatpush.msra.mxu1 %v9439_v38  ;;  %v9616_v19 = vld [vmem:[%s10887_s2 + $0x3f0] sm:$0xff]  ;;  %v9635_v38 = vld [vmem:[%s10887_s2 + $0x3c8] sm:$0xff]  ;;  %11963 = vst [vmem:[#allocation15_spill] sm:$0xff] %v9851_v2 }
 0x57d   :  { %3252 = vmatpush.msra.mxu2 %v9444_v41  ;;  %3272 = vmatpush.msra.mxu3 %v9451_v4  ;;  %v9623_v41 = vld [vmem:[%s10887_s2 + $0x3f8] sm:$0xff]  ;;  %v9630_v4 = vld [vmem:[%s10887_s2 + $0x3c0] sm:$0xff]  ;;  %11964 = vst [vmem:[#allocation22_spill] sm:$0xff] %v9856_v44 }
 0x57e   :  { %3350 = vmatpush.msrb.mxu0 %v9606_v61  ;;  %3370 = vmatpush.msrb.mxu1 %v9611_v21 }
 0x57f   :  { %3390 = vmatpush.msrb.mxu2 %v9616_v19  ;;  %3410 = vmatpush.msrb.mxu3 %v9623_v41 }
 0x580   :  { %3351 = vmatpush.msrb.mxu0 %v9630_v4  ;;  %3371 = vmatpush.msrb.mxu1 %v9635_v38 }
 0x581   :  { %3391 = vmatpush.msrb.mxu2 %v9640_v8  ;;  %3411 = vmatpush.msrb.mxu3 %v9651_v47 }
 0x582   :  { %3352 = vmatpush.msrb.mxu0 %v9658_v25  ;;  %3372 = vmatpush.msrb.mxu1 %v9663_v59 }
 0x583   :  { %3392 = vmatpush.msrb.mxu2 %v9668_v0  ;;  %3412 = vmatpush.msrb.mxu3 %v9675_v11 }
 0x584   :  { %3353 = vmatpush.msrb.mxu0 %v9682_v6  ;;  %3373 = vmatpush.msrb.mxu1 %v9687_v23 }
 0x585   :  { %3393 = vmatpush.msrb.mxu2 %v9692_v31  ;;  %3413 = vmatpush.msrb.mxu3 %v9699_v34 }
 0x586   :  { %3354 = vmatpush.msrb.mxu0 %v9706_v52  ;;  %3374 = vmatpush.msrb.mxu1 %v9711_v51 }
 0x587   :  { %3394 = vmatpush.msrb.mxu2 %v9716_v29  ;;  %3414 = vmatpush.msrb.mxu3 %v9723_v5 }
 0x588   :  { %3355 = vmatpush.msrb.mxu0 %v9736_v50  ;;  %3375 = vmatpush.msrb.mxu1 %v9741_v49 }
 0x589   :  { %3395 = vmatpush.msrb.mxu2 %v9746_v57  ;;  %3415 = vmatpush.msrb.mxu3 %v9753_v26 }
 0x58a   :  { %3356 = vmatpush.msrb.mxu0 %v9760_v12  ;;  %3376 = vmatpush.msrb.mxu1 %v9765_v40 }
 0x58b   :  { %3396 = vmatpush.msrb.mxu2 %v9770_v15  ;;  %3416 = vmatpush.msrb.mxu3 %v9777_v20 }
 0x58c   :  { %3357 = vmatpush.msrb.mxu0 %v9784_v33  ;;  %3377 = vmatpush.msrb.mxu1 %v9789_v46 }
 0x58d   :  { %3397 = vmatpush.msrb.mxu2 %v9796_v43  ;;  %3417 = vmatpush.msrb.mxu3 %v9801_v22 }
 0x58e   :  { %3358 = vmatpush.msrb.mxu0 %v9806_v27  ;;  %3378 = vmatpush.msrb.mxu1 %v9813_v28 }
 0x58f   :  { %3398 = vmatpush.msrb.mxu2 %v9818_v36  ;;  %3418 = vmatpush.msrb.mxu3 %v9823_v13 }
 0x590   :  { %3359 = vmatpush.msrb.mxu0 %v9832_v3  ;;  %3379 = vmatpush.msrb.mxu1 %v9837_v14 }
 0x591   :  { %3399 = vmatpush.msrb.mxu2 %v9842_v62  ;;  %3419 = vmatpush.msrb.mxu3 %v9851_v2 }
 0x592   :  { %3360 = vmatpush.msrb.mxu0 %v9856_v44  ;;  %3380 = vmatpush.msrb.mxu1 %v9861_v16 }
 0x593   :  { %3400 = vmatpush.msrb.mxu2 %v9868_v48 }
 0x5d7   :  { %v9642_v45 = vpop.f32.mrf.mxu0  ;;  %v9644_v24 = vpop.f32.mrf.mxu1 }
 0x5d8   :  { %11955 = vst [vmem:[#allocation86_spill] sm:$0xff] %v9642_v45  ;;  %v9953_v45 = vld [vmem:[%s10887_s2 + $0x258] sm:$0xff] }
 0x5d9   :  { %11956 = vst [vmem:[#allocation99_spill] sm:$0xff] %v9644_v24  ;;  %v9948_v24 = vld [vmem:[%s10887_s2 + $0x250] sm:$0xff] }
 0x5da   :  { %11978 = vst [vmem:[#allocation102_spill] sm:$0xff] %v9948_v24 }
 0x5db   :  { %11979 = vst [vmem:[#allocation37_spill] sm:$0xff] %v9953_v45 }
 0x5de   :  { %v9729_v58 = vpop.f32.mrf.mxu3  ;;  %v9844_v9 = vpop.f32.mrf.mxu2 }
 0x5df   :  { %11959 = vst [vmem:[#allocation12_spill] sm:$0xff] %v9729_v58  ;;  %v2993_v39 = vpop.f32.mrf.mxu0  ;;  %v3013_v30 = vpop.f32.mrf.mxu1  ;;  %v9941_v58 = vld [vmem:[%s10887_s2 + $0x248] sm:$0xff] }
 0x5e0   :  { %v3056_v60 = vadd.f32 %v2993_v39, %v138_v56  ;;  %v3057_v7 = vadd.f32 %v3013_v30, %v179_v37  ;;  %11962 = vst [vmem:[#allocation14_spill] sm:$0xff] %v9844_v9  ;;  %v9873_v37 = vld [vmem:[%s10887_s2 + $0x2b8] sm:$0xff]  ;;  %v9880_v39 = vld [vmem:[%s10887_s2 + $0x280] sm:$0xff]  ;;  %v9885_v30 = vld [vmem:[%s10887_s2 + $0x288] sm:$0xff] }
 0x5e1   :  { %11967 = vst [vmem:[#allocation27_spill] sm:$0xff] %v9873_v37  ;;  %3420 = vmatpush.msrb.mxu3 %v9873_v37  ;;  %3361 = vmatpush.msrb.mxu0 %v9880_v39  ;;  %v9936_v9 = vld [vmem:[%s10887_s2 + $0x240] sm:$0xff] }
 0x5e2   :  { %v5035_v32 = vmul.f32 -1.442695, %v3056_v60  ;;  %v5036_v54 = vmul.f32 -1.442695, %v3057_v7  ;;  %11968 = vst [vmem:[#allocation30_spill] sm:$0xff] %v9880_v39  ;;  %v9892_v7 = vld [vmem:[%s10887_s2 + $0x290] sm:$0xff]  ;;  %3381 = vmatpush.msrb.mxu1 %v9885_v30 }
 0x5e3   :  { %11969 = vst [vmem:[#allocation31_spill] sm:$0xff] %v9885_v30  ;;  %3401 = vmatpush.msrb.mxu2 %v9892_v7 }
 0x5e4   :  { %5304 = vpow2.f32 %v5035_v32  ;;  %11970 = vst [vmem:[#allocation32_spill] sm:$0xff] %v9892_v7  ;;  %v9897_v32 = vld [vmem:[%s10887_s2 + $0x298] sm:$0xff] }
 0x5e5   :  { %5306 = vpow2.f32 %v5036_v54  ;;  %11971 = vst [vmem:[#allocation33_spill] sm:$0xff] %v9897_v32  ;;  %3421 = vmatpush.msrb.mxu3 %v9897_v32 }
 0x5e6   :  { %v3053_v17 = vpop.f32.mrf.mxu3  ;;  %11976 = vst [vmem:[#allocation36_spill] sm:$0xff] %v9936_v9  ;;  %v3033_v35 = vpop.f32.mrf.mxu2 }
 0x5e7   :  { %v3059_v56 = vadd.f32 %v3053_v17, %v261_v53  ;;  %11977 = vst [vmem:[#allocation105_spill] sm:$0xff] %v9941_v58 }
 0x5e9   :  { %v5037_v60 = vmul.f32 -1.442695, %v3059_v56  ;;  %v9913_v56 = vld [vmem:[%s10887_s2 + $0x260] sm:$0xff] }
 0x5ea   :  { %v5305_v54 = vpop.eup %5304  ;;  %11972 = vst [vmem:[#allocation34_spill] sm:$0xff] %v9913_v56  ;;  %3362 = vmatpush.msrb.mxu0 %v9913_v56  ;;  %v9989_v56 = vld [vmem:[%s10887_s2 + $0x208] sm:$0xff] }
 0x5eb   :  { %v5307_v63 = vpop.eup %5306  ;;  %v9901_v53 = vadd.f32 1.0, %v5305_v54  ;;  %5308 = vpow2.f32 %v5037_v60  ;;  %v9918_v60 = vld [vmem:[%s10887_s2 + $0x268] sm:$0xff]  ;;  %v9923_v54 = vld [vmem:[%s10887_s2 + $0x270] sm:$0xff]  ;;  %11986 = vst [vmem:[#allocation43_spill] sm:$0xff] %v9989_v56 }
 0x5ec   :  { %v9905_v17 = vadd.f32 1.0, %v5307_v63  ;;  %11973 = vst [vmem:[#allocation25_spill] sm:$0xff] %v9918_v60  ;;  %3382 = vmatpush.msrb.mxu1 %v9918_v60  ;;  %v9931_v63 = vld [vmem:[%s10887_s2 + $0x278] sm:$0xff]  ;;  %3402 = vmatpush.msrb.mxu2 %v9923_v54 }
 0x5ed   :  { %5310 = vrcp.f32 %v9901_v53  ;;  %11974 = vst [vmem:[#allocation35_spill] sm:$0xff] %v9923_v54  ;;  %3422 = vmatpush.msrb.mxu3 %v9931_v63  ;;  %3363 = vmatpush.msrb.mxu0 %v9936_v9  ;;  %v11984_v9 = vld [vmem:[#allocation104_spill] sm:$0xff]  ;;  %v3073_v30 = vand.u32 2147483647, %v9901_v53  ;;  %vm3069_vm6 = vweird.f32 %v9901_v53 }
 0x5ee   :  { %5312 = vrcp.f32 %v9905_v17  ;;  %11975 = vst [vmem:[#allocation68_spill] sm:$0xff] %v9931_v63  ;;  %3383 = vmatpush.msrb.mxu1 %v9941_v58  ;;  %v9975_v63 = vld [vmem:[%s10887_s2 + $0x238] sm:$0xff]  ;;  %v220_v60 = vadd.f32 %v11984_v9, %v11900_v55  ;;  %3403 = vmatpush.msrb.mxu2 %v9948_v24  ;;  %v9984_v58 = vld [vmem:[%s10887_s2 + $0x200] sm:$0xff]  ;;  %v9996_v55 = vld [vmem:[%s10887_s2 + $0x210] sm:$0xff]  ;;  %vm3088_vm7 = vweird.f32 %v9905_v17 }
 0x5ef   :  { %11983 = vst [vmem:[#allocation41_spill] sm:$0xff] %v9975_v63  ;;  %3423 = vmatpush.msrb.mxu3 %v9953_v45  ;;  %3364 = vmatpush.msrb.mxu0 %v9958_v10  ;;  %v10001_v9 = vld [vmem:[%s10887_s2 + $0x218] sm:$0xff]  ;;  %vm3074_vm10 = vcmp.eq.f32.partialorder %v3073_v30, 8.507059e+37 }
 0x5f0   :  { %11985 = vst [vmem:[#allocation42_spill] sm:$0xff] %v9984_v58  ;;  %3384 = vmatpush.msrb.mxu1 %v9965_v18  ;;  %v3058_v24 = vadd.f32 %v3033_v35, %v220_v60  ;;  %3404 = vmatpush.msrb.mxu2 %v9970_v1  ;;  %v3075_v60 = vand.u32 2147483648, %v9901_v53 }
 0x5f1   :  { %v5309_v54 = vpop.eup %5308  ;;  %11987 = vst [vmem:[#allocation46_spill] sm:$0xff] %v9996_v55  ;;  %3424 = vmatpush.msrb.mxu3 %v9975_v63  ;;  %3365 = vmatpush.msrb.mxu0 %v9984_v58  ;;  %v3094_v63 = vand.u32 2147483648, %v9905_v17 }
 0x5f2   :  { %v3102_v32 = vadd.f32 1.0, %v5309_v54  ;;  %11988 = vst [vmem:[#allocation49_spill] sm:$0xff] %v10001_v9  ;;  %3385 = vmatpush.msrb.mxu1 %v9989_v56  ;;  %3405 = vmatpush.msrb.mxu2 %v9996_v55  ;;  %v3092_v56 = vand.u32 2147483647, %v9905_v17 }
 0x5f3   :  { %v5311_v45 = vpop.eup %5310  ;;  %3425 = vmatpush.msrb.mxu3 %v10001_v9  ;;  %v3095_v9 = vor.u32 1.1754944e-38, %v3094_v63 }
 0x5f4   :  { %v5313_v54 = vpop.eup %5312  ;;  %v3065_v10 = vmul.f32 %v5311_v45, %v9901_v53  ;;  %5314 = vrcp.f32 %v3102_v32  ;;  %vm3070_vm4 = vweird.f32 %v5311_v45  ;;  %vm3093_vm11 = vcmp.eq.f32.partialorder %v3092_v56, 8.507059e+37 }
 0x5f5   :  { %v3084_v18 = vmul.f32 %v5313_v54, %v9905_v17  ;;  %5316 = vtanh.f32 %v3058_v24  ;;  %vm3089_vm5 = vweird.f32 %v5313_v54  ;;  %vm3071_vm8 = vmor %vm3069_vm6, %vm3070_vm4  ;;  %vm3108_vm13 = vweird.f32 %v3102_v32 }
 0x5f6   :  { %v3066_v7 = vsub.f32 1.0, %v3065_v10  ;;  %vm3090_vm9 = vmor %vm3088_vm7, %vm3089_vm5 }
 0x5f7   :  { %v3085_v35 = vsub.f32 1.0, %v3084_v18  ;;  %v3076_v18 = vor.u32 1.1754944e-38, %v3075_v60  ;;  %v3112_v60 = vand.u32 2147483647, %v3102_v32 }
 0x5f8   :  { %v3067_v1 = vmul.f32 %v5311_v45, %v3066_v7 }
 0x5f9   :  { %v3086_v58 = vmul.f32 %v5313_v54, %v3085_v35  ;;  %vm3113_vm15 = vcmp.eq.f32.partialorder %v3112_v60, 8.507059e+37  ;;  %v12009_v60 = vld [vmem:[#allocation39_spill] sm:$0xff] }
 0x5fa   :  { %v5315_v39 = vpop.eup %5314  ;;  %v3068_v37 = vadd.f32 %v5311_v45, %v3067_v1 }
 0x5fb   :  { %v3087_v10 = vadd.f32 %v5313_v54, %v3086_v58  ;;  %v3104_v24 = vmul.f32 %v5315_v39, %v3102_v32  ;;  %v5317_v55 = vpop.eup %5316  ;;  %vm3109_vm12 = vweird.f32 %v5315_v39  ;;  %v3114_v58 = vand.u32 2147483648, %v3102_v32  ;;  %v11996_v32 = vld [vmem:[#allocation30_spill] sm:$0xff] }
 0x5fc   :  { %v3072_v7 = vsel %vm3071_vm8, %v5311_v45, %v3068_v37  ;;  %vm3110_vm14 = vmor %vm3108_vm13, %vm3109_vm12 }
 0x5fd   :  { %v3077_v48 = vsel %vm3074_vm10, %v3076_v18, %v3072_v7  ;;  %v3091_v35 = vsel %vm3090_vm9, %v5313_v54, %v3087_v10  ;;  %v3105_v16 = vsub.f32 1.0, %v3104_v24  ;;  %v3115_v37 = vor.u32 1.1754944e-38, %v3114_v58  ;;  %v11999_v54 = vld [vmem:[#allocation33_spill] sm:$0xff]  ;;  %v12000_v18 = vld [vmem:[#allocation34_spill] sm:$0xff]  ;;  %v12002_v24 = vld [vmem:[#allocation35_spill] sm:$0xff] }
 0x5fe   :  { %v3096_v44 = vsel %vm3093_vm11, %v3095_v9, %v3091_v35  ;;  %v3119_v2 = vmul.f32 %v5317_v55, %v3077_v48  ;;  %v11994_v48 = vld [vmem:[#allocation24_spill] sm:$0xff]  ;;  %v11997_v55 = vld [vmem:[#allocation31_spill] sm:$0xff]  ;;  %v12001_v10 = vld [vmem:[#allocation25_spill] sm:$0xff] }
 0x5ff   :  { %v3118_v1 = vmul.f32 %v3096_v44, %v9536_v42  ;;  %v3106_v53 = vmul.f32 %v5315_v39, %v3105_v16  ;;  %v11989_v42 = vmov 0.0   ;;  %v11992_v44 = vld [vmem:[#allocation22_spill] sm:$0xff]  ;;  %v11993_v16 = vld [vmem:[#allocation23_spill] sm:$0xff]  ;;  %v11998_v9 = vld [vmem:[#allocation32_spill] sm:$0xff] }
 0x600   :  { %v12003_v7 = vld [vmem:[#allocation68_spill] sm:$0xff]  ;;  %v12008_v58 = vld [vmem:[#allocation38_spill] sm:$0xff] }
 0x601   :  { %v3120_v62 = vadd.f32 %v3119_v2, %v3118_v1  ;;  %v3107_v17 = vadd.f32 %v5315_v39, %v3106_v53  ;;  %v11991_v2 = vld [vmem:[#allocation15_spill] sm:$0xff]  ;;  %v12004_v35 = vld [vmem:[#allocation36_spill] sm:$0xff]  ;;  %v12005_v1 = vld [vmem:[#allocation105_spill] sm:$0xff] }
 0x602   :  { %v12006_v53 = vld [vmem:[#allocation102_spill] sm:$0xff] }
 0x603   :  { %5318 = vtanh.f32 %v3120_v62  ;;  %v3111_v45 = vsel %vm3110_vm14, %v5315_v39, %v3107_v17  ;;  %v11990_v62 = vld [vmem:[#allocation13_spill] sm:$0xff]  ;;  %v11995_v39 = vld [vmem:[#allocation27_spill] sm:$0xff] }
 0x604   :  { %v3116_v63 = vsel %vm3113_vm15, %v3115_v37, %v3111_v45  ;;  %v12007_v17 = vld [vmem:[#allocation37_spill] sm:$0xff]  ;;  %v12010_v45 = vld [vmem:[#allocation40_spill] sm:$0xff] }
 0x605   :  { %v12011_v37 = vld [vmem:[#allocation41_spill] sm:$0xff] }
 0x609   :  { %v5319_v30 = vpop.eup %5318 }
 0x60a   :  { %v3122_v56 = vmul.f32 %v5319_v30, %v3116_v63  ;;  %v12012_v30 = vld [vmem:[#allocation42_spill] sm:$0xff]  ;;  %v12013_v63 = vld [vmem:[#allocation43_spill] sm:$0xff] }
 0x60c   :  { %3213 = vmatmul.f32.vlgmr.msra.gmra.mxu0 %v3122_v56  ;;  %3233 = vmatmul.f32.vlgmr.msra.gmra.mxu1 %v3122_v56 }
 0x60d   :  { %3253 = vmatmul.f32.vlgmr.msra.gmra.mxu2 %v3122_v56  ;;  %3273 = vmatmul.f32.vlgmr.msra.gmra.mxu3 %v3122_v56  ;;  %v12014_v56 = vld [vmem:[#allocation46_spill] sm:$0xff] }
 0x60e   :  { %3501 = vmatpush.msra.mxu0 %v9606_v61  ;;  %3521 = vmatpush.msra.mxu1 %v9611_v21 }
 0x60f   :  { %3541 = vmatpush.msra.mxu2 %v9616_v19  ;;  %3561 = vmatpush.msra.mxu3 %v9623_v41 }
 0x610   :  { %3502 = vmatpush.msra.mxu0 %v9630_v4  ;;  %3522 = vmatpush.msra.mxu1 %v9635_v38 }
 0x611   :  { %3542 = vmatpush.msra.mxu2 %v9640_v8  ;;  %3562 = vmatpush.msra.mxu3 %v9651_v47 }
 0x612   :  { %3503 = vmatpush.msra.mxu0 %v9658_v25  ;;  %3523 = vmatpush.msra.mxu1 %v9663_v59 }
 0x613   :  { %3543 = vmatpush.msra.mxu2 %v9668_v0  ;;  %3563 = vmatpush.msra.mxu3 %v9675_v11 }
 0x614   :  { %3366 = vmatmul.f32.vlgmr.msrb.gmra.mxu0 %v11989_v42  ;;  %3386 = vmatmul.f32.vlgmr.msrb.gmra.mxu1 %v11989_v42 }
 0x615   :  { %3406 = vmatmul.f32.vlgmr.msrb.gmra.mxu2 %v11989_v42  ;;  %3426 = vmatmul.f32.vlgmr.msrb.gmra.mxu3 %v11989_v42  ;;  %v12015_v42 = vld [vmem:[#allocation49_spill] sm:$0xff] }
 0x616   :  { %3504 = vmatpush.msra.mxu0 %v9682_v6  ;;  %3524 = vmatpush.msra.mxu1 %v9687_v23 }
 0x617   :  { %3544 = vmatpush.msra.mxu2 %v9692_v31  ;;  %3564 = vmatpush.msra.mxu3 %v9699_v34 }
 0x618   :  { %3505 = vmatpush.msra.mxu0 %v9706_v52  ;;  %3525 = vmatpush.msra.mxu1 %v9711_v51 }
 0x619   :  { %3545 = vmatpush.msra.mxu2 %v9716_v29  ;;  %3565 = vmatpush.msra.mxu3 %v9723_v5 }
 0x61a   :  { %3506 = vmatpush.msra.mxu0 %v9736_v50  ;;  %3526 = vmatpush.msra.mxu1 %v9741_v49 }
 0x61b   :  { %3546 = vmatpush.msra.mxu2 %v9746_v57  ;;  %3566 = vmatpush.msra.mxu3 %v9753_v26 }
 0x61c   :  { %3507 = vmatpush.msra.mxu0 %v9760_v12  ;;  %3527 = vmatpush.msra.mxu1 %v9765_v40 }
 0x61d   :  { %3547 = vmatpush.msra.mxu2 %v9770_v15  ;;  %3567 = vmatpush.msra.mxu3 %v9777_v20 }
 0x61e   :  { %3508 = vmatpush.msra.mxu0 %v9784_v33  ;;  %3528 = vmatpush.msra.mxu1 %v9789_v46 }
 0x61f   :  { %3548 = vmatpush.msra.mxu2 %v9796_v43  ;;  %3568 = vmatpush.msra.mxu3 %v9801_v22 }
 0x620   :  { %3509 = vmatpush.msra.mxu0 %v9806_v27  ;;  %3529 = vmatpush.msra.mxu1 %v9813_v28 }
 0x621   :  { %3549 = vmatpush.msra.mxu2 %v9818_v36  ;;  %3569 = vmatpush.msra.mxu3 %v9823_v13 }
 0x622   :  { %3510 = vmatpush.msra.mxu0 %v9832_v3  ;;  %3530 = vmatpush.msra.mxu1 %v9837_v14 }
 0x623   :  { %3550 = vmatpush.msra.mxu2 %v11990_v62  ;;  %3570 = vmatpush.msra.mxu3 %v11991_v2 }
 0x624   :  { %3511 = vmatpush.msra.mxu0 %v11992_v44  ;;  %3531 = vmatpush.msra.mxu1 %v11993_v16 }
 0x625   :  { %3551 = vmatpush.msra.mxu2 %v11994_v48  ;;  %3571 = vmatpush.msra.mxu3 %v11995_v39 }
 0x626   :  { %3512 = vmatpush.msra.mxu0 %v11996_v32  ;;  %3532 = vmatpush.msra.mxu1 %v11997_v55 }
 0x627   :  { %3552 = vmatpush.msra.mxu2 %v11998_v9  ;;  %3572 = vmatpush.msra.mxu3 %v11999_v54 }
 0x628   :  { %3513 = vmatpush.msra.mxu0 %v12000_v18  ;;  %3533 = vmatpush.msra.mxu1 %v12001_v10 }
 0x629   :  { %3553 = vmatpush.msra.mxu2 %v12002_v24  ;;  %3573 = vmatpush.msra.mxu3 %v12003_v7 }
 0x62a   :  { %3514 = vmatpush.msra.mxu0 %v12004_v35  ;;  %3534 = vmatpush.msra.mxu1 %v12005_v1 }
 0x62b   :  { %3554 = vmatpush.msra.mxu2 %v12006_v53  ;;  %3574 = vmatpush.msra.mxu3 %v12007_v17 }
 0x62c   :  { %3515 = vmatpush.msra.mxu0 %v12008_v58  ;;  %3535 = vmatpush.msra.mxu1 %v12009_v60 }
 0x62d   :  { %3555 = vmatpush.msra.mxu2 %v12010_v45  ;;  %3575 = vmatpush.msra.mxu3 %v12011_v37 }
 0x62e   :  { %3516 = vmatpush.msra.mxu0 %v12012_v30  ;;  %3536 = vmatpush.msra.mxu1 %v12013_v63 }
 0x62f   :  { %3556 = vmatpush.msra.mxu2 %v12014_v56  ;;  %3576 = vmatpush.msra.mxu3 %v12015_v42 }
 0x630   :  { %3652 = vmatpush.msrb.mxu0 %v9606_v61  ;;  %3672 = vmatpush.msrb.mxu1 %v9611_v21 }
 0x631   :  { %3692 = vmatpush.msrb.mxu2 %v9616_v19  ;;  %3712 = vmatpush.msrb.mxu3 %v9623_v41 }
 0x632   :  { %3653 = vmatpush.msrb.mxu0 %v9630_v4  ;;  %3673 = vmatpush.msrb.mxu1 %v9635_v38 }
 0x633   :  { %3693 = vmatpush.msrb.mxu2 %v9640_v8  ;;  %3713 = vmatpush.msrb.mxu3 %v9651_v47 }
 0x634   :  { %3654 = vmatpush.msrb.mxu0 %v9658_v25  ;;  %3674 = vmatpush.msrb.mxu1 %v9663_v59 }
 0x635   :  { %3694 = vmatpush.msrb.mxu2 %v9668_v0  ;;  %3714 = vmatpush.msrb.mxu3 %v9675_v11 }
 0x636   :  { %3655 = vmatpush.msrb.mxu0 %v9682_v6  ;;  %3675 = vmatpush.msrb.mxu1 %v9687_v23 }
 0x637   :  { %3695 = vmatpush.msrb.mxu2 %v9692_v31  ;;  %3715 = vmatpush.msrb.mxu3 %v9699_v34 }
 0x638   :  { %3656 = vmatpush.msrb.mxu0 %v9706_v52  ;;  %3676 = vmatpush.msrb.mxu1 %v9711_v51 }
 0x639   :  { %3696 = vmatpush.msrb.mxu2 %v9716_v29  ;;  %3716 = vmatpush.msrb.mxu3 %v9723_v5 }
 0x63a   :  { %3657 = vmatpush.msrb.mxu0 %v9736_v50  ;;  %3677 = vmatpush.msrb.mxu1 %v9741_v49 }
 0x63b   :  { %3697 = vmatpush.msrb.mxu2 %v9746_v57  ;;  %3717 = vmatpush.msrb.mxu3 %v9753_v26 }
 0x63c   :  { %3658 = vmatpush.msrb.mxu0 %v9760_v12  ;;  %3678 = vmatpush.msrb.mxu1 %v9765_v40 }
 0x63d   :  { %3698 = vmatpush.msrb.mxu2 %v9770_v15  ;;  %3718 = vmatpush.msrb.mxu3 %v9777_v20 }
 0x63e   :  { %3659 = vmatpush.msrb.mxu0 %v9784_v33  ;;  %3679 = vmatpush.msrb.mxu1 %v9789_v46 }
 0x63f   :  { %3699 = vmatpush.msrb.mxu2 %v9796_v43  ;;  %3719 = vmatpush.msrb.mxu3 %v9801_v22 }
 0x640   :  { %3660 = vmatpush.msrb.mxu0 %v9806_v27  ;;  %3680 = vmatpush.msrb.mxu1 %v9813_v28 }
 0x641   :  { %3700 = vmatpush.msrb.mxu2 %v9818_v36  ;;  %3720 = vmatpush.msrb.mxu3 %v9823_v13 }
 0x642   :  { %3661 = vmatpush.msrb.mxu0 %v9832_v3  ;;  %3681 = vmatpush.msrb.mxu1 %v9837_v14 }
 0x643   :  { %3701 = vmatpush.msrb.mxu2 %v11990_v62  ;;  %3721 = vmatpush.msrb.mxu3 %v11991_v2 }
 0x644   :  { %3662 = vmatpush.msrb.mxu0 %v11992_v44  ;;  %3682 = vmatpush.msrb.mxu1 %v11993_v16 }
 0x645   :  { %3702 = vmatpush.msrb.mxu2 %v11994_v48  ;;  %3722 = vmatpush.msrb.mxu3 %v11995_v39 }
 0x646   :  { %3663 = vmatpush.msrb.mxu0 %v11996_v32  ;;  %3683 = vmatpush.msrb.mxu1 %v11997_v55 }
 0x647   :  { %3703 = vmatpush.msrb.mxu2 %v11998_v9  ;;  %3723 = vmatpush.msrb.mxu3 %v11999_v54  ;;  %v12021_v9 = vld [vmem:[#allocation7_spill] sm:$0xff] }
 0x648   :  { %3664 = vmatpush.msrb.mxu0 %v12000_v18  ;;  %3684 = vmatpush.msrb.mxu1 %v12001_v10 }
 0x649   :  { %3704 = vmatpush.msrb.mxu2 %v12002_v24  ;;  %3724 = vmatpush.msrb.mxu3 %v12003_v7 }
 0x64a   :  { %3665 = vmatpush.msrb.mxu0 %v12004_v35  ;;  %3685 = vmatpush.msrb.mxu1 %v12005_v1  ;;  %v12018_v1 = vld [vmem:[#allocation4_spill] sm:$0xff]  ;;  %v12019_v35 = vld [vmem:[#allocation5_spill] sm:$0xff] }
 0x64b   :  { %3705 = vmatpush.msrb.mxu2 %v12006_v53  ;;  %3725 = vmatpush.msrb.mxu3 %v12007_v17  ;;  %v4626_v17 = vld [vmem:[%s10888_s3 + $0x4] sm:$0xf] }
 0x64c   :  { %3666 = vmatpush.msrb.mxu0 %v12008_v58  ;;  %3686 = vmatpush.msrb.mxu1 %v12009_v60  ;;  %v578_v60 = vperm.slane %v4626_v17, 0  ;;  %v581_v10 = vperm.slane %v4626_v17, 3  ;;  %v580_v39 = vperm.slane %v4626_v17, 2 }
 0x64d   :  { %3706 = vmatpush.msrb.mxu2 %v12010_v45  ;;  %3726 = vmatpush.msrb.mxu3 %v12011_v37  ;;  %v579_v45 = vperm.slane %v4626_v17, 1 }
 0x64e   :  { %3667 = vmatpush.msrb.mxu0 %v12012_v30  ;;  %3687 = vmatpush.msrb.mxu1 %v12013_v63  ;;  %v604_v37 = vadd.f32 %v12018_v1, %v578_v60 }
 0x64f   :  { %3707 = vmatpush.msrb.mxu2 %v12014_v56  ;;  %3727 = vmatpush.msrb.mxu3 %v12015_v42  ;;  %v624_v30 = vadd.f32 %v12019_v35, %v579_v45 }
 0x689   :  { %v10153_v53 = vpop.f32.mrf.mxu0  ;;  %v10155_v58 = vpop.f32.mrf.mxu1 }
 0x68a   :  { %12016 = vst [vmem:[#allocation50_spill] sm:$0xff] %v10153_v53  ;;  %v664_v53 = vadd.f32 %v12021_v9, %v581_v10 }
 0x68b   :  { %12017 = vst [vmem:[#allocation51_spill] sm:$0xff] %v10155_v58 }
 0x690   :  { %v10159_v7 = vpop.f32.mrf.mxu3  ;;  %v10162_v58 = vpop.f32.mrf.mxu2 }
 0x691   :  { %12020 = vst [vmem:[#allocation52_spill] sm:$0xff] %v10159_v7  ;;  %v3367_v63 = vpop.f32.mrf.mxu0  ;;  %v3387_v56 = vpop.f32.mrf.mxu1 }
 0x692   :  { %v3430_v24 = vadd.f32 %v3367_v63, %v604_v37  ;;  %v3431_v42 = vadd.f32 %v3387_v56, %v624_v30  ;;  %12022 = vst [vmem:[#allocation53_spill] sm:$0xff] %v10162_v58  ;;  %v12023_v30 = vld [vmem:[#allocation6_spill] sm:$0xff] }
 0x694   :  { %v5167_v18 = vmul.f32 -1.442695, %v3430_v24  ;;  %v5168_v54 = vmul.f32 -1.442695, %v3431_v42 }
 0x696   :  { %5320 = vpow2.f32 %v5167_v18  ;;  %v644_v18 = vadd.f32 %v12023_v30, %v580_v39 }
 0x697   :  { %5322 = vpow2.f32 %v5168_v54 }
 0x698   :  { %v3427_v55 = vpop.f32.mrf.mxu3  ;;  %v3407_v37 = vpop.f32.mrf.mxu2 }
 0x699   :  { %v3433_v32 = vadd.f32 %v3427_v55, %v664_v53  ;;  %v3432_v54 = vadd.f32 %v3407_v37, %v644_v18 }
 0x69b   :  { %v5169_v1 = vmul.f32 -1.442695, %v3433_v32 }
 0x69c   :  { %v5321_v60 = vpop.eup %5320 }
 0x69d   :  { %v5323_v35 = vpop.eup %5322  ;;  %v3437_v45 = vadd.f32 1.0, %v5321_v60  ;;  %5324 = vpow2.f32 %v5169_v1 }
 0x69e   :  { %v3456_v7 = vadd.f32 1.0, %v5323_v35 }
 0x69f   :  { %5326 = vrcp.f32 %v3437_v45  ;;  %v3449_v42 = vand.u32 2147483648, %v3437_v45  ;;  %v3447_v17 = vand.u32 2147483647, %v3437_v45  ;;  %vm3443_vm2 = vweird.f32 %v3437_v45 }
 0x6a0   :  { %5328 = vrcp.f32 %v3456_v7  ;;  %v3468_v1 = vand.u32 2147483648, %v3456_v7  ;;  %v3466_v58 = vand.u32 2147483647, %v3456_v7  ;;  %vm3462_vm3 = vweird.f32 %v3456_v7 }
 0x6a1   :  { %v3450_v37 = vor.u32 1.1754944e-38, %v3449_v42  ;;  %vm3448_vm5 = vcmp.eq.f32.partialorder %v3447_v17, 8.507059e+37 }
 0x6a2   :  { %v3469_v18 = vor.u32 1.1754944e-38, %v3468_v1  ;;  %vm3467_vm7 = vcmp.eq.f32.partialorder %v3466_v58, 8.507059e+37 }
 0x6a3   :  { %v5325_v24 = vpop.eup %5324 }
 0x6a4   :  { %v3476_v63 = vadd.f32 1.0, %v5325_v24 }
 0x6a5   :  { %v5327_v9 = vpop.eup %5326 }
 0x6a6   :  { %v5329_v10 = vpop.eup %5328  ;;  %v3439_v56 = vmul.f32 %v5327_v9, %v3437_v45  ;;  %5330 = vrcp.f32 %v3476_v63  ;;  %vm3444_vm0 = vweird.f32 %v5327_v9  ;;  %v3488_v45 = vand.u32 2147483648, %v3476_v63 }
 0x6a7   :  { %v3458_v55 = vmul.f32 %v5329_v10, %v3456_v7  ;;  %5332 = vtanh.f32 %v3432_v54  ;;  %vm3463_vm1 = vweird.f32 %v5329_v10  ;;  %vm3445_vm4 = vmor %vm3443_vm2, %vm3444_vm0  ;;  %vm3482_vm9 = vweird.f32 %v3476_v63 }
 0x6a8   :  { %v3440_v32 = vsub.f32 1.0, %v3439_v56  ;;  %vm3464_vm6 = vmor %vm3462_vm3, %vm3463_vm1  ;;  %v3489_v1 = vor.u32 1.1754944e-38, %v3488_v45 }
 0x6a9   :  { %v3459_v53 = vsub.f32 1.0, %v3458_v55 }
 0x6aa   :  { %v3441_v60 = vmul.f32 %v5327_v9, %v3440_v32 }
 0x6ab   :  { %v3460_v35 = vmul.f32 %v5329_v10, %v3459_v53 }
 0x6ac   :  { %v5331_v48 = vpop.eup %5330  ;;  %v3442_v39 = vadd.f32 %v5327_v9, %v3441_v60 }
 0x6ad   :  { %v3461_v24 = vadd.f32 %v5329_v10, %v3460_v35  ;;  %v3478_v30 = vmul.f32 %v5331_v48, %v3476_v63  ;;  %v5333_v54 = vpop.eup %5332  ;;  %vm3483_vm8 = vweird.f32 %v5331_v48 }
 0x6ae   :  { %v3446_v56 = vsel %vm3445_vm4, %v5327_v9, %v3442_v39  ;;  %v3486_v9 = vand.u32 2147483647, %v3476_v63  ;;  %vm3484_vm10 = vmor %vm3482_vm9, %vm3483_vm8 }
 0x6af   :  { %v3451_v55 = vsel %vm3448_vm5, %v3450_v37, %v3446_v56  ;;  %v3465_v32 = vsel %vm3464_vm6, %v5329_v10, %v3461_v24  ;;  %v3479_v16 = vsub.f32 1.0, %v3478_v30 }
 0x6b0   :  { %v3470_v53 = vsel %vm3467_vm7, %v3469_v18, %v3465_v32  ;;  %v3493_v44 = vmul.f32 %v5333_v54, %v3451_v55  ;;  %vm3487_vm11 = vcmp.eq.f32.partialorder %v3486_v9, 8.507059e+37  ;;  %v12053_v55 = vld [vmem:[#allocation20_spill] sm:$0xff] }
 0x6b1   :  { %v3492_v2 = vmul.f32 0.0, %v3470_v53  ;;  %v3480_v62 = vmul.f32 %v5331_v48, %v3479_v16 }
 0x6b3   :  { %v10165_v60 = vadd.f32 %v3493_v44, %v3492_v2  ;;  %v3481_v7 = vadd.f32 %v5331_v48, %v3480_v62  ;;  %v12052_v44 = vld [vmem:[#allocation18_spill] sm:$0xff] }
 0x6b5   :  { %5334 = vtanh.f32 %v10165_v60  ;;  %v3485_v42 = vsel %vm3484_vm10, %v5331_v48, %v3481_v7 }
 0x6b6   :  { %v3490_v58 = vsel %vm3487_vm11, %v3489_v1, %v3485_v42 }
 0x6bb   :  { %v5335_v10 = vpop.eup %5334 }
 0x6bc   :  { %v3496_v17 = vmul.f32 %v5335_v10, %v3490_v58 }
 0x6be   :  { %3517 = vmatmul.f32.vlgmr.msra.gmra.mxu0 %v3496_v17  ;;  %3537 = vmatmul.f32.vlgmr.msra.gmra.mxu1 %v3496_v17 }
 0x6bf   :  { %3557 = vmatmul.f32.vlgmr.msra.gmra.mxu2 %v3496_v17  ;;  %3577 = vmatmul.f32.vlgmr.msra.gmra.mxu3 %v3496_v17 }
 0x6c0   :  { %3803 = vmatpush.msra.mxu0 %v9606_v61  ;;  %3823 = vmatpush.msra.mxu1 %v9611_v21  ;;  %v12024_v61 = vld [vmem:[#allocation13_spill] sm:$0xff]  ;;  %v12025_v21 = vld [vmem:[#allocation15_spill] sm:$0xff] }
 0x6c1   :  { %3843 = vmatpush.msra.mxu2 %v9616_v19  ;;  %3863 = vmatpush.msra.mxu3 %v9623_v41  ;;  %v12026_v19 = vld [vmem:[#allocation22_spill] sm:$0xff]  ;;  %v12027_v41 = vld [vmem:[#allocation23_spill] sm:$0xff] }
 0x6c2   :  { %3804 = vmatpush.msra.mxu0 %v9630_v4  ;;  %3824 = vmatpush.msra.mxu1 %v9635_v38  ;;  %v12028_v4 = vld [vmem:[#allocation24_spill] sm:$0xff]  ;;  %v12029_v38 = vld [vmem:[#allocation27_spill] sm:$0xff] }
 0x6c3   :  { %3844 = vmatpush.msra.mxu2 %v9640_v8  ;;  %3864 = vmatpush.msra.mxu3 %v9651_v47  ;;  %v12030_v8 = vld [vmem:[#allocation30_spill] sm:$0xff]  ;;  %v12031_v47 = vld [vmem:[#allocation31_spill] sm:$0xff] }
 0x6c4   :  { %3805 = vmatpush.msra.mxu0 %v9658_v25  ;;  %3825 = vmatpush.msra.mxu1 %v9663_v59  ;;  %v12032_v25 = vld [vmem:[#allocation32_spill] sm:$0xff]  ;;  %v12033_v59 = vld [vmem:[#allocation33_spill] sm:$0xff] }
 0x6c5   :  { %3845 = vmatpush.msra.mxu2 %v9668_v0  ;;  %3865 = vmatpush.msra.mxu3 %v9675_v11  ;;  %v12034_v0 = vld [vmem:[#allocation34_spill] sm:$0xff]  ;;  %v12035_v11 = vld [vmem:[#allocation25_spill] sm:$0xff] }
 0x6c6   :  { %3806 = vmatpush.msra.mxu0 %v9682_v6  ;;  %3826 = vmatpush.msra.mxu1 %v9687_v23  ;;  %v12036_v6 = vld [vmem:[#allocation35_spill] sm:$0xff]  ;;  %v12037_v23 = vld [vmem:[#allocation68_spill] sm:$0xff] }
 0x6c7   :  { %3846 = vmatpush.msra.mxu2 %v9692_v31  ;;  %3866 = vmatpush.msra.mxu3 %v9699_v34  ;;  %v12038_v31 = vld [vmem:[#allocation36_spill] sm:$0xff]  ;;  %v12039_v34 = vld [vmem:[#allocation105_spill] sm:$0xff] }
 0x6c8   :  { %3807 = vmatpush.msra.mxu0 %v9706_v52  ;;  %3827 = vmatpush.msra.mxu1 %v9711_v51  ;;  %v12040_v52 = vld [vmem:[#allocation102_spill] sm:$0xff]  ;;  %v12041_v51 = vld [vmem:[#allocation37_spill] sm:$0xff] }
 0x6c9   :  { %3847 = vmatpush.msra.mxu2 %v9716_v29  ;;  %3867 = vmatpush.msra.mxu3 %v9723_v5  ;;  %v12042_v29 = vld [vmem:[#allocation38_spill] sm:$0xff]  ;;  %v12043_v5 = vld [vmem:[#allocation39_spill] sm:$0xff] }
 0x6ca   :  { %3808 = vmatpush.msra.mxu0 %v9736_v50  ;;  %3828 = vmatpush.msra.mxu1 %v9741_v49  ;;  %v12044_v50 = vld [vmem:[#allocation40_spill] sm:$0xff]  ;;  %v12045_v49 = vld [vmem:[#allocation41_spill] sm:$0xff] }
 0x6cb   :  { %3848 = vmatpush.msra.mxu2 %v9746_v57  ;;  %3868 = vmatpush.msra.mxu3 %v9753_v26  ;;  %v12046_v57 = vld [vmem:[#allocation42_spill] sm:$0xff]  ;;  %v12047_v26 = vld [vmem:[#allocation43_spill] sm:$0xff] }
 0x6cc   :  { %3809 = vmatpush.msra.mxu0 %v9760_v12  ;;  %3829 = vmatpush.msra.mxu1 %v9765_v40  ;;  %v12048_v12 = vld [vmem:[#allocation46_spill] sm:$0xff]  ;;  %v12049_v40 = vld [vmem:[#allocation49_spill] sm:$0xff] }
 0x6cd   :  { %3849 = vmatpush.msra.mxu2 %v9770_v15  ;;  %3869 = vmatpush.msra.mxu3 %v9777_v20  ;;  %v4694_v15 = vld [vmem:[%s10888_s3 + $0x4] sm:$0xf] }
 0x6ce   :  { %3810 = vmatpush.msra.mxu0 %v9784_v33  ;;  %3830 = vmatpush.msra.mxu1 %v9789_v46  ;;  %v951_v20 = vperm.slane %v4694_v15, 0  ;;  %v952_v33 = vperm.slane %v4694_v15, 1  ;;  %v12050_v46 = vld [vmem:[#allocation17_spill] sm:$0xff]  ;;  %v953_v18 = vperm.slane %v4694_v15, 2 }
 0x6cf   :  { %3850 = vmatpush.msra.mxu2 %v9796_v43  ;;  %3870 = vmatpush.msra.mxu3 %v9801_v22  ;;  %v12051_v22 = vld [vmem:[#allocation19_spill] sm:$0xff] }
 0x6d0   :  { %3811 = vmatpush.msra.mxu0 %v9806_v27  ;;  %3831 = vmatpush.msra.mxu1 %v9813_v28  ;;  %v977_v43 = vadd.f32 %v12050_v46, %v951_v20  ;;  %v997_v27 = vadd.f32 %v12051_v22, %v952_v33  ;;  %v1017_v32 = vadd.f32 %v12053_v55, %v953_v18  ;;  %v10294_v18 = vld [vmem:[%s10887_s2 + $0x3a0] sm:$0xff]  ;;  %v10312_v55 = vld [vmem:[%s10887_s2 + $0x3b8] sm:$0xff] }
 0x6d1   :  { %3851 = vmatpush.msra.mxu2 %v9818_v36  ;;  %3871 = vmatpush.msra.mxu3 %v9823_v13 }
 0x6d2   :  { %3812 = vmatpush.msra.mxu0 %v9832_v3  ;;  %3832 = vmatpush.msra.mxu1 %v9837_v14  ;;  %v954_v14 = vperm.slane %v4694_v15, 3 }
 0x6d3   :  { %3852 = vmatpush.msra.mxu2 %v12024_v61  ;;  %3872 = vmatpush.msra.mxu3 %v12025_v21 }
 0x6d4   :  { %3813 = vmatpush.msra.mxu0 %v12026_v19  ;;  %3833 = vmatpush.msra.mxu1 %v12027_v41  ;;  %v1037_v16 = vadd.f32 %v12052_v44, %v954_v14 }
 0x6d5   :  { %3853 = vmatpush.msra.mxu2 %v12028_v4  ;;  %3873 = vmatpush.msra.mxu3 %v12029_v38 }
 0x6d6   :  { %3814 = vmatpush.msra.mxu0 %v12030_v8  ;;  %3834 = vmatpush.msra.mxu1 %v12031_v47 }
 0x6d7   :  { %3854 = vmatpush.msra.mxu2 %v12032_v25  ;;  %3874 = vmatpush.msra.mxu3 %v12033_v59 }
 0x6d8   :  { %3815 = vmatpush.msra.mxu0 %v12034_v0  ;;  %3835 = vmatpush.msra.mxu1 %v12035_v11 }
 0x6d9   :  { %3855 = vmatpush.msra.mxu2 %v12036_v6  ;;  %3875 = vmatpush.msra.mxu3 %v12037_v23 }
 0x6da   :  { %3816 = vmatpush.msra.mxu0 %v12038_v31  ;;  %3836 = vmatpush.msra.mxu1 %v12039_v34 }
 0x6db   :  { %3856 = vmatpush.msra.mxu2 %v12040_v52  ;;  %3876 = vmatpush.msra.mxu3 %v12041_v51 }
 0x6dc   :  { %3817 = vmatpush.msra.mxu0 %v12042_v29  ;;  %3837 = vmatpush.msra.mxu1 %v12043_v5 }
 0x6dd   :  { %3857 = vmatpush.msra.mxu2 %v12044_v50  ;;  %3877 = vmatpush.msra.mxu3 %v12045_v49 }
 0x6de   :  { %3818 = vmatpush.msra.mxu0 %v12046_v57  ;;  %3838 = vmatpush.msra.mxu1 %v12047_v26 }
 0x6df   :  { %3858 = vmatpush.msra.mxu2 %v12048_v12  ;;  %3878 = vmatpush.msra.mxu3 %v12049_v40 }
 0x73b   :  { %v3518_v28 = vpop.f32.mrf.mxu0  ;;  %v3538_v36 = vpop.f32.mrf.mxu1 }
 0x73c   :  { %v3581_v13 = vadd.f32 %v3518_v28, %v977_v43  ;;  %v3582_v3 = vadd.f32 %v3538_v36, %v997_v27 }
 0x73e   :  { %v5170_v62 = vmul.f32 -1.442695, %v3581_v13  ;;  %v5171_v2 = vmul.f32 -1.442695, %v3582_v3 }
 0x740   :  { %5336 = vpow2.f32 %v5170_v62 }
 0x741   :  { %5338 = vpow2.f32 %v5171_v2 }
 0x742   :  { %v3578_v48 = vpop.f32.mrf.mxu3  ;;  %v3558_v56 = vpop.f32.mrf.mxu2 }
 0x743   :  { %v3584_v63 = vadd.f32 %v3578_v48, %v1037_v16  ;;  %v3583_v45 = vadd.f32 %v3558_v56, %v1017_v32  ;;  %v10252_v48 = vld [vmem:[%s10887_s2 + $0x3e8] sm:$0xff]  ;;  %v10318_v32 = vld [vmem:[%s10887_s2 + $0x380] sm:$0xff] }
 0x744   :  { %v10300_v56 = vld [vmem:[%s10887_s2 + $0x3a8] sm:$0xff] }
 0x745   :  { %v5172_v35 = vmul.f32 -1.442695, %v3584_v63  ;;  %v10258_v63 = vld [vmem:[%s10887_s2 + $0x3f0] sm:$0xff] }
 0x746   :  { %v5337_v39 = vpop.eup %5336 }
 0x747   :  { %v5339_v37 = vpop.eup %5338  ;;  %v3588_v24 = vadd.f32 1.0, %v5337_v39  ;;  %5340 = vpow2.f32 %v5172_v35  ;;  %v10264_v35 = vld [vmem:[%s10887_s2 + $0x3f8] sm:$0xff]  ;;  %v10270_v39 = vld [vmem:[%s10887_s2 + $0x3c0] sm:$0xff] }
 0x748   :  { %v3607_v30 = vadd.f32 1.0, %v5339_v37  ;;  %v10276_v37 = vld [vmem:[%s10887_s2 + $0x3c8] sm:$0xff] }
 0x749   :  { %5342 = vrcp.f32 %v3588_v24  ;;  %v3600_v17 = vand.u32 2147483648, %v3588_v24  ;;  %v3598_v19 = vand.u32 2147483647, %v3588_v24  ;;  %vm3594_vm14 = vweird.f32 %v3588_v24 }
 0x74a   :  { %5344 = vrcp.f32 %v3607_v30  ;;  %v3619_v61 = vand.u32 2147483648, %v3607_v30  ;;  %v3617_v4 = vand.u32 2147483647, %v3607_v30  ;;  %vm3613_vm15 = vweird.f32 %v3607_v30 }
 0x74b   :  { %v3601_v47 = vor.u32 1.1754944e-38, %v3600_v17  ;;  %vm3599_vm2 = vcmp.eq.f32.partialorder %v3598_v19, 8.507059e+37  ;;  %v10372_v17 = vld [vmem:[%s10887_s2 + $0x348] sm:$0xff]  ;;  %v10390_v19 = vld [vmem:[%s10887_s2 + $0x320] sm:$0xff] }
 0x74c   :  { %v3620_v0 = vor.u32 1.1754944e-38, %v3619_v61  ;;  %vm3618_vm3 = vcmp.eq.f32.partialorder %v3617_v4, 8.507059e+37  ;;  %v10378_v61 = vld [vmem:[%s10887_s2 + $0x350] sm:$0xff] }
 0x74d   :  { %v5341_v54 = vpop.eup %5340  ;;  %v10402_v4 = vld [vmem:[%s10887_s2 + $0x330] sm:$0xff] }
 0x74e   :  { %v3627_v53 = vadd.f32 1.0, %v5341_v54  ;;  %v10306_v54 = vld [vmem:[%s10887_s2 + $0x3b0] sm:$0xff] }
 0x74f   :  { %v5343_v7 = vpop.eup %5342 }
 0x750   :  { %v5345_v9 = vpop.eup %5344  ;;  %v3590_v42 = vmul.f32 %v5343_v7, %v3588_v24  ;;  %5346 = vrcp.f32 %v3627_v53  ;;  %vm3595_vm12 = vweird.f32 %v5343_v7  ;;  %v3639_v13 = vand.u32 2147483648, %v3627_v53  ;;  %v10282_v24 = vld [vmem:[%s10887_s2 + $0x3d0] sm:$0xff] }
 0x751   :  { %v3609_v1 = vmul.f32 %v5345_v9, %v3607_v30  ;;  %5348 = vtanh.f32 %v3583_v45  ;;  %vm3614_vm13 = vweird.f32 %v5345_v9  ;;  %vm3596_vm0 = vmor %vm3594_vm14, %vm3595_vm12  ;;  %vm3633_vm5 = vweird.f32 %v3627_v53  ;;  %v10288_v30 = vld [vmem:[%s10887_s2 + $0x3d8] sm:$0xff] }
 0x752   :  { %v3591_v10 = vsub.f32 1.0, %v3590_v42  ;;  %vm3615_vm1 = vmor %vm3613_vm15, %vm3614_vm13  ;;  %v3637_v3 = vand.u32 2147483647, %v3627_v53  ;;  %v3640_v62 = vor.u32 1.1754944e-38, %v3639_v13  ;;  %v10336_v45 = vld [vmem:[%s10887_s2 + $0x398] sm:$0xff]  ;;  %v10348_v42 = vld [vmem:[%s10887_s2 + $0x368] sm:$0xff] }
 0x753   :  { %v3610_v58 = vsub.f32 1.0, %v3609_v1  ;;  %v10354_v1 = vld [vmem:[%s10887_s2 + $0x370] sm:$0xff]  ;;  %v10504_v13 = vld [vmem:[%s10887_s2 + $0x2b8] sm:$0xff] }
 0x754   :  { %v3592_v21 = vmul.f32 %v5343_v7, %v3591_v10  ;;  %vm3638_vm7 = vcmp.eq.f32.partialorder %v3637_v3, 8.507059e+37  ;;  %v10360_v10 = vld [vmem:[%s10887_s2 + $0x378] sm:$0xff]  ;;  %12059 = vst [vmem:[#allocation59_spill] sm:$0xff] %v10504_v13  ;;  %v10510_v3 = vld [vmem:[%s10887_s2 + $0x280] sm:$0xff] }
 0x755   :  { %v3611_v41 = vmul.f32 %v5345_v9, %v3610_v58  ;;  %v10366_v58 = vld [vmem:[%s10887_s2 + $0x340] sm:$0xff]  ;;  %12060 = vst [vmem:[#allocation60_spill] sm:$0xff] %v10510_v3 }
 0x756   :  { %v5347_v38 = vpop.eup %5346  ;;  %v3593_v8 = vadd.f32 %v5343_v7, %v3592_v21  ;;  %v10384_v21 = vld [vmem:[%s10887_s2 + $0x358] sm:$0xff] }
 0x757   :  { %v3612_v25 = vadd.f32 %v5345_v9, %v3611_v41  ;;  %v3629_v59 = vmul.f32 %v5347_v38, %v3627_v53  ;;  %v5349_v6 = vpop.eup %5348  ;;  %vm3634_vm4 = vweird.f32 %v5347_v38  ;;  %v10324_v53 = vld [vmem:[%s10887_s2 + $0x388] sm:$0xff] }
 0x758   :  { %v3597_v11 = vsel %vm3596_vm0, %v5343_v7, %v3593_v8  ;;  %vm3635_vm6 = vmor %vm3633_vm5, %vm3634_vm4  ;;  %v10330_v7 = vld [vmem:[%s10887_s2 + $0x390] sm:$0xff]  ;;  %v10396_v41 = vld [vmem:[%s10887_s2 + $0x328] sm:$0xff] }
 0x759   :  { %v3602_v15 = vsel %vm3599_vm2, %v3601_v47, %v3597_v11  ;;  %v3616_v20 = vsel %vm3615_vm1, %v5345_v9, %v3612_v25  ;;  %v3630_v33 = vsub.f32 1.0, %v3629_v59  ;;  %v10342_v9 = vld [vmem:[%s10887_s2 + $0x360] sm:$0xff]  ;;  %v10420_v47 = vld [vmem:[%s10887_s2 + $0x308] sm:$0xff]  ;;  %v10426_v25 = vld [vmem:[%s10887_s2 + $0x310] sm:$0xff] }
 0x75a   :  { %v3621_v46 = vsel %vm3618_vm3, %v3620_v0, %v3616_v20  ;;  %v3644_v43 = vmul.f32 %v5349_v6, %v3602_v15  ;;  %v10414_v8 = vld [vmem:[%s10887_s2 + $0x300] sm:$0xff]  ;;  %v10432_v59 = vld [vmem:[%s10887_s2 + $0x318] sm:$0xff]  ;;  %v10444_v11 = vld [vmem:[%s10887_s2 + $0x2e8] sm:$0xff] }
 0x75b   :  { %v3643_v22 = vmul.f32 %v3621_v46, %v10165_v60  ;;  %v3631_v27 = vmul.f32 %v5347_v38, %v3630_v33  ;;  %v10246_v60 = vld [vmem:[%s10887_s2 + $0x3e0] sm:$0xff]  ;;  %v10450_v6 = vld [vmem:[%s10887_s2 + $0x2f0] sm:$0xff]  ;;  %v10456_v15 = vld [vmem:[%s10887_s2 + $0x2f8] sm:$0xff] }
 0x75c   :  { %v10438_v0 = vld [vmem:[%s10887_s2 + $0x2e0] sm:$0xff]  ;;  %v10468_v33 = vld [vmem:[%s10887_s2 + $0x2c8] sm:$0xff]  ;;  %v10474_v46 = vld [vmem:[%s10887_s2 + $0x2d0] sm:$0xff] }
 0x75d   :  { %v10240_v28 = vadd.f32 %v3644_v43, %v3643_v22  ;;  %v3632_v36 = vadd.f32 %v5347_v38, %v3631_v27  ;;  %v10462_v20 = vld [vmem:[%s10887_s2 + $0x2c0] sm:$0xff]  ;;  %12054 = vst [vmem:[#allocation54_spill] sm:$0xff] %v10474_v46  ;;  %v10480_v43 = vld [vmem:[%s10887_s2 + $0x2d8] sm:$0xff]  ;;  %v10492_v27 = vld [vmem:[%s10887_s2 + $0x2a8] sm:$0xff] }
 0x75e   :  { %12055 = vst [vmem:[#allocation55_spill] sm:$0xff] %v10480_v43  ;;  %v10486_v22 = vld [vmem:[%s10887_s2 + $0x2a0] sm:$0xff] }
 0x75f   :  { %5350 = vtanh.f32 %v10240_v28  ;;  %v3636_v14 = vsel %vm3635_vm6, %v5347_v38, %v3632_v36  ;;  %v10408_v38 = vld [vmem:[%s10887_s2 + $0x338] sm:$0xff]  ;;  %12056 = vst [vmem:[#allocation56_spill] sm:$0xff] %v10486_v22  ;;  %v10498_v36 = vld [vmem:[%s10887_s2 + $0x2b0] sm:$0xff] }
 0x760   :  { %v3641_v44 = vsel %vm3638_vm7, %v3640_v62, %v3636_v14  ;;  %12057 = vst [vmem:[#allocation57_spill] sm:$0xff] %v10492_v27  ;;  %v10516_v14 = vld [vmem:[%s10887_s2 + $0x288] sm:$0xff]  ;;  %v10522_v62 = vld [vmem:[%s10887_s2 + $0x290] sm:$0xff] }
 0x761   :  { %12058 = vst [vmem:[#allocation58_spill] sm:$0xff] %v10498_v36 }
 0x762   :  { %12061 = vst [vmem:[#allocation62_spill] sm:$0xff] %v10516_v14 }
 0x763   :  { %12062 = vst [vmem:[#allocation63_spill] sm:$0xff] %v10522_v62 }
 0x765   :  { %v5351_v2 = vpop.eup %5350 }
 0x766   :  { %v3647_v16 = vmul.f32 %v5351_v2, %v3641_v44  ;;  %v10528_v2 = vld [vmem:[%s10887_s2 + $0x298] sm:$0xff]  ;;  %v10534_v44 = vld [vmem:[%s10887_s2 + $0x260] sm:$0xff] }
 0x767   :  { %12063 = vst [vmem:[#allocation64_spill] sm:$0xff] %v10528_v2 }
 0x768   :  { %3668 = vmatmul.f32.vlgmr.msrb.gmra.mxu0 %v3647_v16  ;;  %3688 = vmatmul.f32.vlgmr.msrb.gmra.mxu1 %v3647_v16  ;;  %12064 = vst [vmem:[#allocation67_spill] sm:$0xff] %v10534_v44 }
 0x769   :  { %3708 = vmatmul.f32.vlgmr.msrb.gmra.mxu2 %v3647_v16  ;;  %3728 = vmatmul.f32.vlgmr.msrb.gmra.mxu3 %v3647_v16  ;;  %v10540_v16 = vld [vmem:[%s10887_s2 + $0x268] sm:$0xff] }
 0x76a   :  { %3954 = vmatpush.msrb.mxu0 %v10246_v60  ;;  %3974 = vmatpush.msrb.mxu1 %v10252_v48  ;;  %12065 = vst [vmem:[#allocation69_spill] sm:$0xff] %v10540_v16 }
 0x76b   :  { %3994 = vmatpush.msrb.mxu2 %v10258_v63  ;;  %4014 = vmatpush.msrb.mxu3 %v10264_v35 }
 0x76c   :  { %3955 = vmatpush.msrb.mxu0 %v10270_v39  ;;  %3975 = vmatpush.msrb.mxu1 %v10276_v37 }
 0x76d   :  { %3995 = vmatpush.msrb.mxu2 %v10282_v24  ;;  %4015 = vmatpush.msrb.mxu3 %v10288_v30 }
 0x76e   :  { %3956 = vmatpush.msrb.mxu0 %v10294_v18  ;;  %3976 = vmatpush.msrb.mxu1 %v10300_v56 }
 0x76f   :  { %3996 = vmatpush.msrb.mxu2 %v10306_v54  ;;  %4016 = vmatpush.msrb.mxu3 %v10312_v55 }
 0x770   :  { %3957 = vmatpush.msrb.mxu0 %v10318_v32  ;;  %3977 = vmatpush.msrb.mxu1 %v10324_v53 }
 0x771   :  { %3997 = vmatpush.msrb.mxu2 %v10330_v7  ;;  %4017 = vmatpush.msrb.mxu3 %v10336_v45 }
 0x772   :  { %3958 = vmatpush.msrb.mxu0 %v10342_v9  ;;  %3978 = vmatpush.msrb.mxu1 %v10348_v42 }
 0x773   :  { %3998 = vmatpush.msrb.mxu2 %v10354_v1  ;;  %4018 = vmatpush.msrb.mxu3 %v10360_v10 }
 0x774   :  { %3959 = vmatpush.msrb.mxu0 %v10366_v58  ;;  %3979 = vmatpush.msrb.mxu1 %v10372_v17 }
 0x775   :  { %3999 = vmatpush.msrb.mxu2 %v10378_v61  ;;  %4019 = vmatpush.msrb.mxu3 %v10384_v21 }
 0x776   :  { %3960 = vmatpush.msrb.mxu0 %v10390_v19  ;;  %3980 = vmatpush.msrb.mxu1 %v10396_v41 }
 0x777   :  { %4000 = vmatpush.msrb.mxu2 %v10402_v4  ;;  %4020 = vmatpush.msrb.mxu3 %v10408_v38 }
 0x778   :  { %3961 = vmatpush.msrb.mxu0 %v10414_v8  ;;  %3981 = vmatpush.msrb.mxu1 %v10420_v47 }
 0x779   :  { %4001 = vmatpush.msrb.mxu2 %v10426_v25  ;;  %4021 = vmatpush.msrb.mxu3 %v10432_v59 }
 0x77a   :  { %3962 = vmatpush.msrb.mxu0 %v10438_v0  ;;  %3982 = vmatpush.msrb.mxu1 %v10444_v11 }
 0x77b   :  { %4002 = vmatpush.msrb.mxu2 %v10450_v6  ;;  %4022 = vmatpush.msrb.mxu3 %v10456_v15 }
 0x77c   :  { %3963 = vmatpush.msrb.mxu0 %v10462_v20  ;;  %3983 = vmatpush.msrb.mxu1 %v10468_v33 }
 0x77d   :  { %4003 = vmatpush.msrb.mxu2 %v10474_v46  ;;  %4023 = vmatpush.msrb.mxu3 %v10480_v43 }
 0x77e   :  { %3964 = vmatpush.msrb.mxu0 %v10486_v22  ;;  %3984 = vmatpush.msrb.mxu1 %v10492_v27 }
 0x77f   :  { %4004 = vmatpush.msrb.mxu2 %v10498_v36  ;;  %4024 = vmatpush.msrb.mxu3 %v10504_v13 }
 0x780   :  { %3965 = vmatpush.msrb.mxu0 %v10510_v3  ;;  %3985 = vmatpush.msrb.mxu1 %v10516_v14 }
 0x781   :  { %4005 = vmatpush.msrb.mxu2 %v10522_v62  ;;  %4025 = vmatpush.msrb.mxu3 %v10528_v2  ;;  %v10546_v62 = vld [vmem:[%s10887_s2 + $0x270] sm:$0xff] }
 0x782   :  { %3966 = vmatpush.msrb.mxu0 %v10534_v44  ;;  %3986 = vmatpush.msrb.mxu1 %v10540_v16  ;;  %12066 = vst [vmem:[#allocation70_spill] sm:$0xff] %v10546_v62 }
 0x783   :  { %4006 = vmatpush.msrb.mxu2 %v10546_v62  ;;  %4026 = vmatpush.msrb.mxu3 %v12037_v23  ;;  %v4762_v23 = vld [vmem:[%s10888_s3 + $0x4] sm:$0xf] }
 0x784   :  { %3967 = vmatpush.msrb.mxu0 %v12038_v31  ;;  %3987 = vmatpush.msrb.mxu1 %v12039_v34  ;;  %v1324_v31 = vperm.slane %v4762_v23, 0  ;;  %v1325_v34 = vperm.slane %v4762_v23, 1  ;;  %v1327_v16 = vperm.slane %v4762_v23, 3 }
 0x785   :  { %4007 = vmatpush.msrb.mxu2 %v12040_v52  ;;  %4027 = vmatpush.msrb.mxu3 %v12041_v51  ;;  %v12067_v52 = vld [vmem:[#allocation21_spill] sm:$0xff] }
 0x786   :  { %3968 = vmatpush.msrb.mxu0 %v12042_v29  ;;  %3988 = vmatpush.msrb.mxu1 %v12043_v5  ;;  %v1350_v51 = vadd.f32 %v12067_v52, %v1324_v31  ;;  %v12068_v29 = vld [vmem:[#allocation26_spill] sm:$0xff] }
 0x787   :  { %4008 = vmatpush.msrb.mxu2 %v12044_v50  ;;  %4028 = vmatpush.msrb.mxu3 %v12045_v49  ;;  %v1370_v5 = vadd.f32 %v12068_v29, %v1325_v34  ;;  %v1326_v34 = vperm.slane %v4762_v23, 2  ;;  %v12070_v29 = vld [vmem:[#allocation9_spill] sm:$0xff] }
 0x788   :  { %3969 = vmatpush.msrb.mxu0 %v12046_v57  ;;  %3989 = vmatpush.msrb.mxu1 %v12047_v26 }
 0x789   :  { %4009 = vmatpush.msrb.mxu2 %v12048_v12  ;;  %4029 = vmatpush.msrb.mxu3 %v12049_v40  ;;  %v12069_v12 = vld [vmem:[#allocation8_spill] sm:$0xff] }
 0x78a   :  { %v1410_v40 = vadd.f32 %v12069_v12, %v1327_v16 }
 0x7e5   :  { %v3669_v50 = vpop.f32.mrf.mxu0  ;;  %v3689_v49 = vpop.f32.mrf.mxu1 }
 0x7e6   :  { %v3732_v62 = vadd.f32 %v3669_v50, %v1350_v51  ;;  %v3733_v57 = vadd.f32 %v3689_v49, %v1370_v5 }
 0x7e8   :  { %v5173_v26 = vmul.f32 -1.442695, %v3732_v62  ;;  %v5174_v44 = vmul.f32 -1.442695, %v3733_v57  ;;  %v1390_v62 = vadd.f32 %v12070_v29, %v1326_v34 }
 0x7ea   :  { %5352 = vpow2.f32 %v5173_v26 }
 0x7eb   :  { %5354 = vpow2.f32 %v5174_v44 }
 0x7ec   :  { %v3729_v2 = vpop.f32.mrf.mxu3  ;;  %v3709_v52 = vpop.f32.mrf.mxu2 }
 0x7ed   :  { %v3735_v14 = vadd.f32 %v3729_v2, %v1410_v40  ;;  %v3734_v49 = vadd.f32 %v3709_v52, %v1390_v62 }
 0x7ef   :  { %v5175_v3 = vmul.f32 -1.442695, %v3735_v14 }
 0x7f0   :  { %v5353_v13 = vpop.eup %5352 }
 0x7f1   :  { %v5355_v36 = vpop.eup %5354  ;;  %v3739_v27 = vadd.f32 1.0, %v5353_v13  ;;  %5356 = vpow2.f32 %v5175_v3 }
 0x7f2   :  { %v3758_v31 = vadd.f32 1.0, %v5355_v36 }
 0x7f3   :  { %5358 = vrcp.f32 %v3739_v27  ;;  %v3751_v26 = vand.u32 2147483648, %v3739_v27  ;;  %v3749_v3 = vand.u32 2147483647, %v3739_v27  ;;  %vm3745_vm10 = vweird.f32 %v3739_v27 }
 0x7f4   :  { %5360 = vrcp.f32 %v3758_v31  ;;  %v3770_v13 = vand.u32 2147483648, %v3758_v31  ;;  %v3768_v12 = vand.u32 2147483647, %v3758_v31  ;;  %vm3764_vm11 = vweird.f32 %v3758_v31 }
 0x7f5   :  { %v3752_v52 = vor.u32 1.1754944e-38, %v3751_v26  ;;  %vm3750_vm14 = vcmp.eq.f32.partialorder %v3749_v3, 8.507059e+37 }
 0x7f6   :  { %v3771_v62 = vor.u32 1.1754944e-38, %v3770_v13  ;;  %vm3769_vm15 = vcmp.eq.f32.partialorder %v3768_v12, 8.507059e+37 }
 0x7f7   :  { %v5357_v51 = vpop.eup %5356 }
 0x7f8   :  { %v3778_v5 = vadd.f32 1.0, %v5357_v51 }
 0x7f9   :  { %v5359_v50 = vpop.eup %5358 }
 0x7fa   :  { %v5361_v16 = vpop.eup %5360  ;;  %v3741_v44 = vmul.f32 %v5359_v50, %v3739_v27  ;;  %5362 = vrcp.f32 %v3778_v5  ;;  %vm3746_vm8 = vweird.f32 %v5359_v50  ;;  %v3790_v26 = vand.u32 2147483648, %v3778_v5 }
 0x7fb   :  { %v3760_v2 = vmul.f32 %v5361_v16, %v3758_v31  ;;  %5364 = vtanh.f32 %v3734_v49  ;;  %vm3765_vm9 = vweird.f32 %v5361_v16  ;;  %vm3747_vm12 = vmor %vm3745_vm10, %vm3746_vm8  ;;  %vm3784_vm1 = vweird.f32 %v3778_v5 }
 0x7fc   :  { %v3742_v14 = vsub.f32 1.0, %v3741_v44  ;;  %vm3766_vm13 = vmor %vm3764_vm11, %vm3765_vm9  ;;  %v3791_v3 = vor.u32 1.1754944e-38, %v3790_v26  ;;  %v10657_v26 = vld [vmem:[%s10887_s2 + $0x220] sm:$0xff] }
 0x7fd   :  { %v3761_v57 = vsub.f32 1.0, %v3760_v2  ;;  %12089 = vst [vmem:[#allocation76_spill] sm:$0xff] %v10657_v26 }
 0x7fe   :  { %v3743_v36 = vmul.f32 %v5359_v50, %v3742_v14 }
 0x7ff   :  { %v3762_v23 = vmul.f32 %v5361_v16, %v3761_v57 }
 0x800   :  { %v5363_v40 = vpop.eup %5362  ;;  %v3744_v34 = vadd.f32 %v5359_v50, %v3743_v36 }
 0x801   :  { %v3763_v51 = vadd.f32 %v5361_v16, %v3762_v23  ;;  %v3780_v29 = vmul.f32 %v5363_v40, %v3778_v5  ;;  %v5365_v49 = vpop.eup %5364  ;;  %vm3785_vm0 = vweird.f32 %v5363_v40 }
 0x802   :  { %v3748_v44 = vsel %vm3747_vm12, %v5359_v50, %v3744_v34  ;;  %v3788_v50 = vand.u32 2147483647, %v3778_v5  ;;  %vm3786_vm2 = vmor %vm3784_vm1, %vm3785_vm0  ;;  %v12075_v5 = vld [vmem:[#allocation58_spill] sm:$0xff]  ;;  %v12077_v34 = vld [vmem:[#allocation60_spill] sm:$0xff] }
 0x803   :  { %v3753_v2 = vsel %vm3750_vm14, %v3752_v52, %v3748_v44  ;;  %v3767_v14 = vsel %vm3766_vm13, %v5361_v16, %v3763_v51  ;;  %v3781_v22 = vsub.f32 1.0, %v3780_v29  ;;  %v12078_v52 = vld [vmem:[#allocation62_spill] sm:$0xff]  ;;  %v12079_v51 = vld [vmem:[#allocation63_spill] sm:$0xff]  ;;  %v12080_v29 = vld [vmem:[#allocation64_spill] sm:$0xff] }
 0x804   :  { %v3772_v57 = vsel %vm3769_vm15, %v3771_v62, %v3767_v14  ;;  %v3795_v43 = vmul.f32 %v5365_v49, %v3753_v2  ;;  %vm3789_vm3 = vcmp.eq.f32.partialorder %v3788_v50, 8.507059e+37  ;;  %v12081_v62 = vld [vmem:[#allocation67_spill] sm:$0xff]  ;;  %v12082_v44 = vld [vmem:[#allocation69_spill] sm:$0xff]  ;;  %v12083_v49 = vld [vmem:[#allocation70_spill] sm:$0xff] }
 0x805   :  { %v3794_v46 = vmul.f32 %v3772_v57, %v10240_v28  ;;  %v3782_v36 = vmul.f32 %v5363_v40, %v3781_v22  ;;  %v12071_v28 = vld [vmem:[#allocation54_spill] sm:$0xff]  ;;  %v12074_v22 = vld [vmem:[#allocation57_spill] sm:$0xff]  ;;  %v10627_v2 = vld [vmem:[%s10887_s2 + $0x278] sm:$0xff] }
 0x806   :  { %12084 = vst [vmem:[#allocation71_spill] sm:$0xff] %v10627_v2  ;;  %v10633_v14 = vld [vmem:[%s10887_s2 + $0x240] sm:$0xff]  ;;  %v10639_v57 = vld [vmem:[%s10887_s2 + $0x248] sm:$0xff] }
 0x807   :  { %v10570_v27 = vadd.f32 %v3795_v43, %v3794_v46  ;;  %v3783_v31 = vadd.f32 %v5363_v40, %v3782_v36  ;;  %v12072_v46 = vld [vmem:[#allocation55_spill] sm:$0xff]  ;;  %v12073_v43 = vld [vmem:[#allocation56_spill] sm:$0xff]  ;;  %12085 = vst [vmem:[#allocation72_spill] sm:$0xff] %v10633_v14  ;;  %v10645_v36 = vld [vmem:[%s10887_s2 + $0x250] sm:$0xff] }
 0x808   :  { %12086 = vst [vmem:[#allocation73_spill] sm:$0xff] %v10639_v57  ;;  %v10663_v50 = vld [vmem:[%s10887_s2 + $0x228] sm:$0xff] }
 0x809   :  { %5366 = vtanh.f32 %v10570_v27  ;;  %v3787_v13 = vsel %vm3786_vm2, %v5363_v40, %v3783_v31  ;;  %v12076_v40 = vld [vmem:[#allocation59_spill] sm:$0xff]  ;;  %12087 = vst [vmem:[#allocation74_spill] sm:$0xff] %v10645_v36 }
 0x80a   :  { %v3792_v23 = vsel %vm3789_vm3, %v3791_v3, %v3787_v13  ;;  %v10651_v31 = vld [vmem:[%s10887_s2 + $0x258] sm:$0xff]  ;;  %12090 = vst [vmem:[#allocation77_spill] sm:$0xff] %v10663_v50  ;;  %v10669_v13 = vld [vmem:[%s10887_s2 + $0x230] sm:$0xff] }
 0x80b   :  { %12088 = vst [vmem:[#allocation75_spill] sm:$0xff] %v10651_v31  ;;  %v10675_v3 = vld [vmem:[%s10887_s2 + $0x238] sm:$0xff] }
 0x80c   :  { %12091 = vst [vmem:[#allocation78_spill] sm:$0xff] %v10669_v13 }
 0x80d   :  { %12092 = vst [vmem:[#allocation79_spill] sm:$0xff] %v10675_v3 }
 0x80f   :  { %v5367_v16 = vpop.eup %5366 }
 0x810   :  { %v3798_v12 = vmul.f32 %v5367_v16, %v3792_v23  ;;  %v10681_v16 = vld [vmem:[%s10887_s2 + $0x200] sm:$0xff]  ;;  %v10687_v23 = vld [vmem:[%s10887_s2 + $0x208] sm:$0xff] }
 0x811   :  { %12093 = vst [vmem:[#allocation80_spill] sm:$0xff] %v10681_v16 }
 0x812   :  { %3819 = vmatmul.f32.vlgmr.msra.gmra.mxu0 %v3798_v12  ;;  %3839 = vmatmul.f32.vlgmr.msra.gmra.mxu1 %v3798_v12  ;;  %12094 = vst [vmem:[#allocation82_spill] sm:$0xff] %v10687_v23 }
 0x813   :  { %3859 = vmatmul.f32.vlgmr.msra.gmra.mxu2 %v3798_v12  ;;  %3879 = vmatmul.f32.vlgmr.msra.gmra.mxu3 %v3798_v12  ;;  %v10693_v12 = vld [vmem:[%s10887_s2 + $0x210] sm:$0xff] }
 0x814   :  { %4105 = vmatpush.msra.mxu0 %v10246_v60  ;;  %4125 = vmatpush.msra.mxu1 %v10252_v48  ;;  %12095 = vst [vmem:[#allocation83_spill] sm:$0xff] %v10693_v12 }
 0x815   :  { %4145 = vmatpush.msra.mxu2 %v10258_v63  ;;  %4165 = vmatpush.msra.mxu3 %v10264_v35 }
 0x816   :  { %4106 = vmatpush.msra.mxu0 %v10270_v39  ;;  %4126 = vmatpush.msra.mxu1 %v10276_v37 }
 0x817   :  { %4146 = vmatpush.msra.mxu2 %v10282_v24  ;;  %4166 = vmatpush.msra.mxu3 %v10288_v30 }
 0x818   :  { %4107 = vmatpush.msra.mxu0 %v10294_v18  ;;  %4127 = vmatpush.msra.mxu1 %v10300_v56 }
 0x819   :  { %4147 = vmatpush.msra.mxu2 %v10306_v54  ;;  %4167 = vmatpush.msra.mxu3 %v10312_v55 }
 0x81a   :  { %4108 = vmatpush.msra.mxu0 %v10318_v32  ;;  %4128 = vmatpush.msra.mxu1 %v10324_v53 }
 0x81b   :  { %4148 = vmatpush.msra.mxu2 %v10330_v7  ;;  %4168 = vmatpush.msra.mxu3 %v10336_v45 }
 0x81c   :  { %4109 = vmatpush.msra.mxu0 %v10342_v9  ;;  %4129 = vmatpush.msra.mxu1 %v10348_v42 }
 0x81d   :  { %4149 = vmatpush.msra.mxu2 %v10354_v1  ;;  %4169 = vmatpush.msra.mxu3 %v10360_v10 }
 0x81e   :  { %4110 = vmatpush.msra.mxu0 %v10366_v58  ;;  %4130 = vmatpush.msra.mxu1 %v10372_v17 }
 0x81f   :  { %4150 = vmatpush.msra.mxu2 %v10378_v61  ;;  %4170 = vmatpush.msra.mxu3 %v10384_v21 }
 0x820   :  { %4111 = vmatpush.msra.mxu0 %v10390_v19  ;;  %4131 = vmatpush.msra.mxu1 %v10396_v41 }
 0x821   :  { %4151 = vmatpush.msra.mxu2 %v10402_v4  ;;  %4171 = vmatpush.msra.mxu3 %v10408_v38 }
 0x822   :  { %4112 = vmatpush.msra.mxu0 %v10414_v8  ;;  %4132 = vmatpush.msra.mxu1 %v10420_v47 }
 0x823   :  { %4152 = vmatpush.msra.mxu2 %v10426_v25  ;;  %4172 = vmatpush.msra.mxu3 %v10432_v59 }
 0x824   :  { %4113 = vmatpush.msra.mxu0 %v10438_v0  ;;  %4133 = vmatpush.msra.mxu1 %v10444_v11 }
 0x825   :  { %4153 = vmatpush.msra.mxu2 %v10450_v6  ;;  %4173 = vmatpush.msra.mxu3 %v10456_v15 }
 0x826   :  { %4114 = vmatpush.msra.mxu0 %v10462_v20  ;;  %4134 = vmatpush.msra.mxu1 %v10468_v33 }
 0x827   :  { %4154 = vmatpush.msra.mxu2 %v12071_v28  ;;  %4174 = vmatpush.msra.mxu3 %v12072_v46 }
 0x828   :  { %4115 = vmatpush.msra.mxu0 %v12073_v43  ;;  %4135 = vmatpush.msra.mxu1 %v12074_v22 }
 0x829   :  { %4155 = vmatpush.msra.mxu2 %v12075_v5  ;;  %4175 = vmatpush.msra.mxu3 %v12076_v40 }
 0x82a   :  { %4116 = vmatpush.msra.mxu0 %v12077_v34  ;;  %4136 = vmatpush.msra.mxu1 %v12078_v52 }
 0x82b   :  { %4156 = vmatpush.msra.mxu2 %v12079_v51  ;;  %4176 = vmatpush.msra.mxu3 %v12080_v29  ;;  %v12099_v29 = vld [vmem:[#allocation44_spill] sm:$0xff] }
 0x82c   :  { %4117 = vmatpush.msra.mxu0 %v12081_v62  ;;  %4137 = vmatpush.msra.mxu1 %v12082_v44 }
 0x82d   :  { %4157 = vmatpush.msra.mxu2 %v12083_v49  ;;  %4177 = vmatpush.msra.mxu3 %v10627_v2 }
 0x82e   :  { %4118 = vmatpush.msra.mxu0 %v10633_v14  ;;  %4138 = vmatpush.msra.mxu1 %v10639_v57 }
 0x82f   :  { %4158 = vmatpush.msra.mxu2 %v10645_v36  ;;  %4178 = vmatpush.msra.mxu3 %v10651_v31  ;;  %v12098_v31 = vld [vmem:[#allocation45_spill] sm:$0xff] }
 0x830   :  { %4119 = vmatpush.msra.mxu0 %v10657_v26  ;;  %4139 = vmatpush.msra.mxu1 %v10663_v50  ;;  %v12097_v50 = vld [vmem:[#allocation29_spill] sm:$0xff] }
 0x831   :  { %4159 = vmatpush.msra.mxu2 %v10669_v13  ;;  %4179 = vmatpush.msra.mxu3 %v10675_v3  ;;  %v10699_v3 = vld [vmem:[%s10887_s2 + $0x218] sm:$0xff] }
 0x832   :  { %4120 = vmatpush.msra.mxu0 %v10681_v16  ;;  %4140 = vmatpush.msra.mxu1 %v10687_v23  ;;  %12096 = vst [vmem:[#allocation84_spill] sm:$0xff] %v10699_v3  ;;  %v4830_v16 = vld [vmem:[%s10888_s3 + $0x4] sm:$0xf] }
 0x833   :  { %4160 = vmatpush.msra.mxu2 %v10693_v12  ;;  %4180 = vmatpush.msra.mxu3 %v10699_v3  ;;  %v1697_v13 = vperm.slane %v4830_v16, 0  ;;  %v1698_v23 = vperm.slane %v4830_v16, 1  ;;  %v1700_v49 = vperm.slane %v4830_v16, 3 }
 0x835   :  { %v1723_v26 = vadd.f32 %v12097_v50, %v1697_v13  ;;  %v1743_v36 = vadd.f32 %v12098_v31, %v1698_v23  ;;  %v1783_v3 = vadd.f32 %v12099_v29, %v1700_v49  ;;  %v1699_v31 = vperm.slane %v4830_v16, 2 }
 0x88f   :  { %v3820_v57 = vpop.f32.mrf.mxu0  ;;  %v3840_v14 = vpop.f32.mrf.mxu1 }
 0x890   :  { %v3883_v12 = vadd.f32 %v3820_v57, %v1723_v26  ;;  %v3884_v2 = vadd.f32 %v3840_v14, %v1743_v36  ;;  %v12100_v36 = vld [vmem:[#allocation47_spill] sm:$0xff] }
 0x891   :  { %v1763_v26 = vadd.f32 %v12100_v36, %v1699_v31 }
 0x892   :  { %v5176_v44 = vmul.f32 -1.442695, %v3883_v12  ;;  %v5177_v62 = vmul.f32 -1.442695, %v3884_v2 }
 0x894   :  { %5368 = vpow2.f32 %v5176_v44 }
 0x895   :  { %5370 = vpow2.f32 %v5177_v62 }
 0x896   :  { %v3880_v51 = vpop.f32.mrf.mxu3  ;;  %v3860_v57 = vpop.f32.mrf.mxu2 }
 0x897   :  { %v3886_v52 = vadd.f32 %v3880_v51, %v1783_v3  ;;  %v3885_v13 = vadd.f32 %v3860_v57, %v1763_v26 }
 0x899   :  { %v5178_v34 = vmul.f32 -1.442695, %v3886_v52 }
 0x89a   :  { %v5369_v40 = vpop.eup %5368 }
 0x89b   :  { %v5371_v5 = vpop.eup %5370  ;;  %v3890_v22 = vadd.f32 1.0, %v5369_v40  ;;  %5372 = vpow2.f32 %v5178_v34 }
 0x89c   :  { %v3909_v50 = vadd.f32 1.0, %v5371_v5 }
 0x89d   :  { %5374 = vrcp.f32 %v3890_v22  ;;  %v3902_v3 = vand.u32 2147483648, %v3890_v22  ;;  %v3900_v34 = vand.u32 2147483647, %v3890_v22  ;;  %vm3896_vm6 = vweird.f32 %v3890_v22 }
 0x89e   :  { %5376 = vrcp.f32 %v3909_v50  ;;  %v3921_v40 = vand.u32 2147483648, %v3909_v50  ;;  %v3919_v23 = vand.u32 2147483647, %v3909_v50  ;;  %vm3915_vm7 = vweird.f32 %v3909_v50 }
 0x89f   :  { %v3903_v57 = vor.u32 1.1754944e-38, %v3902_v3  ;;  %vm3901_vm10 = vcmp.eq.f32.partialorder %v3900_v34, 8.507059e+37 }
 0x8a0   :  { %v3922_v26 = vor.u32 1.1754944e-38, %v3921_v40  ;;  %vm3920_vm11 = vcmp.eq.f32.partialorder %v3919_v23, 8.507059e+37 }
 0x8a1   :  { %v5373_v14 = vpop.eup %5372 }
 0x8a2   :  { %v3929_v2 = vadd.f32 1.0, %v5373_v14 }
 0x8a3   :  { %v5375_v44 = vpop.eup %5374 }
 0x8a4   :  { %v5377_v29 = vpop.eup %5376  ;;  %v3892_v62 = vmul.f32 %v5375_v44, %v3890_v22  ;;  %5378 = vrcp.f32 %v3929_v2  ;;  %vm3897_vm4 = vweird.f32 %v5375_v44  ;;  %v3941_v3 = vand.u32 2147483648, %v3929_v2 }
 0x8a5   :  { %v3911_v51 = vmul.f32 %v5377_v29, %v3909_v50  ;;  %5380 = vtanh.f32 %v3885_v13  ;;  %vm3916_vm5 = vweird.f32 %v5377_v29  ;;  %vm3898_vm8 = vmor %vm3896_vm6, %vm3897_vm4  ;;  %vm3935_vm13 = vweird.f32 %v3929_v2 }
 0x8a6   :  { %v3893_v52 = vsub.f32 1.0, %v3892_v62  ;;  %vm3917_vm9 = vmor %vm3915_vm7, %vm3916_vm5  ;;  %v3942_v34 = vor.u32 1.1754944e-38, %v3941_v3  ;;  %v12119_v3 = vld [vmem:[#allocation76_spill] sm:$0xff] }
 0x8a7   :  { %v3912_v49 = vsub.f32 1.0, %v3911_v51 }
 0x8a8   :  { %v3894_v5 = vmul.f32 %v5375_v44, %v3893_v52 }
 0x8a9   :  { %v3913_v16 = vmul.f32 %v5377_v29, %v3912_v49 }
 0x8aa   :  { %v5379_v12 = vpop.eup %5378  ;;  %v3895_v31 = vadd.f32 %v5375_v44, %v3894_v5 }
 0x8ab   :  { %v3914_v14 = vadd.f32 %v5377_v29, %v3913_v16  ;;  %v3931_v36 = vmul.f32 %v5379_v12, %v3929_v2  ;;  %v5381_v13 = vpop.eup %5380  ;;  %vm3936_vm12 = vweird.f32 %v5379_v12 }
 0x8ac   :  { %v3899_v62 = vsel %vm3898_vm8, %v5375_v44, %v3895_v31  ;;  %v3939_v44 = vand.u32 2147483647, %v3929_v2  ;;  %vm3937_vm14 = vmor %vm3935_vm13, %vm3936_vm12  ;;  %v12105_v2 = vld [vmem:[#allocation58_spill] sm:$0xff]  ;;  %v12107_v31 = vld [vmem:[#allocation60_spill] sm:$0xff] }
 0x8ad   :  { %v3904_v51 = vsel %vm3901_vm10, %v3903_v57, %v3899_v62  ;;  %v3918_v52 = vsel %vm3917_vm9, %v5377_v29, %v3914_v14  ;;  %v3932_v43 = vsub.f32 1.0, %v3931_v36  ;;  %v12108_v57 = vld [vmem:[#allocation62_spill] sm:$0xff]  ;;  %v12109_v14 = vld [vmem:[#allocation63_spill] sm:$0xff]  ;;  %v12110_v36 = vld [vmem:[#allocation64_spill] sm:$0xff] }
 0x8ae   :  { %v3923_v49 = vsel %vm3920_vm11, %v3922_v26, %v3918_v52  ;;  %v3946_v46 = vmul.f32 %v5381_v13, %v3904_v51  ;;  %vm3940_vm15 = vcmp.eq.f32.partialorder %v3939_v44, 8.507059e+37  ;;  %v12111_v26 = vld [vmem:[#allocation67_spill] sm:$0xff]  ;;  %v12112_v62 = vld [vmem:[#allocation69_spill] sm:$0xff]  ;;  %v12113_v13 = vld [vmem:[#allocation70_spill] sm:$0xff] }
 0x8af   :  { %v3945_v28 = vmul.f32 %v3923_v49, %v10570_v27  ;;  %v3933_v5 = vmul.f32 %v5379_v12, %v3932_v43  ;;  %v12101_v27 = vld [vmem:[#allocation54_spill] sm:$0xff]  ;;  %v12104_v43 = vld [vmem:[#allocation57_spill] sm:$0xff]  ;;  %v12114_v51 = vld [vmem:[#allocation71_spill] sm:$0xff] }
 0x8b0   :  { %v12115_v52 = vld [vmem:[#allocation72_spill] sm:$0xff]  ;;  %v12116_v49 = vld [vmem:[#allocation73_spill] sm:$0xff] }
 0x8b1   :  { %v10710_v22 = vadd.f32 %v3946_v46, %v3945_v28  ;;  %v3934_v50 = vadd.f32 %v5379_v12, %v3933_v5  ;;  %v12102_v28 = vld [vmem:[#allocation55_spill] sm:$0xff]  ;;  %v12103_v46 = vld [vmem:[#allocation56_spill] sm:$0xff]  ;;  %v12117_v5 = vld [vmem:[#allocation74_spill] sm:$0xff] }
 0x8b2   :  { %v12120_v44 = vld [vmem:[#allocation77_spill] sm:$0xff] }
 0x8b3   :  { %5382 = vtanh.f32 %v10710_v22  ;;  %v3938_v40 = vsel %vm3937_vm14, %v5379_v12, %v3934_v50  ;;  %v12106_v12 = vld [vmem:[#allocation59_spill] sm:$0xff] }
 0x8b4   :  { %v3943_v16 = vsel %vm3940_vm15, %v3942_v34, %v3938_v40  ;;  %v12118_v50 = vld [vmem:[#allocation75_spill] sm:$0xff]  ;;  %v12121_v40 = vld [vmem:[#allocation78_spill] sm:$0xff] }
 0x8b5   :  { %v12122_v34 = vld [vmem:[#allocation79_spill] sm:$0xff] }
 0x8b9   :  { %v5383_v29 = vpop.eup %5382 }
 0x8ba   :  { %v3949_v23 = vmul.f32 %v5383_v29, %v3943_v16  ;;  %v12123_v29 = vld [vmem:[#allocation80_spill] sm:$0xff]  ;;  %v12124_v16 = vld [vmem:[#allocation82_spill] sm:$0xff] }
 0x8bc   :  { %3970 = vmatmul.f32.vlgmr.msrb.gmra.mxu0 %v3949_v23  ;;  %3990 = vmatmul.f32.vlgmr.msrb.gmra.mxu1 %v3949_v23 }
 0x8bd   :  { %4010 = vmatmul.f32.vlgmr.msrb.gmra.mxu2 %v3949_v23  ;;  %4030 = vmatmul.f32.vlgmr.msrb.gmra.mxu3 %v3949_v23  ;;  %v12125_v23 = vld [vmem:[#allocation83_spill] sm:$0xff] }
 0x8be   :  { %4256 = vmatpush.msrb.mxu0 %v10246_v60  ;;  %4276 = vmatpush.msrb.mxu1 %v10252_v48 }
 0x8bf   :  { %4296 = vmatpush.msrb.mxu2 %v10258_v63  ;;  %4316 = vmatpush.msrb.mxu3 %v10264_v35 }
 0x8c0   :  { %4257 = vmatpush.msrb.mxu0 %v10270_v39  ;;  %4277 = vmatpush.msrb.mxu1 %v10276_v37 }
 0x8c1   :  { %4297 = vmatpush.msrb.mxu2 %v10282_v24  ;;  %4317 = vmatpush.msrb.mxu3 %v10288_v30 }
 0x8c2   :  { %4258 = vmatpush.msrb.mxu0 %v10294_v18  ;;  %4278 = vmatpush.msrb.mxu1 %v10300_v56 }
 0x8c3   :  { %4298 = vmatpush.msrb.mxu2 %v10306_v54  ;;  %4318 = vmatpush.msrb.mxu3 %v10312_v55 }
 0x8c4   :  { %4259 = vmatpush.msrb.mxu0 %v10318_v32  ;;  %4279 = vmatpush.msrb.mxu1 %v10324_v53 }
 0x8c5   :  { %4299 = vmatpush.msrb.mxu2 %v10330_v7  ;;  %4319 = vmatpush.msrb.mxu3 %v10336_v45 }
 0x8c6   :  { %4260 = vmatpush.msrb.mxu0 %v10342_v9  ;;  %4280 = vmatpush.msrb.mxu1 %v10348_v42 }
 0x8c7   :  { %4300 = vmatpush.msrb.mxu2 %v10354_v1  ;;  %4320 = vmatpush.msrb.mxu3 %v10360_v10 }
 0x8c8   :  { %4261 = vmatpush.msrb.mxu0 %v10366_v58  ;;  %4281 = vmatpush.msrb.mxu1 %v10372_v17 }
 0x8c9   :  { %4301 = vmatpush.msrb.mxu2 %v10378_v61  ;;  %4321 = vmatpush.msrb.mxu3 %v10384_v21 }
 0x8ca   :  { %4262 = vmatpush.msrb.mxu0 %v10390_v19  ;;  %4282 = vmatpush.msrb.mxu1 %v10396_v41 }
 0x8cb   :  { %4302 = vmatpush.msrb.mxu2 %v10402_v4  ;;  %4322 = vmatpush.msrb.mxu3 %v10408_v38 }
 0x8cc   :  { %4263 = vmatpush.msrb.mxu0 %v10414_v8  ;;  %4283 = vmatpush.msrb.mxu1 %v10420_v47 }
 0x8cd   :  { %4303 = vmatpush.msrb.mxu2 %v10426_v25  ;;  %4323 = vmatpush.msrb.mxu3 %v10432_v59 }
 0x8ce   :  { %4264 = vmatpush.msrb.mxu0 %v10438_v0  ;;  %4284 = vmatpush.msrb.mxu1 %v10444_v11 }
 0x8cf   :  { %4304 = vmatpush.msrb.mxu2 %v10450_v6  ;;  %4324 = vmatpush.msrb.mxu3 %v10456_v15 }
 0x8d0   :  { %4265 = vmatpush.msrb.mxu0 %v10462_v20  ;;  %4285 = vmatpush.msrb.mxu1 %v10468_v33 }
 0x8d1   :  { %4305 = vmatpush.msrb.mxu2 %v12101_v27  ;;  %4325 = vmatpush.msrb.mxu3 %v12102_v28 }
 0x8d2   :  { %4266 = vmatpush.msrb.mxu0 %v12103_v46  ;;  %4286 = vmatpush.msrb.mxu1 %v12104_v43 }
 0x8d3   :  { %4306 = vmatpush.msrb.mxu2 %v12105_v2  ;;  %4326 = vmatpush.msrb.mxu3 %v12106_v12 }
 0x8d4   :  { %4267 = vmatpush.msrb.mxu0 %v12107_v31  ;;  %4287 = vmatpush.msrb.mxu1 %v12108_v57 }
 0x8d5   :  { %4307 = vmatpush.msrb.mxu2 %v12109_v14  ;;  %4327 = vmatpush.msrb.mxu3 %v12110_v36 }
 0x8d6   :  { %4268 = vmatpush.msrb.mxu0 %v12111_v26  ;;  %4288 = vmatpush.msrb.mxu1 %v12112_v62 }
 0x8d7   :  { %4308 = vmatpush.msrb.mxu2 %v12113_v13  ;;  %4328 = vmatpush.msrb.mxu3 %v12114_v51  ;;  %v12128_v51 = vld [vmem:[#allocation61_spill] sm:$0xff] }
 0x8d8   :  { %4269 = vmatpush.msrb.mxu0 %v12115_v52  ;;  %4289 = vmatpush.msrb.mxu1 %v12116_v49  ;;  %v12126_v52 = vld [vmem:[#allocation84_spill] sm:$0xff] }
 0x8d9   :  { %4309 = vmatpush.msrb.mxu2 %v12117_v5  ;;  %4329 = vmatpush.msrb.mxu3 %v12118_v50  ;;  %v4898_v50 = vld [vmem:[%s10888_s3 + $0x4] sm:$0xf] }
 0x8da   :  { %4270 = vmatpush.msrb.mxu0 %v12119_v3  ;;  %4290 = vmatpush.msrb.mxu1 %v12120_v44  ;;  %v2070_v5 = vperm.slane %v4898_v50, 0  ;;  %v2071_v3 = vperm.slane %v4898_v50, 1  ;;  %v12127_v49 = vld [vmem:[#allocation48_spill] sm:$0xff]  ;;  %v2073_v26 = vperm.slane %v4898_v50, 3 }
 0x8db   :  { %4310 = vmatpush.msrb.mxu2 %v12121_v40  ;;  %4330 = vmatpush.msrb.mxu3 %v12122_v34 }
 0x8dc   :  { %4271 = vmatpush.msrb.mxu0 %v12123_v29  ;;  %4291 = vmatpush.msrb.mxu1 %v12124_v16  ;;  %v2096_v44 = vadd.f32 %v12127_v49, %v2070_v5  ;;  %v2116_v40 = vadd.f32 %v12128_v51, %v2071_v3  ;;  %v2072_v51 = vperm.slane %v4898_v50, 2  ;;  %v12130_v3 = vld [vmem:[#allocation11_spill] sm:$0xff] }
 0x8dd   :  { %4311 = vmatpush.msrb.mxu2 %v12125_v23  ;;  %4331 = vmatpush.msrb.mxu3 %v12126_v52  ;;  %v12129_v23 = vld [vmem:[#allocation10_spill] sm:$0xff] }
 0x8de   :  { %v2156_v52 = vadd.f32 %v12129_v23, %v2073_v26 }
 0x939   :  { %v3971_v13 = vpop.f32.mrf.mxu0  ;;  %v3991_v34 = vpop.f32.mrf.mxu1 }
 0x93a   :  { %v4034_v62 = vadd.f32 %v3971_v13, %v2096_v44  ;;  %v4035_v29 = vadd.f32 %v3991_v34, %v2116_v40 }
 0x93c   :  { %v5179_v16 = vmul.f32 -1.442695, %v4034_v62  ;;  %v5180_v36 = vmul.f32 -1.442695, %v4035_v29  ;;  %v2136_v62 = vadd.f32 %v12130_v3, %v2072_v51 }
 0x93e   :  { %5384 = vpow2.f32 %v5179_v16 }
 0x93f   :  { %5386 = vpow2.f32 %v5180_v36 }
 0x940   :  { %v4031_v14 = vpop.f32.mrf.mxu3  ;;  %v4011_v13 = vpop.f32.mrf.mxu2 }
 0x941   :  { %v4037_v57 = vadd.f32 %v4031_v14, %v2156_v52  ;;  %v4036_v34 = vadd.f32 %v4011_v13, %v2136_v62 }
 0x943   :  { %v5181_v31 = vmul.f32 -1.442695, %v4037_v57 }
 0x944   :  { %v5385_v12 = vpop.eup %5384 }
 0x945   :  { %v5387_v2 = vpop.eup %5386  ;;  %v4041_v43 = vadd.f32 1.0, %v5385_v12  ;;  %5388 = vpow2.f32 %v5181_v31 }
 0x946   :  { %v4060_v49 = vadd.f32 1.0, %v5387_v2 }
 0x947   :  { %5390 = vrcp.f32 %v4041_v43  ;;  %v4053_v29 = vand.u32 2147483648, %v4041_v43  ;;  %v4051_v31 = vand.u32 2147483647, %v4041_v43  ;;  %vm4047_vm2 = vweird.f32 %v4041_v43 }
 0x948   :  { %5392 = vrcp.f32 %v4060_v49  ;;  %v4072_v12 = vand.u32 2147483648, %v4060_v49  ;;  %v4070_v16 = vand.u32 2147483647, %v4060_v49  ;;  %vm4066_vm3 = vweird.f32 %v4060_v49 }
 0x949   :  { %v4054_v13 = vor.u32 1.1754944e-38, %v4053_v29  ;;  %vm4052_vm6 = vcmp.eq.f32.partialorder %v4051_v31, 8.507059e+37 }
 0x94a   :  { %v4073_v62 = vor.u32 1.1754944e-38, %v4072_v12  ;;  %vm4071_vm7 = vcmp.eq.f32.partialorder %v4070_v16, 8.507059e+37 }
 0x94b   :  { %v5389_v5 = vpop.eup %5388 }
 0x94c   :  { %v4080_v44 = vadd.f32 1.0, %v5389_v5 }
 0x94d   :  { %v5391_v40 = vpop.eup %5390 }
 0x94e   :  { %v5393_v26 = vpop.eup %5392  ;;  %v4043_v36 = vmul.f32 %v5391_v40, %v4041_v43  ;;  %5394 = vrcp.f32 %v4080_v44  ;;  %vm4048_vm0 = vweird.f32 %v5391_v40  ;;  %v4092_v29 = vand.u32 2147483648, %v4080_v44 }
 0x94f   :  { %v4062_v14 = vmul.f32 %v5393_v26, %v4060_v49  ;;  %5396 = vtanh.f32 %v4036_v34  ;;  %vm4067_vm1 = vweird.f32 %v5393_v26  ;;  %vm4049_vm4 = vmor %vm4047_vm2, %vm4048_vm0  ;;  %vm4086_vm9 = vweird.f32 %v4080_v44 }
 0x950   :  { %v4044_v57 = vsub.f32 1.0, %v4043_v36  ;;  %vm4068_vm5 = vmor %vm4066_vm3, %vm4067_vm1  ;;  %v4093_v31 = vor.u32 1.1754944e-38, %v4092_v29 }
 0x951   :  { %v4063_v52 = vsub.f32 1.0, %v4062_v14 }
 0x952   :  { %v4045_v2 = vmul.f32 %v5391_v40, %v4044_v57 }
 0x953   :  { %v4064_v50 = vmul.f32 %v5393_v26, %v4063_v52 }
 0x954   :  { %v5395_v23 = vpop.eup %5394  ;;  %v4046_v51 = vadd.f32 %v5391_v40, %v4045_v2 }
 0x955   :  { %v4065_v5 = vadd.f32 %v5393_v26, %v4064_v50  ;;  %v4082_v3 = vmul.f32 %v5395_v23, %v4080_v44  ;;  %v5397_v34 = vpop.eup %5396  ;;  %vm4087_vm8 = vweird.f32 %v5395_v23 }
 0x956   :  { %v4050_v36 = vsel %vm4049_vm4, %v5391_v40, %v4046_v51  ;;  %v4090_v40 = vand.u32 2147483647, %v4080_v44  ;;  %vm4088_vm10 = vmor %vm4086_vm9, %vm4087_vm8 }
 0x957   :  { %v4055_v14 = vsel %vm4052_vm6, %v4054_v13, %v4050_v36  ;;  %v4069_v57 = vsel %vm4068_vm5, %v5393_v26, %v4065_v5  ;;  %v4083_v46 = vsub.f32 1.0, %v4082_v3 }
 0x958   :  { %v4074_v52 = vsel %vm4071_vm7, %v4073_v62, %v4069_v57  ;;  %v4097_v28 = vmul.f32 %v5397_v34, %v4055_v14  ;;  %vm4091_vm11 = vcmp.eq.f32.partialorder %v4090_v40, 8.507059e+37  ;;  %v12160_v57 = vld [vmem:[#allocation85_spill] sm:$0xff] }
 0x959   :  { %v4096_v27 = vmul.f32 %v4074_v52, %v10710_v22  ;;  %v4084_v2 = vmul.f32 %v5395_v23, %v4083_v46 }
 0x95b   :  { %v10785_v43 = vadd.f32 %v4097_v28, %v4096_v27  ;;  %v4085_v49 = vadd.f32 %v5395_v23, %v4084_v2  ;;  %v12159_v28 = vld [vmem:[#allocation92_spill] sm:$0xff] }
 0x95d   :  { %5398 = vtanh.f32 %v10785_v43  ;;  %v4089_v12 = vsel %vm4088_vm10, %v5395_v23, %v4085_v49 }
 0x95e   :  { %v4094_v50 = vsel %vm4091_vm11, %v4093_v31, %v4089_v12 }
 0x963   :  { %v5399_v26 = vpop.eup %5398 }
 0x964   :  { %v4100_v16 = vmul.f32 %v5399_v26, %v4094_v50 }
 0x966   :  { %4121 = vmatmul.f32.vlgmr.msra.gmra.mxu0 %v4100_v16  ;;  %4141 = vmatmul.f32.vlgmr.msra.gmra.mxu1 %v4100_v16 }
 0x967   :  { %4161 = vmatmul.f32.vlgmr.msra.gmra.mxu2 %v4100_v16  ;;  %4181 = vmatmul.f32.vlgmr.msra.gmra.mxu3 %v4100_v16 }
 0x968   :  { %4407 = vmatpush.msra.mxu0 %v10246_v60  ;;  %4427 = vmatpush.msra.mxu1 %v10252_v48  ;;  %v12131_v60 = vld [vmem:[#allocation54_spill] sm:$0xff]  ;;  %v12132_v48 = vld [vmem:[#allocation55_spill] sm:$0xff] }
 0x969   :  { %4447 = vmatpush.msra.mxu2 %v10258_v63  ;;  %4467 = vmatpush.msra.mxu3 %v10264_v35  ;;  %v12133_v63 = vld [vmem:[#allocation56_spill] sm:$0xff]  ;;  %v12134_v35 = vld [vmem:[#allocation57_spill] sm:$0xff] }
 0x96a   :  { %4408 = vmatpush.msra.mxu0 %v10270_v39  ;;  %4428 = vmatpush.msra.mxu1 %v10276_v37  ;;  %v12135_v39 = vld [vmem:[#allocation58_spill] sm:$0xff]  ;;  %v12136_v37 = vld [vmem:[#allocation59_spill] sm:$0xff] }
 0x96b   :  { %4448 = vmatpush.msra.mxu2 %v10282_v24  ;;  %4468 = vmatpush.msra.mxu3 %v10288_v30  ;;  %v12137_v24 = vld [vmem:[#allocation60_spill] sm:$0xff]  ;;  %v12138_v30 = vld [vmem:[#allocation62_spill] sm:$0xff] }
 0x96c   :  { %4409 = vmatpush.msra.mxu0 %v10294_v18  ;;  %4429 = vmatpush.msra.mxu1 %v10300_v56  ;;  %v12139_v18 = vld [vmem:[#allocation63_spill] sm:$0xff]  ;;  %v12140_v56 = vld [vmem:[#allocation64_spill] sm:$0xff] }
 0x96d   :  { %4449 = vmatpush.msra.mxu2 %v10306_v54  ;;  %4469 = vmatpush.msra.mxu3 %v10312_v55  ;;  %v12141_v54 = vld [vmem:[#allocation67_spill] sm:$0xff]  ;;  %v12142_v55 = vld [vmem:[#allocation69_spill] sm:$0xff] }
 0x96e   :  { %4410 = vmatpush.msra.mxu0 %v10318_v32  ;;  %4430 = vmatpush.msra.mxu1 %v10324_v53  ;;  %v12143_v32 = vld [vmem:[#allocation70_spill] sm:$0xff]  ;;  %v12144_v53 = vld [vmem:[#allocation71_spill] sm:$0xff] }
 0x96f   :  { %4450 = vmatpush.msra.mxu2 %v10330_v7  ;;  %4470 = vmatpush.msra.mxu3 %v10336_v45  ;;  %v12145_v7 = vld [vmem:[#allocation72_spill] sm:$0xff]  ;;  %v12146_v45 = vld [vmem:[#allocation73_spill] sm:$0xff] }
 0x970   :  { %4411 = vmatpush.msra.mxu0 %v10342_v9  ;;  %4431 = vmatpush.msra.mxu1 %v10348_v42  ;;  %v12147_v9 = vld [vmem:[#allocation74_spill] sm:$0xff]  ;;  %v12148_v42 = vld [vmem:[#allocation75_spill] sm:$0xff] }
 0x971   :  { %4451 = vmatpush.msra.mxu2 %v10354_v1  ;;  %4471 = vmatpush.msra.mxu3 %v10360_v10  ;;  %v12149_v1 = vld [vmem:[#allocation76_spill] sm:$0xff]  ;;  %v12150_v10 = vld [vmem:[#allocation77_spill] sm:$0xff] }
 0x972   :  { %4412 = vmatpush.msra.mxu0 %v10366_v58  ;;  %4432 = vmatpush.msra.mxu1 %v10372_v17  ;;  %v12151_v58 = vld [vmem:[#allocation78_spill] sm:$0xff]  ;;  %v12152_v17 = vld [vmem:[#allocation79_spill] sm:$0xff] }
 0x973   :  { %4452 = vmatpush.msra.mxu2 %v10378_v61  ;;  %4472 = vmatpush.msra.mxu3 %v10384_v21  ;;  %v12153_v61 = vld [vmem:[#allocation80_spill] sm:$0xff]  ;;  %v12154_v21 = vld [vmem:[#allocation82_spill] sm:$0xff] }
 0x974   :  { %4413 = vmatpush.msra.mxu0 %v10390_v19  ;;  %4433 = vmatpush.msra.mxu1 %v10396_v41  ;;  %v12155_v19 = vld [vmem:[#allocation83_spill] sm:$0xff]  ;;  %v12156_v41 = vld [vmem:[#allocation84_spill] sm:$0xff] }
 0x975   :  { %4453 = vmatpush.msra.mxu2 %v10402_v4  ;;  %4473 = vmatpush.msra.mxu3 %v10408_v38  ;;  %v4966_v4 = vld [vmem:[%s10888_s3 + $0x4] sm:$0xf] }
 0x976   :  { %4414 = vmatpush.msra.mxu0 %v10414_v8  ;;  %4434 = vmatpush.msra.mxu1 %v10420_v47  ;;  %v2443_v38 = vperm.slane %v4966_v4, 0  ;;  %v2444_v8 = vperm.slane %v4966_v4, 1  ;;  %v12157_v47 = vld [vmem:[#allocation66_spill] sm:$0xff]  ;;  %v2445_v36 = vperm.slane %v4966_v4, 2 }
 0x977   :  { %4454 = vmatpush.msra.mxu2 %v10426_v25  ;;  %4474 = vmatpush.msra.mxu3 %v10432_v59  ;;  %v12158_v59 = vld [vmem:[#allocation81_spill] sm:$0xff] }
 0x978   :  { %4415 = vmatpush.msra.mxu0 %v10438_v0  ;;  %4435 = vmatpush.msra.mxu1 %v10444_v11  ;;  %v2469_v25 = vadd.f32 %v12157_v47, %v2443_v38  ;;  %v2489_v0 = vadd.f32 %v12158_v59, %v2444_v8  ;;  %v2509_v52 = vadd.f32 %v12160_v57, %v2445_v36  ;;  %v12161_v59 = vld [vmem:[#allocation86_spill] sm:$0xff] }
 0x979   :  { %4455 = vmatpush.msra.mxu2 %v10450_v6  ;;  %4475 = vmatpush.msra.mxu3 %v10456_v15 }
 0x97a   :  { %4416 = vmatpush.msra.mxu0 %v10462_v20  ;;  %4436 = vmatpush.msra.mxu1 %v10468_v33  ;;  %v2446_v33 = vperm.slane %v4966_v4, 3 }
 0x97b   :  { %4456 = vmatpush.msra.mxu2 %v12131_v60  ;;  %4476 = vmatpush.msra.mxu3 %v12132_v48 }
 0x97c   :  { %4417 = vmatpush.msra.mxu0 %v12133_v63  ;;  %4437 = vmatpush.msra.mxu1 %v12134_v35  ;;  %v2529_v46 = vadd.f32 %v12159_v28, %v2446_v33 }
 0x97d   :  { %4457 = vmatpush.msra.mxu2 %v12135_v39  ;;  %4477 = vmatpush.msra.mxu3 %v12136_v37 }
 0x97e   :  { %4418 = vmatpush.msra.mxu0 %v12137_v24  ;;  %4438 = vmatpush.msra.mxu1 %v12138_v30 }
 0x97f   :  { %4458 = vmatpush.msra.mxu2 %v12139_v18  ;;  %4478 = vmatpush.msra.mxu3 %v12140_v56 }
 0x980   :  { %4419 = vmatpush.msra.mxu0 %v12141_v54  ;;  %4439 = vmatpush.msra.mxu1 %v12142_v55 }
 0x981   :  { %4459 = vmatpush.msra.mxu2 %v12143_v32  ;;  %4479 = vmatpush.msra.mxu3 %v12144_v53 }
 0x982   :  { %4420 = vmatpush.msra.mxu0 %v12145_v7  ;;  %4440 = vmatpush.msra.mxu1 %v12146_v45 }
 0x983   :  { %4460 = vmatpush.msra.mxu2 %v12147_v9  ;;  %4480 = vmatpush.msra.mxu3 %v12148_v42 }
 0x984   :  { %4421 = vmatpush.msra.mxu0 %v12149_v1  ;;  %4441 = vmatpush.msra.mxu1 %v12150_v10 }
 0x985   :  { %4461 = vmatpush.msra.mxu2 %v12151_v58  ;;  %4481 = vmatpush.msra.mxu3 %v12152_v17 }
 0x986   :  { %4422 = vmatpush.msra.mxu0 %v12153_v61  ;;  %4442 = vmatpush.msra.mxu1 %v12154_v21 }
 0x987   :  { %4462 = vmatpush.msra.mxu2 %v12155_v19  ;;  %4482 = vmatpush.msra.mxu3 %v12156_v41 }
 0x9e3   :  { %v4122_v11 = vpop.f32.mrf.mxu0  ;;  %v4142_v6 = vpop.f32.mrf.mxu1 }
 0x9e4   :  { %v4185_v15 = vadd.f32 %v4122_v11, %v2469_v25  ;;  %v4186_v20 = vadd.f32 %v4142_v6, %v2489_v0  ;;  %v12162_v11 = vld [vmem:[#allocation99_spill] sm:$0xff] }
 0x9e6   :  { %v5182_v22 = vmul.f32 -1.442695, %v4185_v15  ;;  %v5183_v27 = vmul.f32 -1.442695, %v4186_v20 }
 0x9e8   :  { %5400 = vpow2.f32 %v5182_v22 }
 0x9e9   :  { %5402 = vpow2.f32 %v5183_v27 }
 0x9ea   :  { %v4182_v44 = vpop.f32.mrf.mxu3  ;;  %v4162_v34 = vpop.f32.mrf.mxu2 }
 0x9eb   :  { %v4188_v23 = vadd.f32 %v4182_v44, %v2529_v46  ;;  %v4187_v29 = vadd.f32 %v4162_v34, %v2509_v52  ;;  %v12163_v44 = vld [vmem:[#allocation12_spill] sm:$0xff] }
 0x9ed   :  { %v5184_v51 = vmul.f32 -1.442695, %v4188_v23 }
 0x9ee   :  { %v5401_v13 = vpop.eup %5400 }
 0x9ef   :  { %v5403_v5 = vpop.eup %5402  ;;  %v4192_v3 = vadd.f32 1.0, %v5401_v13  ;;  %5404 = vpow2.f32 %v5184_v51 }
 0x9f0   :  { %v4211_v62 = vadd.f32 1.0, %v5403_v5 }
 0x9f1   :  { %5406 = vrcp.f32 %v4192_v3  ;;  %v4204_v16 = vand.u32 2147483648, %v4192_v3  ;;  %v4202_v63 = vand.u32 2147483647, %v4192_v3  ;;  %vm4198_vm14 = vweird.f32 %v4192_v3 }
 0x9f2   :  { %5408 = vrcp.f32 %v4211_v62  ;;  %v4223_v60 = vand.u32 2147483648, %v4211_v62  ;;  %v4221_v39 = vand.u32 2147483647, %v4211_v62  ;;  %vm4217_vm15 = vweird.f32 %v4211_v62 }
 0x9f3   :  { %v4205_v30 = vor.u32 1.1754944e-38, %v4204_v16  ;;  %vm4203_vm2 = vcmp.eq.f32.partialorder %v4202_v63, 8.507059e+37 }
 0x9f4   :  { %v4224_v54 = vor.u32 1.1754944e-38, %v4223_v60  ;;  %vm4222_vm3 = vcmp.eq.f32.partialorder %v4221_v39, 8.507059e+37 }
 0x9f5   :  { %v5405_v14 = vpop.eup %5404 }
 0x9f6   :  { %v4231_v2 = vadd.f32 1.0, %v5405_v14 }
 0x9f7   :  { %v5407_v49 = vpop.eup %5406 }
 0x9f8   :  { %v5409_v40 = vpop.eup %5408  ;;  %v4194_v12 = vmul.f32 %v5407_v49, %v4192_v3  ;;  %5410 = vrcp.f32 %v4231_v2  ;;  %vm4199_vm12 = vweird.f32 %v5407_v49  ;;  %v4243_v61 = vand.u32 2147483648, %v4231_v2 }
 0x9f9   :  { %v4213_v31 = vmul.f32 %v5409_v40, %v4211_v62  ;;  %5412 = vtanh.f32 %v4187_v29  ;;  %vm4218_vm13 = vweird.f32 %v5409_v40  ;;  %vm4200_vm0 = vmor %vm4198_vm14, %vm4199_vm12  ;;  %vm4237_vm5 = vweird.f32 %v4231_v2 }
 0x9fa   :  { %v4195_v26 = vsub.f32 1.0, %v4194_v12  ;;  %vm4219_vm1 = vmor %vm4217_vm15, %vm4218_vm13  ;;  %v4241_v21 = vand.u32 2147483647, %v4231_v2  ;;  %v4244_v41 = vor.u32 1.1754944e-38, %v4243_v61 }
 0x9fb   :  { %v4214_v50 = vsub.f32 1.0, %v4213_v31 }
 0x9fc   :  { %v4196_v48 = vmul.f32 %v5407_v49, %v4195_v26  ;;  %vm4242_vm7 = vcmp.eq.f32.partialorder %v4241_v21, 8.507059e+37 }
 0x9fd   :  { %v4215_v35 = vmul.f32 %v5409_v40, %v4214_v50 }
 0x9fe   :  { %v5411_v37 = vpop.eup %5410  ;;  %v4197_v24 = vadd.f32 %v5407_v49, %v4196_v48 }
 0x9ff   :  { %v4216_v18 = vadd.f32 %v5409_v40, %v4215_v35  ;;  %v4233_v56 = vmul.f32 %v5411_v37, %v4231_v2  ;;  %v5413_v32 = vpop.eup %5412  ;;  %vm4238_vm4 = vweird.f32 %v5411_v37  ;;  %v12164_v2 = vld [vmem:[#allocation14_spill] sm:$0xff] }
 0xa00   :  { %v4201_v55 = vsel %vm4200_vm0, %v5407_v49, %v4197_v24  ;;  %vm4239_vm6 = vmor %vm4237_vm5, %vm4238_vm4 }
 0xa01   :  { %v4206_v53 = vsel %vm4203_vm2, %v4205_v30, %v4201_v55  ;;  %v4220_v7 = vsel %vm4219_vm1, %v5409_v40, %v4216_v18  ;;  %v4234_v45 = vsub.f32 1.0, %v4233_v56 }
 0xa02   :  { %v4225_v9 = vsel %vm4222_vm3, %v4224_v54, %v4220_v7  ;;  %v4248_v42 = vmul.f32 %v5413_v32, %v4206_v53 }
 0xa03   :  { %v4247_v1 = vmul.f32 %v4225_v9, %v10785_v43  ;;  %v4235_v10 = vmul.f32 %v5411_v37, %v4234_v45  ;;  %v5034_v43 = vld [vmem:[%s10888_s3 + $0x4] sm:$0xf] }
 0xa04   :  { %v2816_v47 = vperm.slane %v5034_v43, 0  ;;  %v2817_v25 = vperm.slane %v5034_v43, 1  ;;  %v2819_v27 = vperm.slane %v5034_v43, 3  ;;  %v2818_v14 = vperm.slane %v5034_v43, 2 }
 0xa05   :  { %v10860_v58 = vadd.f32 %v4248_v42, %v4247_v1  ;;  %v4236_v17 = vadd.f32 %v5411_v37, %v4235_v10 }
 0xa06   :  { %v2842_v0 = vadd.f32 %v12161_v59, %v2816_v47  ;;  %v2862_v6 = vadd.f32 %v12162_v11, %v2817_v25  ;;  %v2902_v23 = vadd.f32 %v12163_v44, %v2819_v27  ;;  %v2882_v49 = vadd.f32 %v12164_v2, %v2818_v14  ;;  %v12165_v11 = vld [vmem:[#allocation50_spill] sm:$0xff] }
 0xa07   :  { %5414 = vtanh.f32 %v10860_v58  ;;  %v4240_v19 = vsel %vm4239_vm6, %v5411_v37, %v4236_v17 }
 0xa08   :  { %v4245_v38 = vsel %vm4242_vm7, %v4244_v41, %v4240_v19 }
 0xa0d   :  { %v5415_v4 = vpop.eup %5414 }
 0xa0e   :  { %v4251_v8 = vmul.f32 %v5415_v4, %v4245_v38 }
 0xa10   :  { %4272 = vmatmul.f32.vlgmr.msrb.gmra.mxu0 %v4251_v8  ;;  %4292 = vmatmul.f32.vlgmr.msrb.gmra.mxu1 %v4251_v8 }
 0xa11   :  { %4312 = vmatmul.f32.vlgmr.msrb.gmra.mxu2 %v4251_v8  ;;  %4332 = vmatmul.f32.vlgmr.msrb.gmra.mxu3 %v4251_v8 }
 0xa8d   :  { %v4273_v15 = vpop.f32.mrf.mxu0  ;;  %v4293_v20 = vpop.f32.mrf.mxu1 }
 0xa8e   :  { %v4336_v33 = vadd.f32 %v4273_v15, %v2842_v0  ;;  %v4337_v22 = vadd.f32 %v4293_v20, %v2862_v6  ;;  %v12166_v15 = vld [vmem:[#allocation51_spill] sm:$0xff] }
 0xa90   :  { %v5185_v28 = vmul.f32 -1.442695, %v4336_v33  ;;  %v5186_v46 = vmul.f32 -1.442695, %v4337_v22 }
 0xa92   :  { %5416 = vpow2.f32 %v5185_v28 }
 0xa93   :  { %5418 = vpow2.f32 %v5186_v46 }
 0xa94   :  { %v4333_v51 = vpop.f32.mrf.mxu3  ;;  %v4313_v57 = vpop.f32.mrf.mxu2 }
 0xa95   :  { %v4339_v13 = vadd.f32 %v4333_v51, %v2902_v23  ;;  %v4338_v12 = vadd.f32 %v4313_v57, %v2882_v49  ;;  %v12167_v51 = vld [vmem:[#allocation52_spill] sm:$0xff] }
 0xa97   :  { %v5187_v5 = vmul.f32 -1.442695, %v4339_v13 }
 0xa98   :  { %v5417_v3 = vpop.eup %5416 }
 0xa99   :  { %v5419_v62 = vpop.eup %5418  ;;  %v4343_v36 = vadd.f32 1.0, %v5417_v3  ;;  %5420 = vpow2.f32 %v5187_v5 }
 0xa9a   :  { %v4362_v34 = vadd.f32 1.0, %v5419_v62 }
 0xa9b   :  { %5422 = vrcp.f32 %v4343_v36  ;;  %v4355_v48 = vand.u32 2147483648, %v4343_v36  ;;  %v4353_v39 = vand.u32 2147483647, %v4343_v36  ;;  %vm4349_vm10 = vweird.f32 %v4343_v36 }
 0xa9c   :  { %5424 = vrcp.f32 %v4362_v34  ;;  %v4374_v63 = vand.u32 2147483648, %v4362_v34  ;;  %v4372_v24 = vand.u32 2147483647, %v4362_v34  ;;  %vm4368_vm11 = vweird.f32 %v4362_v34 }
 0xa9d   :  { %v4356_v56 = vor.u32 1.1754944e-38, %v4355_v48  ;;  %vm4354_vm14 = vcmp.eq.f32.partialorder %v4353_v39, 8.507059e+37 }
 0xa9e   :  { %v4375_v32 = vor.u32 1.1754944e-38, %v4374_v63  ;;  %vm4373_vm15 = vcmp.eq.f32.partialorder %v4372_v24, 8.507059e+37 }
 0xa9f   :  { %v5421_v52 = vpop.eup %5420 }
 0xaa0   :  { %v4382_v29 = vadd.f32 1.0, %v5421_v52 }
 0xaa1   :  { %v5423_v40 = vpop.eup %5422 }
 0xaa2   :  { %v5425_v31 = vpop.eup %5424  ;;  %v4345_v26 = vmul.f32 %v5423_v40, %v4343_v36  ;;  %5426 = vrcp.f32 %v4382_v29  ;;  %vm4350_vm8 = vweird.f32 %v5423_v40  ;;  %v4394_v41 = vand.u32 2147483648, %v4382_v29 }
 0xaa3   :  { %v4364_v50 = vmul.f32 %v5425_v31, %v4362_v34  ;;  %5428 = vtanh.f32 %v4338_v12  ;;  %vm4369_vm9 = vweird.f32 %v5425_v31  ;;  %vm4351_vm12 = vmor %vm4349_vm10, %vm4350_vm8  ;;  %vm4388_vm1 = vweird.f32 %v4382_v29 }
 0xaa4   :  { %v4346_v16 = vsub.f32 1.0, %v4345_v26  ;;  %vm4370_vm13 = vmor %vm4368_vm11, %vm4369_vm9  ;;  %v4392_v4 = vand.u32 2147483647, %v4382_v29  ;;  %v4395_v8 = vor.u32 1.1754944e-38, %v4394_v41 }
 0xaa5   :  { %v4365_v60 = vsub.f32 1.0, %v4364_v50 }
 0xaa6   :  { %v4347_v35 = vmul.f32 %v5423_v40, %v4346_v16  ;;  %vm4393_vm3 = vcmp.eq.f32.partialorder %v4392_v4, 8.507059e+37 }
 0xaa7   :  { %v4366_v37 = vmul.f32 %v5425_v31, %v4365_v60 }
 0xaa8   :  { %v5427_v30 = vpop.eup %5426  ;;  %v4348_v18 = vadd.f32 %v5423_v40, %v4347_v35 }
 0xaa9   :  { %v4367_v54 = vadd.f32 %v5425_v31, %v4366_v37  ;;  %v4384_v55 = vmul.f32 %v5427_v30, %v4382_v29  ;;  %v5429_v7 = vpop.eup %5428  ;;  %vm4389_vm0 = vweird.f32 %v5427_v30  ;;  %v12168_v29 = vld [vmem:[#allocation53_spill] sm:$0xff] }
 0xaaa   :  { %v4352_v53 = vsel %vm4351_vm12, %v5423_v40, %v4348_v18  ;;  %vm4390_vm2 = vmor %vm4388_vm1, %vm4389_vm0 }
 0xaab   :  { %v4357_v45 = vsel %vm4354_vm14, %v4356_v56, %v4352_v53  ;;  %v4371_v9 = vsel %vm4370_vm13, %v5425_v31, %v4367_v54  ;;  %v4385_v42 = vsub.f32 1.0, %v4384_v55 }
 0xaac   :  { %v4376_v1 = vsel %vm4373_vm15, %v4375_v32, %v4371_v9  ;;  %v4399_v10 = vmul.f32 %v5429_v7, %v4357_v45 }
 0xaad   :  { %v4398_v17 = vmul.f32 %v4376_v1, %v10860_v58  ;;  %v4386_v61 = vmul.f32 %v5427_v30, %v4385_v42  ;;  %v5102_v58 = vld [vmem:[%s10888_s3 + $0x4] sm:$0xf] }
 0xaae   :  { %v3189_v59 = vperm.slane %v5102_v58, 0  ;;  %v3190_v0 = vperm.slane %v5102_v58, 1  ;;  %v3192_v46 = vperm.slane %v5102_v58, 3  ;;  %v3191_v52 = vperm.slane %v5102_v58, 2 }
 0xaaf   :  { %v10871_v21 = vadd.f32 %v4399_v10, %v4398_v17  ;;  %v4387_v19 = vadd.f32 %v5427_v30, %v4386_v61 }
 0xab0   :  { %v3215_v6 = vadd.f32 %v12165_v11, %v3189_v59  ;;  %v3235_v20 = vadd.f32 %v12166_v15, %v3190_v0  ;;  %v3275_v13 = vadd.f32 %v12167_v51, %v3192_v46  ;;  %v3255_v40 = vadd.f32 %v12168_v29, %v3191_v52 }
 0xab1   :  { %5430 = vtanh.f32 %v10871_v21  ;;  %v4391_v38 = vsel %vm4390_vm2, %v5427_v30, %v4387_v19 }
 0xab2   :  { %v4396_v47 = vsel %vm4393_vm3, %v4395_v8, %v4391_v38 }
 0xab7   :  { %v5431_v43 = vpop.eup %5430 }
 0xab8   :  { %v4402_v25 = vmul.f32 %v5431_v43, %v4396_v47 }
 0xaba   :  { %4423 = vmatmul.f32.vlgmr.msra.gmra.mxu0 %v4402_v25  ;;  %4443 = vmatmul.f32.vlgmr.msra.gmra.mxu1 %v4402_v25 }
 0xabb   :  { %4463 = vmatmul.f32.vlgmr.msra.gmra.mxu2 %v4402_v25  ;;  %4483 = vmatmul.f32.vlgmr.msra.gmra.mxu3 %v4402_v25 }
 0xb37   :  { %v4424_v33 = vpop.f32.mrf.mxu0  ;;  %v4444_v22 = vpop.f32.mrf.mxu1 }
 0xb38   :  { %v4487_v27 = vadd.f32 %v4424_v33, %v3215_v6  ;;  %v4488_v28 = vadd.f32 %v4444_v22, %v3235_v20 }
 0xb3a   :  { %v5188_v44 = vmul.f32 -1.442695, %v4487_v27  ;;  %v5189_v23 = vmul.f32 -1.442695, %v4488_v28 }
 0xb3c   :  { %5432 = vpow2.f32 %v5188_v44 }
 0xb3d   :  { %5434 = vpow2.f32 %v5189_v23 }
 0xb3e   :  { %v4484_v5 = vpop.f32.mrf.mxu3  ;;  %v4464_v2 = vpop.f32.mrf.mxu2 }
 0xb3f   :  { %v4490_v3 = vadd.f32 %v4484_v5, %v3275_v13  ;;  %v4489_v26 = vadd.f32 %v4464_v2, %v3255_v40 }
 0xb41   :  { %v5190_v62 = vmul.f32 -1.442695, %v4490_v3 }
 0xb42   :  { %v5433_v36 = vpop.eup %5432 }
 0xb43   :  { %v5435_v34 = vpop.eup %5434  ;;  %v4494_v14 = vadd.f32 1.0, %v5433_v36  ;;  %5436 = vpow2.f32 %v5190_v62 }
 0xb44   :  { %v4513_v57 = vadd.f32 1.0, %v5435_v34 }
 0xb45   :  { %5438 = vrcp.f32 %v4494_v14  ;;  %v4506_v35 = vand.u32 2147483648, %v4494_v14  ;;  %v4504_v24 = vand.u32 2147483647, %v4494_v14  ;;  %vm4500_vm6 = vweird.f32 %v4494_v14 }
 0xb46   :  { %5440 = vrcp.f32 %v4513_v57  ;;  %v4525_v39 = vand.u32 2147483648, %v4513_v57  ;;  %v4523_v18 = vand.u32 2147483647, %v4513_v57  ;;  %vm4519_vm7 = vweird.f32 %v4513_v57 }
 0xb47   :  { %v4507_v55 = vor.u32 1.1754944e-38, %v4506_v35  ;;  %vm4505_vm10 = vcmp.eq.f32.partialorder %v4504_v24, 8.507059e+37 }
 0xb48   :  { %v4526_v7 = vor.u32 1.1754944e-38, %v4525_v39  ;;  %vm4524_vm11 = vcmp.eq.f32.partialorder %v4523_v18, 8.507059e+37 }
 0xb49   :  { %v5437_v49 = vpop.eup %5436 }
 0xb4a   :  { %v4533_v12 = vadd.f32 1.0, %v5437_v49 }
 0xb4b   :  { %v5439_v31 = vpop.eup %5438 }
 0xb4c   :  { %v5441_v50 = vpop.eup %5440  ;;  %v4496_v16 = vmul.f32 %v5439_v31, %v4494_v14  ;;  %5442 = vrcp.f32 %v4533_v12  ;;  %vm4501_vm4 = vweird.f32 %v5439_v31  ;;  %v4545_v8 = vand.u32 2147483648, %v4533_v12 }
 0xb4d   :  { %v4515_v60 = vmul.f32 %v5441_v50, %v4513_v57  ;;  %5444 = vtanh.f32 %v4489_v26  ;;  %vm4520_vm5 = vweird.f32 %v5441_v50  ;;  %vm4502_vm8 = vmor %vm4500_vm6, %vm4501_vm4  ;;  %vm4539_vm13 = vweird.f32 %v4533_v12 }
 0xb4e   :  { %v4497_v48 = vsub.f32 1.0, %v4496_v16  ;;  %vm4521_vm9 = vmor %vm4519_vm7, %vm4520_vm5  ;;  %v4543_v43 = vand.u32 2147483647, %v4533_v12  ;;  %v4546_v25 = vor.u32 1.1754944e-38, %v4545_v8 }
 0xb4f   :  { %v4516_v63 = vsub.f32 1.0, %v4515_v60 }
 0xb50   :  { %v4498_v37 = vmul.f32 %v5439_v31, %v4497_v48  ;;  %vm4544_vm15 = vcmp.eq.f32.partialorder %v4543_v43, 8.507059e+37 }
 0xb51   :  { %v4517_v30 = vmul.f32 %v5441_v50, %v4516_v63 }
 0xb52   :  { %v5443_v56 = vpop.eup %5442  ;;  %v4499_v54 = vadd.f32 %v5439_v31, %v4498_v37 }
 0xb53   :  { %v4518_v32 = vadd.f32 %v5441_v50, %v4517_v30  ;;  %v4535_v53 = vmul.f32 %v5443_v56, %v4533_v12  ;;  %v5445_v9 = vpop.eup %5444  ;;  %vm4540_vm12 = vweird.f32 %v5443_v56 }
 0xb54   :  { %v4503_v45 = vsel %vm4502_vm8, %v5439_v31, %v4499_v54  ;;  %vm4541_vm14 = vmor %vm4539_vm13, %vm4540_vm12 }
 0xb55   :  { %v4508_v42 = vsel %vm4505_vm10, %v4507_v55, %v4503_v45  ;;  %v4522_v1 = vsel %vm4521_vm9, %v5441_v50, %v4518_v32  ;;  %v4536_v10 = vsub.f32 1.0, %v4535_v53 }
 0xb56   :  { %v4527_v17 = vsel %vm4524_vm11, %v4526_v7, %v4522_v1  ;;  %v4550_v61 = vmul.f32 %v5445_v9, %v4508_v42 }
 0xb57   :  { %v4549_v19 = vmul.f32 %v4527_v17, %v10871_v21  ;;  %v4537_v41 = vmul.f32 %v5443_v56, %v4536_v10 }
 0xb59   :  { %v4551_v4 = vadd.f32 %v4550_v61, %v4549_v19  ;;  %v4538_v38 = vadd.f32 %v5443_v56, %v4537_v41 }
 0xb5b   :  { %5446 = vtanh.f32 %v4551_v4  ;;  %v4542_v47 = vsel %vm4541_vm14, %v5443_v56, %v4538_v38 }
 0xb5c   :  { %v4547_v59 = vsel %vm4544_vm15, %v4546_v25, %v4542_v47 }
 0xb61   :  { %v5447_v58 = vpop.eup %5446 }
 0xb62   :  { %v4553_v0 = vmul.f32 %v5447_v58, %v4547_v59 }
 0xb64   :  { %4554 = vst [vmem:[%s10889_s4] sm:$0xff] %v4553_v0 }

</bundles_post_ra>
